<compile_context>
chip_gen: v7x
topology: tpu7x:2x2x1
jax: 0.10.0
libtpu: 0.0.40
codegen_flags: <defaults>
</compile_context>

<pallas_src>
import jax
import jax.numpy as jnp
from jax import lax
from jax.experimental import pallas as pl
from jax.experimental.pallas import tpu as pltpu


BT = 8              # images per grid step
ROWS = 32           # sublane slot per image (28 data rows + 4 pad)
R = BT * ROWS       # rows per batch tile


def _shift_rows(a, s):
    """y[r] = a[r + s]; wrapped rows only ever land in discarded slot rows."""
    if s == 0:
        return a
    return jnp.concatenate([a[s:], a[:s]], axis=0)


# ---------------------------------------------------------------------------
# Fused kernel: conv1+relu+pool -> conv2+relu+pool -> fc1+relu+log_softmax
# (one grid step == BT images)
# ---------------------------------------------------------------------------
def _net_kernel(x_ref, m1_ref, b1_ref, m2_ref, b2_ref, wfc_ref, bfc_ref,
                sel_ref, o_ref):
    f32 = jnp.float32

    # ---- conv1: single (R,140)@(140,768) bf16 matmul (kh folded into K) ----
    z1 = jnp.dot(x_ref[...], m1_ref[...], preferred_element_type=f32)    # (R,768)
    z1 = jnp.maximum(z1 + b1_ref[...], 0.0)                              # bias+ReLU
    # 2x2 max-pool: rows via shifted max (result valid at even slot rows),
    # cols via parity-major lane halves (by M1 construction).
    r1 = jnp.maximum(z1, _shift_rows(z1, 1))
    p1 = jnp.maximum(r1[:, :384], r1[:, 384:]).astype(jnp.bfloat16)      # (R,384)

    # ---- conv2: fold the 5 kernel-row shifts (2*kh in slot-row space) into K
    lhs2 = jnp.concatenate([_shift_rows(p1, 2 * k) for k in range(5)], axis=1)
    z2 = jnp.dot(lhs2, m2_ref[...], preferred_element_type=f32)          # (R,256)
    z2 = jnp.maximum(z2 + b2_ref[...], 0.0)
    r2 = jnp.maximum(z2, _shift_rows(z2, 2))
    p2 = jnp.maximum(r2[:, :128], r2[:, 128:])                           # (R,128) f32

    # ---- fc1 + ReLU + log_softmax ----
    # per image the 4 pooled rows sit at slot rows 0,4,8,12; concatenate them
    # along lanes, pick slot-row 0 of every image (tiny selection matmul),
    # then one (BT,512)@(512,10) matmul (fc weight pre-permuted to (h,w*32+c)).
    lhsf = jnp.concatenate([_shift_rows(p2, 4 * h) for h in range(4)], axis=1)  # (R,512)
    feats = jnp.dot(sel_ref[...], lhsf, preferred_element_type=f32)      # (BT,512)
    logits = jnp.dot(feats, wfc_ref[...], preferred_element_type=f32) + bfc_ref[...]
    z = jnp.maximum(logits, 0.0)
    mx = jnp.max(z, axis=-1, keepdims=True)
    lse = mx + jnp.log(jnp.sum(jnp.exp(z - mx), axis=-1, keepdims=True))
    o_ref[...] = z - lse


# ---------------------------------------------------------------------------
# One-time parameter preparation (pure JAX, run once outside the hot path)
# ---------------------------------------------------------------------------
def _toeplitz(w_khkwcico, wi, wo_n):
    """Per-kh GEMM matrices M[kh] of shape (wi*Ci, wo_n*Co) such that
    sum_kh x[kh:kh+wo_n(h), :] @ M[kh] equals the valid 5x5 convolution, with
    output lanes parity-major: lane = (wo%2)*(wo_n//2)*Co + (wo//2)*Co + co."""
    K, _, ci, co = w_khkwcico.shape
    wo = jnp.arange(wo_n)
    w_pos = jnp.arange(wi)
    kw = w_pos[None, :] - wo[:, None]                        # (wo_n, wi)
    valid = ((kw >= 0) & (kw < K)).astype(jnp.float32)
    kw_c = jnp.clip(kw, 0, K - 1)
    g = w_khkwcico[:, kw_c] * valid[None, :, :, None, None]  # (K, wo_n, wi, Ci, Co)
    g = jnp.transpose(g, (0, 2, 3, 1, 4))                    # (K, wi, Ci, wo_n, Co)
    grp = (wo % 2) * (wo_n // 2) + wo // 2                   # parity-major group id
    inv = jnp.zeros((wo_n,), jnp.int32).at[grp].set(wo)
    g = g[:, :, :, inv, :]
    return g.reshape(K, wi * ci, wo_n * co)


def prepare_params(params):
    f32, bf16 = jnp.float32, jnp.bfloat16
    w1 = params["conv1_w"].astype(f32)          # (32, 1, 5, 5)
    w2 = params["conv2_w"].astype(f32)          # (32, 32, 5, 5)
    wf = params["fc1_w"].astype(f32)            # (10, 512), feature = c*16 + h*4 + w

    m1 = _toeplitz(jnp.transpose(w1, (2, 3, 1, 0)), 28, 24)  # (5, 28, 768)
    m2 = _toeplitz(jnp.transpose(w2, (2, 3, 1, 0)), 12, 8)   # (5, 384, 256)

    # selection matrix picking slot-row 0 of every image in the batch tile
    sel = jnp.zeros((BT, R), f32).at[jnp.arange(BT), jnp.arange(BT) * ROWS].set(1.0)

    return dict(
        m1=m1.reshape(5 * 28, 768).astype(bf16),              # (140, 768)
        b1=jnp.tile(params["conv1_b"].astype(f32), 24).reshape(1, 768),
        m2=m2.reshape(5 * 384, 256).astype(bf16),              # (1920, 256)
        b2=jnp.tile(params["conv2_b"].astype(f32), 8).reshape(1, 256),
        # fold NCHW flatten into fc1 weight: row = h*128 + w*32 + c
        wfc=jnp.transpose(wf.reshape(10, 32, 4, 4), (2, 3, 1, 0)).reshape(512, 10),
        bfc=params["fc1_b"].astype(f32).reshape(1, 10),
        sel=sel,
    )


# ---------------------------------------------------------------------------
# Forward pass
# ---------------------------------------------------------------------------
def net_forward(x_nchw, p):
    n = x_nchw.shape[0]
    n_pad = ((n + BT - 1) // BT) * BT
    x = x_nchw.reshape(n, 28, 28).astype(jnp.float32)        # cin == 1
    x = jnp.pad(x, ((0, n_pad - n), (0, 8), (0, 0)))         # (n_pad, 36, 28)
    # fold conv1's kh row-shifts into the input layout (im2col over kh only)
    xcat = jnp.concatenate([x[:, k:k + ROWS, :] for k in range(5)], axis=2)
    xcat = xcat.reshape(n_pad * ROWS, 140).astype(jnp.bfloat16)

    out = pl.pallas_call(
        _net_kernel,
        out_shape=jax.ShapeDtypeStruct((n_pad, 10), jnp.float32),
        grid_spec=pltpu.PrefetchScalarGridSpec(
            num_scalar_prefetch=0,
            grid=(n_pad // BT,),
            in_specs=[
                pl.BlockSpec((R, 140), lambda i: (i, 0)),      # per-tile input rows
                pl.BlockSpec((140, 768), lambda i: (0, 0)),    # resident weights
                pl.BlockSpec((1, 768), lambda i: (0, 0)),
                pl.BlockSpec((1920, 256), lambda i: (0, 0)),
                pl.BlockSpec((1, 256), lambda i: (0, 0)),
                pl.BlockSpec((512, 10), lambda i: (0, 0)),
                pl.BlockSpec((1, 10), lambda i: (0, 0)),
                pl.BlockSpec((BT, R), lambda i: (0, 0)),
            ],
            out_specs=pl.BlockSpec((BT, 10), lambda i: (i, 0)),
        ),
        compiler_params=pltpu.CompilerParams(
            dimension_semantics=("parallel",),                 # use both v7x TCs
            vmem_limit_bytes=32 * 1024 * 1024,                 # safe on v5e/v6e/v7x
        ),
    )(xcat, p["m1"], p["b1"], p["m2"], p["b2"], p["wfc"], p["bfc"], p["sel"])
    return out[:n]


# ---------------------------------------------------------------------------
# Pure-JAX reference (for a loose numerical sanity check) + param init
# ---------------------------------------------------------------------------
def reference_forward(x_nchw, params):
    y = lax.conv_general_dilated(x_nchw, params["conv1_w"], (1, 1), "VALID",
                                 dimension_numbers=("NCHW", "OIHW", "NCHW"))
    y = jax.nn.relu(y + params["conv1_b"][None, :, None, None])
    n, c, h, w = y.shape
    y = y.reshape(n, c, h // 2, 2, w // 2, 2).max(axis=(3, 5))
    y = lax.conv_general_dilated(y, params["conv2_w"], (1, 1), "VALID",
                                 dimension_numbers=("NCHW", "OIHW", "NCHW"))
    y = jax.nn.relu(y + params["conv2_b"][None, :, None, None])
    n, c, h, w = y.shape
    y = y.reshape(n, c, h // 2, 2, w // 2, 2).max(axis=(3, 5))
    feat = y.reshape(n, -1)                                   # NCHW flatten order
    z = jax.nn.relu(feat @ params["fc1_w"].T + params["fc1_b"])
    return jax.nn.log_softmax(z, axis=-1)


def init_params(key):
    k = jax.random.split(key, 6)
    return {
        "conv1_w": 0.1 * jax.random.normal(k[0], (32, 1, 5, 5), jnp.float32),
        "conv1_b": 0.1 * jax.random.normal(k[1], (32,), jnp.float32),
        "conv2_w": 0.05 * jax.random.normal(k[2], (32, 32, 5, 5), jnp.float32),
        "conv2_b": 0.05 * jax.random.normal(k[3], (32,), jnp.float32),
        "fc1_w": 0.05 * jax.random.normal(k[4], (10, 512), jnp.float32),
        "fc1_b": 0.05 * jax.random.normal(k[5], (10,), jnp.float32),
    }


if __name__ == "__main__":
    key = jax.random.PRNGKey(0)
    kx, kp = jax.random.split(key)
    # Module implies single-channel 28x28 input (-> 4x4x32 before fc1).
    x = jax.random.normal(kx, (2, 1, 28, 28), jnp.float32)    # NCHW like PyTorch
    params = init_params(kp)
    prepped = prepare_params(params)

    out = jax.block_until_ready(jax.jit(net_forward)(x, prepped))
    assert out.shape == (2, 10) and out.dtype == jnp.float32
    assert bool(jnp.all(jnp.isfinite(out)))

    # loose tolerance: conv/matmul operands run in bf16 on the MXU.
    ref = reference_forward(x, params)
    assert bool(jnp.allclose(out, ref, atol=3e-1, rtol=0.0))

    print("KERNEL_OK")
</pallas_src>

<mosaic_0001>
module attributes {stable_mosaic.version = 11 : i64} {
  func.func @_net_kernel(%arg0: i32, %arg1: memref<256x140xbf16, #tpu.memory_space<vmem>>, %arg2: memref<140x768xbf16, #tpu.memory_space<vmem>>, %arg3: memref<1x768xf32, #tpu.memory_space<vmem>>, %arg4: memref<1920x256xbf16, #tpu.memory_space<vmem>>, %arg5: memref<1x256xf32, #tpu.memory_space<vmem>>, %arg6: memref<512x10xf32, #tpu.memory_space<vmem>>, %arg7: memref<1x10xf32, #tpu.memory_space<vmem>>, %arg8: memref<8x256xf32, #tpu.memory_space<vmem>>, %arg9: memref<8x10xf32, #tpu.memory_space<vmem>>) attributes {dimension_semantics = [#tpu.dimension_semantics<parallel>], iteration_bounds = array<i64: 1>, scalar_prefetch = 0 : i64, scratch_operands = 0 : i64, tpu.core_type = #tpu.core_type<tc>, window_params = [{transform_indices = @transform_0, window_bounds = array<i64: 256, 140>}, {pipeline_mode = #tpu.pipeline_mode<synchronous>, transform_indices = @transform_1, window_bounds = array<i64: 140, 768>}, {pipeline_mode = #tpu.pipeline_mode<synchronous>, transform_indices = @transform_2, window_bounds = array<i64: 1, 768>}, {pipeline_mode = #tpu.pipeline_mode<synchronous>, transform_indices = @transform_3, window_bounds = array<i64: 1920, 256>}, {pipeline_mode = #tpu.pipeline_mode<synchronous>, transform_indices = @transform_4, window_bounds = array<i64: 1, 256>}, {pipeline_mode = #tpu.pipeline_mode<synchronous>, transform_indices = @transform_5, window_bounds = array<i64: 512, 10>}, {pipeline_mode = #tpu.pipeline_mode<synchronous>, transform_indices = @transform_6, window_bounds = array<i64: 1, 10>}, {pipeline_mode = #tpu.pipeline_mode<synchronous>, transform_indices = @transform_7, window_bounds = array<i64: 8, 256>}, {transform_indices = @transform_8, window_bounds = array<i64: 8, 10>}]} {
    %c0 = arith.constant 0 : index
    %c0_0 = arith.constant 0 : index
    %0 = vector.load %arg1[%c0, %c0_0] : memref<256x140xbf16, #tpu.memory_space<vmem>>, vector<256x140xbf16>
    %c0_1 = arith.constant 0 : index
    %c0_2 = arith.constant 0 : index
    %1 = vector.load %arg2[%c0_1, %c0_2] : memref<140x768xbf16, #tpu.memory_space<vmem>>, vector<140x768xbf16>
    %cst = arith.constant dense<0.000000e+00> : vector<256x768xf32>
    %2 = tpu.matmul %0, %1, %cst {dimension_numbers = #tpu.dot_dimension_numbers<[1], [0], [0], [1], [0, 0, 1, 1], [], []>} : vector<256x140xbf16>, vector<140x768xbf16>, vector<256x768xf32> -> vector<256x768xf32>
    %c0_3 = arith.constant 0 : index
    %c0_4 = arith.constant 0 : index
    %3 = vector.load %arg3[%c0_3, %c0_4] : memref<1x768xf32, #tpu.memory_space<vmem>>, vector<1x768xf32>
    %4 = vector.broadcast %3 : vector<1x768xf32> to vector<256x768xf32>
    %5 = arith.addf %2, %4 : vector<256x768xf32>
    %cst_5 = arith.constant 0.000000e+00 : f32
    %6 = vector.broadcast %cst_5 : f32 to vector<256x768xf32>
    %7 = arith.maximumf %5, %6 : vector<256x768xf32>
    %8 = vector.extract_strided_slice %7 {offsets = [1, 0], sizes = [255, 768], strides = [1, 1]} : vector<256x768xf32> to vector<255x768xf32>
    %9 = vector.extract_strided_slice %7 {offsets = [0, 0], sizes = [1, 768], strides = [1, 1]} : vector<256x768xf32> to vector<1x768xf32>
    %10 = tpu.concatenate %8, %9 in 0 : vector<255x768xf32>, vector<1x768xf32> -> vector<256x768xf32>
    %11 = arith.maximumf %7, %10 : vector<256x768xf32>
    %12 = vector.extract_strided_slice %11 {offsets = [0, 0], sizes = [256, 384], strides = [1, 1]} : vector<256x768xf32> to vector<256x384xf32>
    %13 = vector.extract_strided_slice %11 {offsets = [0, 384], sizes = [256, 384], strides = [1, 1]} : vector<256x768xf32> to vector<256x384xf32>
    %14 = arith.maximumf %12, %13 : vector<256x384xf32>
    %15 = arith.truncf %14 : vector<256x384xf32> to vector<256x384xbf16>
    %16 = vector.extract_strided_slice %15 {offsets = [2, 0], sizes = [254, 384], strides = [1, 1]} : vector<256x384xbf16> to vector<254x384xbf16>
    %17 = vector.extract_strided_slice %15 {offsets = [0, 0], sizes = [2, 384], strides = [1, 1]} : vector<256x384xbf16> to vector<2x384xbf16>
    %18 = tpu.concatenate %16, %17 in 0 : vector<254x384xbf16>, vector<2x384xbf16> -> vector<256x384xbf16>
    %19 = vector.extract_strided_slice %15 {offsets = [4, 0], sizes = [252, 384], strides = [1, 1]} : vector<256x384xbf16> to vector<252x384xbf16>
    %20 = vector.extract_strided_slice %15 {offsets = [0, 0], sizes = [4, 384], strides = [1, 1]} : vector<256x384xbf16> to vector<4x384xbf16>
    %21 = tpu.concatenate %19, %20 in 0 : vector<252x384xbf16>, vector<4x384xbf16> -> vector<256x384xbf16>
    %22 = vector.extract_strided_slice %15 {offsets = [6, 0], sizes = [250, 384], strides = [1, 1]} : vector<256x384xbf16> to vector<250x384xbf16>
    %23 = vector.extract_strided_slice %15 {offsets = [0, 0], sizes = [6, 384], strides = [1, 1]} : vector<256x384xbf16> to vector<6x384xbf16>
    %24 = tpu.concatenate %22, %23 in 0 : vector<250x384xbf16>, vector<6x384xbf16> -> vector<256x384xbf16>
    %25 = vector.extract_strided_slice %15 {offsets = [8, 0], sizes = [248, 384], strides = [1, 1]} : vector<256x384xbf16> to vector<248x384xbf16>
    %26 = vector.extract_strided_slice %15 {offsets = [0, 0], sizes = [8, 384], strides = [1, 1]} : vector<256x384xbf16> to vector<8x384xbf16>
    %27 = tpu.concatenate %25, %26 in 0 : vector<248x384xbf16>, vector<8x384xbf16> -> vector<256x384xbf16>
    %28 = tpu.concatenate %15, %18, %21, %24, %27 in 1 : vector<256x384xbf16>, vector<256x384xbf16>, vector<256x384xbf16>, vector<256x384xbf16>, vector<256x384xbf16> -> vector<256x1920xbf16>
    %c0_6 = arith.constant 0 : index
    %c0_7 = arith.constant 0 : index
    %29 = vector.load %arg4[%c0_6, %c0_7] : memref<1920x256xbf16, #tpu.memory_space<vmem>>, vector<1920x256xbf16>
    %cst_8 = arith.constant dense<0.000000e+00> : vector<256x256xf32>
    %30 = tpu.matmul %28, %29, %cst_8 {dimension_numbers = #tpu.dot_dimension_numbers<[1], [0], [0], [1], [0, 0, 1, 1], [], []>} : vector<256x1920xbf16>, vector<1920x256xbf16>, vector<256x256xf32> -> vector<256x256xf32>
    %c0_9 = arith.constant 0 : index
    %c0_10 = arith.constant 0 : index
    %31 = vector.load %arg5[%c0_9, %c0_10] : memref<1x256xf32, #tpu.memory_space<vmem>>, vector<1x256xf32>
    %32 = vector.broadcast %31 : vector<1x256xf32> to vector<256x256xf32>
    %33 = arith.addf %30, %32 : vector<256x256xf32>
    %cst_11 = arith.constant 0.000000e+00 : f32
    %34 = vector.broadcast %cst_11 : f32 to vector<256x256xf32>
    %35 = arith.maximumf %33, %34 : vector<256x256xf32>
    %36 = vector.extract_strided_slice %35 {offsets = [2, 0], sizes = [254, 256], strides = [1, 1]} : vector<256x256xf32> to vector<254x256xf32>
    %37 = vector.extract_strided_slice %35 {offsets = [0, 0], sizes = [2, 256], strides = [1, 1]} : vector<256x256xf32> to vector<2x256xf32>
    %38 = tpu.concatenate %36, %37 in 0 : vector<254x256xf32>, vector<2x256xf32> -> vector<256x256xf32>
    %39 = arith.maximumf %35, %38 : vector<256x256xf32>
    %40 = vector.extract_strided_slice %39 {offsets = [0, 0], sizes = [256, 128], strides = [1, 1]} : vector<256x256xf32> to vector<256x128xf32>
    %41 = vector.extract_strided_slice %39 {offsets = [0, 128], sizes = [256, 128], strides = [1, 1]} : vector<256x256xf32> to vector<256x128xf32>
    %42 = arith.maximumf %40, %41 : vector<256x128xf32>
    %43 = vector.extract_strided_slice %42 {offsets = [4, 0], sizes = [252, 128], strides = [1, 1]} : vector<256x128xf32> to vector<252x128xf32>
    %44 = vector.extract_strided_slice %42 {offsets = [0, 0], sizes = [4, 128], strides = [1, 1]} : vector<256x128xf32> to vector<4x128xf32>
    %45 = tpu.concatenate %43, %44 in 0 : vector<252x128xf32>, vector<4x128xf32> -> vector<256x128xf32>
    %46 = vector.extract_strided_slice %42 {offsets = [8, 0], sizes = [248, 128], strides = [1, 1]} : vector<256x128xf32> to vector<248x128xf32>
    %47 = vector.extract_strided_slice %42 {offsets = [0, 0], sizes = [8, 128], strides = [1, 1]} : vector<256x128xf32> to vector<8x128xf32>
    %48 = tpu.concatenate %46, %47 in 0 : vector<248x128xf32>, vector<8x128xf32> -> vector<256x128xf32>
    %49 = vector.extract_strided_slice %42 {offsets = [12, 0], sizes = [244, 128], strides = [1, 1]} : vector<256x128xf32> to vector<244x128xf32>
    %50 = vector.extract_strided_slice %42 {offsets = [0, 0], sizes = [12, 128], strides = [1, 1]} : vector<256x128xf32> to vector<12x128xf32>
    %51 = tpu.concatenate %49, %50 in 0 : vector<244x128xf32>, vector<12x128xf32> -> vector<256x128xf32>
    %52 = tpu.concatenate %42, %45, %48, %51 in 1 : vector<256x128xf32>, vector<256x128xf32>, vector<256x128xf32>, vector<256x128xf32> -> vector<256x512xf32>
    %c0_12 = arith.constant 0 : index
    %c0_13 = arith.constant 0 : index
    %53 = vector.load %arg8[%c0_12, %c0_13] : memref<8x256xf32, #tpu.memory_space<vmem>>, vector<8x256xf32>
    %cst_14 = arith.constant dense<0.000000e+00> : vector<8x512xf32>
    %54 = tpu.matmul %53, %52, %cst_14 {dimension_numbers = #tpu.dot_dimension_numbers<[1], [0], [0], [1], [0, 0, 1, 1], [], []>} : vector<8x256xf32>, vector<256x512xf32>, vector<8x512xf32> -> vector<8x512xf32>
    %c0_15 = arith.constant 0 : index
    %c0_16 = arith.constant 0 : index
    %55 = vector.load %arg6[%c0_15, %c0_16] : memref<512x10xf32, #tpu.memory_space<vmem>>, vector<512x10xf32>
    %cst_17 = arith.constant dense<0.000000e+00> : vector<8x10xf32>
    %56 = tpu.matmul %54, %55, %cst_17 {dimension_numbers = #tpu.dot_dimension_numbers<[1], [0], [0], [1], [0, 0, 1, 1], [], []>} : vector<8x512xf32>, vector<512x10xf32>, vector<8x10xf32> -> vector<8x10xf32>
    %c0_18 = arith.constant 0 : index
    %c0_19 = arith.constant 0 : index
    %57 = vector.load %arg7[%c0_18, %c0_19] : memref<1x10xf32, #tpu.memory_space<vmem>>, vector<1x10xf32>
    %58 = vector.broadcast %57 : vector<1x10xf32> to vector<8x10xf32>
    %59 = arith.addf %56, %58 : vector<8x10xf32>
    %cst_20 = arith.constant 0.000000e+00 : f32
    %60 = vector.broadcast %cst_20 : f32 to vector<8x10xf32>
    %61 = arith.maximumf %59, %60 : vector<8x10xf32>
    %cst_21 = arith.constant dense<0xFF800000> : vector<8xf32>
    %62 = vector.multi_reduction <maximumf>, %61, %cst_21 [1] : vector<8x10xf32> to vector<8xf32>
    %63 = vector.shape_cast %62 : vector<8xf32> to vector<8x1xf32>
    %64 = vector.broadcast %63 : vector<8x1xf32> to vector<8x10xf32>
    %65 = arith.subf %61, %64 : vector<8x10xf32>
    %66 = math.exp %65 : vector<8x10xf32>
    %cst_22 = arith.constant dense<0.000000e+00> : vector<8xf32>
    %67 = vector.multi_reduction <add>, %66, %cst_22 [1] : vector<8x10xf32> to vector<8xf32>
    %68 = vector.shape_cast %67 : vector<8xf32> to vector<8x1xf32>
    %69 = math.log %68 : vector<8x1xf32>
    %70 = arith.addf %63, %69 : vector<8x1xf32>
    %71 = vector.broadcast %70 : vector<8x1xf32> to vector<8x10xf32>
    %72 = arith.subf %61, %71 : vector<8x10xf32>
    %c0_23 = arith.constant 0 : index
    %c0_24 = arith.constant 0 : index
    %73 = vector.load %arg9[%c0_23, %c0_24] : memref<8x10xf32, #tpu.memory_space<vmem>>, vector<8x10xf32>
    tpu.vector_store %arg9[%c0_23, %c0_24], %72 {strides = array<i32>} : memref<8x10xf32, #tpu.memory_space<vmem>>, vector<8x10xf32>,
    return
  }
  func.func @transform_0(%arg0: i32) -> (i32, i32) {
    %c0_i32 = arith.constant 0 : i32
    %c0_i32_0 = arith.constant 0 : i32
    return %arg0, %c0_i32 : i32, i32
  }
  func.func @transform_1(%arg0: i32) -> (i32, i32) {
    %c0_i32 = arith.constant 0 : i32
    %c0_i32_0 = arith.constant 0 : i32
    %c0_i32_1 = arith.constant 0 : i32
    return %c0_i32, %c0_i32_0 : i32, i32
  }
  func.func @transform_2(%arg0: i32) -> (i32, i32) {
    %c0_i32 = arith.constant 0 : i32
    %c0_i32_0 = arith.constant 0 : i32
    %c0_i32_1 = arith.constant 0 : i32
    return %c0_i32, %c0_i32_0 : i32, i32
  }
  func.func @transform_3(%arg0: i32) -> (i32, i32) {
    %c0_i32 = arith.constant 0 : i32
    %c0_i32_0 = arith.constant 0 : i32
    %c0_i32_1 = arith.constant 0 : i32
    return %c0_i32, %c0_i32_0 : i32, i32
  }
  func.func @transform_4(%arg0: i32) -> (i32, i32) {
    %c0_i32 = arith.constant 0 : i32
    %c0_i32_0 = arith.constant 0 : i32
    %c0_i32_1 = arith.constant 0 : i32
    return %c0_i32, %c0_i32_0 : i32, i32
  }
  func.func @transform_5(%arg0: i32) -> (i32, i32) {
    %c0_i32 = arith.constant 0 : i32
    %c0_i32_0 = arith.constant 0 : i32
    %c0_i32_1 = arith.constant 0 : i32
    return %c0_i32, %c0_i32_0 : i32, i32
  }
  func.func @transform_6(%arg0: i32) -> (i32, i32) {
    %c0_i32 = arith.constant 0 : i32
    %c0_i32_0 = arith.constant 0 : i32
    %c0_i32_1 = arith.constant 0 : i32
    return %c0_i32, %c0_i32_0 : i32, i32
  }
  func.func @transform_7(%arg0: i32) -> (i32, i32) {
    %c0_i32 = arith.constant 0 : i32
    %c0_i32_0 = arith.constant 0 : i32
    %c0_i32_1 = arith.constant 0 : i32
    return %c0_i32, %c0_i32_0 : i32, i32
  }
  func.func @transform_8(%arg0: i32) -> (i32, i32) {
    %c0_i32 = arith.constant 0 : i32
    %c0_i32_0 = arith.constant 0 : i32
    return %arg0, %c0_i32 : i32, i32
  }
}

</mosaic_0001>

<bundles_post_ra>
// kernel: net_forward.1
= control target key start
LH: loop header
LB: loop body
LE: loop exit
PB: predicated region body
PF: predicated region fallthrough
CT: control target
= control target key end

     0   :  { %vm556_vm0 = vcmask 97280   ;;  %vm605_vm1 = vcmask 1045504   ;;  %vm1587_vm2 = vcmask 1046528   ;;  %vm2856_vm3 = vcmask 1044480   ;;  %s13898_s1 = inlined_call_operand.vmem [shape: bf16[140,768], index: 1, kind: input, shape index: {}]   ;;  %s13899_s0 = inlined_call_operand.vmem [shape: bf16[256,140], index: 0, kind: input, shape index: {}]   ;;  %s13900_s3 = inlined_call_operand.vmem [shape: bf16[1920,256], index: 3, kind: input, shape index: {}]   ;;  %s13901_s2 = inlined_call_operand.vmem [shape: f32[1,768], index: 2, kind: input, shape index: {}]   ;;  %s13902_s4 = inlined_call_operand.vmem [shape: f32[1,256], index: 4, kind: input, shape index: {}]   ;;  %s13903_s7 = inlined_call_operand.vmem [shape: f32[8,256], index: 7, kind: input, shape index: {}]   ;;  %s13904_s5 = inlined_call_operand.vmem [shape: f32[512,10], index: 5, kind: input, shape index: {}]   ;;  %s13905_s6 = inlined_call_operand.vmem [shape: f32[1,10], index: 6, kind: input, shape index: {}]   ;;  %s13906_s8 = inlined_call_operand.vmem [shape: f32[8,10], index: 8, kind: output, shape index: {}]  }
   0x1   :  { %v8231_v0 = vld [vmem:[%s13898_s1 + $0x4] ss:$24 sps:$4 sm:$0xff]   ;;  %v8235_v2 = vld [vmem:[%s13898_s1] ss:$24 sps:$4 sm:$0xff]   ;;  %v8237_v4 = vld [vmem:[%s13898_s1 + $0x34] ss:$24 sps:$4 sm:$0xff]  }
   0x2   :  { %v8233_v1 = vld [vmem:[%s13898_s1 + $0xc] ss:$24 sps:$4 sm:$0xff]   ;;  %624 = vmatprep.subr.bf16.mxu0 %v8231_v0  ;;  %v8236_v3 = vld [vmem:[%s13898_s1 + $0x8] ss:$24 sps:$4 sm:$0xff]   ;;  %v8239_v5 = vld [vmem:[%s13898_s1 + $0x3c] ss:$24 sps:$4 sm:$0xff]  }
   0x3   :  { %817 = vmatprep.subr.bf16.mxu1 %v8233_v1  ;;  %625 = vmatpush1.bf16.msra.mxu0 %v8235_v2  ;;  %v8241_v6 = vld [vmem:[%s13898_s1 + $0x30] ss:$24 sps:$4 sm:$0xff]   ;;  %v8243_v8 = vld [vmem:[%s13898_s1 + $0x64] ss:$24 sps:$4 sm:$0xff]   ;;  %v8247_v10 = vld [vmem:[%s13898_s1 + $0x60] ss:$24 sps:$4 sm:$0xff]  }
   0x4   :  { %818 = vmatpush1.bf16.msra.mxu1 %v8236_v3  ;;  %626 = vmatprep.subr.bf16.mxu0 %v8237_v4  ;;  %v8242_v7 = vld [vmem:[%s13898_s1 + $0x38] ss:$24 sps:$4 sm:$0xff]   ;;  %v8245_v9 = vld [vmem:[%s13898_s1 + $0x6c] ss:$24 sps:$4 sm:$0xff]   ;;  %v8248_v11 = vld [vmem:[%s13898_s1 + $0x68] ss:$24 sps:$4 sm:$0xff]  }
   0x5   :  { %819 = vmatprep.subr.bf16.mxu1 %v8239_v5  ;;  %v8249_v12 = vld [vmem:[%s13898_s1 + $0x94] ss:$24 sps:$4 sm:$0xff]   ;;  %v8253_v14 = vld [vmem:[%s13898_s1 + $0x90] ss:$24 sps:$4 sm:$0xff]   ;;  %v8255_v16 = vld [vmem:[%s13898_s1 + $0xc4] ss:$24 sps:$4 sm:$0xff]  }
   0x6   :  { %v8251_v13 = vld [vmem:[%s13898_s1 + $0x9c] ss:$24 sps:$4 sm:$0xff]   ;;  %v8254_v15 = vld [vmem:[%s13898_s1 + $0x98] ss:$24 sps:$4 sm:$0xff]   ;;  %v8257_v17 = vld [vmem:[%s13898_s1 + $0xcc] ss:$24 sps:$4 sm:$0xff]  }
   0x7   :  { %627 = vmatpush1.bf16.msra.mxu0 %v8241_v6  ;;  %v8259_v18 = vld [vmem:[%s13898_s1 + $0xc0] ss:$24 sps:$4 sm:$0xff]   ;;  %v8261_v20 = vld [vmem:[%s13898_s1 + $0xf4] ss:$24 sps:$4 sm:$0xff]   ;;  %v8265_v22 = vld [vmem:[%s13898_s1 + $0xf0] ss:$24 sps:$4 sm:$0xff]  }
   0x8   :  { %820 = vmatpush1.bf16.msra.mxu1 %v8242_v7  ;;  %628 = vmatprep.subr.bf16.mxu0 %v8243_v8  ;;  %v8260_v19 = vld [vmem:[%s13898_s1 + $0xc8] ss:$24 sps:$4 sm:$0xff]   ;;  %v8263_v21 = vld [vmem:[%s13898_s1 + $0xfc] ss:$24 sps:$4 sm:$0xff]   ;;  %v8266_v23 = vld [vmem:[%s13898_s1 + $0xf8] ss:$24 sps:$4 sm:$0xff]  }
   0x9   :  { %821 = vmatprep.subr.bf16.mxu1 %v8245_v9  ;;  %v8267_v24 = vld [vmem:[%s13898_s1 + $0x124] ss:$24 sps:$4 sm:$0xff]   ;;  %v8271_v26 = vld [vmem:[%s13898_s1 + $0x120] ss:$24 sps:$4 sm:$0xff]   ;;  %v8273_v28 = vld [vmem:[%s13898_s1 + $0x154] ss:$24 sps:$4 sm:$0xff]  }
   0xa   :  { %v8269_v25 = vld [vmem:[%s13898_s1 + $0x12c] ss:$24 sps:$4 sm:$0xff]   ;;  %v8272_v27 = vld [vmem:[%s13898_s1 + $0x128] ss:$24 sps:$4 sm:$0xff]   ;;  %v8275_v29 = vld [vmem:[%s13898_s1 + $0x15c] ss:$24 sps:$4 sm:$0xff]  }
   0xb   :  { %629 = vmatpush1.bf16.msra.mxu0 %v8247_v10  ;;  %v8866_v30 = vld [vmem:[%s13899_s0 + $0x4] ss:$8 sps:$4 sm:$0xff]   ;;  %v8277_v31 = vld [vmem:[%s13898_s1 + $0x150] ss:$24 sps:$4 sm:$0xff]   ;;  %v8905_v41 = vld [vmem:[%s13899_s0 + $0x14] ss:$8 sps:$4 sm:$0xff]  }
   0xc   :  { %822 = vmatpush1.bf16.msra.mxu1 %v8248_v11  ;;  %630 = vmatprep.subr.bf16.mxu0 %v8249_v12  ;;  %v8278_v32 = vld [vmem:[%s13898_s1 + $0x158] ss:$24 sps:$4 sm:$0xff]   ;;  %v8279_v33 = vld [vmem:[%s13898_s1 + $0x184] ss:$24 sps:$4 sm:$0x3f]   ;;  %vm3008_vm4 = vcmask 1043456  }
   0xd   :  { %823 = vmatprep.subr.bf16.mxu1 %v8251_v13  ;;  %v8281_v34 = vld [vmem:[%s13898_s1 + $0x18c] ss:$24 sps:$4 sm:$0x3f]   ;;  %7165 = vmatprep.mubr.msk.bf16.mxu0 %vm556_vm0, %v8866_v30  ;;  %v8283_v35 = vld [vmem:[%s13898_s1 + $0x180] ss:$24 sps:$4 sm:$0x3f]  }
   0xe   :  { %7182 = vmatprep.mubr.msk.bf16.mxu1 %vm556_vm0, %v8866_v30  ;;  %v8284_v36 = vld [vmem:[%s13898_s1 + $0x188] ss:$24 sps:$4 sm:$0x3f]   ;;  %v607_v37 = vsel %vm605_vm1, %v8283_v35, 0  ;;  %v8292_v39 = vld [vmem:[%s13898_s1 + $0x14] ss:$24 sps:$4 sm:$0xff]   ;;  %v118_v35 = vlaneseq }
   0xf   :  { %631 = vmatpush1.bf16.msra.mxu0 %v8253_v14  ;;  %v613_v38 = vsel %vm605_vm1, %v8284_v36, 0  ;;  %v8900_v40 = vld [vmem:[%s13899_s0] ss:$8 sps:$4 sm:$0xff]   ;;  %v8299_v43 = vld [vmem:[%s13898_s1 + $0x44] ss:$24 sps:$4 sm:$0xff]   ;;  %vm7059_vm5 = vcmask 80896  }
  0x10   :  { %824 = vmatpush1.bf16.msra.mxu1 %v8254_v15  ;;  %632 = vmatprep.subr.bf16.mxu0 %v8255_v16  ;;  %v8290_v42 = vld [vmem:[%s13898_s1 + $0x10] ss:$24 sps:$4 sm:$0xff]   ;;  %v8297_v44 = vld [vmem:[%s13898_s1 + $0x40] ss:$24 sps:$4 sm:$0xff]   ;;  %v8308_v45 = vld [vmem:[%s13898_s1 + $0x74] ss:$24 sps:$4 sm:$0xff]  }
  0x11   :  { %825 = vmatprep.subr.bf16.mxu1 %v8257_v17  ;;  %v8928_v46 = vld [vmem:[%s13899_s0 + $0x10] ss:$8 sps:$4 sm:$0xff]   ;;  %v8933_v47 = vld [vmem:[%s13899_s0 + $0x24] ss:$8 sps:$4 sm:$0xff]   ;;  %v8956_v52 = vld [vmem:[%s13899_s0 + $0x20] ss:$8 sps:$4 sm:$0xff]  }
  0x12   :  { %v8306_v48 = vld [vmem:[%s13898_s1 + $0x70] ss:$24 sps:$4 sm:$0xff]   ;;  %v8317_v49 = vld [vmem:[%s13898_s1 + $0xa4] ss:$24 sps:$4 sm:$0xff]   ;;  %v8315_v50 = vld [vmem:[%s13898_s1 + $0xa0] ss:$24 sps:$4 sm:$0xff]  }
  0x13   :  { %633 = vmatpush1.bf16.msra.mxu0 %v8259_v18  ;;  %v8326_v51 = vld [vmem:[%s13898_s1 + $0xd4] ss:$24 sps:$4 sm:$0xff]   ;;  %v8324_v54 = vld [vmem:[%s13898_s1 + $0xd0] ss:$24 sps:$4 sm:$0xff]   ;;  %v8334_v55 = vld [vmem:[%s13898_s1 + $0x104] ss:$24 sps:$4 sm:$0xff]  }
  0x14   :  { %826 = vmatpush1.bf16.msra.mxu1 %v8260_v19  ;;  %634 = vmatprep.subr.bf16.mxu0 %v8261_v20  ;;  %v8961_v53 = vld [vmem:[%s13899_s0 + $0x34] ss:$8 sps:$4 sm:$0xff]   ;;  %v8332_v56 = vld [vmem:[%s13898_s1 + $0x100] ss:$24 sps:$4 sm:$0xff]   ;;  %v8989_v59 = vld [vmem:[%s13899_s0 + $0x44] ss:$8 sps:$4 sm:$0xff]  }
  0x15   :  { %827 = vmatprep.subr.bf16.mxu1 %v8263_v21  ;;  %v8341_v57 = vld [vmem:[%s13898_s1 + $0x134] ss:$24 sps:$4 sm:$0xff]   ;;  %v8984_v58 = vld [vmem:[%s13899_s0 + $0x30] ss:$8 sps:$4 sm:$0xff]   ;;  %v8350_v61 = vld [vmem:[%s13898_s1 + $0x164] ss:$24 sps:$4 sm:$0xff]  }
  0x16   :  { %v8339_v60 = vld [vmem:[%s13898_s1 + $0x130] ss:$24 sps:$4 sm:$0xff]   ;;  %v8348_v62 = vld [vmem:[%s13898_s1 + $0x160] ss:$24 sps:$4 sm:$0xff]   ;;  %v9020_v2 = vld [vmem:[%s13899_s0 + $0x54] ss:$8 sps:$4 sm:$0xff]  }
  0x17   :  { %635 = vmatpush1.bf16.msra.mxu0 %v8265_v22  ;;  %v8357_v63 = vld [vmem:[%s13898_s1 + $0x194] ss:$24 sps:$4 sm:$0x3f]   ;;  %v8359_v0 = vld [vmem:[%s13898_s1 + $0x190] ss:$24 sps:$4 sm:$0x3f]  }
  0x18   :  { %828 = vmatpush1.bf16.msra.mxu1 %v8266_v23  ;;  %636 = vmatprep.subr.bf16.mxu0 %v8267_v24  ;;  %v9015_v1 = vld [vmem:[%s13899_s0 + $0x40] ss:$8 sps:$4 sm:$0xff]   ;;  %v619_v3 = vsel %vm605_vm1, %v8359_v0, 0  ;;  %v9033_v4 = vld [vmem:[%s13899_s0 + $0x50] ss:$8 sps:$4 sm:$0xff]  }
  0x19   :  { %829 = vmatprep.subr.bf16.mxu1 %v8269_v25  ;;  %v9038_v5 = vld [vmem:[%s13899_s0 + $0x64] ss:$8 sps:$4 sm:$0xff]   ;;  %v9049_v6 = vld [vmem:[%s13899_s0 + $0x60] ss:$8 sps:$4 sm:$0xff]   ;;  %v9054_v7 = vld [vmem:[%s13899_s0 + $0x74] ss:$8 sps:$4 sm:$0xff]  }
  0x1a   :  { %v9065_v8 = vld [vmem:[%s13899_s0 + $0x70] ss:$8 sps:$4 sm:$0xff]   ;;  %v9070_v9 = vld [vmem:[%s13899_s0 + $0x84] ss:$8 sps:$4 sm:$0xff]   ;;  %v9081_v10 = vld [vmem:[%s13899_s0 + $0x80] ss:$8 sps:$4 sm:$0xff]  }
  0x1b   :  { %637 = vmatpush1.bf16.msra.mxu0 %v8271_v26  ;;  %v9086_v11 = vld [vmem:[%s13899_s0 + $0x94] ss:$8 sps:$4 sm:$0xff]   ;;  %v9097_v12 = vld [vmem:[%s13899_s0 + $0x90] ss:$8 sps:$4 sm:$0xff]   ;;  %v9102_v13 = vld [vmem:[%s13899_s0 + $0xa4] ss:$8 sps:$4 sm:$0xff]  }
  0x1c   :  { %830 = vmatpush1.bf16.msra.mxu1 %v8272_v27  ;;  %638 = vmatprep.subr.bf16.mxu0 %v8273_v28  ;;  %v9113_v14 = vld [vmem:[%s13899_s0 + $0xa0] ss:$8 sps:$4 sm:$0xff]   ;;  %v9118_v15 = vld [vmem:[%s13899_s0 + $0xb4] ss:$8 sps:$4 sm:$0xff]   ;;  %v9129_v16 = vld [vmem:[%s13899_s0 + $0xb0] ss:$8 sps:$4 sm:$0xff]  }
  0x1d   :  { %831 = vmatprep.subr.bf16.mxu1 %v8275_v29  ;;  %v9134_v17 = vld [vmem:[%s13899_s0 + $0xc4] ss:$8 sps:$4 sm:$0xff]   ;;  %v9145_v18 = vld [vmem:[%s13899_s0 + $0xc0] ss:$8 sps:$4 sm:$0xff]   ;;  %v9150_v19 = vld [vmem:[%s13899_s0 + $0xd4] ss:$8 sps:$4 sm:$0xff]  }
  0x1e   :  { %v9161_v20 = vld [vmem:[%s13899_s0 + $0xd0] ss:$8 sps:$4 sm:$0xff]   ;;  %v9166_v21 = vld [vmem:[%s13899_s0 + $0xe4] ss:$8 sps:$4 sm:$0xff]   ;;  %v9177_v22 = vld [vmem:[%s13899_s0 + $0xe0] ss:$8 sps:$4 sm:$0xff]  }
  0x1f   :  { %639 = vmatpush1.bf16.msra.mxu0 %v8277_v31  ;;  %v9182_v23 = vld [vmem:[%s13899_s0 + $0xf4] ss:$8 sps:$4 sm:$0xff]   ;;  %v8356_v24 = vld [vmem:[%s13899_s0 + $0xf0] ss:$8 sps:$4 sm:$0xff]   ;;  %v8360_v25 = vld [vmem:[%s13900_s3 + $0x300] ss:$8 sps:$4 sm:$0xff]  }
  0x20   :  { %832 = vmatpush1.bf16.msra.mxu1 %v8278_v32  ;;  %7164 = vmatprep.subr.msk.bf16.mxu0 %vm605_vm1, %v8279_v33  ;;  %v8362_v26 = vld [vmem:[%s13900_s3 + $0x304] ss:$8 sps:$4 sm:$0xff]   ;;  %v8363_v27 = vld [vmem:[%s13900_s3 + $0x310] ss:$8 sps:$4 sm:$0xff]   ;;  %v8365_v28 = vld [vmem:[%s13900_s3 + $0x314] ss:$8 sps:$4 sm:$0xff]  }
  0x21   :  { %7181 = vmatprep.subr.msk.bf16.mxu1 %vm605_vm1, %v8281_v34  ;;  %v8366_v29 = vld [vmem:[%s13900_s3 + $0x320] ss:$8 sps:$4 sm:$0xff]   ;;  %v8369_v31 = vld [vmem:[%s13900_s3 + $0x330] ss:$8 sps:$4 sm:$0xff]   ;;  %v8371_v32 = vld [vmem:[%s13900_s3 + $0x334] ss:$8 sps:$4 sm:$0xff]  }
  0x22   :  { %v8372_v33 = vld [vmem:[%s13900_s3 + $0x340] ss:$8 sps:$4 sm:$0xff]   ;;  %v8374_v34 = vld [vmem:[%s13900_s3 + $0x344] ss:$8 sps:$4 sm:$0xff]  }
  0x23   :  { %641 = vmatpush1.bf16.msra.mxu0 %v607_v37  ;;  %v8380_v36 = vld [vmem:[%s13900_s3 + $0x4] ss:$8 sps:$4 sm:$0xff]   ;;  %v8378_v37 = vld [vmem:[%s13900_s3] ss:$8 sps:$4 sm:$0xff]  }
  0x24   :  { %834 = vmatpush1.bf16.msra.mxu1 %v613_v38  ;;  %1010 = vmatprep.subr.bf16.mxu0 %v8292_v39  ;;  %v9259_v38 = vshrl.u32 %v118_v35, 7  ;;  %v8375_v39 = vld [vmem:[%s13900_s3 + $0x350] ss:$8 sps:$4 sm:$0xff]  }
  0x25   :  { %5191 = vmatprep.subr.bf16.mxu1 %v8362_v26 }
  0x26   :  { %657 = vmatmul.mubr.bf16.vlgmr.msra.gmra.mrb[0].mxu0 %v8900_v40  ;;  %14143 = vst [vmem:[#allocation2_spill] sm:$0xff] %v9259_v38 }
  0x27   :  { %850 = vmatmul.mubr.bf16.vlgmr.msra.gmra.mrb[0].mxu1 %v8900_v40  ;;  %7166 = vmatprep.mubr.msk.bf16.mxu0 %vm556_vm0, %v8905_v41 }
  0x28   :  { %7183 = vmatprep.mubr.msk.bf16.mxu1 %vm556_vm0, %v8905_v41  ;;  %1011 = vmatpush1.bf16.msra.mxu0 %v8290_v42  ;;  %v116_v42 = vld [vmem:[%s13901_s2] sm:$0x3f] }
  0x29   :  { %1012 = vmatprep.subr.bf16.mxu0 %v8299_v43  ;;  %5192 = vmatpush1.bf16.msra.mxu1 %v8360_v25  ;;  %v8384_v43 = vld [vmem:[%s13900_s3 + $0x10] ss:$8 sps:$4 sm:$0xff]  }
  0x2a   :  { %5193 = vmatprep.subr.bf16.mxu1 %v8365_v28 }
  0x2c   :  { %1013 = vmatpush1.bf16.msra.mxu0 %v8297_v44  ;;  %v13908_v44 = vsub.s32 0, %v9259_v38 }
  0x2d   :  { %1014 = vmatprep.subr.bf16.mxu0 %v8308_v45  ;;  %5194 = vmatpush1.bf16.msra.mxu1 %v8363_v27  ;;  %v128_v45 = vsub.s32 2, %v9259_v38 }
  0x2e   :  { %667 = vmatmul.mubr.bf16.gmra.mrb[4].mxu0 %v8928_v46 }
  0x2f   :  { %860 = vmatmul.mubr.bf16.gmra.mrb[4].mxu1 %v8928_v46  ;;  %7167 = vmatprep.mubr.msk.bf16.mxu0 %vm556_vm0, %v8933_v47 }
  0x30   :  { %7184 = vmatprep.mubr.msk.bf16.mxu1 %vm556_vm0, %v8933_v47  ;;  %1015 = vmatpush1.bf16.msra.mxu0 %v8306_v48  ;;  %v8389_v48 = vld [vmem:[%s13900_s3 + $0x24] ss:$8 sps:$4 sm:$0xff]  }
  0x31   :  { %1016 = vmatprep.subr.bf16.mxu0 %v8317_v49  ;;  %v8387_v49 = vld [vmem:[%s13900_s3 + $0x20] ss:$8 sps:$4 sm:$0xff]  }
  0x34   :  { %1017 = vmatpush1.bf16.msra.mxu0 %v8315_v50  ;;  %v9291_v50 = vrot.slane %v116_v42, %v13908_v44 }
  0x35   :  { %1018 = vmatprep.subr.bf16.mxu0 %v8326_v51  ;;  %v9293_v51 = vrot.slane %v116_v42, %v128_v45  ;;  %v8392_v45 = vld [vmem:[%s13900_s3 + $0x374] ss:$8 sps:$4 sm:$0xff]  }
  0x36   :  { %677 = vmatmul.mubr.bf16.gmra.mrb[8].mxu0 %v8956_v52 }
  0x37   :  { %870 = vmatmul.mubr.bf16.gmra.mrb[8].mxu1 %v8956_v52  ;;  %7168 = vmatprep.mubr.msk.bf16.mxu0 %vm556_vm0, %v8961_v53 }
  0x38   :  { %7185 = vmatprep.mubr.msk.bf16.mxu1 %vm556_vm0, %v8961_v53  ;;  %1019 = vmatpush1.bf16.msra.mxu0 %v8324_v54  ;;  %v8381_v54 = vld [vmem:[%s13900_s3 + $0x360] ss:$8 sps:$4 sm:$0xff]  }
  0x39   :  { %1020 = vmatprep.subr.bf16.mxu0 %v8334_v55  ;;  %v8383_v55 = vld [vmem:[%s13900_s3 + $0x364] ss:$8 sps:$4 sm:$0xff]  }
  0x3c   :  { %1021 = vmatpush1.bf16.msra.mxu0 %v8332_v56 }
  0x3d   :  { %1022 = vmatprep.subr.bf16.mxu0 %v8341_v57 }
  0x3e   :  { %687 = vmatmul.mubr.bf16.gmra.mrb[12].mxu0 %v8984_v58 }
  0x3f   :  { %880 = vmatmul.mubr.bf16.gmra.mrb[12].mxu1 %v8984_v58  ;;  %7169 = vmatprep.mubr.msk.bf16.mxu0 %vm556_vm0, %v8989_v59 }
  0x40   :  { %7186 = vmatprep.mubr.msk.bf16.mxu1 %vm556_vm0, %v8989_v59  ;;  %1023 = vmatpush1.bf16.msra.mxu0 %v8339_v60 }
  0x41   :  { %1024 = vmatprep.subr.bf16.mxu0 %v8350_v61 }
  0x44   :  { %1025 = vmatpush1.bf16.msra.mxu0 %v8348_v62 }
  0x45   :  { %7198 = vmatprep.subr.msk.bf16.mxu0 %vm605_vm1, %v8357_v63 }
  0x46   :  { %697 = vmatmul.mubr.bf16.gmra.mrb[16].mxu0 %v9015_v1 }
  0x47   :  { %890 = vmatmul.mubr.bf16.gmra.mrb[16].mxu1 %v9015_v1  ;;  %7170 = vmatprep.mubr.msk.bf16.mxu0 %vm556_vm0, %v9020_v2 }
  0x48   :  { %7187 = vmatprep.mubr.msk.bf16.mxu1 %vm556_vm0, %v9020_v2  ;;  %1027 = vmatpush1.bf16.msra.mxu0 %v619_v3 }
  0x49   :  { %4612 = vmatprep.subr.bf16.mxu0 %v8380_v36  ;;  %v8390_v36 = vld [vmem:[%s13900_s3 + $0x370] ss:$8 sps:$4 sm:$0xff]  }
  0x4e   :  { %707 = vmatmul.mubr.bf16.gmra.mrb[20].mxu0 %v9033_v4 }
  0x4f   :  { %900 = vmatmul.mubr.bf16.gmra.mrb[20].mxu1 %v9033_v4  ;;  %7171 = vmatprep.mubr.msk.bf16.mxu0 %vm556_vm0, %v9038_v5 }
  0x50   :  { %7188 = vmatprep.mubr.msk.bf16.mxu1 %vm556_vm0, %v9038_v5 }
  0x56   :  { %717 = vmatmul.mubr.bf16.gmra.mrb[24].mxu0 %v9049_v6 }
  0x57   :  { %910 = vmatmul.mubr.bf16.gmra.mrb[24].mxu1 %v9049_v6  ;;  %7172 = vmatprep.mubr.msk.bf16.mxu0 %vm556_vm0, %v9054_v7 }
  0x58   :  { %7189 = vmatprep.mubr.msk.bf16.mxu1 %vm556_vm0, %v9054_v7 }
  0x5e   :  { %727 = vmatmul.mubr.bf16.gmra.mrb[28].mxu0 %v9065_v8 }
  0x5f   :  { %920 = vmatmul.mubr.bf16.gmra.mrb[28].mxu1 %v9065_v8  ;;  %7173 = vmatprep.mubr.msk.bf16.mxu0 %vm556_vm0, %v9070_v9 }
  0x60   :  { %7190 = vmatprep.mubr.msk.bf16.mxu1 %vm556_vm0, %v9070_v9 }
  0x66   :  { %737 = vmatmul.mubr.bf16.gmra.mrb[32].mxu0 %v9081_v10 }
  0x67   :  { %930 = vmatmul.mubr.bf16.gmra.mrb[32].mxu1 %v9081_v10  ;;  %7174 = vmatprep.mubr.msk.bf16.mxu0 %vm556_vm0, %v9086_v11 }
  0x68   :  { %7191 = vmatprep.mubr.msk.bf16.mxu1 %vm556_vm0, %v9086_v11 }
  0x6e   :  { %747 = vmatmul.mubr.bf16.gmra.mrb[36].mxu0 %v9097_v12 }
  0x6f   :  { %940 = vmatmul.mubr.bf16.gmra.mrb[36].mxu1 %v9097_v12  ;;  %7175 = vmatprep.mubr.msk.bf16.mxu0 %vm556_vm0, %v9102_v13 }
  0x70   :  { %7192 = vmatprep.mubr.msk.bf16.mxu1 %vm556_vm0, %v9102_v13 }
  0x76   :  { %757 = vmatmul.mubr.bf16.gmra.mrb[40].mxu0 %v9113_v14 }
  0x77   :  { %950 = vmatmul.mubr.bf16.gmra.mrb[40].mxu1 %v9113_v14  ;;  %7176 = vmatprep.mubr.msk.bf16.mxu0 %vm556_vm0, %v9118_v15 }
  0x78   :  { %7193 = vmatprep.mubr.msk.bf16.mxu1 %vm556_vm0, %v9118_v15 }
  0x7e   :  { %767 = vmatmul.mubr.bf16.gmra.mrb[44].mxu0 %v9129_v16 }
  0x7f   :  { %960 = vmatmul.mubr.bf16.gmra.mrb[44].mxu1 %v9129_v16  ;;  %7177 = vmatprep.mubr.msk.bf16.mxu0 %vm556_vm0, %v9134_v17 }
  0x80   :  { %7194 = vmatprep.mubr.msk.bf16.mxu1 %vm556_vm0, %v9134_v17 }
  0x86   :  { %777 = vmatmul.mubr.bf16.gmra.mrb[48].mxu0 %v9145_v18 }
  0x87   :  { %970 = vmatmul.mubr.bf16.gmra.mrb[48].mxu1 %v9145_v18  ;;  %7178 = vmatprep.mubr.msk.bf16.mxu0 %vm556_vm0, %v9150_v19 }
  0x88   :  { %7195 = vmatprep.mubr.msk.bf16.mxu1 %vm556_vm0, %v9150_v19 }
  0x8e   :  { %787 = vmatmul.mubr.bf16.gmra.mrb[52].mxu0 %v9161_v20 }
  0x8f   :  { %980 = vmatmul.mubr.bf16.gmra.mrb[52].mxu1 %v9161_v20  ;;  %7179 = vmatprep.mubr.msk.bf16.mxu0 %vm556_vm0, %v9166_v21 }
  0x90   :  { %7196 = vmatprep.mubr.msk.bf16.mxu1 %vm556_vm0, %v9166_v21 }
  0x96   :  { %797 = vmatmul.mubr.bf16.gmra.mrb[56].mxu0 %v9177_v22 }
  0x97   :  { %990 = vmatmul.mubr.bf16.gmra.mrb[56].mxu1 %v9177_v22  ;;  %7180 = vmatprep.mubr.msk.bf16.mxu0 %vm556_vm0, %v9182_v23 }
  0x98   :  { %7197 = vmatprep.mubr.msk.bf16.mxu1 %vm556_vm0, %v9182_v23 }
  0x9e   :  { %807 = vmatmul.mubr.bf16.gmra.mrb[60].mxu0 %v8356_v24 }
  0x9f   :  { %1000 = vmatmul.mubr.bf16.gmra.mrb[60].mxu1 %v8356_v24  ;;  %7199 = vmatprep.mubr.msk.bf16.mxu0 %vm556_vm0, %v8866_v30  ;;  %v8368_v30 = vld [vmem:[%s13900_s3 + $0x324] ss:$8 sps:$4 sm:$0xff]  }
  0xa0   :  { %5195 = vmatprep.subr.bf16.mxu1 %v8368_v30  ;;  %v8398_v30 = vld [vmem:[%s13900_s3 + $0x44] ss:$8 sps:$4 sm:$0xff]  }
  0xa1   :  { %5196 = vmatpush1.bf16.msra.mxu1 %v8366_v29 }
  0xa2   :  { %5197 = vmatprep.subr.bf16.mxu1 %v8371_v32  ;;  %v8396_v32 = vld [vmem:[%s13900_s3 + $0x40] ss:$8 sps:$4 sm:$0xff]  }
  0xa5   :  { %5198 = vmatpush1.bf16.msra.mxu1 %v8369_v31 }
  0xa6   :  { %1043 = vmatmul.mubr.bf16.vlgmr.msra.gmra.mrb[64].mxu0 %v8900_v40  ;;  %5199 = vmatprep.subr.bf16.mxu1 %v8374_v34  ;;  %v8377_v40 = vld [vmem:[%s13900_s3 + $0x354] ss:$8 sps:$4 sm:$0xff]  }
  0xa7   :  { %7200 = vmatprep.mubr.msk.bf16.mxu0 %vm556_vm0, %v8905_v41  ;;  %4613 = vmatpush1.bf16.msra.mxu0 %v8378_v37  ;;  %v8386_v41 = vld [vmem:[%s13900_s3 + $0x14] ss:$8 sps:$4 sm:$0xff]  }
  0xa8   :  { %4614 = vmatprep.subr.bf16.mxu0 %v8386_v41 }
  0xa9   :  { %5200 = vmatpush1.bf16.msra.mxu1 %v8372_v33 }
  0xaa   :  { %5201 = vmatprep.subr.bf16.mxu1 %v8377_v40 }
  0xab   :  { %4615 = vmatpush1.bf16.msra.mxu0 %v8384_v43 }
  0xac   :  { %4616 = vmatprep.subr.bf16.mxu0 %v8389_v48 }
  0xad   :  { %5202 = vmatpush1.bf16.msra.mxu1 %v8375_v39 }
  0xae   :  { %1053 = vmatmul.mubr.bf16.gmra.mrb[68].mxu0 %v8928_v46  ;;  %v13907_v46 = vsub.s32 1, %v9259_v38  ;;  %5203 = vmatprep.subr.bf16.mxu1 %v8383_v55 }
  0xaf   :  { %7201 = vmatprep.mubr.msk.bf16.mxu0 %vm556_vm0, %v8933_v47  ;;  %v132_v47 = vsub.s32 3, %v9259_v38  ;;  %4617 = vmatpush1.bf16.msra.mxu0 %v8387_v49 }
  0xb1   :  { %5204 = vmatpush1.bf16.msra.mxu1 %v8381_v54 }
  0xb2   :  { %5205 = vmatprep.subr.bf16.mxu1 %v8392_v45 }
  0xb5   :  { %5206 = vmatpush1.bf16.msra.mxu1 %v8390_v36 }
  0xb6   :  { %1063 = vmatmul.mubr.bf16.gmra.mrb[72].mxu0 %v8956_v52  ;;  %v9297_v52 = vrot.slane %v116_v42, %v13907_v46  ;;  %v8413_v46 = vld [vmem:[%s13900_s3 + $0x74] ss:$8 sps:$4 sm:$0xff]  }
  0xb7   :  { %7202 = vmatprep.mubr.msk.bf16.mxu0 %vm556_vm0, %v8961_v53  ;;  %v9299_v53 = vrot.slane %v116_v42, %v132_v47 }
  0xbe   :  { %1073 = vmatmul.mubr.bf16.gmra.mrb[76].mxu0 %v8984_v58 }
  0xbf   :  { %7203 = vmatprep.mubr.msk.bf16.mxu0 %vm556_vm0, %v8989_v59 }
  0xc6   :  { %1083 = vmatmul.mubr.bf16.gmra.mrb[80].mxu0 %v9015_v1 }
  0xc7   :  { %7204 = vmatprep.mubr.msk.bf16.mxu0 %vm556_vm0, %v9020_v2  ;;  %v8395_v2 = vld [vmem:[%s13900_s3 + $0x34] ss:$8 sps:$4 sm:$0xff]  }
  0xc8   :  { %4618 = vmatprep.subr.bf16.mxu0 %v8395_v2 }
  0xce   :  { %1093 = vmatmul.mubr.bf16.gmra.mrb[84].mxu0 %v9033_v4 }
  0xcf   :  { %7205 = vmatprep.mubr.msk.bf16.mxu0 %vm556_vm0, %v9038_v5 }
  0xd6   :  { %1103 = vmatmul.mubr.bf16.gmra.mrb[88].mxu0 %v9049_v6 }
  0xd7   :  { %7206 = vmatprep.mubr.msk.bf16.mxu0 %vm556_vm0, %v9054_v7 }
  0xde   :  { %1113 = vmatmul.mubr.bf16.gmra.mrb[92].mxu0 %v9065_v8 }
  0xdf   :  { %7207 = vmatprep.mubr.msk.bf16.mxu0 %vm556_vm0, %v9070_v9  ;;  %v8393_v9 = vld [vmem:[%s13900_s3 + $0x30] ss:$8 sps:$4 sm:$0xff]  }
  0xe0   :  { %4619 = vmatpush1.bf16.msra.mxu0 %v8393_v9 }
  0xe1   :  { %4620 = vmatprep.subr.bf16.mxu0 %v8398_v30 }
  0xe4   :  { %4621 = vmatpush1.bf16.msra.mxu0 %v8396_v32 }
  0xe6   :  { %1123 = vmatmul.mubr.bf16.gmra.mrb[96].mxu0 %v9081_v10 }
  0xe7   :  { %7208 = vmatprep.mubr.msk.bf16.mxu0 %vm556_vm0, %v9086_v11 }
  0xee   :  { %1133 = vmatmul.mubr.bf16.gmra.mrb[100].mxu0 %v9097_v12 }
  0xef   :  { %7209 = vmatprep.mubr.msk.bf16.mxu0 %vm556_vm0, %v9102_v13 }
  0xf6   :  { %1143 = vmatmul.mubr.bf16.gmra.mrb[104].mxu0 %v9113_v14 }
  0xf7   :  { %7210 = vmatprep.mubr.msk.bf16.mxu0 %vm556_vm0, %v9118_v15 }
  0xf9   :  { %v658_v56 = vpop.f32.mrb[0].mxu0 }
  0xfa   :  { %v851_v57 = vpop.f32.mrb[0].mxu1  ;;  %v659_v58 = vadd.f32 %v658_v56, %v9291_v50  ;;  %v660_v60 = vpop.f32.mrb[1].mxu0 }
  0xfb   :  { %v852_v59 = vadd.f32 %v851_v57, %v9293_v51  ;;  %v853_v61 = vpop.f32.mrb[1].mxu1  ;;  %v661_v62 = vadd.f32 %v660_v60, %v9297_v52  ;;  %v662_v0 = vpop.f32.mrb[2].mxu0 }
  0xfc   :  { %v854_v63 = vadd.f32 %v853_v61, %v9299_v53  ;;  %v855_v1 = vpop.f32.mrb[2].mxu1  ;;  %v1203_v3 = vmax.f32 %v659_v58, 0.0  ;;  %v9317_v5 = vadd.f32 %v662_v0, %v9291_v50  ;;  %v664_v7 = vpop.f32.mrb[3].mxu0 }
  0xfd   :  { %v1205_v4 = vmax.f32 %v852_v59, 0.0  ;;  %v9320_v6 = vadd.f32 %v855_v1, %v9293_v51  ;;  %v857_v8 = vpop.f32.mrb[3].mxu1  ;;  %v1204_v10 = vmax.f32 %v661_v62, 0.0  ;;  %v9326_v12 = vadd.f32 %v664_v7, %v9297_v52 }
  0xfe   :  { %v1206_v11 = vmax.f32 %v854_v63, 0.0  ;;  %v9329_v13 = vadd.f32 %v857_v8, %v9299_v53  ;;  %v9331_v14 = vrot.slane %v1203_v3, 1  ;;  %v1209_v24 = vmax.f32 %v9317_v5, 0.0  ;;  %1153 = vmatmul.mubr.bf16.gmra.mrb[108].mxu0 %v9129_v16 }
  0xff   :  { %v9333_v15 = vrot.slane %v1205_v4, 1  ;;  %v1211_v25 = vmax.f32 %v9320_v6, 0.0  ;;  %v9338_v26 = vrot.slane %v1204_v10, 1  ;;  %v1210_v28 = vmax.f32 %v9326_v12, 0.0  ;;  %7211 = vmatprep.mubr.msk.bf16.mxu0 %vm556_vm0, %v9134_v17 }
 0x100   :  { %14144 = vst [vmem:[#allocation3_spill] sm:$0xff] %v9331_v14  ;;  %v9340_v27 = vrot.slane %v1206_v11, 1  ;;  %v1212_v29 = vmax.f32 %v9329_v13, 0.0  ;;  %v1589_v31 = vrot.slane %v1209_v24, 1  ;;  %v8399_v13 = vld [vmem:[%s13900_s3 + $0x380] ss:$8 sps:$4 sm:$0xff]  }
 0x101   :  { %14145 = vst [vmem:[#allocation4_spill] sm:$0xff] %v9333_v15  ;;  %14146 = vst [vmem:[#allocation5_spill] sm:$0xff] %v9338_v26  ;;  %v1595_v16 = vrot.slane %v1211_v25, 1  ;;  %v9358_v33 = vrot.slane %v1210_v28, 1  ;;  %v668_v34 = vpop.f32.mrb[4].mxu0 }
 0x102   :  { %14147 = vst [vmem:[#allocation6_spill] sm:$0xff] %v9340_v27  ;;  %v9362_v17 = vrot.slane %v1212_v29, 1  ;;  %v861_v35 = vpop.f32.mrb[4].mxu1  ;;  %v1590_v37 = vsel %vm1587_vm2, %v9331_v14, %v1589_v31  ;;  %v9372_v40 = vadd.f32 %v668_v34, %v9291_v50  ;;  %v670_v42 = vpop.f32.mrb[5].mxu0 }
 0x103   :  { %v1596_v39 = vsel %vm1587_vm2, %v9333_v15, %v1595_v16  ;;  %v9375_v41 = vadd.f32 %v861_v35, %v9293_v51  ;;  %v863_v43 = vpop.f32.mrb[5].mxu1  ;;  %v9380_v47 = vmax.f32 %v1203_v3, %v1590_v37  ;;  %v1593_v49 = vsel %vm1587_vm2, %v9338_v26, %v9358_v33  ;;  %v672_v55 = vpop.f32.mrb[6].mxu0  ;;  %v8404_v3 = vld [vmem:[%s13900_s3 + $0x54] ss:$8 sps:$4 sm:$0xff]  }
 0x104   :  { %v9382_v48 = vmax.f32 %v1205_v4, %v1596_v39  ;;  %v1599_v54 = vsel %vm1587_vm2, %v9340_v27, %v9362_v17  ;;  %v865_v56 = vpop.f32.mrb[6].mxu1  ;;  %v9390_v57 = vmax.f32 %v1204_v10, %v1593_v49  ;;  %v1215_v59 = vmax.f32 %v9372_v40, 0.0  ;;  %v674_v61 = vpop.f32.mrb[7].mxu0  ;;  %v8402_v10 = vld [vmem:[%s13900_s3 + $0x50] ss:$8 sps:$4 sm:$0xff]   ;;  %4622 = vmatprep.subr.bf16.mxu0 %v8404_v3 }
 0x105   :  { %14148 = vst [vmem:[#allocation7_spill] sm:$0xff] %v9380_v47  ;;  %v9392_v58 = vmax.f32 %v1206_v11, %v1599_v54  ;;  %v1217_v60 = vmax.f32 %v9375_v41, 0.0  ;;  %v867_v62 = vpop.f32.mrb[7].mxu1  ;;  %v671_v63 = vadd.f32 %v670_v42, %v9297_v52  ;;  %v9398_v0 = vadd.f32 %v863_v43, %v9299_v53  ;;  %4623 = vmatpush1.bf16.msra.mxu0 %v8402_v10 }
 0x106   :  { %14149 = vst [vmem:[#allocation8_spill] sm:$0xff] %v9382_v48  ;;  %14150 = vst [vmem:[#allocation9_spill] sm:$0xff] %v9390_v57  ;;  %v9401_v1 = vadd.f32 %v672_v55, %v9291_v50  ;;  %v9404_v2 = vadd.f32 %v865_v56, %v9293_v51  ;;  %v1606_v7 = vrot.slane %v1215_v59, 1  ;;  %v9412_v9 = vadd.f32 %v674_v61, %v9297_v52 }
 0x107   :  { %14151 = vst [vmem:[#allocation10_spill] sm:$0xff] %v9392_v58  ;;  %v1610_v8 = vrot.slane %v1217_v60, 1  ;;  %1163 = vmatmul.mubr.bf16.gmra.mrb[112].mxu0 %v9145_v18  ;;  %v1216_v11 = vmax.f32 %v671_v63, 0.0  ;;  %v1218_v30 = vmax.f32 %v9398_v0, 0.0  ;;  %v9427_v37 = vadd.f32 %v867_v62, %v9299_v53  ;;  %v8405_v63 = vld [vmem:[%s13900_s3 + $0x60] ss:$8 sps:$4 sm:$0xff]  }
 0x108   :  { %v1221_v32 = vmax.f32 %v9401_v1, 0.0  ;;  %v1223_v34 = vmax.f32 %v9404_v2, 0.0  ;;  %7212 = vmatprep.mubr.msk.bf16.mxu0 %vm556_vm0, %v9150_v19  ;;  %v1607_v35 = vsel %vm1587_vm2, %v1589_v31, %v1606_v7  ;;  %v1222_v18 = vmax.f32 %v9412_v9, 0.0 }
 0x109   :  { %v1611_v36 = vsel %vm1587_vm2, %v1595_v16, %v1610_v8  ;;  %v9431_v39 = vmax.f32 %v1209_v24, %v1607_v35  ;;  %v1608_v19 = vrot.slane %v1216_v11, 1  ;;  %v1612_v41 = vrot.slane %v1218_v30, 1  ;;  %v678_v42 = vpop.f32.mrb[8].mxu0  ;;  %v8407_v16 = vld [vmem:[%s13900_s3 + $0x64] ss:$8 sps:$4 sm:$0xff]  }
 0x10a   :  { %v9435_v40 = vmax.f32 %v1211_v25, %v1611_v36  ;;  %v871_v31 = vpop.f32.mrb[8].mxu1  ;;  %v1618_v43 = vrot.slane %v1221_v32, 1  ;;  %v1622_v5 = vrot.slane %v1223_v34, 1  ;;  %v9446_v24 = vrot.slane %v1222_v18, 1  ;;  %v680_v25 = vpop.f32.mrb[9].mxu0  ;;  %4624 = vmatprep.subr.bf16.mxu0 %v8407_v16 }
 0x10b   :  { %14152 = vst [vmem:[#allocation11_spill] sm:$0xff] %v9431_v39  ;;  %v1224_v6 = vmax.f32 %v9427_v37, 0.0  ;;  %v873_v45 = vpop.f32.mrb[9].mxu1  ;;  %v1609_v49 = vsel %vm1587_vm2, %v9358_v33, %v1608_v19  ;;  %v1613_v54 = vsel %vm1587_vm2, %v9362_v17, %v1612_v41  ;;  %v9454_v55 = vadd.f32 %v678_v42, %v9291_v50  ;;  %v682_v61 = vpop.f32.mrb[10].mxu0  ;;  %4625 = vmatpush1.bf16.msra.mxu0 %v8405_v63  ;;  %v8410_v37 = vld [vmem:[%s13900_s3 + $0x394] ss:$8 sps:$4 sm:$0xff]  }
 0x10c   :  { %14153 = vst [vmem:[#allocation12_spill] sm:$0xff] %v9435_v40  ;;  %v9457_v56 = vadd.f32 %v871_v31, %v9293_v51  ;;  %v875_v62 = vpop.f32.mrb[10].mxu1  ;;  %v9464_v0 = vmax.f32 %v1210_v28, %v1609_v49  ;;  %v9468_v33 = vmax.f32 %v1212_v29, %v1613_v54  ;;  %v1619_v17 = vsel %vm1587_vm2, %v1606_v7, %v1618_v43  ;;  %v684_v10 = vpop.f32.mrb[11].mxu0  ;;  %v8401_v28 = vld [vmem:[%s13900_s3 + $0x384] ss:$8 sps:$4 sm:$0xff]  }
 0x10d   :  { %v1623_v3 = vsel %vm1587_vm2, %v1610_v8, %v1622_v5  ;;  %v877_v35 = vpop.f32.mrb[11].mxu1  ;;  %v9472_v36 = vmax.f32 %v1215_v59, %v1619_v17  ;;  %v1621_v31 = vsel %vm1587_vm2, %v1608_v19, %v9446_v24  ;;  %v1624_v12 = vrot.slane %v1224_v6, 1  ;;  %5207 = vmatprep.subr.bf16.mxu1 %v8401_v28  ;;  %v8411_v28 = vld [vmem:[%s13900_s3 + $0x70] ss:$8 sps:$4 sm:$0xff]   ;;  %4626 = vmatprep.subr.bf16.mxu0 %v8413_v46  ;;  %v8414_v46 = vld [vmem:[%s13900_s3 + $0x80] ss:$8 sps:$4 sm:$0xff]  }
 0x10e   :  { %14154 = vst [vmem:[#allocation13_spill] sm:$0xff] %v9464_v0  ;;  %14155 = vst [vmem:[#allocation14_spill] sm:$0xff] %v9468_v33  ;;  %v9474_v42 = vmax.f32 %v1217_v60, %v1623_v3  ;;  %v9488_v59 = vmax.f32 %v1216_v11, %v1621_v31  ;;  %v1227_v60 = vmax.f32 %v9454_v55, 0.0  ;;  %v1229_v7 = vmax.f32 %v9457_v56, 0.0  ;;  %5208 = vmatpush1.bf16.msra.mxu1 %v8399_v13 }
 0x10f   :  { %14156 = vst [vmem:[#allocation15_spill] sm:$0xff] %v9472_v36  ;;  %1173 = vmatmul.mubr.bf16.gmra.mrb[116].mxu0 %v9161_v20  ;;  %v1625_v8 = vsel %vm1587_vm2, %v1612_v41, %v1624_v12  ;;  %v9495_v19 = vadd.f32 %v680_v25, %v9297_v52  ;;  %v9498_v16 = vadd.f32 %v873_v45, %v9299_v53 }
 0x110   :  { %14157 = vst [vmem:[#allocation16_spill] sm:$0xff] %v9474_v42  ;;  %14158 = vst [vmem:[#allocation17_spill] sm:$0xff] %v9488_v59  ;;  %v9501_v49 = vadd.f32 %v682_v61, %v9291_v50  ;;  %7213 = vmatprep.mubr.msk.bf16.mxu0 %vm556_vm0, %v9166_v21  ;;  %v9505_v11 = vmax.f32 %v1218_v30, %v1625_v8  ;;  %v1630_v54 = vrot.slane %v1227_v60, 1  ;;  %v1634_v55 = vrot.slane %v1229_v7, 1 }
 0x111   :  { %v9508_v20 = vadd.f32 %v875_v62, %v9293_v51  ;;  %v1228_v41 = vmax.f32 %v9495_v19, 0.0  ;;  %v1230_v25 = vmax.f32 %v9498_v16, 0.0  ;;  %v9514_v56 = vadd.f32 %v684_v10, %v9297_v52  ;;  %v688_v61 = vpop.f32.mrb[12].mxu0  ;;  %4627 = vmatpush1.bf16.msra.mxu0 %v8411_v28  ;;  %5209 = vmatprep.subr.bf16.mxu1 %v8410_v37 }
 0x112   :  { %14159 = vst [vmem:[#allocation18_spill] sm:$0xff] %v9505_v11  ;;  %v13910_v45 = vmax.f32 %v9501_v49, 0.0  ;;  %v881_v63 = vpop.f32.mrb[12].mxu1  ;;  %v1631_v30 = vsel %vm1587_vm2, %v1618_v43, %v1630_v54  ;;  %v1635_v62 = vsel %vm1587_vm2, %v1622_v5, %v1634_v55  ;;  %v690_v3 = vpop.f32.mrb[13].mxu0  ;;  %v9553_v29 = vadd.f32 %v688_v61, %v9291_v50 }
 0x113   :  { %v13909_v17 = vmax.f32 %v9508_v20, 0.0  ;;  %v883_v31 = vpop.f32.mrb[13].mxu1  ;;  %v9526_v10 = vmax.f32 %v1221_v32, %v1631_v30  ;;  %v9530_v13 = vmax.f32 %v1223_v34, %v1635_v62  ;;  %v1632_v8 = vrot.slane %v1228_v41, 1  ;;  %v692_v5 = vpop.f32.mrb[14].mxu0 }
 0x114   :  { %v1636_v43 = vrot.slane %v1230_v25, 1  ;;  %v885_v19 = vpop.f32.mrb[14].mxu1  ;;  %v1642_v44 = vrot.slane %v13910_v45, 1  ;;  %v13911_v2 = vmax.f32 %v9514_v56, 0.0  ;;  %v9543_v32 = vadd.f32 %v877_v35, %v9299_v53  ;;  %v9545_v34 = vpop.f32.mrb[15].mxu0 }
 0x115   :  { %14160 = vst [vmem:[#allocation19_spill] sm:$0xff] %v9526_v10  ;;  %14161 = vst [vmem:[#allocation20_spill] sm:$0xff] %v9530_v13  ;;  %v1646_v1 = vrot.slane %v13909_v17, 1  ;;  %v9547_v30 = vpop.f32.mrb[15].mxu1  ;;  %v1633_v62 = vsel %vm1587_vm2, %v9446_v24, %v1632_v8  ;;  %v9556_v4 = vadd.f32 %v881_v63, %v9293_v51  ;;  %v8416_v35 = vld [vmem:[%s13900_s3 + $0x84] ss:$8 sps:$4 sm:$0xff]  }
 0x116   :  { %v1637_v21 = vsel %vm1587_vm2, %v1624_v12, %v1636_v43  ;;  %v9563_v17 = vmax.f32 %v1222_v18, %v1633_v62  ;;  %v1643_v12 = vsel %vm1587_vm2, %v1630_v54, %v1642_v44  ;;  %v1644_v9 = vrot.slane %v13911_v2, 1  ;;  %4628 = vmatprep.subr.bf16.mxu0 %v8416_v35 }
 0x117   :  { %v9567_v24 = vmax.f32 %v1224_v6, %v1637_v21  ;;  %v1647_v61 = vsel %vm1587_vm2, %v1634_v55, %v1646_v1  ;;  %1183 = vmatmul.mubr.bf16.gmra.mrb[120].mxu0 %v9177_v22  ;;  %v9575_v63 = vmax.f32 %v1227_v60, %v1643_v12  ;;  %v1236_v18 = vmax.f32 %v9543_v32, 0.0  ;;  %v8408_v22 = vld [vmem:[%s13900_s3 + $0x390] ss:$8 sps:$4 sm:$0xff]  }
 0x118   :  { %14162 = vst [vmem:[#allocation21_spill] sm:$0xff] %v9563_v17  ;;  %v9577_v45 = vmax.f32 %v1229_v7, %v1647_v61  ;;  %7214 = vmatprep.mubr.msk.bf16.mxu0 %vm556_vm0, %v9182_v23  ;;  %v1239_v60 = vmax.f32 %v9553_v29, 0.0  ;;  %v13912_v7 = vmax.f32 %v9556_v4, 0.0  ;;  %v9595_v54 = vadd.f32 %v690_v3, %v9297_v52  ;;  %5210 = vmatpush1.bf16.msra.mxu1 %v8408_v22 }
 0x119   :  { %14163 = vst [vmem:[#allocation22_spill] sm:$0xff] %v9567_v24  ;;  %14164 = vst [vmem:[#allocation23_spill] sm:$0xff] %v9575_v63  ;;  %v1645_v23 = vsel %vm1587_vm2, %v1632_v8, %v1644_v9  ;;  %v1648_v55 = vrot.slane %v1236_v18, 1  ;;  %v9599_v21 = vadd.f32 %v883_v31, %v9299_v53  ;;  %v9602_v32 = vadd.f32 %v692_v5, %v9291_v50  ;;  %v698_v28 = vpop.f32.mrb[16].mxu0 }
 0x11a   :  { %14165 = vst [vmem:[#allocation24_spill] sm:$0xff] %v9577_v45  ;;  %v891_v62 = vpop.f32.mrb[16].mxu1  ;;  %v9604_v12 = vmax.f32 %v1228_v41, %v1645_v23  ;;  %v1654_v29 = vrot.slane %v1239_v60, 1  ;;  %v1658_v3 = vrot.slane %v13912_v7, 1  ;;  %v13914_v35 = vmax.f32 %v9595_v54, 0.0  ;;  %v700_v61 = vpop.f32.mrb[17].mxu0  ;;  %4629 = vmatpush1.bf16.msra.mxu0 %v8414_v46 }
 0x11b   :  { %v893_v8 = vpop.f32.mrb[17].mxu1  ;;  %v1649_v31 = vsel %vm1587_vm2, %v1636_v43, %v1648_v55  ;;  %v9613_v2 = vadd.f32 %v885_v19, %v9293_v51  ;;  %v702_v41 = vpop.f32.mrb[18].mxu0  ;;  %v8422_v23 = vld [vmem:[%s13900_s3 + $0x94] ss:$8 sps:$4 sm:$0xff]   ;;  %v8420_v46 = vld [vmem:[%s13900_s3 + $0x90] ss:$8 sps:$4 sm:$0xff]  }
 0x11c   :  { %14166 = vst [vmem:[#allocation25_spill] sm:$0xff] %v9604_v12  ;;  %v9615_v37 = vpop.f32.mrb[18].mxu1  ;;  %v9622_v22 = vmax.f32 %v1230_v25, %v1649_v31  ;;  %v1655_v43 = vsel %vm1587_vm2, %v1642_v44, %v1654_v29  ;;  %v1659_v7 = vsel %vm1587_vm2, %v1646_v1, %v1658_v3  ;;  %v1656_v19 = vrot.slane %v13914_v35, 1  ;;  %v9628_v5 = vpop.f32.mrb[19].mxu0  ;;  %4630 = vmatprep.subr.bf16.mxu0 %v8422_v23 }
 0x11d   :  { %v9630_v6 = vpop.f32.mrb[19].mxu1  ;;  %v14168_v45 = vmax.f32 %v9501_v49, 0.0  ;;  %v14170_v25 = vmax.f32 %v9508_v20, 0.0  ;;  %v14172_v1 = vmax.f32 %v9599_v21, 0.0  ;;  %v14173_v35 = vmax.f32 %v9602_v32, 0.0 }
 0x11e   :  { %14167 = vst [vmem:[#allocation26_spill] sm:$0xff] %v9622_v22  ;;  %v1657_v11 = vsel %vm1587_vm2, %v1644_v9, %v1656_v19  ;;  %v1247_v49 = vmax.f32 %v9613_v2, 0.0  ;;  %v8724_v20 = vld [vmem:[%s13899_s0 + $0xf0] ss:$8 sps:$4 sm:$0xff]   ;;  %v9666_v2 = vadd.f32 %v9547_v30, %v9299_v53  ;;  %4631 = vmatpush1.bf16.msra.mxu0 %v8420_v46  ;;  %v9681_v30 = vadd.f32 %v698_v28, %v9291_v50 }
 0x11f   :  { %v9637_v16 = vmax.f32 %v14168_v45, %v1655_v43  ;;  %v9641_v44 = vmax.f32 %v14170_v25, %v1659_v7  ;;  %v1660_v31 = vrot.slane %v14172_v1, 1  ;;  %v1666_v24 = vrot.slane %v14173_v35, 1  ;;  %1193 = vmatmul.mubr.bf16.gmra.mrb[124].mxu0 %v8724_v20 }
 0x120   :  { %v9653_v45 = vadd.f32 %v9545_v34, %v9297_v52  ;;  %v14174_v7 = vmax.f32 %v9514_v56, 0.0  ;;  %v8425_v34 = vld [vmem:[%s13900_s3 + $0xa4] ss:$8 sps:$4 sm:$0xff]   ;;  %v1670_v56 = vrot.slane %v1247_v49, 1  ;;  %v9684_v46 = vadd.f32 %v891_v62, %v9293_v51 }
 0x121   :  { %14169 = vst [vmem:[#allocation27_spill] sm:$0xff] %v9637_v16  ;;  %14171 = vst [vmem:[#allocation28_spill] sm:$0xff] %v9641_v44  ;;  %v1661_v23 = vsel %vm1587_vm2, %v1648_v55, %v1660_v31  ;;  %v1667_v43 = vsel %vm1587_vm2, %v1654_v29, %v1666_v24  ;;  %v8423_v55 = vld [vmem:[%s13900_s3 + $0xa0] ss:$8 sps:$4 sm:$0xff]   ;;  %v1248_v29 = vmax.f32 %v9666_v2, 0.0  ;;  %4632 = vmatprep.subr.bf16.mxu0 %v8425_v34  ;;  %v14178_v2 = vmax.f32 %v9556_v4, 0.0 }
 0x122   :  { %v9660_v35 = vmax.f32 %v14174_v7, %v1657_v11  ;;  %v9671_v9 = vmax.f32 %v1236_v18, %v1661_v23  ;;  %v9673_v25 = vmax.f32 %v1239_v60, %v1667_v43  ;;  %v1246_v11 = vmax.f32 %v9653_v45, 0.0  ;;  %v708_v60 = vpop.f32.mrb[20].mxu0  ;;  %v901_v1 = vpop.f32.mrb[20].mxu1  ;;  %v8417_v45 = vld [vmem:[%s13900_s3 + $0x3a0] ss:$8 sps:$4 sm:$0xff]   ;;  %4633 = vmatpush1.bf16.msra.mxu0 %v8423_v55 }
 0x123   :  { %v9687_v18 = vadd.f32 %v700_v61, %v9297_v52  ;;  %v1671_v7 = vsel %vm1587_vm2, %v1658_v3, %v1670_v56  ;;  %v9696_v23 = vadd.f32 %v893_v8, %v9299_v53  ;;  %v710_v62 = vpop.f32.mrb[21].mxu0  ;;  %v9698_v43 = vpop.f32.mrb[21].mxu1  ;;  %v8419_v61 = vld [vmem:[%s13900_s3 + $0x3a4] ss:$8 sps:$4 sm:$0xff]   ;;  %v1672_v34 = vrot.slane %v1248_v29, 1 }
 0x124   :  { %14175 = vst [vmem:[#allocation29_spill] sm:$0xff] %v9660_v35  ;;  %14176 = vst [vmem:[#allocation30_spill] sm:$0xff] %v9671_v9  ;;  %v1668_v28 = vrot.slane %v1246_v11, 1  ;;  %v9705_v10 = vmax.f32 %v14178_v2, %v1671_v7  ;;  %v1251_v20 = vmax.f32 %v9681_v30, 0.0  ;;  %v9709_v9 = vpop.f32.mrb[22].mxu0  ;;  %v9711_v8 = vpop.f32.mrb[22].mxu1  ;;  %v9717_v4 = vadd.f32 %v702_v41, %v9291_v50  ;;  %5211 = vmatprep.subr.bf16.mxu1 %v8419_v61 }
 0x125   :  { %14177 = vst [vmem:[#allocation31_spill] sm:$0xff] %v9673_v25  ;;  %v9719_v7 = vpop.f32.mrb[23].mxu0  ;;  %v9721_v2 = vpop.f32.mrb[23].mxu1  ;;  %v14180_v30 = vmax.f32 %v9595_v54, 0.0  ;;  %v1673_v55 = vsel %vm1587_vm2, %v1660_v31, %v1672_v34  ;;  %5212 = vmatpush1.bf16.msra.mxu1 %v8417_v45  ;;  %v14183_v63 = vmax.f32 %v9599_v21, 0.0  ;;  %v14185_v44 = vmax.f32 %v9687_v18, 0.0 }
 0x126   :  { %14179 = vst [vmem:[#allocation32_spill] sm:$0xff] %v9705_v10  ;;  %v1669_v16 = vsel %vm1587_vm2, %v1656_v19, %v1668_v28  ;;  %v1678_v10 = vrot.slane %v1251_v20, 1  ;;  %v14182_v19 = vmax.f32 %v9684_v46, 0.0  ;;  %v14186_v61 = vmax.f32 %v9696_v23, 0.0 }
 0x127   :  { %v9725_v3 = vmax.f32 %v14180_v30, %v1669_v16  ;;  %v9732_v41 = vmax.f32 %v14183_v63, %v1673_v55  ;;  %v1680_v35 = vrot.slane %v14185_v44, 1  ;;  %v13926_v54 = vmax.f32 %v9717_v4, 0.0  ;;  %v8431_v16 = vld [vmem:[%s13900_s3 + $0xb4] ss:$8 sps:$4 sm:$0xff]   ;;  %v8429_v44 = vld [vmem:[%s13900_s3 + $0xb0] ss:$8 sps:$4 sm:$0xff]  }
 0x128   :  { %v1682_v22 = vrot.slane %v14182_v19, 1  ;;  %v1684_v36 = vrot.slane %v14186_v61, 1  ;;  %v1679_v31 = vsel %vm1587_vm2, %v1666_v24, %v1678_v10  ;;  %v9746_v63 = vadd.f32 %v9615_v37, %v9293_v51  ;;  %4634 = vmatprep.subr.bf16.mxu0 %v8431_v16 }
 0x129   :  { %14181 = vst [vmem:[#allocation33_spill] sm:$0xff] %v9725_v3  ;;  %14184 = vst [vmem:[#allocation34_spill] sm:$0xff] %v9732_v41  ;;  %v9750_v21 = vadd.f32 %v9628_v5, %v9297_v52  ;;  %v14187_v55 = vmax.f32 %v9602_v32, 0.0  ;;  %v1681_v37 = vsel %vm1587_vm2, %v1668_v28, %v1680_v35  ;;  %v1690_v61 = vrot.slane %v13926_v54, 1  ;;  %v9770_v12 = vpop.f32.mrb[24].mxu0  ;;  %4635 = vmatpush1.bf16.msra.mxu0 %v8429_v44 }
 0x12a   :  { %v1683_v45 = vsel %vm1587_vm2, %v1670_v56, %v1682_v22  ;;  %v9764_v19 = vmax.f32 %v1246_v11, %v1681_v37  ;;  %v1685_v5 = vsel %vm1587_vm2, %v1672_v34, %v1684_v36  ;;  %v1259_v3 = vmax.f32 %v9746_v63, 0.0  ;;  %v9772_v30 = vpop.f32.mrb[24].mxu1  ;;  %v9784_v34 = vpop.f32.mrb[25].mxu0  ;;  %v8426_v44 = vld [vmem:[%s13900_s3 + $0x3b0] ss:$8 sps:$4 sm:$0xff]  }
 0x12b   :  { %v9759_v24 = vmax.f32 %v14187_v55, %v1679_v31  ;;  %v9761_v56 = vmax.f32 %v1247_v49, %v1683_v45  ;;  %v9774_v32 = vmax.f32 %v1248_v29, %v1685_v5  ;;  %v1258_v49 = vmax.f32 %v9750_v21, 0.0  ;;  %v9786_v16 = vpop.f32.mrb[25].mxu1  ;;  %v8434_v31 = vld [vmem:[%s13900_s3 + $0xc4] ss:$8 sps:$4 sm:$0xff]   ;;  %v9798_v21 = vpop.f32.mrb[26].mxu0 }
 0x12c   :  { %14190 = vst [vmem:[#allocation37_spill] sm:$0xff] %v9764_v19  ;;  %v9779_v11 = vadd.f32 %v9630_v6, %v9299_v53  ;;  %v9782_v28 = vadd.f32 %v708_v60, %v9291_v50  ;;  %v1691_v29 = vsel %vm1587_vm2, %v1678_v10, %v1690_v61  ;;  %v1694_v45 = vrot.slane %v1259_v3, 1  ;;  %v9800_v60 = vpop.f32.mrb[26].mxu1  ;;  %v9810_v5 = vpop.f32.mrb[27].mxu0  ;;  %v8428_v54 = vld [vmem:[%s13900_s3 + $0x3b4] ss:$8 sps:$4 sm:$0xff]   ;;  %4636 = vmatprep.subr.bf16.mxu0 %v8434_v31 }
 0x12d   :  { %14188 = vst [vmem:[#allocation35_spill] sm:$0xff] %v9759_v24  ;;  %14189 = vst [vmem:[#allocation36_spill] sm:$0xff] %v9761_v56  ;;  %v9793_v63 = vadd.f32 %v901_v1, %v9293_v51  ;;  %v9796_v6 = vadd.f32 %v710_v62, %v9297_v52  ;;  %v9807_v37 = vmax.f32 %v1251_v20, %v1691_v29  ;;  %v1692_v10 = vrot.slane %v1258_v49, 1  ;;  %v9812_v62 = vpop.f32.mrb[27].mxu1  ;;  %v8440_v31 = vld [vmem:[%s13900_s3 + $0xd4] ss:$8 sps:$4 sm:$0xff]  }
 0x12e   :  { %14191 = vst [vmem:[#allocation38_spill] sm:$0xff] %v9774_v32  ;;  %v1260_v1 = vmax.f32 %v9779_v11, 0.0  ;;  %v1695_v41 = vsel %vm1587_vm2, %v1682_v22, %v1694_v45  ;;  %v13933_v25 = vmax.f32 %v9782_v28, 0.0  ;;  %v8432_v11 = vld [vmem:[%s13900_s3 + $0xc0] ss:$8 sps:$4 sm:$0xff]   ;;  %v14193_v29 = vmax.f32 %v9684_v46, 0.0  ;;  %5213 = vmatprep.subr.bf16.mxu1 %v8428_v54 }
 0x12f   :  { %14192 = vst [vmem:[#allocation39_spill] sm:$0xff] %v9807_v37  ;;  %v1693_v24 = vsel %vm1587_vm2, %v1680_v35, %v1692_v10  ;;  %v9831_v22 = vadd.f32 %v9698_v43, %v9299_v53  ;;  %v14195_v20 = vmax.f32 %v9687_v18, 0.0  ;;  %5214 = vmatpush1.bf16.msra.mxu1 %v8426_v44  ;;  %4637 = vmatpush1.bf16.msra.mxu0 %v8432_v11  ;;  %v8438_v43 = vld [vmem:[%s13900_s3 + $0xd0] ss:$8 sps:$4 sm:$0xff]   ;;  %v14199_v44 = vmax.f32 %v9696_v23, 0.0 }
 0x130   :  { %v9826_v32 = vmax.f32 %v14193_v29, %v1695_v41  ;;  %v1696_v56 = vrot.slane %v1260_v1, 1  ;;  %v1702_v46 = vrot.slane %v13933_v25, 1  ;;  %v14197_v41 = vmax.f32 %v9793_v63, 0.0  ;;  %4638 = vmatprep.subr.bf16.mxu0 %v8440_v31  ;;  %v8437_v23 = vld [vmem:[%s13900_s3 + $0x3c4] ss:$8 sps:$4 sm:$0xff]  }
 0x131   :  { %v9838_v55 = vmax.f32 %v14195_v20, %v1693_v24  ;;  %v14198_v29 = vmax.f32 %v9796_v6, 0.0  ;;  %v13934_v54 = vmax.f32 %v9831_v22, 0.0  ;;  %v9855_v24 = vadd.f32 %v9709_v9, %v9291_v50  ;;  %v9869_v25 = vpop.f32.mrb[28].mxu0  ;;  %v8441_v19 = vld [vmem:[%s13900_s3 + $0xe0] ss:$8 sps:$4 sm:$0xff]   ;;  %5215 = vmatprep.subr.bf16.mxu1 %v8437_v23 }
 0x132   :  { %14194 = vst [vmem:[#allocation40_spill] sm:$0xff] %v9826_v32  ;;  %v1706_v35 = vrot.slane %v14197_v41, 1  ;;  %v1697_v18 = vsel %vm1587_vm2, %v1684_v36, %v1696_v56  ;;  %v9859_v20 = vadd.f32 %v9711_v8, %v9293_v51  ;;  %v1703_v41 = vsel %vm1587_vm2, %v1690_v61, %v1702_v46  ;;  %v9871_v9 = vpop.f32.mrb[28].mxu1  ;;  %v8435_v8 = vld [vmem:[%s13900_s3 + $0x3c0] ss:$8 sps:$4 sm:$0xff]  }
 0x133   :  { %14196 = vst [vmem:[#allocation41_spill] sm:$0xff] %v9838_v55  ;;  %v9846_v32 = vrot.slane %v14198_v29, 1  ;;  %v9863_v11 = vmax.f32 %v14199_v44, %v1697_v18  ;;  %v14201_v31 = vmax.f32 %v9717_v4, 0.0  ;;  %v9889_v44 = vpop.f32.mrb[29].mxu0  ;;  %v9891_v55 = vpop.f32.mrb[29].mxu1  ;;  %4639 = vmatpush1.bf16.msra.mxu0 %v8438_v43  ;;  %5216 = vmatpush1.bf16.msra.mxu1 %v8435_v8  ;;  %v14208_v8 = vmax.f32 %v9793_v63, 0.0 }
 0x134   :  { %v1707_v29 = vsel %vm1587_vm2, %v1694_v45, %v1706_v35  ;;  %v14215_v13 = vmax.f32 %v9831_v22, 0.0 }
 0x135   :  { %14200 = vst [vmem:[#allocation42_spill] sm:$0xff] %v9863_v11  ;;  %v1705_v36 = vsel %vm1587_vm2, %v1692_v10, %v9846_v32  ;;  %v9881_v61 = vmax.f32 %v14201_v31, %v1703_v41  ;;  %v9883_v45 = vmax.f32 %v1259_v3, %v1707_v29  ;;  %v1708_v10 = vrot.slane %v13934_v54, 1  ;;  %v9904_v29 = vpop.f32.mrb[30].mxu0  ;;  %v8443_v31 = vld [vmem:[%s13900_s3 + $0xe4] ss:$8 sps:$4 sm:$0xff]  }
 0x136   :  { %v9885_v18 = vmax.f32 %v1258_v49, %v1705_v36  ;;  %v1269_v41 = vmax.f32 %v9855_v24, 0.0  ;;  %v1271_v3 = vmax.f32 %v9859_v20, 0.0  ;;  %v9902_v49 = vadd.f32 %v9719_v7, %v9297_v52  ;;  %v9906_v36 = vpop.f32.mrb[30].mxu1  ;;  %v9924_v23 = vpop.f32.mrb[31].mxu0  ;;  %4640 = vmatprep.subr.bf16.mxu0 %v8443_v31 }
 0x137   :  { %14202 = vst [vmem:[#allocation43_spill] sm:$0xff] %v9881_v61  ;;  %14203 = vst [vmem:[#allocation44_spill] sm:$0xff] %v9883_v45  ;;  %v1709_v4 = vsel %vm1587_vm2, %v1696_v56, %v1708_v10  ;;  %v9914_v24 = vadd.f32 %v9721_v2, %v9299_v53  ;;  %v9918_v7 = vadd.f32 %v9770_v12, %v9291_v50  ;;  %v9926_v43 = vpop.f32.mrb[31].mxu1  ;;  %4641 = vmatpush1.bf16.msra.mxu0 %v8441_v19  ;;  %v8444_v45 = vld [vmem:[%s13900_s3 + $0x3d0] ss:$8 sps:$4 sm:$0xff]  }
 0x138   :  { %14204 = vst [vmem:[#allocation45_spill] sm:$0xff] %v9885_v18  ;;  %v9922_v20 = vadd.f32 %v9772_v30, %v9293_v51  ;;  %v9928_v54 = vmax.f32 %v1260_v1, %v1709_v4  ;;  %v1714_v56 = vrot.slane %v1269_v41, 1  ;;  %v1718_v11 = vrot.slane %v1271_v3, 1  ;;  %v8449_v1 = vld [vmem:[%s13900_s3 + $0xf4] ss:$8 sps:$4 sm:$0xff]  }
 0x139   :  { %v1270_v2 = vmax.f32 %v9902_v49, 0.0  ;;  %v9936_v30 = vadd.f32 %v9784_v34, %v9297_v52  ;;  %v8446_v34 = vld [vmem:[%s13900_s3 + $0x3d4] ss:$8 sps:$4 sm:$0xff]   ;;  %v14206_v12 = vmax.f32 %v9782_v28, 0.0  ;;  %v14211_v19 = vmax.f32 %v9918_v7, 0.0  ;;  %4642 = vmatprep.subr.bf16.mxu0 %v8449_v1 }
 0x13a   :  { %14205 = vst [vmem:[#allocation46_spill] sm:$0xff] %v9928_v54  ;;  %v1715_v4 = vsel %vm1587_vm2, %v1702_v46, %v1714_v56  ;;  %v1719_v49 = vsel %vm1587_vm2, %v1706_v35, %v1718_v11  ;;  %v14210_v46 = vmax.f32 %v9914_v24, 0.0  ;;  %v8447_v18 = vld [vmem:[%s13900_s3 + $0xf0] ss:$8 sps:$4 sm:$0xff]   ;;  %5217 = vmatprep.subr.bf16.mxu1 %v8446_v34 }
 0x13b   :  { %v1716_v31 = vrot.slane %v1270_v2, 1  ;;  %v9953_v37 = vmax.f32 %v14206_v12, %v1715_v4  ;;  %v9957_v54 = vmax.f32 %v14208_v8, %v1719_v49  ;;  %v1726_v61 = vrot.slane %v14211_v19, 1  ;;  %v9975_v49 = vpop.f32.mrb[32].mxu0  ;;  %5218 = vmatpush1.bf16.msra.mxu1 %v8444_v45  ;;  %4643 = vmatpush1.bf16.msra.mxu0 %v8447_v18 }
 0x13c   :  { %v1720_v35 = vrot.slane %v14210_v46, 1  ;;  %v14212_v12 = vmax.f32 %v9922_v20, 0.0  ;;  %v9973_v8 = vadd.f32 %v9786_v16, %v9299_v53  ;;  %v9977_v46 = vpop.f32.mrb[32].mxu1  ;;  %v14213_v19 = vmax.f32 %v9796_v6, 0.0  ;;  %v9989_v63 = vpop.f32.mrb[33].mxu0 }
 0x13d   :  { %14207 = vst [vmem:[#allocation47_spill] sm:$0xff] %v9953_v37  ;;  %14209 = vst [vmem:[#allocation48_spill] sm:$0xff] %v9957_v54  ;;  %v1717_v28 = vsel %vm1587_vm2, %v9846_v32, %v1716_v31  ;;  %v1727_v54 = vsel %vm1587_vm2, %v1714_v56, %v1726_v61  ;;  %v9991_v16 = vpop.f32.mrb[33].mxu1  ;;  %v725_v18 = vadd.f32 %v9810_v5, %v9297_v52 }
 0x13e   :  { %v1730_v4 = vrot.slane %v14212_v12, 1  ;;  %v9981_v1 = vmax.f32 %v14213_v19, %v1717_v28  ;;  %v1721_v32 = vsel %vm1587_vm2, %v1708_v10, %v1720_v35  ;;  %v9987_v12 = vadd.f32 %v9798_v21, %v9291_v50  ;;  %v10002_v19 = vpop.f32.mrb[34].mxu0  ;;  %v10004_v21 = vpop.f32.mrb[34].mxu1 }
 0x13f   :  { %v9995_v34 = vmax.f32 %v14215_v13, %v1721_v32  ;;  %v9997_v6 = vmax.f32 %v1269_v41, %v1727_v54  ;;  %v14218_v10 = vmax.f32 %v9936_v30, 0.0  ;;  %v1278_v45 = vmax.f32 %v9973_v8, 0.0  ;;  %v10012_v54 = vpop.f32.mrb[35].mxu0  ;;  %v8452_v8 = vld [vmem:[%s13900_s3 + $0x3e4] ss:$8 sps:$4 sm:$0xff]  }
 0x140   :  { %14214 = vst [vmem:[#allocation49_spill] sm:$0xff] %v9981_v1  ;;  %v1731_v28 = vsel %vm1587_vm2, %v1718_v11, %v1730_v4  ;;  %v1281_v22 = vmax.f32 %v9987_v12, 0.0  ;;  %v916_v13 = vadd.f32 %v9800_v60, %v9293_v51  ;;  %v10014_v11 = vpop.f32.mrb[35].mxu1  ;;  %v8450_v60 = vld [vmem:[%s13900_s3 + $0x3e0] ss:$8 sps:$4 sm:$0xff]   ;;  %v1282_v41 = vmax.f32 %v725_v18, 0.0  ;;  %5219 = vmatprep.subr.bf16.mxu1 %v8452_v8 }
 0x141   :  { %14216 = vst [vmem:[#allocation50_spill] sm:$0xff] %v9995_v34  ;;  %14217 = vst [vmem:[#allocation51_spill] sm:$0xff] %v9997_v6  ;;  %v1728_v56 = vrot.slane %v14218_v10, 1  ;;  %v10006_v1 = vmax.f32 %v1271_v3, %v1731_v28  ;;  %v10023_v3 = vadd.f32 %v9812_v62, %v9299_v53  ;;  %v1732_v28 = vrot.slane %v1278_v45, 1  ;;  %5220 = vmatpush1.bf16.msra.mxu1 %v8450_v60 }
 0x142   :  { %v1738_v10 = vrot.slane %v1281_v22, 1  ;;  %v10036_v62 = vadd.f32 %v9869_v25, %v9291_v50  ;;  %v10040_v34 = vadd.f32 %v9871_v9, %v9293_v51  ;;  %v8453_v25 = vld [vmem:[%s13900_s3 + $0x3f0] ss:$8 sps:$4 sm:$0xff]   ;;  %v8455_v9 = vld [vmem:[%s13900_s3 + $0x3f4] ss:$8 sps:$4 sm:$0xff]   ;;  %v14221_v18 = vmax.f32 %v9914_v24, 0.0 }
 0x143   :  { %14219 = vst [vmem:[#allocation52_spill] sm:$0xff] %v10006_v1  ;;  %v1729_v32 = vsel %vm1587_vm2, %v1716_v31, %v1728_v56  ;;  %v1283_v31 = vmax.f32 %v916_v13, 0.0  ;;  %v1733_v37 = vsel %vm1587_vm2, %v1720_v35, %v1732_v28  ;;  %v10046_v13 = vadd.f32 %v9889_v44, %v9297_v52  ;;  %v10064_v1 = vpop.f32.mrb[36].mxu0  ;;  %5221 = vmatprep.subr.bf16.mxu1 %v8455_v9 }
 0x144   :  { %v10031_v12 = vmax.f32 %v1270_v2, %v1729_v32  ;;  %v1739_v2 = vsel %vm1587_vm2, %v1726_v61, %v1738_v10  ;;  %v10056_v8 = vmax.f32 %v14221_v18, %v1733_v37  ;;  %v14223_v61 = vmax.f32 %v9918_v7, 0.0  ;;  %v10072_v18 = vpop.f32.mrb[37].mxu0 }
 0x145   :  { %v1742_v32 = vrot.slane %v1283_v31, 1  ;;  %v1740_v5 = vrot.slane %v1282_v41, 1  ;;  %v14225_v44 = vmax.f32 %v10023_v3, 0.0  ;;  %v1287_v33 = vmax.f32 %v10036_v62, 0.0  ;;  %v10084_v39 = vpop.f32.mrb[38].mxu0  ;;  %5222 = vmatpush1.bf16.msra.mxu1 %v8453_v25 }
 0x146   :  { %14220 = vst [vmem:[#allocation53_spill] sm:$0xff] %v10031_v12  ;;  %14222 = vst [vmem:[#allocation54_spill] sm:$0xff] %v10056_v8  ;;  %v10060_v35 = vmax.f32 %v14223_v61, %v1739_v2  ;;  %v10066_v12 = vpop.f32.mrb[36].mxu1  ;;  %v1289_v24 = vmax.f32 %v10040_v34, 0.0  ;;  %v1288_v37 = vmax.f32 %v10046_v13, 0.0  ;;  %v14226_v61 = vmax.f32 %v9922_v20, 0.0 }
 0x147   :  { %v1744_v60 = vrot.slane %v14225_v44, 1  ;;  %v1743_v17 = vsel %vm1587_vm2, %v1730_v4, %v1742_v32  ;;  %v10074_v7 = vpop.f32.mrb[37].mxu1  ;;  %v1741_v4 = vsel %vm1587_vm2, %v1728_v56, %v1740_v5  ;;  %v14228_v13 = vmax.f32 %v9936_v30, 0.0  ;;  %v10094_v8 = vpop.f32.mrb[39].mxu0 }
 0x148   :  { %14224 = vst [vmem:[#allocation55_spill] sm:$0xff] %v10060_v35  ;;  %v10080_v44 = vmax.f32 %v14226_v61, %v1743_v17  ;;  %v10086_v34 = vpop.f32.mrb[38].mxu1  ;;  %v1750_v47 = vrot.slane %v1287_v33, 1  ;;  %v1754_v2 = vrot.slane %v1289_v24, 1  ;;  %v1752_v20 = vrot.slane %v1288_v37, 1 }
 0x149   :  { %v1745_v62 = vsel %vm1587_vm2, %v1732_v28, %v1744_v60  ;;  %v10090_v58 = vmax.f32 %v14228_v13, %v1741_v4  ;;  %v10096_v17 = vpop.f32.mrb[39].mxu1  ;;  %v924_v56 = vadd.f32 %v9891_v55, %v9299_v53  ;;  %v733_v28 = vadd.f32 %v9904_v29, %v9291_v50 }
 0x14a   :  { %14227 = vst [vmem:[#allocation56_spill] sm:$0xff] %v10080_v44  ;;  %v10092_v9 = vmax.f32 %v1278_v45, %v1745_v62  ;;  %v926_v30 = vadd.f32 %v9906_v36, %v9293_v51  ;;  %v1751_v61 = vsel %vm1587_vm2, %v1738_v10, %v1750_v47  ;;  %v1755_v4 = vsel %vm1587_vm2, %v1742_v32, %v1754_v2 }
 0x14b   :  { %14229 = vst [vmem:[#allocation57_spill] sm:$0xff] %v10090_v58  ;;  %v10110_v25 = vadd.f32 %v9924_v23, %v9297_v52  ;;  %v10112_v62 = vmax.f32 %v1281_v22, %v1751_v61  ;;  %v10114_v55 = vmax.f32 %v1283_v31, %v1755_v4  ;;  %v1753_v29 = vsel %vm1587_vm2, %v1740_v5, %v1752_v20  ;;  %v10132_v31 = vpop.f32.mrb[40].mxu0 }
 0x14c   :  { %14230 = vst [vmem:[#allocation58_spill] sm:$0xff] %v10092_v9  ;;  %v1290_v13 = vmax.f32 %v924_v56, 0.0  ;;  %v10117_v44 = vmax.f32 %v1282_v41, %v1753_v29  ;;  %v1293_v36 = vmax.f32 %v733_v28, 0.0  ;;  %v1295_v6 = vmax.f32 %v926_v30, 0.0  ;;  %v10134_v41 = vpop.f32.mrb[40].mxu1 }
 0x14d   :  { %14231 = vst [vmem:[#allocation59_spill] sm:$0xff] %v10112_v62  ;;  %14232 = vst [vmem:[#allocation60_spill] sm:$0xff] %v10114_v55  ;;  %v1294_v45 = vmax.f32 %v10110_v25, 0.0  ;;  %v10122_v32 = vadd.f32 %v9926_v43, %v9299_v53  ;;  %v10126_v23 = vadd.f32 %v9975_v49, %v9291_v50  ;;  %v10130_v22 = vadd.f32 %v9977_v46, %v9293_v51  ;;  %v10140_v43 = vpop.f32.mrb[41].mxu0  ;;  %v10142_v61 = vpop.f32.mrb[41].mxu1 }
 0x14e   :  { %14233 = vst [vmem:[#allocation61_spill] sm:$0xff] %v10117_v44  ;;  %v1756_v10 = vrot.slane %v1290_v13, 1  ;;  %v1762_v5 = vrot.slane %v1293_v36, 1  ;;  %v1766_v56 = vrot.slane %v1295_v6, 1  ;;  %v10138_v30 = vadd.f32 %v9989_v63, %v9297_v52  ;;  %v10148_v29 = vpop.f32.mrb[42].mxu0  ;;  %v10150_v9 = vpop.f32.mrb[42].mxu1 }
 0x14f   :  { %v1764_v28 = vrot.slane %v1294_v45, 1  ;;  %v1296_v46 = vmax.f32 %v10122_v32, 0.0  ;;  %v1299_v4 = vmax.f32 %v10126_v23, 0.0  ;;  %v1301_v25 = vmax.f32 %v10130_v22, 0.0  ;;  %v10159_v58 = vpop.f32.mrb[43].mxu0  ;;  %v10161_v32 = vpop.f32.mrb[43].mxu1 }
 0x150   :  { %v1757_v49 = vsel %vm1587_vm2, %v1744_v60, %v1756_v10  ;;  %v14234_v35 = vmax.f32 %v10023_v3, 0.0  ;;  %v1763_v55 = vsel %vm1587_vm2, %v1750_v47, %v1762_v5  ;;  %v1767_v44 = vsel %vm1587_vm2, %v1754_v2, %v1766_v56  ;;  %v8458_v23 = vld [vmem:[%s13900_s3 + $0x404] ss:$8 sps:$4 sm:$0xff]  }
 0x151   :  { %v1765_v60 = vsel %vm1587_vm2, %v1752_v20, %v1764_v28  ;;  %v10166_v22 = vmax.f32 %v1287_v33, %v1763_v55  ;;  %v10168_v42 = vmax.f32 %v1289_v24, %v1767_v44  ;;  %v1774_v2 = vrot.slane %v1299_v4, 1  ;;  %5384 = vmatprep.subr.bf16.mxu1 %v8458_v23 }
 0x152   :  { %v10154_v63 = vmax.f32 %v14234_v35, %v1757_v49  ;;  %v10170_v3 = vmax.f32 %v1288_v37, %v1765_v60  ;;  %v1768_v35 = vrot.slane %v1296_v46, 1  ;;  %v1778_v20 = vrot.slane %v1301_v25, 1  ;;  %v10197_v47 = vpop.f32.mrb[44].mxu1 }
 0x153   :  { %14236 = vst [vmem:[#allocation63_spill] sm:$0xff] %v10166_v22  ;;  %14237 = vst [vmem:[#allocation64_spill] sm:$0xff] %v10168_v42  ;;  %v1300_v49 = vmax.f32 %v10138_v30, 0.0  ;;  %v934_v48 = vadd.f32 %v9991_v16, %v9299_v53  ;;  %v10180_v33 = vadd.f32 %v10002_v19, %v9291_v50  ;;  %v10184_v24 = vadd.f32 %v10004_v21, %v9293_v51  ;;  %v10195_v19 = vpop.f32.mrb[44].mxu0 }
 0x154   :  { %14235 = vst [vmem:[#allocation62_spill] sm:$0xff] %v10154_v63  ;;  %14238 = vst [vmem:[#allocation65_spill] sm:$0xff] %v10170_v3  ;;  %v1769_v40 = vsel %vm1587_vm2, %v1756_v10, %v1768_v35  ;;  %v1775_v44 = vsel %vm1587_vm2, %v1762_v5, %v1774_v2  ;;  %v1779_v55 = vsel %vm1587_vm2, %v1766_v56, %v1778_v20  ;;  %v10205_v5 = vpop.f32.mrb[45].mxu0 }
 0x155   :  { %v10186_v37 = vmax.f32 %v1290_v13, %v1769_v40  ;;  %v1776_v30 = vrot.slane %v1300_v49, 1  ;;  %v10190_v60 = vmax.f32 %v1293_v36, %v1775_v44  ;;  %v10192_v10 = vmax.f32 %v1295_v6, %v1779_v55  ;;  %v10207_v6 = vpop.f32.mrb[45].mxu1  ;;  %v10213_v55 = vpop.f32.mrb[46].mxu0 }
 0x156   :  { %v1302_v16 = vmax.f32 %v934_v48, 0.0  ;;  %v1305_v23 = vmax.f32 %v10180_v33, 0.0  ;;  %v1307_v13 = vmax.f32 %v10184_v24, 0.0  ;;  %v745_v36 = vadd.f32 %v10012_v54, %v9297_v52  ;;  %v10215_v40 = vpop.f32.mrb[46].mxu1 }
 0x157   :  { %14239 = vst [vmem:[#allocation66_spill] sm:$0xff] %v10186_v37  ;;  %14240 = vst [vmem:[#allocation67_spill] sm:$0xff] %v10190_v60  ;;  %v1777_v21 = vsel %vm1587_vm2, %v1764_v28, %v1776_v30  ;;  %v938_v44 = vadd.f32 %v10014_v11, %v9299_v53  ;;  %v10219_v54 = vadd.f32 %v10064_v1, %v9291_v50 }
 0x158   :  { %14241 = vst [vmem:[#allocation68_spill] sm:$0xff] %v10192_v10  ;;  %v10209_v48 = vmax.f32 %v1294_v45, %v1777_v21  ;;  %v1780_v56 = vrot.slane %v1302_v16, 1  ;;  %v1786_v33 = vrot.slane %v1305_v23, 1  ;;  %v1790_v28 = vrot.slane %v1307_v13, 1  ;;  %v10225_v45 = vpop.f32.mrb[47].mxu0  ;;  %v10227_v21 = vpop.f32.mrb[47].mxu1 }
 0x159   :  { %v1306_v24 = vmax.f32 %v745_v36, 0.0  ;;  %v10223_v37 = vadd.f32 %v10066_v12, %v9293_v51  ;;  %v1308_v10 = vmax.f32 %v938_v44, 0.0  ;;  %v10233_v36 = vadd.f32 %v10072_v18, %v9297_v52 }
 0x15a   :  { %14242 = vst [vmem:[#allocation69_spill] sm:$0xff] %v10209_v48  ;;  %v1781_v11 = vsel %vm1587_vm2, %v1768_v35, %v1780_v56  ;;  %v1787_v22 = vsel %vm1587_vm2, %v1774_v2, %v1786_v33  ;;  %v1791_v12 = vsel %vm1587_vm2, %v1778_v20, %v1790_v28  ;;  %v1311_v3 = vmax.f32 %v10219_v54, 0.0  ;;  %v10255_v54 = vpop.f32.mrb[48].mxu0 }
 0x15b   :  { %v10235_v48 = vmax.f32 %v1296_v46, %v1781_v11  ;;  %v10237_v1 = vmax.f32 %v1299_v4, %v1787_v22  ;;  %v1788_v63 = vrot.slane %v1306_v24, 1  ;;  %v10240_v62 = vmax.f32 %v1301_v25, %v1791_v12 }
 0x15c   :  { %v1792_v42 = vrot.slane %v1308_v10, 1  ;;  %v1313_v35 = vmax.f32 %v10223_v37, 0.0  ;;  %v1312_v46 = vmax.f32 %v10233_v36, 0.0  ;;  %v10250_v4 = vadd.f32 %v10074_v7, %v9299_v53  ;;  %v10257_v37 = vpop.f32.mrb[48].mxu1  ;;  %v10264_v7 = vpop.f32.mrb[49].mxu0 }
 0x15d   :  { %14243 = vst [vmem:[#allocation70_spill] sm:$0xff] %v10235_v48  ;;  %14244 = vst [vmem:[#allocation71_spill] sm:$0xff] %v10237_v1  ;;  %v1789_v18 = vsel %vm1587_vm2, %v1776_v30, %v1788_v63  ;;  %v1798_v20 = vrot.slane %v1311_v3, 1  ;;  %v753_v36 = vadd.f32 %v10084_v39, %v9291_v50  ;;  %v946_v2 = vadd.f32 %v10086_v34, %v9293_v51 }
 0x15e   :  { %14245 = vst [vmem:[#allocation72_spill] sm:$0xff] %v10240_v62  ;;  %v10252_v22 = vmax.f32 %v1300_v49, %v1789_v18  ;;  %v1793_v25 = vsel %vm1587_vm2, %v1780_v56, %v1792_v42  ;;  %v1802_v44 = vrot.slane %v1313_v35, 1  ;;  %v1800_v12 = vrot.slane %v1312_v46, 1  ;;  %v10266_v49 = vpop.f32.mrb[49].mxu1 }
 0x15f   :  { %v10259_v11 = vmax.f32 %v1302_v16, %v1793_v25  ;;  %v1314_v30 = vmax.f32 %v10250_v4, 0.0  ;;  %v1799_v56 = vsel %vm1587_vm2, %v1786_v33, %v1798_v20  ;;  %v755_v16 = vadd.f32 %v10094_v8, %v9297_v52  ;;  %v10274_v25 = vpop.f32.mrb[50].mxu0  ;;  %v10276_v4 = vpop.f32.mrb[50].mxu1 }
 0x160   :  { %14246 = vst [vmem:[#allocation73_spill] sm:$0xff] %v10252_v22  ;;  %v1803_v18 = vsel %vm1587_vm2, %v1790_v28, %v1802_v44  ;;  %v10280_v48 = vmax.f32 %v1305_v23, %v1799_v56  ;;  %v1801_v33 = vsel %vm1587_vm2, %v1788_v63, %v1800_v12  ;;  %v10285_v28 = vpop.f32.mrb[51].mxu0  ;;  %v10287_v62 = vpop.f32.mrb[51].mxu1  ;;  %v1317_v22 = vmax.f32 %v753_v36, 0.0 }
 0x161   :  { %14247 = vst [vmem:[#allocation74_spill] sm:$0xff] %v10259_v11  ;;  %v10282_v60 = vmax.f32 %v1307_v13, %v1803_v18  ;;  %v10289_v34 = vmax.f32 %v1306_v24, %v1801_v33  ;;  %v1804_v8 = vrot.slane %v1314_v30, 1  ;;  %v1319_v59 = vmax.f32 %v946_v2, 0.0  ;;  %v10316_v39 = vpop.f32.mrb[52].mxu0 }
 0x162   :  { %14248 = vst [vmem:[#allocation75_spill] sm:$0xff] %v10280_v48  ;;  %v1318_v0 = vmax.f32 %v755_v16, 0.0  ;;  %v10293_v57 = vadd.f32 %v10096_v17, %v9299_v53  ;;  %v10297_v23 = vadd.f32 %v10132_v31, %v9291_v50  ;;  %v10301_v63 = vadd.f32 %v10134_v41, %v9293_v51  ;;  %v10318_v11 = vpop.f32.mrb[52].mxu1 }
 0x163   :  { %14249 = vst [vmem:[#allocation76_spill] sm:$0xff] %v10282_v60  ;;  %14250 = vst [vmem:[#allocation77_spill] sm:$0xff] %v10289_v34  ;;  %v1805_v13 = vsel %vm1587_vm2, %v1792_v42, %v1804_v8  ;;  %v1810_v24 = vrot.slane %v1317_v22, 1  ;;  %v1814_v56 = vrot.slane %v1319_v59, 1  ;;  %v10306_v2 = vadd.f32 %v10140_v43, %v9297_v52 }
 0x164   :  { %v10308_v36 = vmax.f32 %v1308_v10, %v1805_v13  ;;  %v1812_v17 = vrot.slane %v1318_v0, 1  ;;  %v1320_v18 = vmax.f32 %v10293_v57, 0.0  ;;  %v1323_v31 = vmax.f32 %v10297_v23, 0.0 }
 0x165   :  { %v1811_v16 = vsel %vm1587_vm2, %v1798_v20, %v1810_v24  ;;  %v1815_v41 = vsel %vm1587_vm2, %v1802_v44, %v1814_v56  ;;  %v1325_v33 = vmax.f32 %v10301_v63, 0.0  ;;  %v1324_v42 = vmax.f32 %v10306_v2, 0.0  ;;  %v10327_v20 = vpop.f32.mrb[53].mxu0  ;;  %v10329_v44 = vpop.f32.mrb[53].mxu1 }
 0x166   :  { %14251 = vst [vmem:[#allocation78_spill] sm:$0xff] %v10308_v36  ;;  %v10322_v10 = vmax.f32 %v1311_v3, %v1811_v16  ;;  %v10324_v57 = vmax.f32 %v1313_v35, %v1815_v41  ;;  %v1813_v23 = vsel %vm1587_vm2, %v1800_v12, %v1812_v17  ;;  %v1816_v13 = vrot.slane %v1320_v18, 1  ;;  %v10333_v60 = vpop.f32.mrb[54].mxu0  ;;  %v10335_v34 = vpop.f32.mrb[54].mxu1 }
 0x167   :  { %v10331_v63 = vmax.f32 %v1312_v46, %v1813_v23  ;;  %v1822_v2 = vrot.slane %v1323_v31, 1  ;;  %v1826_v1 = vrot.slane %v1325_v33, 1  ;;  %v1824_v43 = vrot.slane %v1324_v42, 1  ;;  %v10343_v16 = vpop.f32.mrb[55].mxu0  ;;  %v10345_v46 = vpop.f32.mrb[55].mxu1 }
 0x168   :  { %14252 = vst [vmem:[#allocation79_spill] sm:$0xff] %v10322_v10  ;;  %14253 = vst [vmem:[#allocation80_spill] sm:$0xff] %v10324_v57  ;;  %v954_v3 = vadd.f32 %v10142_v61, %v9299_v53  ;;  %v763_v35 = vadd.f32 %v10148_v29, %v9291_v50  ;;  %v956_v12 = vadd.f32 %v10150_v9, %v9293_v51 }
 0x169   :  { %14254 = vst [vmem:[#allocation81_spill] sm:$0xff] %v10331_v63  ;;  %v1817_v41 = vsel %vm1587_vm2, %v1804_v8, %v1816_v13  ;;  %v1823_v23 = vsel %vm1587_vm2, %v1810_v24, %v1822_v2  ;;  %v1827_v57 = vsel %vm1587_vm2, %v1814_v56, %v1826_v1  ;;  %v10352_v36 = vadd.f32 %v10159_v58, %v9297_v52 }
 0x16a   :  { %v10354_v61 = vmax.f32 %v1314_v30, %v1817_v41  ;;  %v10356_v29 = vmax.f32 %v1317_v22, %v1823_v23  ;;  %v10358_v48 = vmax.f32 %v1319_v59, %v1827_v57  ;;  %v1825_v9 = vsel %vm1587_vm2, %v1812_v17, %v1824_v43  ;;  %v10378_v57 = vpop.f32.mrb[56].mxu0 }
 0x16b   :  { %v10361_v63 = vmax.f32 %v1318_v0, %v1825_v9  ;;  %v1326_v27 = vmax.f32 %v954_v3, 0.0  ;;  %v1329_v8 = vmax.f32 %v763_v35, 0.0  ;;  %v1331_v26 = vmax.f32 %v956_v12, 0.0  ;;  %v10380_v3 = vpop.f32.mrb[56].mxu1  ;;  %v10388_v12 = vpop.f32.mrb[57].mxu0 }
 0x16c   :  { %14255 = vst [vmem:[#allocation82_spill] sm:$0xff] %v10354_v61  ;;  %14256 = vst [vmem:[#allocation83_spill] sm:$0xff] %v10356_v29  ;;  %v1330_v56 = vmax.f32 %v10352_v36, 0.0  ;;  %v10368_v58 = vadd.f32 %v10161_v32, %v9299_v53  ;;  %v10372_v59 = vadd.f32 %v10195_v19, %v9291_v50  ;;  %v10376_v17 = vadd.f32 %v10197_v47, %v9293_v51  ;;  %v10390_v41 = vpop.f32.mrb[57].mxu1  ;;  %v10396_v61 = vpop.f32.mrb[58].mxu0 }
 0x16d   :  { %14257 = vst [vmem:[#allocation84_spill] sm:$0xff] %v10358_v48  ;;  %14258 = vst [vmem:[#allocation85_spill] sm:$0xff] %v10361_v63  ;;  %v1828_v22 = vrot.slane %v1326_v27, 1  ;;  %v1834_v30 = vrot.slane %v1329_v8, 1  ;;  %v1838_v0 = vrot.slane %v1331_v26, 1  ;;  %v10386_v19 = vadd.f32 %v10205_v5, %v9297_v52  ;;  %v10407_v63 = vpop.f32.mrb[59].mxu0 }
 0x16e   :  { %v1836_v36 = vrot.slane %v1330_v56, 1  ;;  %v1332_v35 = vmax.f32 %v10368_v58, 0.0  ;;  %v1335_v32 = vmax.f32 %v10372_v59, 0.0  ;;  %v1337_v24 = vmax.f32 %v10376_v17, 0.0  ;;  %v10398_v58 = vpop.f32.mrb[58].mxu1 }
 0x16f   :  { %v1829_v47 = vsel %vm1587_vm2, %v1816_v13, %v1828_v22  ;;  %v1835_v23 = vsel %vm1587_vm2, %v1822_v2, %v1834_v30  ;;  %v1839_v9 = vsel %vm1587_vm2, %v1826_v1, %v1838_v0  ;;  %v10409_v13 = vpop.f32.mrb[59].mxu1 }
 0x170   :  { %v10400_v59 = vmax.f32 %v1320_v18, %v1829_v47  ;;  %v10402_v5 = vmax.f32 %v1323_v31, %v1835_v23  ;;  %v10404_v10 = vmax.f32 %v1325_v33, %v1839_v9  ;;  %v1837_v48 = vsel %vm1587_vm2, %v1824_v43, %v1836_v36 }
 0x171   :  { %v10411_v2 = vmax.f32 %v1324_v42, %v1837_v48  ;;  %v1840_v1 = vrot.slane %v1332_v35, 1  ;;  %v1846_v17 = vrot.slane %v1335_v32, 1  ;;  %v1850_v15 = vrot.slane %v1337_v24, 1 }
 0x172   :  { %14259 = vst [vmem:[#allocation86_spill] sm:$0xff] %v10400_v59  ;;  %14260 = vst [vmem:[#allocation87_spill] sm:$0xff] %v10402_v5  ;;  %v1336_v18 = vmax.f32 %v10386_v19, 0.0  ;;  %v964_v31 = vadd.f32 %v10207_v6, %v9299_v53  ;;  %v773_v33 = vadd.f32 %v10213_v55, %v9291_v50  ;;  %v10425_v42 = vadd.f32 %v10215_v40, %v9293_v51 }
 0x173   :  { %14261 = vst [vmem:[#allocation88_spill] sm:$0xff] %v10404_v10  ;;  %14262 = vst [vmem:[#allocation89_spill] sm:$0xff] %v10411_v2  ;;  %v1841_v43 = vsel %vm1587_vm2, %v1828_v22, %v1840_v1  ;;  %v1847_v47 = vsel %vm1587_vm2, %v1834_v30, %v1846_v17  ;;  %v1851_v48 = vsel %vm1587_vm2, %v1838_v0, %v1850_v15  ;;  %v10436_v30 = vpop.f32.mrb[60].mxu0  ;;  %v10438_v0 = vpop.f32.mrb[60].mxu1 }
 0x174   :  { %v10427_v23 = vmax.f32 %v1326_v27, %v1841_v43  ;;  %v10429_v9 = vmax.f32 %v1329_v8, %v1847_v47  ;;  %v10431_v19 = vmax.f32 %v1331_v26, %v1851_v48  ;;  %v1848_v6 = vrot.slane %v1336_v18, 1 }
 0x175   :  { %v1338_v14 = vmax.f32 %v964_v31, 0.0  ;;  %v1341_v59 = vmax.f32 %v773_v33, 0.0  ;;  %v1343_v55 = vmax.f32 %v10425_v42, 0.0  ;;  %v775_v22 = vadd.f32 %v10225_v45, %v9297_v52  ;;  %v10451_v31 = vpop.f32.mrb[61].mxu0  ;;  %v10453_v45 = vpop.f32.mrb[61].mxu1 }
 0x176   :  { %14263 = vst [vmem:[#allocation90_spill] sm:$0xff] %v10427_v23  ;;  %14264 = vst [vmem:[#allocation91_spill] sm:$0xff] %v10429_v9  ;;  %v1849_v40 = vsel %vm1587_vm2, %v1836_v36, %v1848_v6  ;;  %v10445_v26 = vadd.f32 %v10227_v21, %v9299_v53  ;;  %v10449_v8 = vadd.f32 %v10255_v54, %v9291_v50  ;;  %v10457_v42 = vpop.f32.mrb[62].mxu0  ;;  %v10459_v36 = vpop.f32.mrb[62].mxu1 }
 0x177   :  { %14265 = vst [vmem:[#allocation92_spill] sm:$0xff] %v10431_v19  ;;  %v10455_v33 = vmax.f32 %v1330_v56, %v1849_v40  ;;  %v1852_v43 = vrot.slane %v1338_v14, 1  ;;  %v1858_v47 = vrot.slane %v1341_v59, 1  ;;  %v1862_v48 = vrot.slane %v1343_v55, 1  ;;  %v10467_v5 = vpop.f32.mrb[63].mxu0  ;;  %v10469_v56 = vpop.f32.mrb[63].mxu1 }
 0x178   :  { %v1342_v27 = vmax.f32 %v775_v22, 0.0  ;;  %v1344_v21 = vmax.f32 %v10445_v26, 0.0  ;;  %v1347_v23 = vmax.f32 %v10449_v8, 0.0  ;;  %v10465_v54 = vadd.f32 %v10257_v37, %v9293_v51  ;;  %v8476_v26 = vld [vmem:[%s13900_s3 + $0x104] ss:$8 sps:$4 sm:$0xff]  }
 0x179   :  { %14266 = vst [vmem:[#allocation93_spill] sm:$0xff] %v10455_v33  ;;  %v1853_v40 = vsel %vm1587_vm2, %v1840_v1, %v1852_v43  ;;  %v1859_v19 = vsel %vm1587_vm2, %v1846_v17, %v1858_v47  ;;  %v1863_v33 = vsel %vm1587_vm2, %v1850_v15, %v1862_v48  ;;  %v781_v22 = vadd.f32 %v10264_v7, %v9297_v52 }
 0x17a   :  { %v10479_v8 = vmax.f32 %v1332_v35, %v1853_v40  ;;  %v10481_v37 = vmax.f32 %v1335_v32, %v1859_v19  ;;  %v10483_v29 = vmax.f32 %v1337_v24, %v1863_v33  ;;  %v1860_v10 = vrot.slane %v1342_v27, 1  ;;  %4805 = vmatprep.subr.bf16.mxu0 %v8476_v26  ;;  %v10497_v40 = vpop.f32.mrb[64].mxu0 }
 0x17b   :  { %v1864_v2 = vrot.slane %v1344_v21, 1  ;;  %v1870_v1 = vrot.slane %v1347_v23, 1  ;;  %v1349_v17 = vmax.f32 %v10465_v54, 0.0  ;;  %v1348_v38 = vmax.f32 %v781_v22, 0.0 }
 0x17c   :  { %14267 = vst [vmem:[#allocation94_spill] sm:$0xff] %v10479_v8  ;;  %14268 = vst [vmem:[#allocation95_spill] sm:$0xff] %v10481_v37  ;;  %v1861_v7 = vsel %vm1587_vm2, %v1848_v6, %v1860_v10  ;;  %v974_v35 = vadd.f32 %v10266_v49, %v9299_v53  ;;  %v783_v32 = vadd.f32 %v10274_v25, %v9291_v50  ;;  %v10503_v8 = vpop.f32.mrb[65].mxu0 }
 0x17d   :  { %v10493_v24 = vmax.f32 %v1336_v18, %v1861_v7  ;;  %v1865_v19 = vsel %vm1587_vm2, %v1852_v43, %v1864_v2  ;;  %v1871_v33 = vsel %vm1587_vm2, %v1858_v47, %v1870_v1  ;;  %v1874_v54 = vrot.slane %v1349_v17, 1  ;;  %v10510_v47 = vpop.f32.mrb[66].mxu0 }
 0x17e   :  { %v10499_v22 = vmax.f32 %v1338_v14, %v1865_v19  ;;  %v10501_v26 = vmax.f32 %v1341_v59, %v1871_v33  ;;  %v1872_v6 = vrot.slane %v1348_v38, 1  ;;  %v1350_v15 = vmax.f32 %v974_v35, 0.0  ;;  %v10517_v19 = vpop.f32.mrb[67].mxu0 }
 0x17f   :  { %v1875_v49 = vsel %vm1587_vm2, %v1862_v48, %v1874_v54  ;;  %v1353_v25 = vmax.f32 %v783_v32, 0.0  ;;  %v976_v18 = vadd.f32 %v10276_v4, %v9293_v51  ;;  %v785_v43 = vadd.f32 %v10285_v28, %v9297_v52 }
 0x180   :  { %14269 = vst [vmem:[#allocation96_spill] sm:$0xff] %v10499_v22  ;;  %14270 = vst [vmem:[#allocation97_spill] sm:$0xff] %v10501_v26  ;;  %v10514_v59 = vmax.f32 %v1343_v55, %v1875_v49  ;;  %v1873_v7 = vsel %vm1587_vm2, %v1860_v10, %v1872_v6  ;;  %v1876_v35 = vrot.slane %v1350_v15, 1  ;;  %v978_v28 = vadd.f32 %v10287_v62, %v9299_v53 }
 0x181   :  { %v10519_v48 = vmax.f32 %v1342_v27, %v1873_v7  ;;  %v1882_v32 = vrot.slane %v1353_v25, 1  ;;  %v1355_v33 = vmax.f32 %v976_v18, 0.0  ;;  %v1354_v4 = vmax.f32 %v785_v43, 0.0 }
 0x182   :  { %14271 = vst [vmem:[#allocation98_spill] sm:$0xff] %v10514_v59  ;;  %v1877_v9 = vsel %vm1587_vm2, %v1864_v2, %v1876_v35  ;;  %v789_v14 = vadd.f32 %v10316_v39, %v9291_v50  ;;  %v982_v55 = vadd.f32 %v10318_v11, %v9293_v51  ;;  %v1356_v18 = vmax.f32 %v978_v28, 0.0 }
 0x183   :  { %v10528_v10 = vmax.f32 %v1344_v21, %v1877_v9  ;;  %v1883_v49 = vsel %vm1587_vm2, %v1870_v1, %v1882_v32  ;;  %v1886_v27 = vrot.slane %v1355_v33, 1  ;;  %v1884_v7 = vrot.slane %v1354_v4, 1  ;;  %v10539_v9 = vpop.f32.mrb[68].mxu0 }
 0x184   :  { %v10531_v22 = vmax.f32 %v1347_v23, %v1883_v49  ;;  %v1359_v43 = vmax.f32 %v789_v14, 0.0  ;;  %v1361_v2 = vmax.f32 %v982_v55, 0.0  ;;  %v791_v11 = vadd.f32 %v10327_v20, %v9297_v52  ;;  %v10545_v14 = vpop.f32.mrb[69].mxu0 }
 0x185   :  { %14272 = vst [vmem:[#allocation99_spill] sm:$0xff] %v10528_v10  ;;  %v1887_v37 = vsel %vm1587_vm2, %v1874_v54, %v1886_v27  ;;  %v1885_v39 = vsel %vm1587_vm2, %v1872_v6, %v1884_v7  ;;  %v1888_v23 = vrot.slane %v1356_v18, 1  ;;  %v984_v54 = vadd.f32 %v10329_v44, %v9299_v53  ;;  %v10551_v62 = vpop.f32.mrb[70].mxu0 }
 0x186   :  { %14273 = vst [vmem:[#allocation100_spill] sm:$0xff] %v10531_v22  ;;  %v10541_v21 = vmax.f32 %v1349_v17, %v1887_v37  ;;  %v10543_v1 = vmax.f32 %v1348_v38, %v1885_v39  ;;  %v1894_v28 = vrot.slane %v1359_v43, 1  ;;  %v1898_v55 = vrot.slane %v1361_v2, 1  ;;  %v10559_v39 = vpop.f32.mrb[71].mxu0 }
 0x187   :  { %v1360_v49 = vmax.f32 %v791_v11, 0.0  ;;  %v793_v6 = vadd.f32 %v10333_v60, %v9291_v50  ;;  %v1889_v20 = vsel %vm1587_vm2, %v1876_v35, %v1888_v23  ;;  %v986_v38 = vadd.f32 %v10335_v34, %v9293_v51 }
 0x188   :  { %14274 = vst [vmem:[#allocation101_spill] sm:$0xff] %v10541_v21  ;;  %14275 = vst [vmem:[#allocation102_spill] sm:$0xff] %v10543_v1  ;;  %v1895_v37 = vsel %vm1587_vm2, %v1882_v32, %v1894_v28  ;;  %v795_v17 = vadd.f32 %v10343_v16, %v9297_v52  ;;  %v10561_v11 = vmax.f32 %v1350_v15, %v1889_v20  ;;  %v1362_v35 = vmax.f32 %v984_v54, 0.0 }
 0x189   :  { %v10563_v44 = vmax.f32 %v1353_v25, %v1895_v37  ;;  %v1899_v60 = vsel %vm1587_vm2, %v1886_v27, %v1898_v55  ;;  %v1896_v21 = vrot.slane %v1360_v49, 1  ;;  %v1365_v26 = vmax.f32 %v793_v6, 0.0 }
 0x18a   :  { %14276 = vst [vmem:[#allocation103_spill] sm:$0xff] %v10561_v11  ;;  %v10566_v10 = vmax.f32 %v1355_v33, %v1899_v60  ;;  %v1367_v32 = vmax.f32 %v986_v38, 0.0  ;;  %v1366_v16 = vmax.f32 %v795_v17, 0.0  ;;  %v988_v15 = vadd.f32 %v10345_v46, %v9299_v53  ;;  %v10579_v38 = vpop.f32.mrb[72].mxu0 }
 0x18b   :  { %14277 = vst [vmem:[#allocation104_spill] sm:$0xff] %v10563_v44  ;;  %v1897_v1 = vsel %vm1587_vm2, %v1884_v7, %v1896_v21  ;;  %v1900_v25 = vrot.slane %v1362_v35, 1  ;;  %v1906_v37 = vrot.slane %v1365_v26, 1  ;;  %v799_v54 = vadd.f32 %v10378_v57, %v9291_v50 }
 0x18c   :  { %v10573_v20 = vmax.f32 %v1354_v4, %v1897_v1  ;;  %v1910_v27 = vrot.slane %v1367_v32, 1  ;;  %v1908_v59 = vrot.slane %v1366_v16, 1  ;;  %v1368_v33 = vmax.f32 %v988_v15, 0.0  ;;  %v10586_v1 = vpop.f32.mrb[73].mxu0 }
 0x18d   :  { %v992_v6 = vadd.f32 %v10380_v3, %v9293_v51  ;;  %v1901_v7 = vsel %vm1587_vm2, %v1888_v23, %v1900_v25  ;;  %v1907_v17 = vsel %vm1587_vm2, %v1894_v28, %v1906_v37  ;;  %v801_v4 = vadd.f32 %v10388_v12, %v9297_v52  ;;  %v10595_v34 = vpop.f32.mrb[74].mxu0 }
 0x18e   :  { %v1911_v46 = vsel %vm1587_vm2, %v1898_v55, %v1910_v27  ;;  %v10588_v60 = vmax.f32 %v1356_v18, %v1901_v7  ;;  %v10590_v15 = vmax.f32 %v1359_v43, %v1907_v17  ;;  %v1909_v3 = vsel %vm1587_vm2, %v1896_v21, %v1908_v59  ;;  %v10599_v22 = vpop.f32.mrb[75].mxu0 }
 0x18f   :  { %v10592_v57 = vmax.f32 %v1361_v2, %v1911_v46  ;;  %v10597_v23 = vmax.f32 %v1360_v49, %v1909_v3  ;;  %v1912_v28 = vrot.slane %v1368_v33, 1  ;;  %v1371_v11 = vmax.f32 %v799_v54, 0.0 }
 0x190   :  { %14278 = vst [vmem:[#allocation105_spill] sm:$0xff] %v10588_v60  ;;  %14279 = vst [vmem:[#allocation106_spill] sm:$0xff] %v10590_v15  ;;  %v1373_v55 = vmax.f32 %v992_v6, 0.0  ;;  %v1372_v18 = vmax.f32 %v801_v4, 0.0  ;;  %v994_v43 = vadd.f32 %v10390_v41, %v9299_v53  ;;  %v803_v2 = vadd.f32 %v10396_v61, %v9291_v50 }
 0x191   :  { %v1913_v21 = vsel %vm1587_vm2, %v1900_v25, %v1912_v28  ;;  %v1918_v7 = vrot.slane %v1371_v11, 1  ;;  %v996_v54 = vadd.f32 %v10398_v58, %v9293_v51  ;;  %v805_v61 = vadd.f32 %v10407_v63, %v9297_v52 }
 0x192   :  { %v1922_v49 = vrot.slane %v1373_v55, 1  ;;  %v10610_v6 = vmax.f32 %v1362_v35, %v1913_v21  ;;  %v1920_v17 = vrot.slane %v1372_v18, 1  ;;  %v1374_v46 = vmax.f32 %v994_v43, 0.0  ;;  %v10623_v35 = vpop.f32.mrb[76].mxu0 }
 0x193   :  { %v1377_v3 = vmax.f32 %v803_v2, 0.0  ;;  %v1919_v4 = vsel %vm1587_vm2, %v1906_v37, %v1918_v7  ;;  %v1379_v41 = vmax.f32 %v996_v54, 0.0  ;;  %v10627_v21 = vpop.f32.mrb[77].mxu0  ;;  %v1378_v54 = vmax.f32 %v805_v61, 0.0 }
 0x194   :  { %14280 = vst [vmem:[#allocation107_spill] sm:$0xff] %v10610_v6  ;;  %v1923_v12 = vsel %vm1587_vm2, %v1910_v27, %v1922_v49  ;;  %v10618_v60 = vmax.f32 %v1365_v26, %v1919_v4  ;;  %v1921_v58 = vsel %vm1587_vm2, %v1908_v59, %v1920_v17  ;;  %v1924_v37 = vrot.slane %v1374_v46, 1  ;;  %v10635_v59 = vpop.f32.mrb[78].mxu0 }
 0x195   :  { %v10620_v44 = vmax.f32 %v1367_v32, %v1923_v12  ;;  %v10625_v43 = vmax.f32 %v1366_v16, %v1921_v58  ;;  %v1930_v2 = vrot.slane %v1377_v3, 1  ;;  %v1934_v27 = vrot.slane %v1379_v41, 1  ;;  %v10642_v58 = vpop.f32.mrb[79].mxu0 }
 0x196   :  { %14281 = vst [vmem:[#allocation108_spill] sm:$0xff] %v10618_v60  ;;  %v998_v63 = vadd.f32 %v10409_v13, %v9299_v53  ;;  %v809_v26 = vadd.f32 %v10436_v30, %v9291_v50  ;;  %v1002_v32 = vadd.f32 %v10438_v0, %v9293_v51  ;;  %v1925_v16 = vsel %vm1587_vm2, %v1912_v28, %v1924_v37  ;;  %v14462_v60 = vld [vmem:[#allocation80_spill] sm:$0xff] }
 0x197   :  { %14282 = vst [vmem:[#allocation109_spill] sm:$0xff] %v10620_v44  ;;  %v1931_v12 = vsel %vm1587_vm2, %v1918_v7, %v1930_v2  ;;  %v1935_v4 = vsel %vm1587_vm2, %v1922_v49, %v1934_v27  ;;  %v811_v61 = vadd.f32 %v10451_v31, %v9297_v52  ;;  %v10644_v13 = vmax.f32 %v1368_v33, %v1925_v16 }
 0x198   :  { %v10646_v25 = vmax.f32 %v1371_v11, %v1931_v12  ;;  %v10648_v30 = vmax.f32 %v1373_v55, %v1935_v4  ;;  %v1932_v0 = vrot.slane %v1378_v54, 1  ;;  %v1380_v6 = vmax.f32 %v998_v63, 0.0 }
 0x199   :  { %14283 = vst [vmem:[#allocation110_spill] sm:$0xff] %v10644_v13  ;;  %v1383_v15 = vmax.f32 %v809_v26, 0.0  ;;  %v1385_v44 = vmax.f32 %v1002_v32, 0.0  ;;  %v1384_v28 = vmax.f32 %v811_v61, 0.0  ;;  %v10655_v31 = vadd.f32 %v10453_v45, %v9299_v53 }
 0x19a   :  { %14284 = vst [vmem:[#allocation111_spill] sm:$0xff] %v10646_v25  ;;  %14285 = vst [vmem:[#allocation112_spill] sm:$0xff] %v10648_v30  ;;  %v1933_v49 = vsel %vm1587_vm2, %v1920_v17, %v1932_v0  ;;  %v813_v11 = vadd.f32 %v10457_v42, %v9291_v50  ;;  %v1936_v55 = vrot.slane %v1380_v6, 1  ;;  %v1006_v4 = vadd.f32 %v10459_v36, %v9293_v51  ;;  %v10664_v17 = vpop.f32.mrb[80].mxu0 }
 0x19b   :  { %v10659_v33 = vmax.f32 %v1372_v18, %v1933_v49  ;;  %v1942_v16 = vrot.slane %v1383_v15, 1  ;;  %v1946_v63 = vrot.slane %v1385_v44, 1  ;;  %v1944_v26 = vrot.slane %v1384_v28, 1  ;;  %v10671_v18 = vpop.f32.mrb[81].mxu0 }
 0x19c   :  { %v1386_v32 = vmax.f32 %v10655_v31, 0.0  ;;  %v1389_v12 = vmax.f32 %v813_v11, 0.0  ;;  %v1937_v45 = vsel %vm1587_vm2, %v1924_v37, %v1936_v55  ;;  %v815_v42 = vadd.f32 %v10467_v5, %v9297_v52  ;;  %v10680_v36 = vpop.f32.mrb[82].mxu0  ;;  %v14294_v52 = vld [vmem:[#allocation4_spill] sm:$0xff] }
 0x19d   :  { %14286 = vst [vmem:[#allocation113_spill] sm:$0xff] %v10659_v33  ;;  %v1943_v61 = vsel %vm1587_vm2, %v1930_v2, %v1942_v16  ;;  %v1947_v50 = vsel %vm1587_vm2, %v1934_v27, %v1946_v63  ;;  %v10673_v49 = vmax.f32 %v1374_v46, %v1937_v45  ;;  %v1945_v51 = vsel %vm1587_vm2, %v1932_v0, %v1944_v26  ;;  %v10684_v30 = vpop.f32.mrb[83].mxu0  ;;  %v14474_v33 = vld [vmem:[#allocation82_spill] sm:$0xff] }
 0x19e   :  { %v10675_v31 = vmax.f32 %v1377_v3, %v1943_v61  ;;  %v10677_v11 = vmax.f32 %v1379_v41, %v1947_v50  ;;  %v10682_v37 = vmax.f32 %v1378_v54, %v1945_v51  ;;  %v1948_v2 = vrot.slane %v1386_v32, 1  ;;  %v14291_v3 = vld [vmem:[#allocation2_spill] sm:$0xff]  ;;  %v14292_v54 = vld [vmem:[#allocation3_spill] sm:$0xff] }
 0x19f   :  { %14287 = vst [vmem:[#allocation114_spill] sm:$0xff] %v10673_v49  ;;  %v1954_v7 = vrot.slane %v1389_v12, 1  ;;  %v1391_v27 = vmax.f32 %v1006_v4, 0.0  ;;  %v1390_v5 = vmax.f32 %v815_v42, 0.0  ;;  %v1008_v46 = vadd.f32 %v10469_v56, %v9299_v53  ;;  %v14351_v49 = vld [vmem:[#allocation27_spill] sm:$0xff] }
 0x1a0   :  { %14288 = vst [vmem:[#allocation115_spill] sm:$0xff] %v10675_v31  ;;  %14289 = vst [vmem:[#allocation116_spill] sm:$0xff] %v10677_v11  ;;  %v136_v41 = vsub.s32 4, %v14291_v3  ;;  %v1949_v0 = vsel %vm1587_vm2, %v1936_v55, %v1948_v2  ;;  %v8725_v55 = vld [vmem:[%s13901_s2] sm:$0x3f] }
 0x1a1   :  { %14290 = vst [vmem:[#allocation117_spill] sm:$0xff] %v10682_v37  ;;  %v1955_v45 = vsel %vm1587_vm2, %v1942_v16, %v1954_v7  ;;  %v2164_v61 = vsel %vm1587_vm2, %v1954_v7, %v14292_v54  ;;  %v1958_v50 = vrot.slane %v1391_v27, 1  ;;  %v10695_v4 = vmax.f32 %v1380_v6, %v1949_v0  ;;  %v14297_v0 = vld [vmem:[#allocation5_spill] sm:$0xff] }
 0x1a2   :  { %v2350_v51 = vmax.f32 %v1383_v15, %v1955_v45  ;;  %v2356_v11 = vmax.f32 %v1389_v12, %v2164_v61  ;;  %v1956_v37 = vrot.slane %v1390_v5, 1  ;;  %v1392_v56 = vmax.f32 %v1008_v46, 0.0 }
 0x1a3   :  { %14293 = vst [vmem:[#allocation3_spill] sm:$0xff] %v10695_v4  ;;  %v1959_v42 = vsel %vm1587_vm2, %v1946_v63, %v1958_v50  ;;  %v2166_v53 = vsel %vm1587_vm2, %v1958_v50, %v14294_v52  ;;  %v10703_v16 = vrot.slane %v8725_v55, %v136_v41  ;;  %v10712_v63 = vpop.f32.mrb[84].mxu0 }
 0x1a4   :  { %v10707_v6 = vmax.f32 %v1385_v44, %v1959_v42  ;;  %v10709_v15 = vmax.f32 %v1391_v27, %v2166_v53  ;;  %v1957_v12 = vsel %vm1587_vm2, %v1944_v26, %v1956_v37  ;;  %v2165_v52 = vsel %vm1587_vm2, %v1956_v37, %v14297_v0  ;;  %v10720_v54 = vpop.f32.mrb[85].mxu0  ;;  %v14300_v37 = vld [vmem:[#allocation6_spill] sm:$0xff] }
 0x1a5   :  { %v10716_v46 = vmax.f32 %v1384_v28, %v1957_v12  ;;  %v1960_v45 = vrot.slane %v1392_v56, 1  ;;  %v1045_v41 = vadd.f32 %v10497_v40, %v10703_v16  ;;  %v10722_v61 = vmax.f32 %v1390_v5, %v2165_v52  ;;  %v10729_v50 = vpop.f32.mrb[86].mxu0 }
 0x1a6   :  { %14295 = vst [vmem:[#allocation4_spill] sm:$0xff] %v10707_v6  ;;  %14296 = vst [vmem:[#allocation118_spill] sm:$0xff] %v10709_v15  ;;  %v140_v44 = vsub.s32 5, %v14291_v3  ;;  %v1049_v26 = vadd.f32 %v10510_v47, %v10703_v16  ;;  %v1055_v27 = vadd.f32 %v10539_v9, %v10703_v16  ;;  %v1059_v5 = vadd.f32 %v10551_v62, %v10703_v16  ;;  %v10736_v53 = vpop.f32.mrb[87].mxu0 }
 0x1a7   :  { %14298 = vst [vmem:[#allocation5_spill] sm:$0xff] %v10716_v46  ;;  %14299 = vst [vmem:[#allocation119_spill] sm:$0xff] %v10722_v61  ;;  %v1961_v28 = vsel %vm1587_vm2, %v1948_v2, %v1960_v45  ;;  %v2167_v42 = vsel %vm1587_vm2, %v1960_v45, %v14300_v37  ;;  %v1207_v40 = vmax.f32 %v1045_v41, 0.0  ;;  %v10744_v2 = vadd.f32 %v10579_v38, %v10703_v16 }
 0x1a8   :  { %v2353_v12 = vmax.f32 %v1386_v32, %v1961_v28  ;;  %v2359_v0 = vmax.f32 %v1392_v56, %v2167_v42  ;;  %v10738_v52 = vrot.slane %v8725_v55, %v140_v44  ;;  %v1213_v47 = vmax.f32 %v1049_v26, 0.0 }
 0x1a9   :  { %v10740_v7 = vrot.slane %v1207_v40, 1  ;;  %v1219_v9 = vmax.f32 %v1055_v27, 0.0  ;;  %v1225_v3 = vmax.f32 %v1059_v5, 0.0 }
 0x1aa   :  { %v2452_v45 = vmax.f32 %v2350_v51, %v2353_v12  ;;  %v2455_v41 = vmax.f32 %v2356_v11, %v2359_v0  ;;  %v1047_v62 = vadd.f32 %v10503_v8, %v10738_v52  ;;  %v1601_v37 = vrot.slane %v1213_v47, 1  ;;  %v10758_v51 = vpop.f32.mrb[88].mxu0 }
 0x1ab   :  { %14301 = vst [vmem:[#allocation6_spill] sm:$0xff] %v10740_v7  ;;  %v1051_v32 = vadd.f32 %v10517_v19, %v10738_v52  ;;  %v1614_v56 = vrot.slane %v1219_v9, 1  ;;  %v1057_v55 = vadd.f32 %v10545_v14, %v10738_v52  ;;  %v1626_v44 = vrot.slane %v1225_v3, 1  ;;  %v10761_v5 = vpop.f32.mrb[89].mxu0 }
 0x1ac   :  { %v10752_v26 = vpack.c.bf16 %v2455_v41, %v2452_v45  ;;  %v1208_v27 = vmax.f32 %v1047_v62, 0.0  ;;  %v1602_v38 = vsel %vm1587_vm2, %v10740_v7, %v1601_v37  ;;  %v1061_v11 = vadd.f32 %v10559_v39, %v10738_v52  ;;  %v10766_v41 = vpop.f32.mrb[90].mxu0  ;;  %v14304_v62 = vld [vmem:[#allocation9_spill] sm:$0xff]  ;;  %v14404_v7 = vld [vmem:[#allocation54_spill] sm:$0xff] }
 0x1ad   :  { %v2174_v8 = vmax.f32 %v1207_v40, %v1602_v38  ;;  %v1214_v28 = vmax.f32 %v1051_v32, 0.0  ;;  %v1615_v19 = vsel %vm1587_vm2, %v1601_v37, %v1614_v56  ;;  %v1220_v42 = vmax.f32 %v1057_v55, 0.0  ;;  %v10769_v40 = vpop.f32.mrb[91].mxu0  ;;  %v14305_v32 = vld [vmem:[#allocation13_spill] sm:$0xff] }
 0x1ae   :  { %14302 = vst [vmem:[#allocation120_spill] sm:$0xff] %v10752_v26  ;;  %v10763_v14 = vrot.slane %v1208_v27, 1  ;;  %v2180_v12 = vmax.f32 %v1213_v47, %v1615_v19  ;;  %v1627_v0 = vsel %vm1587_vm2, %v1614_v56, %v1626_v44  ;;  %v1226_v45 = vmax.f32 %v1061_v11, 0.0  ;;  %v14306_v19 = vld [vmem:[#allocation17_spill] sm:$0xff] }
 0x1af   :  { %v2363_v15 = vmax.f32 %v14304_v62, %v2174_v8  ;;  %v1604_v39 = vrot.slane %v1214_v28, 1  ;;  %v1616_v6 = vrot.slane %v1220_v42, 1  ;;  %v2186_v26 = vmax.f32 %v1219_v9, %v1627_v0 }
 0x1b0   :  { %14303 = vst [vmem:[#allocation121_spill] sm:$0xff] %v10763_v14  ;;  %v2366_v37 = vmax.f32 %v14305_v32, %v2180_v12  ;;  %v1628_v55 = vrot.slane %v1226_v45, 1  ;;  %v1231_v38 = vmax.f32 %v10744_v2, 0.0  ;;  %v1067_v47 = vadd.f32 %v10586_v1, %v10738_v52 }
 0x1b1   :  { %v1605_v56 = vsel %vm1587_vm2, %v10763_v14, %v1604_v39  ;;  %v1617_v11 = vsel %vm1587_vm2, %v1604_v39, %v1616_v6  ;;  %v2369_v8 = vmax.f32 %v14306_v19, %v2186_v26  ;;  %v1069_v9 = vadd.f32 %v10595_v34, %v10703_v16  ;;  %v14317_v34 = vld [vmem:[#allocation11_spill] sm:$0xff] }
 0x1b2   :  { %v10781_v0 = vmax.f32 %v1208_v27, %v1605_v56  ;;  %v10783_v62 = vmax.f32 %v1214_v28, %v1617_v11  ;;  %v1629_v12 = vsel %vm1587_vm2, %v1616_v6, %v1628_v55  ;;  %v1638_v2 = vrot.slane %v1231_v38, 1  ;;  %v10797_v56 = vpop.f32.mrb[92].mxu0 }
 0x1b3   :  { %v10786_v32 = vmax.f32 %v1220_v42, %v1629_v12  ;;  %v1232_v1 = vmax.f32 %v1067_v47, 0.0  ;;  %v1237_v61 = vmax.f32 %v1069_v9, 0.0  ;;  %v1071_v14 = vadd.f32 %v10599_v22, %v10738_v52  ;;  %v10801_v12 = vpop.f32.mrb[93].mxu0  ;;  %v8474_v22 = vld [vmem:[%s13900_s3 + $0x100] ss:$8 sps:$4 sm:$0xff]  }
 0x1b4   :  { %14307 = vst [vmem:[#allocation9_spill] sm:$0xff] %v10781_v0  ;;  %14308 = vst [vmem:[#allocation13_spill] sm:$0xff] %v10783_v62  ;;  %v1639_v27 = vsel %vm1587_vm2, %v1626_v44, %v1638_v2  ;;  %v10795_v28 = vpack.c.bf16 %v2366_v37, %v2363_v15  ;;  %v14314_v44 = vld [vmem:[#allocation7_spill] sm:$0xff]  ;;  %v14315_v15 = vld [vmem:[#allocation10_spill] sm:$0xff]  ;;  %v10819_v42 = vpop.f32.mrb[94].mxu0 }
 0x1b5   :  { %14309 = vst [vmem:[#allocation17_spill] sm:$0xff] %v10786_v32  ;;  %v2192_v47 = vmax.f32 %v1225_v3, %v1639_v27  ;;  %v1640_v11 = vrot.slane %v1232_v1, 1  ;;  %v1650_v9 = vrot.slane %v1237_v61, 1  ;;  %v1238_v26 = vmax.f32 %v1071_v14, 0.0  ;;  %v14318_v62 = vld [vmem:[#allocation14_spill] sm:$0xff]  ;;  %v14321_v32 = vld [vmem:[#allocation21_spill] sm:$0xff] }
 0x1b6   :  { %14312 = vst [vmem:[#allocation122_spill] sm:$0xff] %v10795_v28  ;;  %4644 = vmatprep.mubr.bf16.mxu0 %v10795_v28  ;;  %v14316_v37 = vmax.f32 %v14314_v44, %v14315_v15  ;;  %v14319_v19 = vmax.f32 %v14317_v34, %v14318_v62  ;;  %v1075_v3 = vadd.f32 %v10623_v35, %v10703_v16  ;;  %v8482_v14 = vld [vmem:[%s13900_s3 + $0x114] ss:$8 sps:$4 sm:$0xff]   ;;  %v10831_v35 = vpop.f32.mrb[95].mxu0 }
 0x1b7   :  { %v1077_v27 = vadd.f32 %v10627_v21, %v10738_v52  ;;  %v2372_v6 = vmax.f32 %v14321_v32, %v2192_v47  ;;  %v1641_v44 = vsel %vm1587_vm2, %v1628_v55, %v1640_v11  ;;  %v1651_v62 = vsel %vm1587_vm2, %v1638_v2, %v1650_v9  ;;  %v14325_v47 = vld [vmem:[#allocation25_spill] sm:$0xff] }
 0x1b8   :  { %v10813_v0 = vpack.c.bf16 %v14319_v19, %v14316_v37  ;;  %v10829_v19 = vadd.f32 %v10635_v59, %v10703_v16  ;;  %v10833_v34 = vmax.f32 %v1226_v45, %v1641_v44  ;;  %v10835_v21 = vmax.f32 %v1231_v38, %v1651_v62  ;;  %v8480_v59 = vld [vmem:[%s13900_s3 + $0x110] ss:$8 sps:$4 sm:$0xff]   ;;  %v14327_v38 = vld [vmem:[#allocation15_spill] sm:$0xff] }
 0x1b9   :  { %v1652_v15 = vrot.slane %v1238_v26, 1  ;;  %v1243_v37 = vmax.f32 %v1075_v3, 0.0  ;;  %v1244_v39 = vmax.f32 %v1077_v27, 0.0  ;;  %v10841_v55 = vadd.f32 %v10642_v58, %v10738_v52  ;;  %v8485_v58 = vld [vmem:[%s13900_s3 + $0x124] ss:$8 sps:$4 sm:$0xff]  }
 0x1ba   :  { %14320 = vst [vmem:[#allocation7_spill] sm:$0xff] %v10813_v0  ;;  %14322 = vst [vmem:[#allocation10_spill] sm:$0xff] %v10833_v34  ;;  %4645 = vmatmul.mubr.bf16.vlgmr.msra.gmra.mrb[128].mxu0 %v10813_v0  ;;  %v1249_v32 = vmax.f32 %v10829_v19, 0.0  ;;  %v10843_v2 = vpack.c.bf16 %v2372_v6, %v2369_v8  ;;  %v2375_v3 = vmax.f32 %v14325_v47, %v10835_v21  ;;  %v14328_v21 = vld [vmem:[#allocation18_spill] sm:$0xff] }
 0x1bb   :  { %4806 = vmatpush1.bf16.msra.mxu0 %v8474_v22  ;;  %v1653_v27 = vsel %vm1587_vm2, %v1640_v11, %v1652_v15  ;;  %v1662_v44 = vrot.slane %v1243_v37, 1  ;;  %v1664_v6 = vrot.slane %v1244_v39, 1  ;;  %v1250_v62 = vmax.f32 %v10841_v55, 0.0  ;;  %v14330_v11 = vld [vmem:[#allocation19_spill] sm:$0xff]  ;;  %v14331_v34 = vld [vmem:[#allocation22_spill] sm:$0xff]  ;;  %v10877_v55 = vpop.f32.mrb[96].mxu0 }
 0x1bc   :  { %14323 = vst [vmem:[#allocation11_spill] sm:$0xff] %v10843_v2  ;;  %4807 = vmatprep.subr.bf16.mxu0 %v8482_v14  ;;  %v10856_v8 = vmax.f32 %v1232_v1, %v1653_v27  ;;  %v1674_v22 = vrot.slane %v1249_v32, 1  ;;  %4654 = vmatprep.mubr.bf16.mxu0 %v10843_v2  ;;  %v14329_v47 = vmax.f32 %v14327_v38, %v14328_v21  ;;  %v10883_v21 = vpop.f32.mrb[97].mxu0 }
 0x1bd   :  { %v1663_v19 = vsel %vm1587_vm2, %v1650_v9, %v1662_v44  ;;  %v14332_v14 = vmax.f32 %v14330_v11, %v14331_v34  ;;  %v10871_v1 = vadd.f32 %v10664_v17, %v10703_v16  ;;  %v10875_v27 = vadd.f32 %v10671_v18, %v10738_v52  ;;  %v8483_v17 = vld [vmem:[%s13900_s3 + $0x120] ss:$8 sps:$4 sm:$0xff]   ;;  %v10893_v46 = vpop.f32.mrb[98].mxu0 }
 0x1be   :  { %14326 = vst [vmem:[#allocation14_spill] sm:$0xff] %v10856_v8  ;;  %v2204_v4 = vmax.f32 %v1237_v61, %v1663_v19  ;;  %v1665_v38 = vsel %vm1587_vm2, %v1652_v15, %v1664_v6  ;;  %v1675_v34 = vsel %vm1587_vm2, %v1662_v44, %v1674_v22  ;;  %v1676_v11 = vrot.slane %v1250_v62, 1  ;;  %v8491_v61 = vld [vmem:[%s13900_s3 + $0x134] ss:$8 sps:$4 sm:$0xff]  }
 0x1bf   :  { %v10867_v45 = vpack.c.bf16 %v14332_v14, %v14329_v47  ;;  %4808 = vmatpush1.bf16.msra.mxu0 %v8480_v59  ;;  %v10888_v47 = vmax.f32 %v1238_v26, %v1665_v38  ;;  %v10890_v18 = vmax.f32 %v1243_v37, %v1675_v34  ;;  %v14336_v15 = vld [vmem:[#allocation29_spill] sm:$0xff]  ;;  %v2710_v26 = vrot.slane %v10843_v2, 2  ;;  %v10902_v37 = vpop.f32.mrb[99].mxu0 }
 0x1c0   :  { %4809 = vmatprep.subr.bf16.mxu0 %v8485_v58  ;;  %v2378_v59 = vmax.f32 %v14336_v15, %v2204_v4  ;;  %v14338_v14 = vld [vmem:[#allocation33_spill] sm:$0xff]  ;;  %v1677_v8 = vsel %vm1587_vm2, %v1664_v6, %v1676_v11  ;;  %v14339_v4 = vmax.f32 %v10871_v1, 0.0  ;;  %v14341_v19 = vmax.f32 %v10875_v27, 0.0 }
 0x1c1   :  { %14333 = vst [vmem:[#allocation21_spill] sm:$0xff] %v10867_v45  ;;  %14335 = vst [vmem:[#allocation25_spill] sm:$0xff] %v10888_v47  ;;  %v10912_v44 = vmax.f32 %v1244_v39, %v1677_v8  ;;  %v14342_v9 = vrot.slane %v10795_v28, 2  ;;  %v10921_v34 = vadd.f32 %v10680_v36, %v10703_v16  ;;  %v8489_v6 = vld [vmem:[%s13900_s3 + $0x130] ss:$8 sps:$4 sm:$0xff]   ;;  %v2707_v8 = vrot.slane %v10867_v45, 2 }
 0x1c2   :  { %4655 = vmatmul.mubr.bf16.gmra.mrb[132].mxu0 %v10867_v45  ;;  %v1686_v15 = vrot.slane %v14339_v4, 1  ;;  %v1688_v2 = vrot.slane %v14341_v19, 1  ;;  %v10931_v19 = vadd.f32 %v10684_v30, %v10738_v52  ;;  %v8456_v36 = vld [vmem:[%s13900_s3 + $0x400] ss:$8 sps:$4 sm:$0xff]   ;;  %v8461_v39 = vld [vmem:[%s13900_s3 + $0x414] ss:$8 sps:$4 sm:$0xff]  }
 0x1c3   :  { %14340 = vst [vmem:[#allocation15_spill] sm:$0xff] %v10912_v44  ;;  %v2711_v31 = vsel %vm605_vm1, %v14342_v9, %v2710_v26  ;;  %4810 = vmatpush1.bf16.msra.mxu0 %v8483_v17  ;;  %v8494_v30 = vld [vmem:[%s13900_s3 + $0x144] ss:$8 sps:$4 sm:$0xff]  }
 0x1c4   :  { %v1687_v4 = vsel %vm1587_vm2, %v1674_v22, %v1686_v15  ;;  %5223 = vmatprep.mubr.bf16.mxu1 %v2711_v31  ;;  %4811 = vmatprep.subr.bf16.mxu0 %v8491_v61  ;;  %v1689_v22 = vsel %vm1587_vm2, %v1676_v11, %v1688_v2  ;;  %v1261_v31 = vmax.f32 %v10921_v34, 0.0  ;;  %v14345_v61 = vrot.slane %v10813_v0, 2  ;;  %v10954_v11 = vpop.f32.mrb[100].mxu0  ;;  %v14347_v34 = vld [vmem:[#allocation37_spill] sm:$0xff]  ;;  %v14348_v9 = vld [vmem:[#allocation23_spill] sm:$0xff]  ;;  %v14349_v47 = vld [vmem:[#allocation26_spill] sm:$0xff] }
 0x1c5   :  { %v2216_v58 = vmax.f32 %v1249_v32, %v1687_v4  ;;  %v10946_v28 = vmax.f32 %v1250_v62, %v1689_v22  ;;  %v1262_v32 = vmax.f32 %v10931_v19, 0.0  ;;  %v10952_v4 = vpack.c.bf16 %v2378_v59, %v2375_v3  ;;  %v14352_v62 = vld [vmem:[#allocation30_spill] sm:$0xff]  ;;  %v8459_v3 = vld [vmem:[%s13900_s3 + $0x410] ss:$8 sps:$4 sm:$0xff]   ;;  %v10972_v59 = vpop.f32.mrb[101].mxu0 }
 0x1c6   :  { %v2708_v45 = vsel %vm605_vm1, %v14345_v61, %v2707_v8  ;;  %v1698_v44 = vrot.slane %v1261_v31, 1  ;;  %v14350_v38 = vmax.f32 %v14348_v9, %v14349_v47  ;;  %v14353_v22 = vmax.f32 %v14351_v49, %v14352_v62  ;;  %v10985_v19 = vpop.f32.mrb[102].mxu0 }
 0x1c7   :  { %14344 = vst [vmem:[#allocation18_spill] sm:$0xff] %v10946_v28  ;;  %14346 = vst [vmem:[#allocation19_spill] sm:$0xff] %v10952_v4  ;;  %v2384_v17 = vmax.f32 %v14347_v34, %v2216_v58  ;;  %5224 = vmatmul.mubr.bf16.vlgmr.msra.gmra.mrb[64].mxu1 %v2708_v45  ;;  %v10967_v61 = vadd.f32 %v10712_v63, %v10703_v16  ;;  %4812 = vmatpush1.bf16.msra.mxu0 %v8489_v6  ;;  %v8492_v45 = vld [vmem:[%s13900_s3 + $0x140] ss:$8 sps:$4 sm:$0xff]   ;;  %v8500_v6 = vld [vmem:[%s13900_s3 + $0x154] ss:$8 sps:$4 sm:$0xff]  }
 0x1c8   :  { %v10963_v25 = vpack.c.bf16 %v14353_v22, %v14350_v38  ;;  %v1700_v38 = vrot.slane %v1262_v32, 1  ;;  %4664 = vmatprep.mubr.bf16.mxu0 %v10952_v4  ;;  %v10982_v63 = vadd.f32 %v10720_v54, %v10738_v52  ;;  %5385 = vmatpush1.bf16.msra.mxu1 %v8456_v36  ;;  %v1699_v9 = vsel %vm1587_vm2, %v1686_v15, %v1698_v44  ;;  %v8464_v36 = vld [vmem:[%s13900_s3 + $0x424] ss:$8 sps:$4 sm:$0xff]   ;;  %v11000_v22 = vpop.f32.mrb[103].mxu0 }
 0x1c9   :  { %v1267_v34 = vmax.f32 %v10967_v61, 0.0  ;;  %v10994_v62 = vadd.f32 %v10729_v50, %v10703_v16  ;;  %5386 = vmatprep.subr.bf16.mxu1 %v8461_v39  ;;  %4813 = vmatprep.subr.bf16.mxu0 %v8494_v30  ;;  %v14356_v49 = vmax.f32 %v10871_v1, 0.0  ;;  %v14357_v61 = vrot.slane %v10952_v4, 2 }
 0x1ca   :  { %14354 = vst [vmem:[#allocation22_spill] sm:$0xff] %v10963_v25  ;;  %v1701_v15 = vsel %vm1587_vm2, %v1688_v2, %v1700_v38  ;;  %4665 = vmatmul.mubr.bf16.gmra.mrb[136].mxu0 %v10963_v25  ;;  %v1268_v50 = vmax.f32 %v10982_v63, 0.0  ;;  %v14358_v54 = vmax.f32 %v10875_v27, 0.0  ;;  %v14360_v30 = vrot.slane %v10963_v25, 2  ;;  %v14361_v63 = vld [vmem:[#allocation41_spill] sm:$0xff] }
 0x1cb   :  { %v11004_v58 = vmax.f32 %v14356_v49, %v1699_v9  ;;  %v2718_v39 = vsel %vm605_vm1, %v2710_v26, %v14357_v61  ;;  %v1710_v28 = vrot.slane %v1267_v34, 1  ;;  %v14033_v1 = vmax.f32 %v10994_v62, 0.0  ;;  %4814 = vmatpush1.bf16.msra.mxu0 %v8492_v45  ;;  %v8498_v49 = vld [vmem:[%s13900_s3 + $0x150] ss:$8 sps:$4 sm:$0xff]   ;;  %v8503_v45 = vld [vmem:[%s13900_s3 + $0x164] ss:$8 sps:$4 sm:$0xff]  }
 0x1cc   :  { %v11014_v0 = vmax.f32 %v14358_v54, %v1701_v15  ;;  %5233 = vmatprep.mubr.bf16.mxu1 %v2718_v39  ;;  %v2716_v2 = vsel %vm605_vm1, %v2707_v8, %v14360_v30  ;;  %v1712_v9 = vrot.slane %v1268_v50, 1  ;;  %v11027_v27 = vadd.f32 %v10736_v53, %v10738_v52  ;;  %5387 = vmatpush1.bf16.msra.mxu1 %v8459_v3  ;;  %v8462_v8 = vld [vmem:[%s13900_s3 + $0x420] ss:$8 sps:$4 sm:$0xff]  }
 0x1cd   :  { %v2387_v26 = vmax.f32 %v14361_v63, %v11004_v58  ;;  %v14362_v54 = vmax.f32 %v14338_v14, %v10890_v18  ;;  %4815 = vmatprep.subr.bf16.mxu0 %v8500_v6  ;;  %v1711_v53 = vsel %vm1587_vm2, %v1698_v44, %v1710_v28  ;;  %v1722_v18 = vrot.slane %v14033_v1, 1  ;;  %v14365_v14 = vld [vmem:[#allocation31_spill] sm:$0xff]  ;;  %v14369_v30 = vld [vmem:[#allocation38_spill] sm:$0xff]  ;;  %5388 = vmatprep.subr.bf16.mxu1 %v8464_v36  ;;  %v8467_v6 = vld [vmem:[%s13900_s3 + $0x434] ss:$8 sps:$4 sm:$0xff]  }
 0x1ce   :  { %14359 = vst [vmem:[#allocation29_spill] sm:$0xff] %v11014_v0  ;;  %v14368_v39 = vld [vmem:[#allocation35_spill] sm:$0xff]  ;;  %v2228_v47 = vmax.f32 %v1261_v31, %v1711_v53  ;;  %v1713_v61 = vsel %vm1587_vm2, %v1700_v38, %v1712_v9  ;;  %v1274_v44 = vmax.f32 %v11027_v27, 0.0  ;;  %v11070_v31 = vadd.f32 %v10761_v5, %v10738_v52  ;;  %v14373_v53 = vld [vmem:[#allocation45_spill] sm:$0xff]  ;;  %v14384_v0 = vld [vmem:[#allocation46_spill] sm:$0xff] }
 0x1cf   :  { %v11032_v15 = vpack.c.bf16 %v2384_v17, %v14362_v54  ;;  %v14366_v17 = vld [vmem:[#allocation34_spill] sm:$0xff]  ;;  %v14370_v63 = vmax.f32 %v14368_v39, %v14369_v30  ;;  %v1723_v36 = vsel %vm1587_vm2, %v1710_v28, %v1722_v18  ;;  %5234 = vmatmul.mubr.bf16.gmra.mrb[68].mxu1 %v2716_v2  ;;  %4816 = vmatpush1.bf16.msra.mxu0 %v8498_v49  ;;  %v8465_v5 = vld [vmem:[%s13900_s3 + $0x430] ss:$8 sps:$4 sm:$0xff]   ;;  %v14378_v30 = vrot.slane %v10963_v25, 2  ;;  %v14383_v49 = vld [vmem:[#allocation43_spill] sm:$0xff] }
 0x1d0   :  { %v14367_v3 = vmax.f32 %v14365_v14, %v14366_v17  ;;  %v11061_v14 = vadd.f32 %v10758_v51, %v10703_v16  ;;  %v11063_v17 = vpop.f32.mrb[104].mxu0  ;;  %v8501_v51 = vld [vmem:[%s13900_s3 + $0x160] ss:$8 sps:$4 sm:$0xff]   ;;  %v2390_v39 = vmax.f32 %v14373_v53, %v2228_v47  ;;  %5389 = vmatpush1.bf16.msra.mxu1 %v8462_v8  ;;  %4817 = vmatprep.subr.bf16.mxu0 %v8503_v45  ;;  %v14375_v47 = vrot.slane %v10952_v4, 2  ;;  %v8470_v45 = vld [vmem:[%s13900_s3 + $0x444] ss:$8 sps:$4 sm:$0xff]  }
 0x1d1   :  { %14363 = vst [vmem:[#allocation33_spill] sm:$0xff] %v11032_v15  ;;  %4674 = vmatprep.mubr.bf16.mxu0 %v11032_v15  ;;  %v14032_v38 = vrot.slane %v11032_v15, 2  ;;  %v11073_v27 = vpop.f32.mrb[105].mxu0  ;;  %v11097_v8 = vadd.f32 %v10766_v41, %v10703_v16  ;;  %5390 = vmatprep.subr.bf16.mxu1 %v8467_v6  ;;  %v14376_v53 = vld [vmem:[#allocation49_spill] sm:$0xff]  ;;  %v14393_v25 = vrot.slane %v11032_v15, 2 }
 0x1d2   :  { %v11051_v54 = vpack.c.bf16 %v14370_v63, %v14367_v3  ;;  %v11065_v3 = vmax.f32 %v1262_v32, %v1713_v61  ;;  %v11079_v32 = vmax.f32 %v1267_v34, %v1723_v36  ;;  %v1724_v61 = vrot.slane %v1274_v44, 1  ;;  %v11085_v2 = vpop.f32.mrb[106].mxu0  ;;  %v8509_v36 = vld [vmem:[%s13900_s3 + $0x174] ss:$8 sps:$4 sm:$0xff]  }
 0x1d3   :  { %v1279_v28 = vmax.f32 %v11061_v14, 0.0  ;;  %v14037_v63 = vmax.f32 %v11070_v31, 0.0  ;;  %v2724_v34 = vsel %vm605_vm1, %v14375_v47, %v14032_v38  ;;  %v11102_v14 = vpop.f32.mrb[107].mxu0  ;;  %4818 = vmatpush1.bf16.msra.mxu0 %v8501_v51  ;;  %v8468_v51 = vld [vmem:[%s13900_s3 + $0x440] ss:$8 sps:$4 sm:$0xff]  }
 0x1d4   :  { %14371 = vst [vmem:[#allocation37_spill] sm:$0xff] %v11051_v54  ;;  %14372 = vst [vmem:[#allocation23_spill] sm:$0xff] %v11065_v3  ;;  %v1725_v47 = vsel %vm1587_vm2, %v1712_v9, %v1724_v61  ;;  %4675 = vmatmul.mubr.bf16.gmra.mrb[140].mxu0 %v11051_v54  ;;  %5243 = vmatprep.mubr.bf16.mxu1 %v2724_v34  ;;  %v2721_v6 = vrot.slane %v11051_v54, 2  ;;  %v11119_v3 = vadd.f32 %v10769_v40, %v10738_v52  ;;  %v8507_v9 = vld [vmem:[%s13900_s3 + $0x170] ss:$8 sps:$4 sm:$0xff]   ;;  %v14381_v54 = vld [vmem:[#allocation42_spill] sm:$0xff] }
 0x1d5   :  { %v1734_v41 = vrot.slane %v1279_v28, 1  ;;  %v11112_v38 = vmax.f32 %v1268_v50, %v1725_v47  ;;  %v1736_v1 = vrot.slane %v14037_v63, 1  ;;  %v11128_v47 = vpack.c.bf16 %v2390_v39, %v2387_v26  ;;  %v14380_v63 = vld [vmem:[#allocation39_spill] sm:$0xff]  ;;  %5391 = vmatpush1.bf16.msra.mxu1 %v8465_v5  ;;  %v8473_v5 = vld [vmem:[%s13900_s3 + $0x454] ss:$8 sps:$4 sm:$0xff]   ;;  %4819 = vmatprep.subr.bf16.mxu0 %v8509_v36 }
 0x1d6   :  { %v2722_v50 = vsel %vm605_vm1, %v14378_v30, %v2721_v6  ;;  %v14382_v4 = vmax.f32 %v14380_v63, %v14381_v54  ;;  %v14385_v40 = vmax.f32 %v14383_v49, %v14384_v0  ;;  %v14388_v30 = vmax.f32 %v10994_v62, 0.0  ;;  %5392 = vmatprep.subr.bf16.mxu1 %v8470_v45  ;;  %v14391_v45 = vld [vmem:[#allocation53_spill] sm:$0xff]  ;;  %v14403_v26 = vld [vmem:[#allocation51_spill] sm:$0xff] }
 0x1d7   :  { %14377 = vst [vmem:[#allocation26_spill] sm:$0xff] %v11112_v38  ;;  %v1735_v34 = vsel %vm1587_vm2, %v1722_v18, %v1734_v41  ;;  %14379 = vst [vmem:[#allocation27_spill] sm:$0xff] %v11128_v47  ;;  %v8512_v18 = vld [vmem:[%s13900_s3 + $0x184] ss:$8 sps:$4 sm:$0xff]   ;;  %v1737_v63 = vsel %vm1587_vm2, %v1724_v61, %v1736_v1  ;;  %v14389_v0 = vmax.f32 %v11097_v8, 0.0  ;;  %4684 = vmatprep.mubr.bf16.mxu0 %v11128_v47  ;;  %5244 = vmatmul.mubr.bf16.gmra.mrb[72].mxu1 %v2722_v50 }
 0x1d8   :  { %v11136_v58 = vpack.c.bf16 %v14385_v40, %v14382_v4  ;;  %v2240_v54 = vmax.f32 %v14388_v30, %v1735_v34  ;;  %v11154_v49 = vmax.f32 %v1274_v44, %v1737_v63  ;;  %v1286_v40 = vmax.f32 %v11119_v3, 0.0  ;;  %v11164_v34 = vpop.f32.mrb[108].mxu0  ;;  %4820 = vmatpush1.bf16.msra.mxu0 %v8507_v9  ;;  %v8518_v39 = vld [vmem:[%s13900_s3 + $0x194] ss:$8 sps:$4 sm:$0xff]  }
 0x1d9   :  { %v1746_v4 = vrot.slane %v14389_v0, 1  ;;  %v1115_v62 = vadd.f32 %v10797_v56, %v10703_v16  ;;  %v11162_v61 = vadd.f32 %v10801_v12, %v10738_v52  ;;  %v14046_v44 = vrot.slane %v11128_v47, 2  ;;  %v8471_v56 = vld [vmem:[%s13900_s3 + $0x450] ss:$8 sps:$4 sm:$0xff]   ;;  %v11176_v36 = vpop.f32.mrb[109].mxu0  ;;  %5393 = vmatpush1.bf16.msra.mxu1 %v8468_v51  ;;  %4821 = vmatprep.subr.bf16.mxu0 %v8512_v18 }
 0x1da   :  { %14386 = vst [vmem:[#allocation30_spill] sm:$0xff] %v11136_v58  ;;  %14390 = vst [vmem:[#allocation41_spill] sm:$0xff] %v11154_v49  ;;  %v2396_v30 = vmax.f32 %v14391_v45, %v2240_v54  ;;  %v11171_v3 = vadd.f32 %v10819_v42, %v10703_v16  ;;  %v8510_v12 = vld [vmem:[%s13900_s3 + $0x180] ss:$8 sps:$4 sm:$0xff]   ;;  %v1748_v63 = vrot.slane %v1286_v40, 1  ;;  %v11185_v42 = vpop.f32.mrb[110].mxu0  ;;  %5394 = vmatprep.subr.bf16.mxu1 %v8473_v5 }
 0x1db   :  { %v1747_v0 = vsel %vm1587_vm2, %v1734_v41, %v1746_v4  ;;  %v1291_v45 = vmax.f32 %v1115_v62, 0.0  ;;  %v1292_v9 = vmax.f32 %v11162_v61, 0.0  ;;  %v2730_v50 = vsel %vm605_vm1, %v14393_v25, %v14046_v44  ;;  %v8479_v51 = vld [vmem:[%s13900_s3 + $0x464] ss:$8 sps:$4 sm:$0xff]   ;;  %v11201_v18 = vpop.f32.mrb[111].mxu0 }
 0x1dc   :  { %v11183_v54 = vmax.f32 %v1279_v28, %v1747_v0  ;;  %v14047_v28 = vmax.f32 %v11171_v3, 0.0  ;;  %v14394_v0 = vld [vmem:[#allocation57_spill] sm:$0xff]  ;;  %v1749_v49 = vsel %vm1587_vm2, %v1736_v1, %v1748_v63  ;;  %4685 = vmatmul.mubr.bf16.gmra.mrb[144].mxu0 %v11136_v58  ;;  %5253 = vmatprep.mubr.bf16.mxu1 %v2730_v50  ;;  %v11209_v25 = vadd.f32 %v10831_v35, %v10738_v52 }
 0x1dd   :  { %v1758_v15 = vrot.slane %v1291_v45, 1  ;;  %v14395_v5 = vmax.f32 %v11070_v31, 0.0  ;;  %v1760_v62 = vrot.slane %v1292_v9, 1  ;;  %4822 = vmatpush1.bf16.msra.mxu0 %v8510_v12  ;;  %v8516_v50 = vld [vmem:[%s13900_s3 + $0x190] ss:$8 sps:$4 sm:$0xff]   ;;  %v14398_v31 = vmax.f32 %v14376_v53, %v11079_v32  ;;  %5395 = vmatpush1.bf16.msra.mxu1 %v8471_v56 }
 0x1de   :  { %v2399_v61 = vmax.f32 %v14394_v0, %v11183_v54  ;;  %v1770_v41 = vrot.slane %v14047_v28, 1  ;;  %v14397_v54 = vrot.slane %v11136_v58, 2  ;;  %v14051_v0 = vmax.f32 %v11209_v25, 0.0  ;;  %v14401_v28 = vld [vmem:[#allocation50_spill] sm:$0xff]  ;;  %4823 = vmatprep.subr.bf16.mxu0 %v8518_v39  ;;  %5396 = vmatprep.subr.bf16.mxu1 %v8479_v51 }
 0x1df   :  { %v11213_v44 = vmax.f32 %v14395_v5, %v1749_v49  ;;  %v1759_v35 = vsel %vm1587_vm2, %v1746_v4, %v1758_v15  ;;  %v11228_v49 = vpack.c.bf16 %v2396_v30, %v14398_v31  ;;  %v14400_v5 = vld [vmem:[#allocation47_spill] sm:$0xff] }
 0x1e0   :  { %v2728_v1 = vsel %vm605_vm1, %v2721_v6, %v14397_v54  ;;  %v14402_v38 = vmax.f32 %v14400_v5, %v14401_v28  ;;  %v14405_v6 = vmax.f32 %v14403_v26, %v14404_v7  ;;  %v8477_v4 = vld [vmem:[%s13900_s3 + $0x460] ss:$8 sps:$4 sm:$0xff]   ;;  %v8521_v32 = vld [vmem:[%s13900_s3 + $0x1a4] ss:$8 sps:$4 sm:$0xff]   ;;  %v14408_v28 = vmax.f32 %v11097_v8, 0.0 }
 0x1e1   :  { %14396 = vst [vmem:[#allocation31_spill] sm:$0xff] %v11213_v44  ;;  %14399 = vst [vmem:[#allocation34_spill] sm:$0xff] %v11228_v49  ;;  %v1761_v7 = vsel %vm1587_vm2, %v1748_v63, %v1760_v62  ;;  %v8488_v26 = vld [vmem:[%s13900_s3 + $0x474] ss:$8 sps:$4 sm:$0xff]   ;;  %v1772_v31 = vrot.slane %v14051_v0, 1  ;;  %4694 = vmatprep.mubr.bf16.mxu0 %v11228_v49  ;;  %v1125_v8 = vadd.f32 %v10877_v55, %v10703_v16  ;;  %v11262_v63 = vpop.f32.mrb[112].mxu0  ;;  %5254 = vmatmul.mubr.bf16.gmra.mrb[76].mxu1 %v2728_v1 }
 0x1e2   :  { %v11236_v12 = vpack.c.bf16 %v14405_v6, %v14402_v38  ;;  %v2252_v54 = vmax.f32 %v14408_v28, %v1759_v35  ;;  %v1771_v38 = vsel %vm1587_vm2, %v1758_v15, %v1770_v41  ;;  %v11253_v39 = vmax.f32 %v1286_v40, %v1761_v7  ;;  %v14410_v15 = vld [vmem:[#allocation61_spill] sm:$0xff]  ;;  %v11274_v5 = vpop.f32.mrb[113].mxu0  ;;  %4824 = vmatpush1.bf16.msra.mxu0 %v8516_v50  ;;  %v8519_v55 = vld [vmem:[%s13900_s3 + $0x1a0] ss:$8 sps:$4 sm:$0xff]  }
 0x1e3   :  { %v11255_v56 = vmax.f32 %v1291_v45, %v1771_v38  ;;  %v11267_v35 = vadd.f32 %v10883_v21, %v10738_v52  ;;  %v14050_v40 = vrot.slane %v11228_v49, 2  ;;  %v11272_v45 = vadd.f32 %v10893_v46, %v10703_v16  ;;  %v14412_v28 = vld [vmem:[#allocation65_spill] sm:$0xff]  ;;  %5397 = vmatpush1.bf16.msra.mxu1 %v8477_v4  ;;  %v11287_v38 = vpop.f32.mrb[114].mxu0  ;;  %4825 = vmatprep.subr.bf16.mxu0 %v8521_v32  ;;  %v14421_v6 = vld [vmem:[#allocation62_spill] sm:$0xff] }
 0x1e4   :  { %14406 = vst [vmem:[#allocation35_spill] sm:$0xff] %v11236_v12  ;;  %14409 = vst [vmem:[#allocation38_spill] sm:$0xff] %v11253_v39  ;;  %v2402_v51 = vmax.f32 %v14410_v15, %v2252_v54  ;;  %v1773_v54 = vsel %vm1587_vm2, %v1760_v62, %v1772_v31  ;;  %v1303_v7 = vmax.f32 %v1125_v8, 0.0  ;;  %v8486_v46 = vld [vmem:[%s13900_s3 + $0x470] ss:$8 sps:$4 sm:$0xff]   ;;  %v14414_v1 = vrot.slane %v11128_v47, 2  ;;  %5398 = vmatprep.subr.bf16.mxu1 %v8488_v26 }
 0x1e5   :  { %v11289_v50 = vmax.f32 %v1292_v9, %v1773_v54  ;;  %v1304_v15 = vmax.f32 %v11267_v35, 0.0  ;;  %v14057_v62 = vmax.f32 %v11272_v45, 0.0  ;;  %v11298_v4 = vpop.f32.mrb[115].mxu0  ;;  %v8497_v8 = vld [vmem:[%s13900_s3 + $0x484] ss:$8 sps:$4 sm:$0xff]   ;;  %4695 = vmatmul.mubr.bf16.gmra.mrb[148].mxu0 %v11236_v12  ;;  %v11307_v35 = vadd.f32 %v10902_v37, %v10738_v52 }
 0x1e6   :  { %v2736_v30 = vsel %vm605_vm1, %v14414_v1, %v14050_v40  ;;  %v1782_v9 = vrot.slane %v1303_v7, 1  ;;  %v11309_v1 = vpack.c.bf16 %v2402_v51, %v2399_v61  ;;  %v8527_v26 = vld [vmem:[%s13900_s3 + $0x1b4] ss:$8 sps:$4 sm:$0xff]   ;;  %v14418_v47 = vld [vmem:[#allocation58_spill] sm:$0xff]  ;;  %v14420_v39 = vld [vmem:[#allocation59_spill] sm:$0xff]  ;;  %4826 = vmatpush1.bf16.msra.mxu0 %v8519_v55  ;;  %v14424_v21 = vrot.slane %v11236_v12, 2 }
 0x1e7   :  { %14413 = vst [vmem:[#allocation45_spill] sm:$0xff] %v11289_v50  ;;  %5263 = vmatprep.mubr.bf16.mxu1 %v2736_v30  ;;  %v1784_v40 = vrot.slane %v1304_v15, 1  ;;  %v1794_v0 = vrot.slane %v14057_v62, 1  ;;  %v14417_v30 = vld [vmem:[#allocation55_spill] sm:$0xff]  ;;  %v14422_v37 = vmax.f32 %v14420_v39, %v14421_v6  ;;  %v8525_v61 = vld [vmem:[%s13900_s3 + $0x1b0] ss:$8 sps:$4 sm:$0xff]   ;;  %v11339_v39 = vadd.f32 %v10954_v11, %v10703_v16  ;;  %5399 = vmatpush1.bf16.msra.mxu1 %v8486_v46 }
 0x1e8   :  { %14415 = vst [vmem:[#allocation49_spill] sm:$0xff] %v11309_v1  ;;  %v14419_v32 = vmax.f32 %v14417_v30, %v14418_v47  ;;  %v1783_v51 = vsel %vm1587_vm2, %v1770_v41, %v1782_v9  ;;  %v14425_v50 = vrot.slane %v11136_v58, 2  ;;  %v1310_v47 = vmax.f32 %v11307_v35, 0.0  ;;  %4704 = vmatprep.mubr.bf16.mxu0 %v11309_v1  ;;  %v8495_v55 = vld [vmem:[%s13900_s3 + $0x480] ss:$8 sps:$4 sm:$0xff]   ;;  %5400 = vmatprep.subr.bf16.mxu1 %v8497_v8 }
 0x1e9   :  { %v8530_v41 = vld [vmem:[%s13900_s3 + $0x1c4] ss:$8 sps:$4 sm:$0xff]   ;;  %v14426_v6 = vmax.f32 %v11171_v3, 0.0  ;;  %v11353_v11 = vadd.f32 %v10972_v59, %v10738_v52  ;;  %v8506_v46 = vld [vmem:[%s13900_s3 + $0x494] ss:$8 sps:$4 sm:$0xff]   ;;  %v14427_v35 = vmax.f32 %v11209_v25, 0.0  ;;  %4827 = vmatprep.subr.bf16.mxu0 %v8527_v26  ;;  %v11372_v25 = vadd.f32 %v10985_v19, %v10703_v16 }
 0x1ea   :  { %v11324_v44 = vpack.c.bf16 %v14422_v37, %v14419_v32  ;;  %v2734_v62 = vsel %vm605_vm1, %v14425_v50, %v14424_v21  ;;  %v1785_v50 = vsel %vm1587_vm2, %v1772_v31, %v1784_v40  ;;  %v1795_v32 = vsel %vm1587_vm2, %v1782_v9, %v1794_v0  ;;  %v14429_v9 = vld [vmem:[#allocation69_spill] sm:$0xff]  ;;  %4828 = vmatpush1.bf16.msra.mxu0 %v8525_v61  ;;  %v14459_v26 = vld [vmem:[#allocation75_spill] sm:$0xff]  ;;  %v14460_v54 = vld [vmem:[#allocation78_spill] sm:$0xff] }
 0x1eb   :  { %v2264_v21 = vmax.f32 %v14426_v6, %v1783_v51  ;;  %v11360_v30 = vmax.f32 %v14427_v35, %v1785_v50  ;;  %v11362_v37 = vmax.f32 %v1303_v7, %v1795_v32  ;;  %v1796_v3 = vrot.slane %v1310_v47, 1  ;;  %v11365_v51 = vpop.f32.mrb[116].mxu0  ;;  %5264 = vmatmul.mubr.bf16.gmra.mrb[80].mxu1 %v2734_v62  ;;  %v8528_v7 = vld [vmem:[%s13900_s3 + $0x1c0] ss:$8 sps:$4 sm:$0xff]   ;;  %v14431_v62 = vld [vmem:[#allocation73_spill] sm:$0xff]  ;;  %4829 = vmatprep.subr.bf16.mxu0 %v8530_v41 }
 0x1ec   :  { %14423 = vst [vmem:[#allocation39_spill] sm:$0xff] %v11324_v44  ;;  %v1315_v31 = vmax.f32 %v11339_v39, 0.0  ;;  %v14061_v8 = vmax.f32 %v11353_v11, 0.0  ;;  %v11374_v50 = vpop.f32.mrb[117].mxu0  ;;  %5401 = vmatpush1.bf16.msra.mxu1 %v8495_v55  ;;  %v8504_v19 = vld [vmem:[%s13900_s3 + $0x490] ss:$8 sps:$4 sm:$0xff]   ;;  %v14461_v53 = vmax.f32 %v14459_v26, %v14460_v54 }
 0x1ed   :  { %14428 = vst [vmem:[#allocation42_spill] sm:$0xff] %v11360_v30  ;;  %v2408_v59 = vmax.f32 %v14429_v9, %v2264_v21  ;;  %v1797_v32 = vsel %vm1587_vm2, %v1784_v40, %v1796_v3  ;;  %v11384_v9 = vpop.f32.mrb[118].mxu0  ;;  %v14433_v39 = vrot.slane %v11309_v1, 2  ;;  %v14434_v21 = vrot.slane %v11228_v49, 2  ;;  %5402 = vmatprep.subr.bf16.mxu1 %v8506_v46  ;;  %v8515_v55 = vld [vmem:[%s13900_s3 + $0x4a4] ss:$8 sps:$4 sm:$0xff]   ;;  %4705 = vmatmul.mubr.bf16.gmra.mrb[152].mxu0 %v11324_v44 }
 0x1ee   :  { %v1806_v35 = vrot.slane %v1315_v31, 1  ;;  %v11389_v61 = vmax.f32 %v1304_v15, %v1797_v32  ;;  %v1808_v6 = vrot.slane %v14061_v8, 1  ;;  %v11399_v30 = vpop.f32.mrb[119].mxu0  ;;  %v2739_v41 = vrot.slane %v11324_v44, 2  ;;  %v8536_v46 = vld [vmem:[%s13900_s3 + $0x1d4] ss:$8 sps:$4 sm:$0xff]   ;;  %4830 = vmatpush1.bf16.msra.mxu0 %v8528_v7 }
 0x1ef   :  { %v2742_v40 = vsel %vm605_vm1, %v14434_v21, %v14433_v39  ;;  %v11409_v32 = vadd.f32 %v11000_v22, %v10738_v52  ;;  %v14435_v39 = vmax.f32 %v14412_v28, %v11255_v56  ;;  %v14439_v22 = vmax.f32 %v11372_v25, 0.0  ;;  %v8534_v56 = vld [vmem:[%s13900_s3 + $0x1d0] ss:$8 sps:$4 sm:$0xff]   ;;  %4831 = vmatprep.subr.bf16.mxu0 %v8536_v46  ;;  %v8537_v46 = vld [vmem:[%s13900_s3 + $0x1e0] ss:$8 sps:$4 sm:$0xff]  }
 0x1f0   :  { %14432 = vst [vmem:[#allocation43_spill] sm:$0xff] %v11389_v61  ;;  %v1807_v15 = vsel %vm1587_vm2, %v1794_v0, %v1806_v35  ;;  %5273 = vmatprep.mubr.bf16.mxu1 %v2742_v40  ;;  %v14438_v0 = vmax.f32 %v11272_v45, 0.0  ;;  %v1809_v49 = vsel %vm1587_vm2, %v1796_v3, %v1808_v6  ;;  %v14442_v45 = vld [vmem:[#allocation63_spill] sm:$0xff]  ;;  %v14443_v3 = vld [vmem:[#allocation66_spill] sm:$0xff]  ;;  %5403 = vmatpush1.bf16.msra.mxu1 %v8504_v19  ;;  %v8524_v19 = vld [vmem:[%s13900_s3 + $0x4b4] ss:$8 sps:$4 sm:$0xff]  }
 0x1f1   :  { %v11414_v21 = vpack.c.bf16 %v2408_v59, %v14435_v39  ;;  %v1818_v44 = vrot.slane %v14439_v22, 1  ;;  %v11429_v28 = vmax.f32 %v1310_v47, %v1809_v49  ;;  %v14441_v59 = vrot.slane %v11236_v12, 2  ;;  %v14446_v22 = vld [vmem:[#allocation70_spill] sm:$0xff]  ;;  %v14448_v47 = vld [vmem:[#allocation77_spill] sm:$0xff]  ;;  %5404 = vmatprep.subr.bf16.mxu1 %v8515_v55 }
 0x1f2   :  { %v2276_v40 = vmax.f32 %v14438_v0, %v1807_v15  ;;  %v1322_v58 = vmax.f32 %v11409_v32, 0.0  ;;  %v14444_v15 = vmax.f32 %v14442_v45, %v14443_v3  ;;  %v14445_v0 = vld [vmem:[#allocation67_spill] sm:$0xff]  ;;  %v11451_v32 = vadd.f32 %v11063_v17, %v10703_v16  ;;  %4832 = vmatpush1.bf16.msra.mxu0 %v8534_v56  ;;  %v14457_v8 = vld [vmem:[#allocation74_spill] sm:$0xff] }
 0x1f3   :  { %14436 = vst [vmem:[#allocation46_spill] sm:$0xff] %v11414_v21  ;;  %14440 = vst [vmem:[#allocation53_spill] sm:$0xff] %v11429_v28  ;;  %v2740_v39 = vsel %vm605_vm1, %v14441_v59, %v2739_v41  ;;  %4714 = vmatprep.mubr.bf16.mxu0 %v11414_v21  ;;  %v14447_v7 = vmax.f32 %v14445_v0, %v14446_v22  ;;  %v8513_v49 = vld [vmem:[%s13900_s3 + $0x4a0] ss:$8 sps:$4 sm:$0xff]   ;;  %v1819_v59 = vsel %vm1587_vm2, %v1806_v35, %v1818_v44  ;;  %v11465_v22 = vpop.f32.mrb[120].mxu0 }
 0x1f4   :  { %v2414_v12 = vmax.f32 %v14448_v47, %v2276_v40  ;;  %v11455_v45 = vadd.f32 %v11073_v27, %v10738_v52  ;;  %v11462_v0 = vmax.f32 %v1315_v31, %v1819_v59  ;;  %v1820_v40 = vrot.slane %v1322_v58, 1  ;;  %v8539_v17 = vld [vmem:[%s13900_s3 + $0x1e4] ss:$8 sps:$4 sm:$0xff]   ;;  %5274 = vmatmul.mubr.bf16.gmra.mrb[84].mxu1 %v2740_v39  ;;  %v11477_v47 = vpop.f32.mrb[121].mxu0  ;;  %v14450_v59 = vld [vmem:[#allocation81_spill] sm:$0xff] }
 0x1f5   :  { %v11442_v61 = vpack.c.bf16 %v14447_v7, %v14444_v15  ;;  %v14071_v35 = vrot.slane %v11414_v21, 2  ;;  %v1327_v27 = vmax.f32 %v11451_v32, 0.0  ;;  %v11474_v7 = vadd.f32 %v11085_v2, %v10703_v16  ;;  %v11494_v56 = vpop.f32.mrb[122].mxu0  ;;  %5405 = vmatpush1.bf16.msra.mxu1 %v8513_v49  ;;  %v8522_v31 = vld [vmem:[%s13900_s3 + $0x4b0] ss:$8 sps:$4 sm:$0xff]   ;;  %4833 = vmatprep.subr.bf16.mxu0 %v8539_v17 }
 0x1f6   :  { %v1328_v55 = vmax.f32 %v11455_v45, 0.0  ;;  %v1821_v32 = vsel %vm1587_vm2, %v1808_v6, %v1820_v40  ;;  %v14451_v45 = vrot.slane %v11309_v1, 2  ;;  %v11492_v15 = vadd.f32 %v11102_v14, %v10738_v52  ;;  %v8533_v6 = vld [vmem:[%s13900_s3 + $0x4c4] ss:$8 sps:$4 sm:$0xff]   ;;  %v11507_v28 = vpop.f32.mrb[123].mxu0  ;;  %5406 = vmatprep.subr.bf16.mxu1 %v8524_v19  ;;  %4834 = vmatpush1.bf16.msra.mxu0 %v8537_v46 }
 0x1f7   :  { %v14452_v39 = vmax.f32 %v11353_v11, 0.0  ;;  %v8545_v49 = vld [vmem:[%s13900_s3 + $0x1f4] ss:$8 sps:$4 sm:$0xff]   ;;  %4715 = vmatmul.mubr.bf16.gmra.mrb[156].mxu0 %v11442_v61  ;;  %v14453_v3 = vrot.slane %v11442_v61, 2  ;;  %v14456_v14 = vld [vmem:[#allocation71_spill] sm:$0xff]  ;;  %v14464_v54 = vmax.f32 %v11372_v25, 0.0  ;;  %v11554_v25 = vadd.f32 %v11176_v36, %v10738_v52 }
 0x1f8   :  { %v2748_v2 = vsel %vm605_vm1, %v14451_v45, %v14071_v35  ;;  %v1830_v45 = vrot.slane %v1327_v27, 1  ;;  %v1832_v35 = vrot.slane %v1328_v55, 1  ;;  %v14458_v19 = vmax.f32 %v14456_v14, %v14457_v8  ;;  %v8543_v8 = vld [vmem:[%s13900_s3 + $0x1f0] ss:$8 sps:$4 sm:$0xff]   ;;  %4835 = vmatprep.subr.bf16.mxu0 %v8545_v49 }
 0x1f9   :  { %v11504_v1 = vmax.f32 %v14452_v39, %v1821_v32  ;;  %5283 = vmatprep.mubr.bf16.mxu1 %v2748_v2  ;;  %v2746_v11 = vsel %vm605_vm1, %v2739_v41, %v14453_v3  ;;  %v14076_v39 = vmax.f32 %v11492_v15, 0.0  ;;  %v14454_v32 = vmax.f32 %v14431_v62, %v11362_v37  ;;  %5407 = vmatpush1.bf16.msra.mxu1 %v8522_v31  ;;  %v14465_v31 = vld [vmem:[#allocation85_spill] sm:$0xff] }
 0x1fa   :  { %v11528_v13 = vpack.c.bf16 %v14461_v53, %v14458_v19  ;;  %v1831_v41 = vsel %vm1587_vm2, %v1818_v44, %v1830_v45  ;;  %v1833_v3 = vsel %vm1587_vm2, %v1820_v40, %v1832_v35  ;;  %v14463_v37 = vmax.f32 %v11474_v7, 0.0  ;;  %v8531_v40 = vld [vmem:[%s13900_s3 + $0x4c0] ss:$8 sps:$4 sm:$0xff]   ;;  %5408 = vmatprep.subr.bf16.mxu1 %v8533_v6  ;;  %4836 = vmatpush1.bf16.msra.mxu0 %v8543_v8  ;;  %v14469_v8 = vld [vmem:[#allocation88_spill] sm:$0xff] }
 0x1fb   :  { %v11520_v2 = vpack.c.bf16 %v2414_v12, %v14454_v32  ;;  %v2288_v53 = vmax.f32 %v14464_v54, %v1831_v41  ;;  %v11541_v26 = vmax.f32 %v1322_v58, %v1833_v3  ;;  %v1844_v62 = vrot.slane %v14076_v39, 1  ;;  %v11570_v41 = vpop.f32.mrb[124].mxu0  ;;  %v14473_v32 = vld [vmem:[#allocation79_spill] sm:$0xff] }
 0x1fc   :  { %v1842_v12 = vrot.slane %v14463_v37, 1  ;;  %v1155_v44 = vadd.f32 %v11164_v34, %v10703_v16  ;;  %v11559_v46 = vadd.f32 %v11185_v42, %v10703_v16  ;;  %v8542_v34 = vld [vmem:[%s13900_s3 + $0x4d4] ss:$8 sps:$4 sm:$0xff]   ;;  %5284 = vmatmul.mubr.bf16.gmra.mrb[88].mxu1 %v2746_v11  ;;  %v1340_v3 = vmax.f32 %v11554_v25, 0.0  ;;  %v11580_v54 = vpop.f32.mrb[125].mxu0 }
 0x1fd   :  { %14455 = vst [vmem:[#allocation57_spill] sm:$0xff] %v11520_v2  ;;  %4724 = vmatprep.mubr.bf16.mxu0 %v11520_v2  ;;  %v14075_v58 = vrot.slane %v11520_v2, 2  ;;  %v2420_v14 = vmax.f32 %v14465_v31, %v2288_v53  ;;  %v1845_v36 = vsel %vm1587_vm2, %v1832_v35, %v1844_v62  ;;  %v14467_v49 = vrot.slane %v11414_v21, 2  ;;  %5409 = vmatpush1.bf16.msra.mxu1 %v8531_v40 }
 0x1fe   :  { %v1843_v17 = vsel %vm1587_vm2, %v1830_v45, %v1842_v12  ;;  %v14466_v45 = vld [vmem:[#allocation84_spill] sm:$0xff]  ;;  %v11572_v42 = vmax.f32 %v1328_v55, %v1845_v36  ;;  %v1339_v6 = vmax.f32 %v1155_v44, 0.0  ;;  %v1345_v11 = vmax.f32 %v11559_v46, 0.0  ;;  %v11588_v44 = vpop.f32.mrb[126].mxu0  ;;  %5410 = vmatprep.subr.bf16.mxu1 %v8542_v34  ;;  %v8572_v34 = vld [vmem:[%s13900_s3 + $0x204] ss:$8 sps:$4 sm:$0xff]  }
 0x1ff   :  { %v11567_v19 = vmax.f32 %v1327_v27, %v1843_v17  ;;  %v2754_v37 = vsel %vm605_vm1, %v14467_v49, %v14075_v58  ;;  %v14468_v27 = vld [vmem:[#allocation89_spill] sm:$0xff]  ;;  %v2751_v55 = vrot.slane %v11528_v13, 2  ;;  %v1161_v53 = vadd.f32 %v11201_v18, %v10738_v52  ;;  %v11600_v49 = vpop.f32.mrb[127].mxu0  ;;  %v8548_v18 = vld [vmem:[%s13900_s3 + $0x4e4] ss:$8 sps:$4 sm:$0xff]   ;;  %4725 = vmatmul.mubr.bf16.gmra.mrb[160].mxu0 %v11528_v13  ;;  %4998 = vmatprep.subr.bf16.mxu0 %v8572_v34 }
 0x200   :  { %5293 = vmatprep.mubr.bf16.mxu1 %v2754_v37  ;;  %v8540_v17 = vld [vmem:[%s13900_s3 + $0x4d0] ss:$8 sps:$4 sm:$0xff]   ;;  %v1854_v31 = vrot.slane %v1339_v6, 1  ;;  %v14470_v46 = vmax.f32 %v14450_v59, %v11462_v0  ;;  %v1866_v40 = vrot.slane %v1345_v11, 1  ;;  %v14472_v37 = vrot.slane %v11442_v61, 2  ;;  %v14476_v59 = vld [vmem:[#allocation83_spill] sm:$0xff] }
 0x201   :  { %v2423_v35 = vmax.f32 %v14468_v27, %v11567_v19  ;;  %v1856_v19 = vrot.slane %v1340_v3, 1  ;;  %v1346_v25 = vmax.f32 %v1161_v53, 0.0  ;;  %v14475_v0 = vmax.f32 %v14473_v32, %v14474_v33  ;;  %5411 = vmatpush1.bf16.msra.mxu1 %v8540_v17 }
 0x202   :  { %v11598_v36 = vpack.c.bf16 %v2420_v14, %v14470_v46  ;;  %v2752_v27 = vsel %vm605_vm1, %v14472_v37, %v2751_v55  ;;  %v14477_v14 = vld [vmem:[#allocation86_spill] sm:$0xff]  ;;  %v1855_v39 = vsel %vm1587_vm2, %v1842_v12, %v1854_v31  ;;  %v1165_v53 = vadd.f32 %v11262_v63, %v10703_v16  ;;  %5412 = vmatprep.subr.bf16.mxu1 %v8548_v18 }
 0x203   :  { %v14478_v46 = vmax.f32 %v14476_v59, %v14477_v14  ;;  %v1857_v21 = vsel %vm1587_vm2, %v1844_v62, %v1856_v19  ;;  %v11627_v33 = vadd.f32 %v11274_v5, %v10738_v52  ;;  %v14480_v32 = vmax.f32 %v11474_v7, 0.0  ;;  %v8546_v62 = vld [vmem:[%s13900_s3 + $0x4e0] ss:$8 sps:$4 sm:$0xff]  }
 0x204   :  { %14471 = vst [vmem:[#allocation47_spill] sm:$0xff] %v11598_v36  ;;  %4734 = vmatprep.mubr.bf16.mxu0 %v11598_v36  ;;  %v1867_v12 = vsel %vm1587_vm2, %v1854_v31, %v1866_v40  ;;  %v1868_v14 = vrot.slane %v1346_v25, 1  ;;  %v1351_v5 = vmax.f32 %v1165_v53, 0.0  ;;  %v2759_v7 = vrot.slane %v11598_v36, 2  ;;  %5294 = vmatmul.mubr.bf16.gmra.mrb[92].mxu1 %v2752_v27 }
 0x205   :  { %v11615_v58 = vpack.c.bf16 %v14478_v46, %v14475_v0  ;;  %v2300_v37 = vmax.f32 %v14480_v32, %v1855_v39  ;;  %v14481_v0 = vmax.f32 %v11492_v15, 0.0  ;;  %v11639_v63 = vmax.f32 %v1339_v6, %v1867_v12  ;;  %v14482_v15 = vld [vmem:[#allocation93_spill] sm:$0xff]  ;;  %v14483_v39 = vld [vmem:[#allocation92_spill] sm:$0xff]  ;;  %5413 = vmatpush1.bf16.msra.mxu1 %v8546_v62 }
 0x206   :  { %v1352_v46 = vmax.f32 %v11627_v33, 0.0  ;;  %v1869_v17 = vsel %vm1587_vm2, %v1856_v19, %v1868_v14  ;;  %v1169_v32 = vadd.f32 %v11287_v38, %v10703_v16  ;;  %v8551_v6 = vld [vmem:[%s13900_s3 + $0x4f4] ss:$8 sps:$4 sm:$0xff]   ;;  %v1878_v18 = vrot.slane %v1351_v5, 1 }
 0x207   :  { %14479 = vst [vmem:[#allocation50_spill] sm:$0xff] %v11615_v58  ;;  %v11633_v59 = vmax.f32 %v14481_v0, %v1857_v21  ;;  %v2426_v21 = vmax.f32 %v14482_v15, %v2300_v37  ;;  %v2429_v34 = vmax.f32 %v10493_v24, %v11639_v63  ;;  %v11654_v53 = vmax.f32 %v1340_v3, %v1869_v17  ;;  %v8549_v24 = vld [vmem:[%s13900_s3 + $0x4f0] ss:$8 sps:$4 sm:$0xff]   ;;  %v8554_v17 = vld [vmem:[%s13900_s3 + $0x504] ss:$8 sps:$4 sm:$0xff]  }
 0x208   :  { %v1880_v33 = vrot.slane %v1352_v46, 1  ;;  %v14484_v37 = vrot.slane %v11520_v2, 2  ;;  %v1357_v19 = vmax.f32 %v1169_v32, 0.0  ;;  %v2757_v12 = vrot.slane %v11615_v58, 2  ;;  %4735 = vmatmul.mubr.bf16.gmra.mrb[164].mxu0 %v11615_v58  ;;  %5414 = vmatprep.subr.bf16.mxu1 %v8551_v6  ;;  %v14493_v6 = vld [vmem:[#allocation98_spill] sm:$0xff] }
 0x209   :  { %v1171_v38 = vadd.f32 %v11298_v4, %v10738_v52  ;;  %v1879_v27 = vsel %vm1587_vm2, %v1866_v40, %v1878_v18  ;;  %v11669_v15 = vpack.c.bf16 %v2426_v21, %v2423_v35  ;;  %v14486_v40 = vld [vmem:[#allocation87_spill] sm:$0xff]  ;;  %5415 = vmatpush1.bf16.msra.mxu1 %v8549_v24 }
 0x20a   :  { %v2760_v0 = vsel %vm605_vm1, %v14484_v37, %v2759_v7  ;;  %v1881_v63 = vsel %vm1587_vm2, %v1868_v14, %v1880_v33  ;;  %v2312_v4 = vmax.f32 %v1345_v11, %v1879_v27  ;;  %v1890_v32 = vrot.slane %v1357_v19, 1  ;;  %v14487_v14 = vld [vmem:[#allocation90_spill] sm:$0xff]  ;;  %v14489_v21 = vld [vmem:[#allocation91_spill] sm:$0xff]  ;;  %5577 = vmatprep.subr.bf16.mxu1 %v8554_v17 }
 0x20b   :  { %5303 = vmatprep.mubr.bf16.mxu1 %v2760_v0  ;;  %14485 = vst [vmem:[#allocation51_spill] sm:$0xff] %v11669_v15  ;;  %v11675_v62 = vmax.f32 %v1346_v25, %v1881_v63  ;;  %v2758_v37 = vsel %vm605_vm1, %v2751_v55, %v2757_v12  ;;  %v1358_v3 = vmax.f32 %v1171_v38, 0.0  ;;  %4744 = vmatprep.mubr.bf16.mxu0 %v11669_v15  ;;  %v14490_v0 = vld [vmem:[#allocation94_spill] sm:$0xff]  ;;  %v2765_v63 = vrot.slane %v11669_v15, 2 }
 0x20c   :  { %v14488_v35 = vmax.f32 %v14486_v40, %v14487_v14  ;;  %v14491_v31 = vmax.f32 %v14489_v21, %v14490_v0  ;;  %v1175_v11 = vadd.f32 %v11365_v51, %v10703_v16  ;;  %v1177_v25 = vadd.f32 %v11374_v50, %v10738_v52  ;;  %v14494_v21 = vld [vmem:[#allocation102_spill] sm:$0xff]  ;;  %5304 = vmatmul.mubr.bf16.gmra.mrb[96].mxu1 %v2758_v37 }
 0x20d   :  { %v2432_v55 = vmax.f32 %v10519_v48, %v2312_v4  ;;  %v1891_v27 = vsel %vm1587_vm2, %v1878_v18, %v1890_v32  ;;  %v1892_v14 = vrot.slane %v1358_v3, 1  ;;  %v2766_v51 = vsel %vm605_vm1, %v2759_v7, %v2765_v63 }
 0x20e   :  { %v11685_v36 = vpack.c.bf16 %v14491_v31, %v14488_v35  ;;  %v2318_v40 = vmax.f32 %v1351_v5, %v1891_v27  ;;  %v1363_v31 = vmax.f32 %v1175_v11, 0.0  ;;  %v1364_v35 = vmax.f32 %v1177_v25, 0.0  ;;  %5313 = vmatprep.mubr.bf16.mxu1 %v2766_v51 }
 0x20f   :  { %v1179_v50 = vadd.f32 %v11384_v9, %v10703_v16  ;;  %v1181_v4 = vadd.f32 %v11399_v30, %v10738_v52  ;;  %v1893_v24 = vsel %vm1587_vm2, %v1880_v33, %v1892_v14  ;;  %v11709_v38 = vpack.c.bf16 %v2432_v55, %v2429_v34  ;;  %v14496_v30 = vld [vmem:[#allocation95_spill] sm:$0xff] }
 0x210   :  { %14492 = vst [vmem:[#allocation54_spill] sm:$0xff] %v11685_v36  ;;  %v2763_v48 = vrot.slane %v11685_v36, 2  ;;  %v2435_v18 = vmax.f32 %v14494_v21, %v2318_v40  ;;  %v1902_v5 = vrot.slane %v1363_v31, 1  ;;  %v1904_v0 = vrot.slane %v1364_v35, 1  ;;  %v14497_v40 = vld [vmem:[#allocation96_spill] sm:$0xff]  ;;  %v14499_v21 = vld [vmem:[#allocation97_spill] sm:$0xff]  ;;  %4745 = vmatmul.mubr.bf16.gmra.mrb[168].mxu0 %v11685_v36 }
 0x211   :  { %v11704_v11 = vmax.f32 %v1352_v46, %v1893_v24  ;;  %v1369_v17 = vmax.f32 %v1179_v50, 0.0  ;;  %v1370_v25 = vmax.f32 %v1181_v4, 0.0  ;;  %14495 = vst [vmem:[#allocation61_spill] sm:$0xff] %v11709_v38  ;;  %v14498_v37 = vmax.f32 %v14496_v30, %v14497_v40  ;;  %v14500_v33 = vld [vmem:[#allocation99_spill] sm:$0xff]  ;;  %v14502_v46 = vld [vmem:[#allocation101_spill] sm:$0xff]  ;;  %4754 = vmatprep.mubr.bf16.mxu0 %v11709_v38  ;;  %v14591_v36 = vld [vmem:[#allocation76_spill] sm:$0xff] }
 0x212   :  { %v2764_v7 = vsel %vm605_vm1, %v2757_v12, %v2763_v48  ;;  %v1903_v9 = vsel %vm1587_vm2, %v1890_v32, %v1902_v5  ;;  %v1905_v27 = vsel %vm1587_vm2, %v1892_v14, %v1904_v0  ;;  %v14501_v15 = vmax.f32 %v14499_v21, %v14500_v33 }
 0x213   :  { %v2324_v12 = vmax.f32 %v1357_v19, %v1903_v9  ;;  %v11722_v50 = vmax.f32 %v1358_v3, %v1905_v27  ;;  %v1914_v32 = vrot.slane %v1369_v17, 1  ;;  %v1916_v14 = vrot.slane %v1370_v25, 1 }
 0x214   :  { %v11717_v2 = vpack.c.bf16 %v14501_v15, %v14498_v37  ;;  %v1185_v34 = vadd.f32 %v11465_v22, %v10703_v16  ;;  %v1187_v55 = vadd.f32 %v11477_v47, %v10738_v52  ;;  %v2771_v15 = vrot.slane %v11709_v38, 2  ;;  %5314 = vmatmul.mubr.bf16.gmra.mrb[100].mxu1 %v2764_v7  ;;  %v14504_v7 = vld [vmem:[#allocation100_spill] sm:$0xff] }
 0x215   :  { %v2438_v4 = vmax.f32 %v10573_v20, %v2324_v12  ;;  %v1915_v19 = vsel %vm1587_vm2, %v1902_v5, %v1914_v32  ;;  %v1189_v3 = vadd.f32 %v11494_v56, %v10703_v16  ;;  %v1917_v27 = vsel %vm1587_vm2, %v1904_v0, %v1916_v14 }
 0x216   :  { %v2330_v9 = vmax.f32 %v1363_v31, %v1915_v19  ;;  %v1375_v30 = vmax.f32 %v1185_v34, 0.0  ;;  %v1376_v22 = vmax.f32 %v1187_v55, 0.0  ;;  %v11737_v40 = vmax.f32 %v1364_v35, %v1917_v27  ;;  %v14505_v55 = vld [vmem:[#allocation103_spill] sm:$0xff] }
 0x217   :  { %v2772_v47 = vsel %vm605_vm1, %v2765_v63, %v2771_v15  ;;  %v1381_v37 = vmax.f32 %v1189_v3, 0.0  ;;  %v2769_v20 = vrot.slane %v11717_v2, 2  ;;  %v1191_v56 = vadd.f32 %v11507_v28, %v10738_v52  ;;  %v14507_v3 = vld [vmem:[#allocation104_spill] sm:$0xff] }
 0x218   :  { %v2441_v21 = vmax.f32 %v10597_v23, %v2330_v9  ;;  %v1926_v33 = vrot.slane %v1375_v30, 1  ;;  %v1928_v5 = vrot.slane %v1376_v22, 1  ;;  %5323 = vmatprep.mubr.bf16.mxu1 %v2772_v47  ;;  %v11747_v12 = vpack.c.bf16 %v2438_v4, %v2435_v18  ;;  %v14508_v9 = vld [vmem:[#allocation105_spill] sm:$0xff]  ;;  %4755 = vmatmul.mubr.bf16.gmra.mrb[172].mxu0 %v11717_v2 }
 0x219   :  { %v1938_v0 = vrot.slane %v1381_v37, 1  ;;  %v2770_v35 = vsel %vm605_vm1, %v2763_v48, %v2769_v20  ;;  %v1382_v23 = vmax.f32 %v1191_v56, 0.0  ;;  %v14506_v19 = vmax.f32 %v14504_v7, %v14505_v55 }
 0x21a   :  { %14503 = vst [vmem:[#allocation65_spill] sm:$0xff] %v11747_v12  ;;  %v1927_v63 = vsel %vm1587_vm2, %v1914_v32, %v1926_v33  ;;  %v1929_v34 = vsel %vm1587_vm2, %v1916_v14, %v1928_v5  ;;  %v14509_v28 = vmax.f32 %v14507_v3, %v14508_v9  ;;  %v1195_v18 = vadd.f32 %v11570_v41, %v10703_v16 }
 0x21b   :  { %v2336_v47 = vmax.f32 %v1369_v17, %v1927_v63  ;;  %v11760_v31 = vmax.f32 %v1370_v25, %v1929_v34  ;;  %v1939_v48 = vsel %vm1587_vm2, %v1926_v33, %v1938_v0  ;;  %v1940_v14 = vrot.slane %v1382_v23, 1  ;;  %4764 = vmatprep.mubr.bf16.mxu0 %v11747_v12  ;;  %v14510_v17 = vld [vmem:[#allocation109_spill] sm:$0xff] }
 0x21c   :  { %v11757_v27 = vpack.c.bf16 %v14509_v28, %v14506_v19  ;;  %v2342_v32 = vmax.f32 %v1375_v30, %v1939_v48  ;;  %v1197_v4 = vadd.f32 %v11580_v54, %v10738_v52  ;;  %v2777_v56 = vrot.slane %v11747_v12, 2  ;;  %v14511_v34 = vld [vmem:[#allocation113_spill] sm:$0xff]  ;;  %5324 = vmatmul.mubr.bf16.gmra.mrb[104].mxu1 %v2770_v35 }
 0x21d   :  { %v2444_v7 = vmax.f32 %v10625_v43, %v2336_v47  ;;  %v1387_v63 = vmax.f32 %v1195_v18, 0.0  ;;  %v1199_v33 = vadd.f32 %v11588_v44, %v10703_v16  ;;  %v1941_v30 = vsel %vm1587_vm2, %v1928_v5, %v1940_v14  ;;  %v14513_v16 = vld [vmem:[#allocation106_spill] sm:$0xff]  ;;  %v14514_v44 = vld [vmem:[#allocation107_spill] sm:$0xff]  ;;  %v14516_v5 = vld [vmem:[#allocation108_spill] sm:$0xff] }
 0x21e   :  { %v2447_v41 = vmax.f32 %v14511_v34, %v2342_v32  ;;  %v1388_v55 = vmax.f32 %v1197_v4, 0.0  ;;  %v2778_v19 = vsel %vm605_vm1, %v2771_v15, %v2777_v56  ;;  %v11777_v3 = vmax.f32 %v1376_v22, %v1941_v30  ;;  %v14517_v32 = vld [vmem:[#allocation110_spill] sm:$0xff]  ;;  %v14519_v22 = vld [vmem:[#allocation112_spill] sm:$0xff] }
 0x21f   :  { %v1950_v54 = vrot.slane %v1387_v63, 1  ;;  %v1393_v9 = vmax.f32 %v1199_v33, 0.0  ;;  %v2775_v43 = vrot.slane %v11757_v27, 2  ;;  %v1201_v47 = vadd.f32 %v11600_v49, %v10738_v52  ;;  %5333 = vmatprep.mubr.bf16.mxu1 %v2778_v19  ;;  %v14521_v19 = vld [vmem:[#allocation117_spill] sm:$0xff] }
 0x220   :  { %v1952_v28 = vrot.slane %v1388_v55, 1  ;;  %v11782_v48 = vpack.c.bf16 %v2444_v7, %v2441_v21  ;;  %v14515_v18 = vmax.f32 %v14513_v16, %v14514_v44  ;;  %v14518_v4 = vmax.f32 %v14516_v5, %v14517_v32  ;;  %4765 = vmatmul.mubr.bf16.gmra.mrb[176].mxu0 %v11757_v27 }
 0x221   :  { %v1951_v34 = vsel %vm1587_vm2, %v1938_v0, %v1950_v54  ;;  %v1962_v35 = vrot.slane %v1393_v9, 1  ;;  %v2776_v30 = vsel %vm605_vm1, %v2769_v20, %v2775_v43  ;;  %v1394_v21 = vmax.f32 %v1201_v47, 0.0 }
 0x222   :  { %14512 = vst [vmem:[#allocation55_spill] sm:$0xff] %v11782_v48  ;;  %v11790_v15 = vpack.c.bf16 %v14518_v4, %v14515_v18  ;;  %v2348_v52 = vmax.f32 %v1381_v37, %v1951_v34  ;;  %v1953_v49 = vsel %vm1587_vm2, %v1940_v14, %v1952_v28  ;;  %v2783_v7 = vrot.slane %v11782_v48, 2  ;;  %v14520_v18 = vld [vmem:[#allocation6_spill] sm:$0xff]  ;;  %4774 = vmatprep.mubr.bf16.mxu0 %v11782_v48  ;;  %v14522_v14 = vld [vmem:[#allocation116_spill] sm:$0xff] }
 0x223   :  { %v11799_v16 = vmax.f32 %v1382_v23, %v1953_v49  ;;  %v1963_v44 = vsel %vm1587_vm2, %v1950_v54, %v1962_v35  ;;  %v2168_v5 = vsel %vm1587_vm2, %v1962_v35, %v14520_v18  ;;  %v1964_v4 = vrot.slane %v1394_v21, 1  ;;  %v14523_v54 = vld [vmem:[#allocation111_spill] sm:$0xff]  ;;  %v14524_v49 = vld [vmem:[#allocation114_spill] sm:$0xff] }
 0x224   :  { %v2781_v0 = vrot.slane %v11790_v15, 2  ;;  %v2450_v32 = vmax.f32 %v14521_v19, %v2348_v52  ;;  %v2354_v20 = vmax.f32 %v1387_v63, %v1963_v44  ;;  %v2360_v37 = vmax.f32 %v1393_v9, %v2168_v5  ;;  %v14526_v35 = vld [vmem:[#allocation115_spill] sm:$0xff]  ;;  %v14529_v63 = vld [vmem:[#allocation5_spill] sm:$0xff]  ;;  %5334 = vmatmul.mubr.bf16.gmra.mrb[108].mxu1 %v2776_v30 }
 0x225   :  { %v2784_v23 = vsel %vm605_vm1, %v2777_v56, %v2783_v7  ;;  %v14525_v33 = vmax.f32 %v14523_v54, %v14524_v49  ;;  %v14527_v18 = vld [vmem:[#allocation3_spill] sm:$0xff]  ;;  %v1965_v5 = vsel %vm1587_vm2, %v1952_v28, %v1964_v4  ;;  %v14531_v19 = vld [vmem:[#allocation121_spill] sm:$0xff] }
 0x226   :  { %v2782_v34 = vsel %vm605_vm1, %v2775_v43, %v2781_v0  ;;  %v14528_v25 = vmax.f32 %v14526_v35, %v14527_v18  ;;  %v2453_v9 = vmax.f32 %v14529_v63, %v2354_v20  ;;  %v14530_v52 = vld [vmem:[#allocation119_spill] sm:$0xff]  ;;  %v2169_v47 = vsel %vm1587_vm2, %v1964_v4, %v14531_v19  ;;  %v14535_v35 = vld [vmem:[#allocation4_spill] sm:$0xff]  ;;  %v14536_v18 = vld [vmem:[#allocation118_spill] sm:$0xff]  ;;  %5343 = vmatprep.mubr.bf16.mxu1 %v2784_v23 }
 0x227   :  { %v2456_v44 = vmax.f32 %v14530_v52, %v2360_v37  ;;  %v2355_v56 = vmax.f32 %v1388_v55, %v1965_v5  ;;  %v2361_v51 = vmax.f32 %v1394_v21, %v2169_v47  ;;  %v11824_v43 = vpack.c.bf16 %v2450_v32, %v2447_v41  ;;  %v14537_v55 = vld [vmem:[#allocation8_spill] sm:$0xff]  ;;  %v14538_v21 = vld [vmem:[#allocation9_spill] sm:$0xff]  ;;  %v14548_v5 = vld [vmem:[#allocation10_spill] sm:$0xff] }
 0x228   :  { %v11817_v24 = vpack.c.bf16 %v14528_v25, %v14525_v33  ;;  %v14534_v25 = vld [vmem:[#allocation120_spill] sm:$0xff]  ;;  %v14539_v32 = vmax.f32 %v14537_v55, %v14538_v21  ;;  %v14541_v30 = vld [vmem:[#allocation13_spill] sm:$0xff]  ;;  %4775 = vmatmul.mubr.bf16.gmra.mrb[180].mxu0 %v11790_v15 }
 0x229   :  { %14532 = vst [vmem:[#allocation58_spill] sm:$0xff] %v11824_v43  ;;  %v11827_v49 = vpack.c.bf16 %v2456_v44, %v2453_v9  ;;  %v14086_v33 = vrot.slane %v14534_v25, 2  ;;  %v2454_v20 = vmax.f32 %v14535_v35, %v2355_v56  ;;  %v2457_v37 = vmax.f32 %v14536_v18, %v2361_v51  ;;  %v14540_v47 = vld [vmem:[#allocation12_spill] sm:$0xff]  ;;  %4784 = vmatprep.mubr.bf16.mxu0 %v11824_v43  ;;  %v14551_v18 = vld [vmem:[#allocation14_spill] sm:$0xff] }
 0x22a   :  { %v2787_v54 = vrot.slane %v11817_v24, 2  ;;  %v2789_v4 = vrot.slane %v11824_v43, 2  ;;  %v14542_v63 = vmax.f32 %v14540_v47, %v14541_v30  ;;  %v14544_v51 = vld [vmem:[#allocation16_spill] sm:$0xff] }
 0x22b   :  { %14533 = vst [vmem:[#allocation59_spill] sm:$0xff] %v11827_v49  ;;  %v11845_v52 = vpack.c.bf16 %v2457_v37, %v2454_v20  ;;  %v14547_v44 = vld [vmem:[#allocation20_spill] sm:$0xff]  ;;  %v14554_v20 = vld [vmem:[#allocation25_spill] sm:$0xff] }
 0x22c   :  { %v2788_v28 = vsel %vm605_vm1, %v2781_v0, %v2787_v54  ;;  %v2794_v41 = vsel %vm605_vm1, %v2787_v54, %v14086_v33  ;;  %v11843_v9 = vpack.c.bf16 %v14542_v63, %v14539_v32  ;;  %v14545_v0 = vld [vmem:[#allocation17_spill] sm:$0xff]  ;;  %v14549_v19 = vmax.f32 %v14547_v44, %v14548_v5  ;;  %v14550_v35 = vld [vmem:[#allocation24_spill] sm:$0xff]  ;;  %5344 = vmatmul.mubr.bf16.gmra.mrb[112].mxu1 %v2782_v34 }
 0x22d   :  { %14543 = vst [vmem:[#allocation62_spill] sm:$0xff] %v11845_v52  ;;  %v14546_v23 = vmax.f32 %v14544_v51, %v14545_v0  ;;  %v2790_v54 = vsel %vm605_vm1, %v2783_v7, %v2789_v4  ;;  %v14552_v55 = vmax.f32 %v14550_v35, %v14551_v18  ;;  %v14553_v21 = vld [vmem:[#allocation28_spill] sm:$0xff]  ;;  %v14557_v0 = vld [vmem:[#allocation15_spill] sm:$0xff]  ;;  %v14560_v7 = vld [vmem:[#allocation18_spill] sm:$0xff]  ;;  %v2795_v18 = vrot.slane %v11827_v49, 2 }
 0x22e   :  { %v14555_v37 = vmax.f32 %v14553_v21, %v14554_v20  ;;  %v14085_v47 = vrot.slane %v11843_v9, 2  ;;  %v14556_v51 = vld [vmem:[#allocation32_spill] sm:$0xff]  ;;  %5353 = vmatprep.mubr.bf16.mxu1 %v2790_v54  ;;  %v14563_v20 = vld [vmem:[#allocation29_spill] sm:$0xff]  ;;  %v14585_v52 = vld [vmem:[#allocation42_spill] sm:$0xff] }
 0x22f   :  { %v11855_v56 = vpack.c.bf16 %v14549_v19, %v14546_v23  ;;  %v14558_v23 = vmax.f32 %v14556_v51, %v14557_v0  ;;  %v14559_v44 = vld [vmem:[#allocation36_spill] sm:$0xff]  ;;  %v14566_v0 = vld [vmem:[#allocation23_spill] sm:$0xff]  ;;  %v14572_v33 = vld [vmem:[#allocation41_spill] sm:$0xff] }
 0x230   :  { %v11864_v32 = vpack.c.bf16 %v14555_v37, %v14552_v55  ;;  %v14561_v5 = vmax.f32 %v14559_v44, %v14560_v7  ;;  %v14562_v21 = vld [vmem:[#allocation40_spill] sm:$0xff]  ;;  %4785 = vmatmul.mubr.bf16.gmra.mrb[184].mxu0 %v11817_v24  ;;  %v14569_v7 = vld [vmem:[#allocation26_spill] sm:$0xff] }
 0x231   :  { %v2713_v30 = vrot.slane %v11855_v56, 2  ;;  %v14564_v37 = vmax.f32 %v14562_v21, %v14563_v20  ;;  %v14565_v51 = vld [vmem:[#allocation44_spill] sm:$0xff]  ;;  %4794 = vmatprep.mubr.bf16.mxu0 %v11827_v49 }
 0x232   :  { %v2719_v63 = vrot.slane %v11864_v32, 2  ;;  %v11875_v19 = vpack.c.bf16 %v14561_v5, %v14558_v23  ;;  %v14567_v23 = vmax.f32 %v14565_v51, %v14566_v0  ;;  %v14568_v54 = vld [vmem:[#allocation48_spill] sm:$0xff] }
 0x233   :  { %v11880_v35 = vsel %vm605_vm1, %v14085_v47, %v2713_v30  ;;  %v14570_v5 = vmax.f32 %v14568_v54, %v14569_v7  ;;  %v14571_v47 = vld [vmem:[#allocation52_spill] sm:$0xff]  ;;  %v2796_v54 = vsel %vm605_vm1, %v2789_v4, %v2795_v18  ;;  %v14582_v7 = vld [vmem:[#allocation45_spill] sm:$0xff] }
 0x234   :  { %v11884_v34 = vsel %vm605_vm1, %v2713_v30, %v2719_v63  ;;  %v2725_v55 = vrot.slane %v11875_v19, 2  ;;  %v11893_v44 = vpack.c.bf16 %v14567_v23, %v14564_v37  ;;  %v14573_v43 = vmax.f32 %v14571_v47, %v14572_v33  ;;  %v14574_v20 = vld [vmem:[#allocation56_spill] sm:$0xff]  ;;  %v14575_v37 = vld [vmem:[#allocation31_spill] sm:$0xff]  ;;  %v14578_v23 = vld [vmem:[#allocation38_spill] sm:$0xff]  ;;  %5354 = vmatmul.mubr.bf16.gmra.mrb[116].mxu1 %v2788_v28 }
 0x235   :  { %v14576_v51 = vmax.f32 %v14574_v20, %v14575_v37  ;;  %v14577_v0 = vld [vmem:[#allocation60_spill] sm:$0xff]  ;;  %v14580_v33 = vld [vmem:[#allocation21_spill] sm:$0xff]  ;;  %5363 = vmatprep.mubr.bf16.mxu1 %v2796_v54  ;;  %v14596_v54 = vmax.f32 %v14469_v8, %v11572_v42  ;;  %v14107_v8 = vrot.slane %v11717_v2, 3 }
 0x236   :  { %v11902_v30 = vpack.c.bf16 %v14573_v43, %v14570_v5  ;;  %v11906_v48 = vsel %vm605_vm1, %v2719_v63, %v2725_v55  ;;  %v14100_v21 = vrot.slane %v11893_v44, 2  ;;  %v14579_v12 = vmax.f32 %v14577_v0, %v14578_v23  ;;  %v14581_v63 = vld [vmem:[#allocation64_spill] sm:$0xff]  ;;  %v14589_v0 = vld [vmem:[#allocation43_spill] sm:$0xff] }
 0x237   :  { %v2556_v47 = vrot.slane %v14580_v33, 1  ;;  %v14583_v5 = vmax.f32 %v14581_v63, %v14582_v7  ;;  %v14584_v49 = vld [vmem:[#allocation68_spill] sm:$0xff]  ;;  %v14594_v63 = vmax.f32 %v14462_v60, %v11504_v1  ;;  %v14112_v60 = vrot.slane %v11717_v2, 1 }
 0x238   :  { %v11915_v38 = vpack.c.bf16 %v14579_v12, %v14576_v51  ;;  %v11921_v43 = vsel %vm605_vm1, %v2725_v55, %v14100_v21  ;;  %v14586_v20 = vmax.f32 %v14584_v49, %v14585_v52  ;;  %v14587_v12 = vld [vmem:[#allocation7_spill] sm:$0xff]  ;;  %v14588_v4 = vld [vmem:[#allocation72_spill] sm:$0xff]  ;;  %v14592_v55 = vld [vmem:[#allocation53_spill] sm:$0xff]  ;;  %v14595_v49 = vmax.f32 %v14466_v45, %v11541_v26  ;;  %4795 = vmatmul.mubr.bf16.gmra.mrb[188].mxu0 %v14534_v25 }
 0x239   :  { %v2555_v51 = vrot.slane %v14587_v12, 1  ;;  %v14590_v23 = vmax.f32 %v14588_v4, %v14589_v0  ;;  %v14593_v21 = vmax.f32 %v14591_v36, %v14592_v55  ;;  %v14597_v36 = vmax.f32 %v14483_v39, %v11633_v59  ;;  %v14598_v26 = vld [vmem:[#allocation22_spill] sm:$0xff] }
 0x23a   :  { %v11930_v37 = vpack.c.bf16 %v14586_v20, %v14583_v5  ;;  %v11947_v52 = vpack.c.bf16 %v14595_v49, %v14594_v63  ;;  %v2624_v1 = vrot.slane %v11757_v27, 1  ;;  %v2564_v45 = vrot.slane %v14598_v26, 1  ;;  %v14601_v4 = vld [vmem:[#allocation122_spill] sm:$0xff] }
 0x23b   :  { %v11939_v58 = vpack.c.bf16 %v14593_v21, %v14590_v23  ;;  %v2557_v28 = vsel %vm1587_vm2, %v2555_v51, %v2556_v47  ;;  %v11957_v21 = vpack.c.bf16 %v14597_v36, %v14596_v54  ;;  %v14599_v7 = vmax.f32 %v10483_v29, %v11654_v53  ;;  %v8570_v53 = vld [vmem:[%s13900_s3 + $0x200] ss:$8 sps:$4 sm:$0xff]  }
 0x23c   :  { %4837 = vmatprep.mubr.bf16.mxu0 %v2557_v28  ;;  %v14600_v5 = vmax.f32 %v14493_v6, %v11675_v62  ;;  %v11973_v42 = vsel %vm1587_vm2, %v14112_v60, %v2624_v1  ;;  %v2630_v59 = vrot.slane %v11790_v15, 1  ;;  %v2926_v39 = vrot.slane %v11757_v27, 3  ;;  %5364 = vmatmul.mubr.bf16.gmra.mrb[120].mxu1 %v2794_v41  ;;  %v8578_v41 = vld [vmem:[%s13900_s3 + $0x214] ss:$8 sps:$4 sm:$0xff]  }
 0x23d   :  { %v14602_v0 = vrot.slane %v14601_v4, 2  ;;  %v14603_v62 = vmax.f32 %v14502_v46, %v11704_v11  ;;  %v14604_v6 = vmax.f32 %v10566_v10, %v11722_v50  ;;  %v2636_v55 = vrot.slane %v11817_v24, 1 }
 0x23e   :  { %v11968_v20 = vpack.c.bf16 %v14600_v5, %v14599_v7  ;;  %v12002_v63 = vsel %vm2856_vm3, %v14107_v8, %v2926_v39  ;;  %v2932_v11 = vrot.slane %v11790_v15, 3  ;;  %v14606_v10 = vmax.f32 %v10592_v57, %v11737_v40  ;;  %v8605_v8 = vld [vmem:[%s13900_s3 + $0x274] ss:$8 sps:$4 sm:$0xff]  }
 0x23f   :  { %v2850_v29 = vsel %vm605_vm1, %v2795_v18, %v14602_v0  ;;  %v11990_v23 = vpack.c.bf16 %v14604_v6, %v14603_v62  ;;  %v11997_v18 = vsel %vm1587_vm2, %v2624_v1, %v2630_v59  ;;  %v14607_v46 = vmax.f32 %v14510_v17, %v11760_v31 }
 0x240   :  { %5373 = vmatprep.mubr.bf16.mxu1 %v2850_v29  ;;  %v2857_v49 = vrot.slane %v14587_v12, 3  ;;  %v12015_v28 = vsel %vm1587_vm2, %v2630_v59, %v2636_v55  ;;  %v2642_v54 = vrot.slane %v14534_v25, 1  ;;  %4838 = vmatmul.mubr.bf16.vlgmr.msra.gmra.mrb[128].mxu0 %v11843_v9  ;;  %v2565_v36 = vsel %vm1587_vm2, %v2556_v47, %v2564_v45  ;;  %v8576_v47 = vld [vmem:[%s13900_s3 + $0x210] ss:$8 sps:$4 sm:$0xff]  }
 0x241   :  { %14605 = vst [vmem:[#allocation69_spill] sm:$0xff] %v11990_v23  ;;  %v12011_v50 = vpack.c.bf16 %v14607_v46, %v14606_v10  ;;  %v12021_v1 = vsel %vm2856_vm3, %v2926_v39, %v2932_v11  ;;  %v2938_v57 = vrot.slane %v11817_v24, 3  ;;  %v14608_v40 = vmax.f32 %v14519_v22, %v11777_v3  ;;  %4847 = vmatprep.mubr.bf16.mxu0 %v2565_v36  ;;  %v8581_v22 = vld [vmem:[%s13900_s3 + $0x224] ss:$8 sps:$4 sm:$0xff]   ;;  %v8587_v10 = vld [vmem:[%s13900_s3 + $0x234] ss:$8 sps:$4 sm:$0xff]  }
 0x242   :  { %v14609_v31 = vmax.f32 %v14522_v14, %v11799_v16  ;;  %v2858_v7 = vrot.slane %v14580_v33, 3  ;;  %4999 = vmatpush1.bf16.msra.mxu0 %v8570_v53  ;;  %v12037_v5 = vsel %vm1587_vm2, %v2636_v55, %v2642_v54  ;;  %v12040_v59 = vsel %vm1587_vm2, %v2642_v54, %v2555_v51  ;;  %v14612_v53 = vld [vmem:[#allocation37_spill] sm:$0xff] }
 0x243   :  { %v2944_v3 = vrot.slane %v14534_v25, 3  ;;  %5000 = vmatprep.subr.bf16.mxu0 %v8578_v41  ;;  %v12047_v16 = vsel %vm2856_vm3, %v2932_v11, %v2938_v57  ;;  %v14610_v0 = vrot.slane %v14587_v12, 2  ;;  %v14611_v51 = vrot.slane %v14534_v25, 2  ;;  %v8579_v11 = vld [vmem:[%s13900_s3 + $0x220] ss:$8 sps:$4 sm:$0xff]  }
 0x244   :  { %v12030_v17 = vpack.c.bf16 %v14609_v31, %v14608_v40  ;;  %v2570_v62 = vrot.slane %v14612_v53, 1  ;;  %v14104_v6 = vrot.slane %v11855_v56, 1  ;;  %v2568_v55 = vrot.slane %v11864_v32, 1  ;;  %v8585_v31 = vld [vmem:[%s13900_s3 + $0x230] ss:$8 sps:$4 sm:$0xff]  }
 0x245   :  { %v12050_v14 = vsel %vm2856_vm3, %v2938_v57, %v2944_v3  ;;  %v12053_v39 = vsel %vm2856_vm3, %v2944_v3, %v2857_v49  ;;  %v2846_v29 = vsel %vm605_vm1, %v14611_v51, %v14610_v0  ;;  %v2859_v41 = vsel %vm2856_vm3, %v2857_v49, %v2858_v7  ;;  %v8557_v51 = vld [vmem:[%s13900_s3 + $0x514] ss:$8 sps:$4 sm:$0xff]  }
 0x246   :  { %5374 = vmatmul.mubr.bf16.gmra.mrb[124].mxu1 %v2846_v29  ;;  %5001 = vmatpush1.bf16.msra.mxu0 %v8576_v47  ;;  %v12073_v46 = vsel %vm1587_vm2, %v14104_v6, %v2568_v55  ;;  %v14103_v54 = vrot.slane %v11855_v56, 3  ;;  %v2574_v49 = vrot.slane %v11875_v19, 1  ;;  %v2870_v36 = vrot.slane %v11864_v32, 3  ;;  %v8590_v29 = vld [vmem:[%s13900_s3 + $0x244] ss:$8 sps:$4 sm:$0xff]  }
 0x247   :  { %5416 = vmatprep.mubr.bf16.mxu1 %v2859_v41  ;;  %5002 = vmatprep.subr.bf16.mxu0 %v8581_v22  ;;  %v2571_v57 = vsel %vm1587_vm2, %v2564_v45, %v2570_v62  ;;  %v2866_v40 = vrot.slane %v14598_v26, 3  ;;  %v14106_v22 = vrot.slane %v11893_v44, 1  ;;  %v8552_v45 = vld [vmem:[%s13900_s3 + $0x500] ss:$8 sps:$4 sm:$0xff]   ;;  %v2876_v0 = vrot.slane %v11875_v19, 3 }
 0x248   :  { %4848 = vmatmul.mubr.bf16.gmra.mrb[132].mxu0 %v11855_v56  ;;  %v12085_v47 = vsel %vm1587_vm2, %v2568_v55, %v2574_v49  ;;  %v12090_v3 = vsel %vm2856_vm3, %v14103_v54, %v2870_v36  ;;  %v14105_v41 = vrot.slane %v11893_v44, 3  ;;  %v8588_v6 = vld [vmem:[%s13900_s3 + $0x240] ss:$8 sps:$4 sm:$0xff]  }
 0x249   :  { %4857 = vmatprep.mubr.bf16.mxu0 %v2571_v57  ;;  %v12106_v55 = vsel %vm1587_vm2, %v2574_v49, %v14106_v22  ;;  %v2867_v54 = vsel %vm2856_vm3, %v2858_v7, %v2866_v40  ;;  %v8560_v7 = vld [vmem:[%s13900_s3 + $0x524] ss:$8 sps:$4 sm:$0xff]   ;;  %v3084_v22 = vrot.slane %v11790_v15, 4 }
 0x24a   :  { %5003 = vmatpush1.bf16.msra.mxu0 %v8579_v11  ;;  %v14613_v11 = vld [vmem:[#allocation30_spill] sm:$0xff]  ;;  %v12121_v49 = vsel %vm2856_vm3, %v2876_v0, %v14105_v41  ;;  %v3078_v41 = vrot.slane %v11757_v27, 4 }
 0x24b   :  { %5004 = vmatprep.subr.bf16.mxu0 %v8587_v10  ;;  %v2576_v57 = vrot.slane %v14613_v11, 1  ;;  %v12111_v10 = vsel %vm2856_vm3, %v2870_v36, %v2876_v0  ;;  %v8555_v36 = vld [vmem:[%s13900_s3 + $0x510] ss:$8 sps:$4 sm:$0xff]   ;;  %v8558_v0 = vld [vmem:[%s13900_s3 + $0x520] ss:$8 sps:$4 sm:$0xff]  }
 0x24c   :  { %v8566_v27 = vld [vmem:[%s13900_s3 + $0x544] ss:$8 sps:$4 sm:$0xff]   ;;  %v12174_v15 = vsel %vm3008_vm4, %v3078_v41, %v3084_v22 }
 0x24e   :  { %5417 = vmatmul.mubr.bf16.vlgmr.msra.gmra.mrb[64].mxu1 %v11880_v35  ;;  %5005 = vmatpush1.bf16.msra.mxu0 %v8585_v31  ;;  %v8596_v35 = vld [vmem:[%s13900_s3 + $0x254] ss:$8 sps:$4 sm:$0xff]   ;;  %v2577_v31 = vsel %vm1587_vm2, %v2570_v62, %v2576_v57  ;;  %v8599_v62 = vld [vmem:[%s13900_s3 + $0x264] ss:$8 sps:$4 sm:$0xff]  }
 0x24f   :  { %5426 = vmatprep.mubr.bf16.mxu1 %v2867_v54  ;;  %5578 = vmatpush1.bf16.msra.mxu1 %v8552_v45  ;;  %v2872_v54 = vrot.slane %v14612_v53, 3  ;;  %v8594_v45 = vld [vmem:[%s13900_s3 + $0x250] ss:$8 sps:$4 sm:$0xff]  }
 0x250   :  { %5579 = vmatprep.subr.bf16.mxu1 %v8557_v51  ;;  %5006 = vmatprep.subr.bf16.mxu0 %v8590_v29  ;;  %v8563_v51 = vld [vmem:[%s13900_s3 + $0x534] ss:$8 sps:$4 sm:$0xff]   ;;  %v14614_v29 = vld [vmem:[#allocation35_spill] sm:$0xff] }
 0x251   :  { %4858 = vmatmul.mubr.bf16.gmra.mrb[136].mxu0 %v11864_v32 }
 0x252   :  { %4867 = vmatprep.mubr.bf16.mxu0 %v2577_v31  ;;  %5007 = vmatpush1.bf16.msra.mxu0 %v8588_v6  ;;  %v2873_v6 = vsel %vm2856_vm3, %v2866_v40, %v2872_v54  ;;  %v2582_v31 = vrot.slane %v14614_v29, 1  ;;  %v3090_v40 = vrot.slane %v11817_v24, 4 }
 0x253   :  { %5580 = vmatpush1.bf16.msra.mxu1 %v8555_v36  ;;  %5008 = vmatprep.subr.bf16.mxu0 %v8596_v35  ;;  %v8561_v36 = vld [vmem:[%s13900_s3 + $0x530] ss:$8 sps:$4 sm:$0xff]   ;;  %v8597_v35 = vld [vmem:[%s13900_s3 + $0x260] ss:$8 sps:$4 sm:$0xff]  }
 0x254   :  { %5581 = vmatprep.subr.bf16.mxu1 %v8560_v7  ;;  %v14108_v7 = vrot.slane %v11717_v2, 4 }
 0x256   :  { %5427 = vmatmul.mubr.bf16.gmra.mrb[68].mxu1 %v11884_v34  ;;  %5009 = vmatpush1.bf16.msra.mxu0 %v8594_v45  ;;  %v14110_v34 = vrot.slane %v14587_v12, 4  ;;  %v3096_v45 = vrot.slane %v14534_v25, 4  ;;  %v12171_v24 = vsel %vm3008_vm4, %v14108_v7, %v3078_v41  ;;  %v2583_v25 = vsel %vm1587_vm2, %v2576_v57, %v2582_v31  ;;  %v8564_v41 = vld [vmem:[%s13900_s3 + $0x540] ss:$8 sps:$4 sm:$0xff]   ;;  %v8569_v57 = vld [vmem:[%s13900_s3 + $0x554] ss:$8 sps:$4 sm:$0xff]  }
 0x257   :  { %5436 = vmatprep.mubr.bf16.mxu1 %v2873_v6  ;;  %5582 = vmatpush1.bf16.msra.mxu1 %v8558_v0  ;;  %v12177_v0 = vsel %vm3008_vm4, %v3084_v22, %v3090_v40  ;;  %v2878_v6 = vrot.slane %v14613_v11, 3  ;;  %v8603_v22 = vld [vmem:[%s13900_s3 + $0x270] ss:$8 sps:$4 sm:$0xff]   ;;  %v14109_v7 = vrot.slane %v11855_v56, 4 }
 0x258   :  { %5583 = vmatprep.subr.bf16.mxu1 %v8563_v51  ;;  %5010 = vmatprep.subr.bf16.mxu0 %v8599_v62  ;;  %v12182_v51 = vsel %vm3008_vm4, %v3090_v40, %v3096_v45  ;;  %v12187_v62 = vsel %vm3008_vm4, %v3096_v45, %v14110_v34  ;;  %v8608_v40 = vld [vmem:[%s13900_s3 + $0x284] ss:$8 sps:$4 sm:$0xff]   ;;  %v14111_v34 = vrot.slane %v11893_v44, 4 }
 0x259   :  { %4868 = vmatmul.mubr.bf16.gmra.mrb[140].mxu0 %v11875_v19 }
 0x25a   :  { %4877 = vmatprep.mubr.bf16.mxu0 %v2583_v25  ;;  %5011 = vmatpush1.bf16.msra.mxu0 %v8597_v35  ;;  %v14615_v35 = vld [vmem:[#allocation39_spill] sm:$0xff]  ;;  %v8614_v25 = vld [vmem:[%s13900_s3 + $0x294] ss:$8 sps:$4 sm:$0xff]  }
 0x25b   :  { %5584 = vmatpush1.bf16.msra.mxu1 %v8561_v36  ;;  %5012 = vmatprep.subr.bf16.mxu0 %v8605_v8  ;;  %v2588_v45 = vrot.slane %v14615_v35, 1  ;;  %v2879_v36 = vsel %vm2856_vm3, %v2872_v54, %v2878_v6  ;;  %v8606_v8 = vld [vmem:[%s13900_s3 + $0x280] ss:$8 sps:$4 sm:$0xff]   ;;  %v8575_v54 = vld [vmem:[%s13900_s3 + $0x564] ss:$8 sps:$4 sm:$0xff]  }
 0x25c   :  { %5585 = vmatprep.subr.bf16.mxu1 %v8566_v27  ;;  %v8567_v27 = vld [vmem:[%s13900_s3 + $0x550] ss:$8 sps:$4 sm:$0xff]  }
 0x25e   :  { %5437 = vmatmul.mubr.bf16.gmra.mrb[72].mxu1 %v11906_v48  ;;  %5013 = vmatpush1.bf16.msra.mxu0 %v8603_v22  ;;  %v3022_v48 = vrot.slane %v11864_v32, 4  ;;  %v2589_v22 = vsel %vm1587_vm2, %v2582_v31, %v2588_v45  ;;  %v8612_v32 = vld [vmem:[%s13900_s3 + $0x290] ss:$8 sps:$4 sm:$0xff]   ;;  %v8584_v31 = vld [vmem:[%s13900_s3 + $0x574] ss:$8 sps:$4 sm:$0xff]  }
 0x25f   :  { %5446 = vmatprep.mubr.bf16.mxu1 %v2879_v36  ;;  %5586 = vmatpush1.bf16.msra.mxu1 %v8564_v41  ;;  %v2884_v36 = vrot.slane %v14614_v29, 3 }
 0x260   :  { %5587 = vmatprep.subr.bf16.mxu1 %v8569_v57  ;;  %5014 = vmatprep.subr.bf16.mxu0 %v8608_v40  ;;  %v12224_v41 = vsel %vm3008_vm4, %v14109_v7, %v3022_v48  ;;  %v8573_v57 = vld [vmem:[%s13900_s3 + $0x560] ss:$8 sps:$4 sm:$0xff]   ;;  %v8617_v40 = vld [vmem:[%s13900_s3 + $0x2a4] ss:$8 sps:$4 sm:$0xff]   ;;  %v3028_v7 = vrot.slane %v11875_v19, 4 }
 0x261   :  { %4878 = vmatmul.mubr.bf16.gmra.mrb[144].mxu0 %v11893_v44  ;;  %v8621_v19 = vld [vmem:[%s13900_s3 + $0x2b0] ss:$8 sps:$4 sm:$0xff]  }
 0x262   :  { %4887 = vmatprep.mubr.bf16.mxu0 %v2589_v22  ;;  %5015 = vmatpush1.bf16.msra.mxu0 %v8606_v8  ;;  %v2594_v8 = vrot.slane %v11442_v61, 1  ;;  %v8623_v22 = vld [vmem:[%s13900_s3 + $0x2b4] ss:$8 sps:$4 sm:$0xff]  }
 0x263   :  { %5588 = vmatpush1.bf16.msra.mxu1 %v8567_v27  ;;  %5016 = vmatprep.subr.bf16.mxu0 %v8614_v25  ;;  %v2885_v27 = vsel %vm2856_vm3, %v2878_v6, %v2884_v36  ;;  %v8615_v25 = vld [vmem:[%s13900_s3 + $0x2a0] ss:$8 sps:$4 sm:$0xff]  }
 0x264   :  { %5589 = vmatprep.subr.bf16.mxu1 %v8575_v54  ;;  %v8582_v54 = vld [vmem:[%s13900_s3 + $0x570] ss:$8 sps:$4 sm:$0xff]   ;;  %v2595_v6 = vsel %vm1587_vm2, %v2588_v45, %v2594_v8  ;;  %v8602_v45 = vld [vmem:[%s13900_s3 + $0x594] ss:$8 sps:$4 sm:$0xff]  }
 0x266   :  { %5447 = vmatmul.mubr.bf16.gmra.mrb[76].mxu1 %v11921_v43  ;;  %5017 = vmatpush1.bf16.msra.mxu0 %v8612_v32  ;;  %v8593_v43 = vld [vmem:[%s13900_s3 + $0x584] ss:$8 sps:$4 sm:$0xff]   ;;  %v2737_v32 = vrot.slane %v11902_v30, 2 }
 0x267   :  { %5456 = vmatprep.mubr.bf16.mxu1 %v2885_v27  ;;  %5590 = vmatpush1.bf16.msra.mxu1 %v8573_v57  ;;  %v12259_v57 = vsel %vm3008_vm4, %v3022_v48, %v3028_v7  ;;  %v2890_v27 = vrot.slane %v14615_v35, 3  ;;  %v8626_v48 = vld [vmem:[%s13900_s3 + $0x2c4] ss:$8 sps:$4 sm:$0xff]  }
 0x268   :  { %5591 = vmatprep.subr.bf16.mxu1 %v8584_v31  ;;  %5018 = vmatprep.subr.bf16.mxu0 %v8617_v40  ;;  %v8591_v31 = vld [vmem:[%s13900_s3 + $0x580] ss:$8 sps:$4 sm:$0xff]   ;;  %v14616_v40 = vrot.slane %v11893_v44, 2 }
 0x269   :  { %4888 = vmatmul.mubr.bf16.gmra.mrb[148].mxu0 %v11902_v30 }
 0x26a   :  { %4897 = vmatprep.mubr.bf16.mxu0 %v2595_v6  ;;  %5019 = vmatpush1.bf16.msra.mxu0 %v8615_v25  ;;  %v2738_v25 = vsel %vm605_vm1, %v14616_v40, %v2737_v32  ;;  %v2891_v6 = vsel %vm2856_vm3, %v2884_v36, %v2890_v27  ;;  %v8632_v40 = vld [vmem:[%s13900_s3 + $0x2d4] ss:$8 sps:$4 sm:$0xff]   ;;  %v8611_v36 = vld [vmem:[%s13900_s3 + $0x5a4] ss:$8 sps:$4 sm:$0xff]  }
 0x26b   :  { %5592 = vmatpush1.bf16.msra.mxu1 %v8582_v54  ;;  %5020 = vmatprep.subr.bf16.mxu0 %v8623_v22  ;;  %v2600_v54 = vrot.slane %v11528_v13, 1  ;;  %v8624_v22 = vld [vmem:[%s13900_s3 + $0x2c0] ss:$8 sps:$4 sm:$0xff]  }
 0x26c   :  { %5593 = vmatprep.subr.bf16.mxu1 %v8593_v43  ;;  %v8600_v43 = vld [vmem:[%s13900_s3 + $0x590] ss:$8 sps:$4 sm:$0xff]  }
 0x26e   :  { %5457 = vmatmul.mubr.bf16.gmra.mrb[80].mxu1 %v2738_v25  ;;  %5021 = vmatpush1.bf16.msra.mxu0 %v8621_v19  ;;  %v2601_v19 = vsel %vm1587_vm2, %v2594_v8, %v2600_v54  ;;  %v12298_v25 = vsel %vm3008_vm4, %v3028_v7, %v14111_v34  ;;  %v8609_v8 = vld [vmem:[%s13900_s3 + $0x5a0] ss:$8 sps:$4 sm:$0xff]   ;;  %v8620_v7 = vld [vmem:[%s13900_s3 + $0x5b4] ss:$8 sps:$4 sm:$0xff]  }
 0x26f   :  { %5466 = vmatprep.mubr.bf16.mxu1 %v2891_v6  ;;  %5594 = vmatpush1.bf16.msra.mxu1 %v8591_v31  ;;  %v2743_v31 = vrot.slane %v11915_v38, 2  ;;  %v2896_v6 = vrot.slane %v11442_v61, 3 }
 0x270   :  { %5595 = vmatprep.subr.bf16.mxu1 %v8602_v45  ;;  %5022 = vmatprep.subr.bf16.mxu0 %v8626_v48  ;;  %v8630_v45 = vld [vmem:[%s13900_s3 + $0x2d0] ss:$8 sps:$4 sm:$0xff]   ;;  %v8635_v48 = vld [vmem:[%s13900_s3 + $0x2e4] ss:$8 sps:$4 sm:$0xff]  }
 0x271   :  { %4898 = vmatmul.mubr.bf16.gmra.mrb[152].mxu0 %v11915_v38 }
 0x272   :  { %4907 = vmatprep.mubr.bf16.mxu0 %v2601_v19  ;;  %5023 = vmatpush1.bf16.msra.mxu0 %v8624_v22  ;;  %v2744_v22 = vsel %vm605_vm1, %v2737_v32, %v2743_v31  ;;  %v14617_v19 = vld [vmem:[#allocation50_spill] sm:$0xff]  ;;  %v8641_v32 = vld [vmem:[%s13900_s3 + $0x2f4] ss:$8 sps:$4 sm:$0xff]  }
 0x273   :  { %5596 = vmatpush1.bf16.msra.mxu1 %v8600_v43  ;;  %5024 = vmatprep.subr.bf16.mxu0 %v8632_v40  ;;  %v2606_v34 = vrot.slane %v14617_v19, 1  ;;  %v2897_v43 = vsel %vm2856_vm3, %v2890_v27, %v2896_v6  ;;  %v8633_v40 = vld [vmem:[%s13900_s3 + $0x2e0] ss:$8 sps:$4 sm:$0xff]   ;;  %v8629_v27 = vld [vmem:[%s13900_s3 + $0x5c4] ss:$8 sps:$4 sm:$0xff]  }
 0x274   :  { %5597 = vmatprep.subr.bf16.mxu1 %v8611_v36  ;;  %v8618_v36 = vld [vmem:[%s13900_s3 + $0x5b0] ss:$8 sps:$4 sm:$0xff]  }
 0x276   :  { %5467 = vmatmul.mubr.bf16.gmra.mrb[84].mxu1 %v2744_v22  ;;  %5025 = vmatpush1.bf16.msra.mxu0 %v8630_v45  ;;  %v2607_v45 = vsel %vm1587_vm2, %v2600_v54, %v2606_v34  ;;  %v2902_v22 = vrot.slane %v11528_v13, 3  ;;  %v8638_v54 = vld [vmem:[%s13900_s3 + $0x5d4] ss:$8 sps:$4 sm:$0xff]  }
 0x277   :  { %5476 = vmatprep.mubr.bf16.mxu1 %v2897_v43  ;;  %5598 = vmatpush1.bf16.msra.mxu1 %v8609_v8  ;;  %v2749_v8 = vrot.slane %v11930_v37, 2  ;;  %v8639_v43 = vld [vmem:[%s13900_s3 + $0x2f0] ss:$8 sps:$4 sm:$0xff]  }
 0x278   :  { %5599 = vmatprep.subr.bf16.mxu1 %v8620_v7  ;;  %5026 = vmatprep.subr.bf16.mxu0 %v8635_v48  ;;  %v8627_v7 = vld [vmem:[%s13900_s3 + $0x5c0] ss:$8 sps:$4 sm:$0xff]  }
 0x279   :  { %4908 = vmatmul.mubr.bf16.gmra.mrb[156].mxu0 %v11930_v37  ;;  %v2750_v48 = vsel %vm605_vm1, %v2743_v31, %v2749_v8 }
 0x27a   :  { %4917 = vmatprep.mubr.bf16.mxu0 %v2607_v45  ;;  %5027 = vmatpush1.bf16.msra.mxu0 %v8633_v40  ;;  %v14618_v45 = vld [vmem:[#allocation54_spill] sm:$0xff]  ;;  %v2903_v40 = vsel %vm2856_vm3, %v2896_v6, %v2902_v22  ;;  %v2908_v6 = vrot.slane %v14617_v19, 3 }
 0x27b   :  { %5600 = vmatpush1.bf16.msra.mxu1 %v8618_v36  ;;  %5028 = vmatprep.subr.bf16.mxu0 %v8641_v32  ;;  %v2612_v60 = vrot.slane %v14618_v45, 1  ;;  %v8636_v36 = vld [vmem:[%s13900_s3 + $0x5d0] ss:$8 sps:$4 sm:$0xff]   ;;  %v8644_v32 = vld [vmem:[%s13900_s3 + $0x5e4] ss:$8 sps:$4 sm:$0xff]  }
 0x27c   :  { %5601 = vmatprep.subr.bf16.mxu1 %v8629_v27  ;;  %v2755_v27 = vrot.slane %v11939_v58, 2 }
 0x27d   :  { %v2613_v31 = vsel %vm1587_vm2, %v2606_v34, %v2612_v60  ;;  %v2909_v34 = vsel %vm2856_vm3, %v2902_v22, %v2908_v6  ;;  %v2914_v22 = vrot.slane %v14618_v45, 3 }
 0x27e   :  { %5477 = vmatmul.mubr.bf16.gmra.mrb[88].mxu1 %v2750_v48  ;;  %5029 = vmatpush1.bf16.msra.mxu0 %v8639_v43  ;;  %v8642_v43 = vld [vmem:[%s13900_s3 + $0x5e0] ss:$8 sps:$4 sm:$0xff]   ;;  %v8645_v48 = vld [vmem:[%s13900_s3 + $0x5f0] ss:$8 sps:$4 sm:$0xff]  }
 0x27f   :  { %5486 = vmatprep.mubr.bf16.mxu1 %v2903_v40  ;;  %5602 = vmatpush1.bf16.msra.mxu1 %v8627_v7  ;;  %v8647_v7 = vld [vmem:[%s13900_s3 + $0x5f4] ss:$8 sps:$4 sm:$0xff]   ;;  %v8650_v40 = vld [vmem:[%s13900_s3 + $0x604] ss:$8 sps:$4 sm:$0xff]  }
 0x280   :  { %5603 = vmatprep.subr.bf16.mxu1 %v8638_v54  ;;  %v2756_v54 = vsel %vm605_vm1, %v2749_v8, %v2755_v27 }
 0x281   :  { %4918 = vmatmul.mubr.bf16.gmra.mrb[160].mxu0 %v11939_v58 }
 0x282   :  { %4927 = vmatprep.mubr.bf16.mxu0 %v2613_v31 }
 0x283   :  { %5604 = vmatpush1.bf16.msra.mxu1 %v8636_v36  ;;  %v14619_v36 = vrot.slane %v11717_v2, 1 }
 0x284   :  { %5605 = vmatprep.subr.bf16.mxu1 %v8644_v32  ;;  %v2761_v32 = vrot.slane %v11947_v52, 2 }
 0x285   :  { %v2619_v8 = vsel %vm1587_vm2, %v2612_v60, %v14619_v36  ;;  %v14621_v36 = vld [vmem:[#allocation62_spill] sm:$0xff] }
 0x286   :  { %5487 = vmatmul.mubr.bf16.gmra.mrb[92].mxu1 %v2756_v54  ;;  %v2762_v31 = vsel %vm605_vm1, %v2755_v27, %v2761_v32  ;;  %v14620_v54 = vrot.slane %v11717_v2, 3  ;;  %v2773_v27 = vrot.slane %v11968_v20, 2 }
 0x287   :  { %5496 = vmatprep.mubr.bf16.mxu1 %v2909_v34  ;;  %5606 = vmatpush1.bf16.msra.mxu1 %v8642_v43  ;;  %v2915_v43 = vsel %vm2856_vm3, %v2908_v6, %v2914_v22 }
 0x288   :  { %5607 = vmatprep.subr.bf16.mxu1 %v8647_v7  ;;  %v2767_v7 = vrot.slane %v11957_v21, 2  ;;  %v2921_v34 = vsel %vm2856_vm3, %v2914_v22, %v14620_v54  ;;  %v14625_v54 = vrot.slane %v11843_v9, 2 }
 0x289   :  { %4928 = vmatmul.mubr.bf16.gmra.mrb[164].mxu0 %v11947_v52 }
 0x28a   :  { %4937 = vmatprep.mubr.bf16.mxu0 %v2619_v8  ;;  %v2768_v60 = vsel %vm605_vm1, %v2761_v32, %v2767_v7  ;;  %v2774_v6 = vsel %vm605_vm1, %v2767_v7, %v2773_v27  ;;  %v2797_v8 = vrot.slane %v14621_v36, 2  ;;  %v14623_v32 = vld [vmem:[#allocation11_spill] sm:$0xff] }
 0x28b   :  { %5608 = vmatpush1.bf16.msra.mxu1 %v8645_v48  ;;  %v14624_v7 = vld [vmem:[#allocation19_spill] sm:$0xff] }
 0x28c   :  { %5770 = vmatprep.subr.bf16.mxu1 %v8650_v40 }
 0x28e   :  { %5497 = vmatmul.mubr.bf16.gmra.mrb[96].mxu1 %v2762_v31 }
 0x28f   :  { %5506 = vmatprep.mubr.bf16.mxu1 %v2915_v43  ;;  %v14114_v43 = vrot.slane %v11843_v9, 3 }
 0x291   :  { %4938 = vmatmul.mubr.bf16.gmra.mrb[168].mxu0 %v11957_v21 }
 0x292   :  { %4947 = vmatprep.mubr.bf16.mxu0 %v11973_v42  ;;  %v2779_v42 = vrot.slane %v11990_v23, 2 }
 0x294   :  { %v2780_v48 = vsel %vm605_vm1, %v2773_v27, %v2779_v42  ;;  %v14626_v27 = vrot.slane %v11855_v56, 3 }
 0x296   :  { %5507 = vmatmul.mubr.bf16.gmra.mrb[100].mxu1 %v2768_v60  ;;  %v2566_v60 = vrot.slane %v14624_v7, 1 }
 0x297   :  { %5516 = vmatprep.mubr.bf16.mxu1 %v2921_v34  ;;  %v2854_v34 = vsel %vm605_vm1, %v2797_v8, %v14625_v54  ;;  %v2586_v54 = vrot.slane %v11902_v30, 1 }
 0x299   :  { %4948 = vmatmul.mubr.bf16.gmra.mrb[172].mxu0 %v11968_v20 }
 0x29a   :  { %4957 = vmatprep.mubr.bf16.mxu0 %v11997_v18  ;;  %v2785_v18 = vrot.slane %v12011_v50, 2 }
 0x29c   :  { %v2786_v40 = vsel %vm605_vm1, %v2779_v42, %v2785_v18  ;;  %v14113_v42 = vrot.slane %v14601_v4, 3 }
 0x29e   :  { %5517 = vmatmul.mubr.bf16.gmra.mrb[104].mxu1 %v2774_v6 }
 0x29f   :  { %5526 = vmatprep.mubr.bf16.mxu1 %v12002_v63  ;;  %v2791_v63 = vrot.slane %v12030_v17, 2 }
 0x2a1   :  { %4958 = vmatmul.mubr.bf16.gmra.mrb[176].mxu0 %v11990_v23  ;;  %v2798_v22 = vsel %vm605_vm1, %v2791_v63, %v2797_v8  ;;  %v2868_v8 = vrot.slane %v14624_v7, 3 }
 0x2a2   :  { %4967 = vmatprep.mubr.bf16.mxu0 %v12015_v28  ;;  %v2792_v28 = vsel %vm605_vm1, %v2785_v18, %v2791_v63  ;;  %v14627_v18 = vld [vmem:[#allocation33_spill] sm:$0xff] }
 0x2a3   :  { %v8653_v63 = vld [vmem:[%s13900_s3 + $0x614] ss:$8 sps:$4 sm:$0xff]  }
 0x2a6   :  { %5527 = vmatmul.mubr.bf16.gmra.mrb[108].mxu1 %v2780_v48  ;;  %v8648_v48 = vld [vmem:[%s13900_s3 + $0x600] ss:$8 sps:$4 sm:$0xff]  }
 0x2a7   :  { %5536 = vmatprep.mubr.bf16.mxu1 %v12021_v1  ;;  %v14116_v1 = vrot.slane %v11843_v9, 1 }
 0x2a9   :  { %4968 = vmatmul.mubr.bf16.gmra.mrb[180].mxu0 %v12011_v50 }
 0x2aa   :  { %4977 = vmatprep.mubr.bf16.mxu0 %v12037_v5  ;;  %v14622_v5 = vrot.slane %v11855_v56, 1 }
 0x2ae   :  { %5537 = vmatmul.mubr.bf16.gmra.mrb[112].mxu1 %v2786_v40  ;;  %v2572_v40 = vrot.slane %v14627_v18, 1 }
 0x2af   :  { %5546 = vmatprep.mubr.bf16.mxu1 %v12047_v16  ;;  %v2563_v16 = vsel %vm1587_vm2, %v14116_v1, %v14622_v5  ;;  %v2640_v1 = vrot.slane %v12030_v17, 1 }
 0x2b0   :  { %v2573_v5 = vsel %vm1587_vm2, %v2566_v60, %v2572_v40 }
 0x2b1   :  { %4978 = vmatmul.mubr.bf16.gmra.mrb[184].mxu0 %v12030_v17 }
 0x2b2   :  { %4987 = vmatprep.mubr.bf16.mxu0 %v12040_v59  ;;  %v2559_v59 = vrot.slane %v14623_v32, 1 }
 0x2b4   :  { %v2567_v6 = vsel %vm1587_vm2, %v2559_v59, %v2566_v60 }
 0x2b6   :  { %5547 = vmatmul.mubr.bf16.gmra.mrb[116].mxu1 %v2792_v28 }
 0x2b7   :  { %5556 = vmatprep.mubr.bf16.mxu1 %v12050_v14  ;;  %v14115_v14 = vrot.slane %v14601_v4, 1 }
 0x2b9   :  { %4988 = vmatmul.mubr.bf16.gmra.mrb[188].mxu0 %v14621_v36  ;;  %v2560_v31 = vsel %vm1587_vm2, %v14115_v14, %v2559_v59  ;;  %v14628_v59 = vld [vmem:[#allocation27_spill] sm:$0xff]  ;;  %v2634_v14 = vrot.slane %v12011_v50, 1 }
 0x2ba   :  { %5030 = vmatprep.mubr.bf16.mxu0 %v2563_v16  ;;  %v8656_v16 = vld [vmem:[%s13900_s3 + $0x624] ss:$8 sps:$4 sm:$0xff]  }
 0x2be   :  { %5557 = vmatmul.mubr.bf16.gmra.mrb[120].mxu1 %v2798_v22  ;;  %v2578_v22 = vrot.slane %v14628_v59, 1 }
 0x2bf   :  { %5566 = vmatprep.mubr.bf16.mxu1 %v12053_v39  ;;  %v2865_v39 = vsel %vm2856_vm3, %v14114_v43, %v14626_v27  ;;  %v8662_v27 = vld [vmem:[%s13900_s3 + $0x644] ss:$8 sps:$4 sm:$0xff]   ;;  %v14638_v43 = vld [vmem:[#allocation65_spill] sm:$0xff] }
 0x2c1   :  { %5031 = vmatmul.mubr.bf16.vlgmr.msra.gmra.mrb[128].mxu0 %v2560_v31  ;;  %v8659_v31 = vld [vmem:[%s13900_s3 + $0x634] ss:$8 sps:$4 sm:$0xff]  }
 0x2c2   :  { %5040 = vmatprep.mubr.bf16.mxu0 %v12073_v46  ;;  %v2861_v46 = vrot.slane %v14623_v32, 3 }
 0x2c4   :  { %v2862_v28 = vsel %vm2856_vm3, %v14113_v42, %v2861_v46  ;;  %v2869_v60 = vsel %vm2856_vm3, %v2861_v46, %v2868_v8  ;;  %v2874_v46 = vrot.slane %v14627_v18, 3 }
 0x2c6   :  { %5567 = vmatmul.mubr.bf16.gmra.mrb[124].mxu1 %v2854_v34  ;;  %v2579_v34 = vsel %vm1587_vm2, %v2572_v40, %v2578_v22 }
 0x2c7   :  { %5609 = vmatprep.mubr.bf16.mxu1 %v2865_v39  ;;  %v14629_v39 = vrot.slane %v11893_v44, 1 }
 0x2c9   :  { %5041 = vmatmul.mubr.bf16.gmra.mrb[132].mxu0 %v2567_v6  ;;  %v2587_v6 = vsel %vm1587_vm2, %v14629_v39, %v2586_v54  ;;  %v14632_v39 = vrot.slane %v11893_v44, 3 }
 0x2ca   :  { %5050 = vmatprep.mubr.bf16.mxu0 %v12085_v47  ;;  %v8651_v47 = vld [vmem:[%s13900_s3 + $0x610] ss:$8 sps:$4 sm:$0xff]  }
 0x2ce   :  { %5610 = vmatmul.mubr.bf16.vlgmr.msra.gmra.mrb[64].mxu1 %v2862_v28  ;;  %v2875_v28 = vsel %vm2856_vm3, %v2868_v8, %v2874_v46 }
 0x2cf   :  { %5619 = vmatprep.mubr.bf16.mxu1 %v12090_v3  ;;  %5771 = vmatpush1.bf16.msra.mxu1 %v8648_v48  ;;  %v8654_v3 = vld [vmem:[%s13900_s3 + $0x620] ss:$8 sps:$4 sm:$0xff]  }
 0x2d0   :  { %5772 = vmatprep.subr.bf16.mxu1 %v8653_v63  ;;  %v14630_v48 = vld [vmem:[#allocation34_spill] sm:$0xff]  ;;  %v8665_v63 = vld [vmem:[%s13900_s3 + $0x654] ss:$8 sps:$4 sm:$0xff]  }
 0x2d1   :  { %5051 = vmatmul.mubr.bf16.gmra.mrb[136].mxu0 %v2573_v5  ;;  %v2584_v40 = vrot.slane %v14630_v48, 1  ;;  %v8663_v5 = vld [vmem:[%s13900_s3 + $0x650] ss:$8 sps:$4 sm:$0xff]  }
 0x2d2   :  { %5060 = vmatprep.mubr.bf16.mxu0 %v12106_v55  ;;  %v8657_v55 = vld [vmem:[%s13900_s3 + $0x630] ss:$8 sps:$4 sm:$0xff]  }
 0x2d3   :  { %5773 = vmatpush1.bf16.msra.mxu1 %v8651_v47  ;;  %v2592_v47 = vrot.slane %v11915_v38, 1 }
 0x2d4   :  { %5774 = vmatprep.subr.bf16.mxu1 %v8656_v16  ;;  %v2585_v16 = vsel %vm1587_vm2, %v2578_v22, %v2584_v40 }
 0x2d5   :  { %v2593_v8 = vsel %vm1587_vm2, %v2586_v54, %v2592_v47  ;;  %v2598_v54 = vrot.slane %v11930_v37, 1 }
 0x2d6   :  { %5620 = vmatmul.mubr.bf16.gmra.mrb[68].mxu1 %v2869_v60  ;;  %v8666_v60 = vld [vmem:[%s13900_s3 + $0x660] ss:$8 sps:$4 sm:$0xff]  }
 0x2d7   :  { %5629 = vmatprep.mubr.bf16.mxu1 %v12111_v10  ;;  %5775 = vmatpush1.bf16.msra.mxu1 %v8654_v3  ;;  %v8660_v10 = vld [vmem:[%s13900_s3 + $0x640] ss:$8 sps:$4 sm:$0xff]   ;;  %v8668_v3 = vld [vmem:[%s13900_s3 + $0x664] ss:$8 sps:$4 sm:$0xff]  }
 0x2d8   :  { %5776 = vmatprep.subr.bf16.mxu1 %v8659_v31  ;;  %v2880_v31 = vrot.slane %v14628_v59, 3 }
 0x2d9   :  { %5061 = vmatmul.mubr.bf16.gmra.mrb[140].mxu0 %v2579_v34  ;;  %v8671_v34 = vld [vmem:[%s13900_s3 + $0x674] ss:$8 sps:$4 sm:$0xff]  }
 0x2da   :  { %5070 = vmatprep.mubr.bf16.mxu0 %v2587_v6 }
 0x2db   :  { %5777 = vmatpush1.bf16.msra.mxu1 %v8657_v55  ;;  %v14631_v55 = vld [vmem:[#allocation49_spill] sm:$0xff] }
 0x2dc   :  { %5778 = vmatprep.subr.bf16.mxu1 %v8662_v27  ;;  %v2590_v22 = vrot.slane %v14631_v55, 1  ;;  %v2881_v27 = vsel %vm2856_vm3, %v2874_v46, %v2880_v31  ;;  %v8674_v46 = vld [vmem:[%s13900_s3 + $0x684] ss:$8 sps:$4 sm:$0xff]  }
 0x2de   :  { %5630 = vmatmul.mubr.bf16.gmra.mrb[72].mxu1 %v2875_v28  ;;  %v2599_v28 = vsel %vm1587_vm2, %v2592_v47, %v2598_v54  ;;  %v2604_v47 = vrot.slane %v11939_v58, 1 }
 0x2df   :  { %5639 = vmatprep.mubr.bf16.mxu1 %v12121_v49  ;;  %5779 = vmatpush1.bf16.msra.mxu1 %v8660_v10  ;;  %v2888_v49 = vrot.slane %v11902_v30, 3  ;;  %v8669_v10 = vld [vmem:[%s13900_s3 + $0x670] ss:$8 sps:$4 sm:$0xff]  }
 0x2e0   :  { %5780 = vmatprep.subr.bf16.mxu1 %v8665_v63  ;;  %v2591_v63 = vsel %vm1587_vm2, %v2584_v40, %v2590_v22 }
 0x2e1   :  { %5071 = vmatmul.mubr.bf16.gmra.mrb[144].mxu0 %v2585_v16  ;;  %v2889_v6 = vsel %vm2856_vm3, %v14632_v39, %v2888_v49  ;;  %v2894_v16 = vrot.slane %v11915_v38, 3  ;;  %v8675_v39 = vld [vmem:[%s13900_s3 + $0x690] ss:$8 sps:$4 sm:$0xff]  }
 0x2e2   :  { %5080 = vmatprep.mubr.bf16.mxu0 %v2593_v8  ;;  %v14633_v8 = vld [vmem:[#allocation46_spill] sm:$0xff] }
 0x2e3   :  { %5781 = vmatpush1.bf16.msra.mxu1 %v8663_v5  ;;  %v2886_v5 = vrot.slane %v14630_v48, 3  ;;  %v2596_v40 = vrot.slane %v14633_v8, 1 }
 0x2e4   :  { %5782 = vmatprep.subr.bf16.mxu1 %v8668_v3  ;;  %v8672_v3 = vld [vmem:[%s13900_s3 + $0x680] ss:$8 sps:$4 sm:$0xff]  }
 0x2e6   :  { %5640 = vmatmul.mubr.bf16.gmra.mrb[76].mxu1 %v2881_v27  ;;  %v2895_v27 = vsel %vm2856_vm3, %v2888_v49, %v2894_v16  ;;  %v2900_v49 = vrot.slane %v11930_v37, 3 }
 0x2e7   :  { %5649 = vmatprep.mubr.bf16.mxu1 %v2889_v6  ;;  %5783 = vmatpush1.bf16.msra.mxu1 %v8666_v60  ;;  %v8677_v60 = vld [vmem:[%s13900_s3 + $0x694] ss:$8 sps:$4 sm:$0xff]   ;;  %v2597_v6 = vsel %vm1587_vm2, %v2590_v22, %v2596_v40 }
 0x2e8   :  { %5784 = vmatprep.subr.bf16.mxu1 %v8671_v34  ;;  %v2887_v34 = vsel %vm2856_vm3, %v2880_v31, %v2886_v5  ;;  %v2605_v31 = vsel %vm1587_vm2, %v2598_v54, %v2604_v47  ;;  %v2610_v54 = vrot.slane %v11947_v52, 1 }
 0x2e9   :  { %5081 = vmatmul.mubr.bf16.gmra.mrb[148].mxu0 %v2591_v63  ;;  %v2892_v63 = vrot.slane %v14631_v55, 3 }
 0x2ea   :  { %5090 = vmatprep.mubr.bf16.mxu0 %v2599_v28  ;;  %v14634_v28 = vld [vmem:[#allocation57_spill] sm:$0xff] }
 0x2eb   :  { %5785 = vmatpush1.bf16.msra.mxu1 %v8669_v10  ;;  %v8680_v10 = vld [vmem:[%s13900_s3 + $0x6a4] ss:$8 sps:$4 sm:$0xff]   ;;  %v2602_v22 = vrot.slane %v14634_v28, 1 }
 0x2ec   :  { %5786 = vmatprep.subr.bf16.mxu1 %v8674_v46  ;;  %v8678_v46 = vld [vmem:[%s13900_s3 + $0x6a0] ss:$8 sps:$4 sm:$0xff]  }
 0x2ee   :  { %5650 = vmatmul.mubr.bf16.gmra.mrb[80].mxu1 %v2887_v34  ;;  %v2901_v34 = vsel %vm2856_vm3, %v2894_v16, %v2900_v49  ;;  %v2906_v16 = vrot.slane %v11939_v58, 3 }
 0x2ef   :  { %5659 = vmatprep.mubr.bf16.mxu1 %v2895_v27  ;;  %5787 = vmatpush1.bf16.msra.mxu1 %v8672_v3  ;;  %v8683_v3 = vld [vmem:[%s13900_s3 + $0x6b4] ss:$8 sps:$4 sm:$0xff]   ;;  %v8681_v27 = vld [vmem:[%s13900_s3 + $0x6b0] ss:$8 sps:$4 sm:$0xff]  }
 0x2f0   :  { %5788 = vmatprep.subr.bf16.mxu1 %v8677_v60  ;;  %v2893_v60 = vsel %vm2856_vm3, %v2886_v5, %v2892_v63  ;;  %v2611_v5 = vsel %vm1587_vm2, %v2604_v47, %v2610_v54  ;;  %v2616_v47 = vrot.slane %v11957_v21, 1 }
 0x2f1   :  { %5091 = vmatmul.mubr.bf16.gmra.mrb[152].mxu0 %v2597_v6  ;;  %v8686_v6 = vld [vmem:[%s13900_s3 + $0x6c4] ss:$8 sps:$4 sm:$0xff]  }
 0x2f2   :  { %5100 = vmatprep.mubr.bf16.mxu0 %v2605_v31  ;;  %v8684_v31 = vld [vmem:[%s13900_s3 + $0x6c0] ss:$8 sps:$4 sm:$0xff]  }
 0x2f3   :  { %5789 = vmatpush1.bf16.msra.mxu1 %v8675_v39  ;;  %v2603_v39 = vsel %vm1587_vm2, %v2596_v40, %v2602_v22 }
 0x2f4   :  { %5790 = vmatprep.subr.bf16.mxu1 %v8680_v10  ;;  %v2898_v10 = vrot.slane %v14633_v8, 3 }
 0x2f6   :  { %5660 = vmatmul.mubr.bf16.gmra.mrb[84].mxu1 %v2893_v60  ;;  %v2899_v60 = vsel %vm2856_vm3, %v2892_v63, %v2898_v10  ;;  %v2617_v63 = vsel %vm1587_vm2, %v2610_v54, %v2616_v47  ;;  %v2622_v54 = vrot.slane %v11968_v20, 1 }
 0x2f7   :  { %5669 = vmatprep.mubr.bf16.mxu1 %v2901_v34  ;;  %5791 = vmatpush1.bf16.msra.mxu1 %v8678_v46  ;;  %v14635_v46 = vld [vmem:[#allocation47_spill] sm:$0xff]  ;;  %v2907_v34 = vsel %vm2856_vm3, %v2900_v49, %v2906_v16  ;;  %v2912_v49 = vrot.slane %v11947_v52, 3 }
 0x2f8   :  { %5792 = vmatprep.subr.bf16.mxu1 %v8683_v3  ;;  %v2608_v40 = vrot.slane %v14635_v46, 1  ;;  %v8689_v3 = vld [vmem:[%s13900_s3 + $0x6d4] ss:$8 sps:$4 sm:$0xff]  }
 0x2f9   :  { %5101 = vmatmul.mubr.bf16.gmra.mrb[156].mxu0 %v2603_v39 }
 0x2fa   :  { %5110 = vmatprep.mubr.bf16.mxu0 %v2611_v5  ;;  %v2609_v39 = vsel %vm1587_vm2, %v2602_v22, %v2608_v40  ;;  %v2904_v5 = vrot.slane %v14634_v28, 3 }
 0x2fb   :  { %5793 = vmatpush1.bf16.msra.mxu1 %v8681_v27  ;;  %v8687_v27 = vld [vmem:[%s13900_s3 + $0x6d0] ss:$8 sps:$4 sm:$0xff]  }
 0x2fc   :  { %5794 = vmatprep.subr.bf16.mxu1 %v8686_v6  ;;  %v8692_v6 = vld [vmem:[%s13900_s3 + $0x6e4] ss:$8 sps:$4 sm:$0xff]  }
 0x2fe   :  { %5670 = vmatmul.mubr.bf16.gmra.mrb[88].mxu1 %v2899_v60  ;;  %v14636_v60 = vld [vmem:[#allocation51_spill] sm:$0xff] }
 0x2ff   :  { %5679 = vmatprep.mubr.bf16.mxu1 %v2907_v34  ;;  %5795 = vmatpush1.bf16.msra.mxu1 %v8684_v31  ;;  %v8690_v31 = vld [vmem:[%s13900_s3 + $0x6e0] ss:$8 sps:$4 sm:$0xff]   ;;  %v2614_v22 = vrot.slane %v14636_v60, 1  ;;  %v2905_v34 = vsel %vm2856_vm3, %v2898_v10, %v2904_v5  ;;  %v2623_v10 = vsel %vm1587_vm2, %v2616_v47, %v2622_v54 }
 0x300   :  { %5796 = vmatprep.subr.bf16.mxu1 %v8689_v3  ;;  %v8695_v3 = vld [vmem:[%s13900_s3 + $0x6f4] ss:$8 sps:$4 sm:$0xff]  }
 0x301   :  { %5111 = vmatmul.mubr.bf16.gmra.mrb[160].mxu0 %v2609_v39  ;;  %v2913_v39 = vsel %vm2856_vm3, %v2906_v16, %v2912_v49  ;;  %v2918_v16 = vrot.slane %v11957_v21, 3 }
 0x302   :  { %5120 = vmatprep.mubr.bf16.mxu0 %v2617_v63  ;;  %v2615_v63 = vsel %vm1587_vm2, %v2608_v40, %v2614_v22  ;;  %v2628_v40 = vrot.slane %v11990_v23, 1 }
 0x303   :  { %5797 = vmatpush1.bf16.msra.mxu1 %v8687_v27  ;;  %v8693_v27 = vld [vmem:[%s13900_s3 + $0x6f0] ss:$8 sps:$4 sm:$0xff]  }
 0x304   :  { %5798 = vmatprep.subr.bf16.mxu1 %v8692_v6  ;;  %v8698_v6 = vld [vmem:[%s13900_s3 + $0x704] ss:$8 sps:$4 sm:$0xff]   ;;  %v2629_v47 = vsel %vm1587_vm2, %v2622_v54, %v2628_v40 }
 0x306   :  { %5680 = vmatmul.mubr.bf16.gmra.mrb[92].mxu1 %v2905_v34  ;;  %v2910_v34 = vrot.slane %v14635_v46, 3 }
 0x307   :  { %5689 = vmatprep.mubr.bf16.mxu1 %v2913_v39  ;;  %5799 = vmatpush1.bf16.msra.mxu1 %v8690_v31  ;;  %v14637_v31 = vld [vmem:[#allocation61_spill] sm:$0xff] }
 0x308   :  { %5800 = vmatprep.subr.bf16.mxu1 %v8695_v3  ;;  %v2620_v39 = vrot.slane %v14637_v31, 1  ;;  %v2911_v42 = vsel %vm2856_vm3, %v2904_v5, %v2910_v34  ;;  %v2919_v3 = vsel %vm2856_vm3, %v2912_v49, %v2918_v16  ;;  %v2922_v54 = vrot.slane %v14637_v31, 3 }
 0x309   :  { %5121 = vmatmul.mubr.bf16.gmra.mrb[164].mxu0 %v2615_v63 }
 0x30a   :  { %5130 = vmatprep.mubr.bf16.mxu0 %v2623_v10  ;;  %v2621_v63 = vsel %vm1587_vm2, %v2614_v22, %v2620_v39  ;;  %v2916_v10 = vrot.slane %v14636_v60, 3  ;;  %v2635_v22 = vsel %vm1587_vm2, %v2628_v40, %v2634_v14  ;;  %v2641_v40 = vsel %vm1587_vm2, %v2634_v14, %v2640_v1 }
 0x30b   :  { %5801 = vmatpush1.bf16.msra.mxu1 %v8693_v27  ;;  %v2924_v27 = vrot.slane %v11968_v20, 3 }
 0x30c   :  { %5963 = vmatprep.subr.bf16.mxu1 %v8698_v6  ;;  %v2626_v6 = vrot.slane %v14638_v43, 1  ;;  %v2917_v5 = vsel %vm2856_vm3, %v2910_v34, %v2916_v10  ;;  %v2923_v34 = vsel %vm2856_vm3, %v2916_v10, %v2922_v54 }
 0x30e   :  { %5690 = vmatmul.mubr.bf16.gmra.mrb[96].mxu1 %v2911_v42  ;;  %v2925_v42 = vsel %vm2856_vm3, %v2918_v16, %v2924_v27  ;;  %v2627_v49 = vsel %vm1587_vm2, %v2620_v39, %v2626_v6 }
 0x30f   :  { %5699 = vmatprep.mubr.bf16.mxu1 %v2919_v3  ;;  %v2930_v3 = vrot.slane %v11990_v23, 3  ;;  %v2646_v23 = vrot.slane %v14621_v36, 1 }
 0x311   :  { %5131 = vmatmul.mubr.bf16.gmra.mrb[168].mxu0 %v2621_v63  ;;  %v14639_v63 = vld [vmem:[#allocation55_spill] sm:$0xff]  ;;  %v2931_v16 = vsel %vm2856_vm3, %v2924_v27, %v2930_v3  ;;  %v2647_v14 = vsel %vm1587_vm2, %v2640_v1, %v2646_v23 }
 0x312   :  { %5140 = vmatprep.mubr.bf16.mxu0 %v2629_v47  ;;  %v2632_v47 = vrot.slane %v14639_v63, 1 }
 0x314   :  { %v2633_v39 = vsel %vm1587_vm2, %v2626_v6, %v2632_v47 }
 0x316   :  { %5700 = vmatmul.mubr.bf16.gmra.mrb[100].mxu1 %v2917_v5  ;;  %v2928_v5 = vrot.slane %v14638_v43, 3 }
 0x317   :  { %5709 = vmatprep.mubr.bf16.mxu1 %v2925_v42  ;;  %v2936_v42 = vrot.slane %v12011_v50, 3 }
 0x318   :  { %v2929_v10 = vsel %vm2856_vm3, %v2922_v54, %v2928_v5 }
 0x319   :  { %5141 = vmatmul.mubr.bf16.gmra.mrb[172].mxu0 %v2627_v49  ;;  %v14640_v49 = vld [vmem:[#allocation58_spill] sm:$0xff]  ;;  %v2937_v27 = vsel %vm2856_vm3, %v2930_v3, %v2936_v42 }
 0x31a   :  { %5150 = vmatprep.mubr.bf16.mxu0 %v2635_v22  ;;  %v2638_v22 = vrot.slane %v14640_v49, 1 }
 0x31c   :  { %v2639_v6 = vsel %vm1587_vm2, %v2632_v47, %v2638_v22  ;;  %v14642_v47 = vrot.slane %v11843_v9, 1 }
 0x31e   :  { %5710 = vmatmul.mubr.bf16.gmra.mrb[104].mxu1 %v2923_v34  ;;  %v2934_v34 = vrot.slane %v14639_v63, 3  ;;  %v2703_v1 = vsel %vm1587_vm2, %v2646_v23, %v14642_v47  ;;  %v14645_v47 = vrot.slane %v14601_v4, 3 }
 0x31f   :  { %5719 = vmatprep.mubr.bf16.mxu1 %v2931_v16  ;;  %v2942_v16 = vrot.slane %v12030_v17, 3 }
 0x320   :  { %v2935_v54 = vsel %vm2856_vm3, %v2928_v5, %v2934_v34 }
 0x321   :  { %5151 = vmatmul.mubr.bf16.gmra.mrb[176].mxu0 %v2633_v39  ;;  %v14641_v39 = vld [vmem:[#allocation59_spill] sm:$0xff] }
 0x322   :  { %5160 = vmatprep.mubr.bf16.mxu0 %v2641_v40  ;;  %v2644_v40 = vrot.slane %v14641_v39, 1 }
 0x324   :  { %v2645_v3 = vsel %vm1587_vm2, %v2638_v22, %v2644_v40 }
 0x326   :  { %5720 = vmatmul.mubr.bf16.gmra.mrb[108].mxu1 %v2929_v10  ;;  %v2943_v10 = vsel %vm2856_vm3, %v2936_v42, %v2942_v16  ;;  %v14643_v42 = vrot.slane %v14601_v4, 1 }
 0x327   :  { %5729 = vmatprep.mubr.bf16.mxu1 %v2937_v27  ;;  %v2940_v27 = vrot.slane %v14640_v49, 3 }
 0x328   :  { %v2699_v22 = vsel %vm1587_vm2, %v2644_v40, %v14643_v42 }
 0x329   :  { %5161 = vmatmul.mubr.bf16.gmra.mrb[180].mxu0 %v2639_v6  ;;  %v2948_v6 = vrot.slane %v14621_v36, 3 }
 0x32a   :  { %5170 = vmatprep.mubr.bf16.mxu0 %v2647_v14  ;;  %v2941_v14 = vsel %vm2856_vm3, %v2934_v34, %v2940_v27  ;;  %v3013_v34 = vrot.slane %v14623_v32, 4  ;;  %v8696_v32 = vld [vmem:[%s13900_s3 + $0x700] ss:$8 sps:$4 sm:$0xff]  }
 0x32b   :  { %v2949_v5 = vsel %vm2856_vm3, %v2942_v16, %v2948_v6  ;;  %v3012_v16 = vrot.slane %v14601_v4, 4  ;;  %v14118_v4 = vrot.slane %v11843_v9, 4 }
 0x32d   :  { %v3014_v40 = vsel %vm3008_vm4, %v3012_v16, %v3013_v34 }
 0x32e   :  { %5730 = vmatmul.mubr.bf16.gmra.mrb[112].mxu1 %v2935_v54  ;;  %v2946_v54 = vrot.slane %v14641_v39, 3 }
 0x32f   :  { %5739 = vmatprep.mubr.bf16.mxu1 %v2943_v10  ;;  %v14644_v10 = vrot.slane %v11843_v9, 3 }
 0x330   :  { %v2947_v23 = vsel %vm2856_vm3, %v2940_v27, %v2946_v54  ;;  %v3010_v27 = vrot.slane %v14580_v33, 4  ;;  %v8699_v33 = vld [vmem:[%s13900_s3 + $0x710] ss:$8 sps:$4 sm:$0xff]  }
 0x331   :  { %5171 = vmatmul.mubr.bf16.gmra.mrb[184].mxu0 %v2645_v3  ;;  %v3006_v3 = vsel %vm2856_vm3, %v2948_v6, %v14644_v10  ;;  %v8701_v6 = vld [vmem:[%s13900_s3 + $0x714] ss:$8 sps:$4 sm:$0xff]  }
 0x332   :  { %5180 = vmatprep.mubr.bf16.mxu0 %v2703_v1  ;;  %v3002_v1 = vsel %vm2856_vm3, %v2946_v54, %v14645_v47  ;;  %v3018_v54 = vrot.slane %v14598_v26, 4  ;;  %v8707_v10 = vld [vmem:[%s13900_s3 + $0x734] ss:$8 sps:$4 sm:$0xff]   ;;  %v8705_v26 = vld [vmem:[%s13900_s3 + $0x730] ss:$8 sps:$4 sm:$0xff]   ;;  %v3024_v47 = vrot.slane %v14612_v53, 4 }
 0x333   :  { %v8711_v53 = vld [vmem:[%s13900_s3 + $0x750] ss:$8 sps:$4 sm:$0xff]  }
 0x336   :  { %5740 = vmatmul.mubr.bf16.gmra.mrb[116].mxu1 %v2941_v14  ;;  %v3020_v14 = vrot.slane %v14624_v7, 4  ;;  %v8704_v7 = vld [vmem:[%s13900_s3 + $0x724] ss:$8 sps:$4 sm:$0xff]  }
 0x337   :  { %5749 = vmatprep.mubr.bf16.mxu1 %v2949_v5  ;;  %v14646_v5 = vrot.slane %v14587_v12, 4  ;;  %v3026_v12 = vrot.slane %v14627_v18, 4  ;;  %v8710_v18 = vld [vmem:[%s13900_s3 + $0x744] ss:$8 sps:$4 sm:$0xff]  }
 0x339   :  { %5181 = vmatmul.mubr.bf16.gmra.mrb[188].mxu0 %v2699_v22  ;;  %v3011_v42 = vsel %vm3008_vm4, %v14646_v5, %v3010_v27  ;;  %v3021_v22 = vsel %vm3008_vm4, %v3013_v34, %v3020_v14  ;;  %v3027_v34 = vsel %vm3008_vm4, %v3020_v14, %v3026_v12  ;;  %v3025_v14 = vsel %vm3008_vm4, %v3018_v54, %v3024_v47 }
 0x33a   :  { %v3038_v5 = vrot.slane %v14630_v48, 4  ;;  %v3036_v48 = vrot.slane %v14614_v29, 4  ;;  %v3048_v29 = vrot.slane %v11442_v61, 4  ;;  %v3060_v61 = vrot.slane %v14617_v19, 4 }
 0x33e   :  { %5750 = vmatmul.mubr.bf16.gmra.mrb[120].mxu1 %v2947_v23  ;;  %v8702_v23 = vld [vmem:[%s13900_s3 + $0x720] ss:$8 sps:$4 sm:$0xff]  }
 0x33f   :  { %5759 = vmatprep.mubr.bf16.mxu1 %v3006_v3  ;;  %v3019_v3 = vsel %vm3008_vm4, %v3010_v27, %v3018_v54  ;;  %v8713_v27 = vld [vmem:[%s13900_s3 + $0x754] ss:$8 sps:$4 sm:$0xff]   ;;  %v3044_v54 = vrot.slane %v14631_v55, 4  ;;  %v3056_v55 = vrot.slane %v14634_v28, 4  ;;  %v3068_v28 = vrot.slane %v14636_v60, 4 }
 0x346   :  { %5760 = vmatmul.mubr.bf16.gmra.mrb[124].mxu1 %v3002_v1  ;;  %v3032_v1 = vrot.slane %v14628_v59, 4  ;;  %v8716_v59 = vld [vmem:[%s13900_s3 + $0x764] ss:$8 sps:$4 sm:$0xff]  }
 0x347   :  { %5802 = vmatprep.mubr.bf16.mxu1 %v3014_v40  ;;  %v8708_v40 = vld [vmem:[%s13900_s3 + $0x740] ss:$8 sps:$4 sm:$0xff]  }
 0x34e   :  { %5803 = vmatmul.mubr.bf16.vlgmr.msra.gmra.mrb[64].mxu1 %v3011_v42  ;;  %v8714_v42 = vld [vmem:[%s13900_s3 + $0x760] ss:$8 sps:$4 sm:$0xff]  }
 0x34f   :  { %5812 = vmatprep.mubr.bf16.mxu1 %v3021_v22  ;;  %5964 = vmatpush1.bf16.msra.mxu1 %v8696_v32  ;;  %v3033_v32 = vsel %vm3008_vm4, %v3026_v12, %v3032_v1  ;;  %v8719_v22 = vld [vmem:[%s13900_s3 + $0x774] ss:$8 sps:$4 sm:$0xff]  }
 0x350   :  { %5965 = vmatprep.subr.bf16.mxu1 %v8701_v6  ;;  %v3030_v6 = vrot.slane %v14613_v11, 4  ;;  %v8717_v11 = vld [vmem:[%s13900_s3 + $0x770] ss:$8 sps:$4 sm:$0xff]  }
 0x352   :  { %v3037_v12 = vsel %vm3008_vm4, %v3030_v6, %v3036_v48 }
 0x353   :  { %5966 = vmatpush1.bf16.msra.mxu1 %v8699_v33  ;;  %v3031_v33 = vsel %vm3008_vm4, %v3024_v47, %v3030_v6 }
 0x354   :  { %5967 = vmatprep.subr.bf16.mxu1 %v8704_v7  ;;  %v3039_v7 = vsel %vm3008_vm4, %v3032_v1, %v3038_v5 }
 0x356   :  { %5813 = vmatmul.mubr.bf16.gmra.mrb[68].mxu1 %v3019_v3  ;;  %v3050_v3 = vrot.slane %v14633_v8, 4  ;;  %v3062_v8 = vrot.slane %v14635_v46, 4  ;;  %v3074_v46 = vrot.slane %v14637_v31, 4 }
 0x357   :  { %5822 = vmatprep.mubr.bf16.mxu1 %v3027_v34  ;;  %5968 = vmatpush1.bf16.msra.mxu1 %v8702_v23  ;;  %v3045_v23 = vsel %vm3008_vm4, %v3038_v5, %v3044_v54  ;;  %v3080_v5 = vrot.slane %v14638_v43, 4 }
 0x358   :  { %5969 = vmatprep.subr.bf16.mxu1 %v8707_v10  ;;  %v3042_v10 = vrot.slane %v14615_v35, 4  ;;  %v3057_v47 = vsel %vm3008_vm4, %v3050_v3, %v3056_v55  ;;  %v3054_v35 = vrot.slane %v11528_v13, 4  ;;  %v3066_v13 = vrot.slane %v14618_v45, 4 }
 0x359   :  { %v3075_v19 = vsel %vm3008_vm4, %v3068_v28, %v3074_v46  ;;  %v14647_v45 = vrot.slane %v11717_v2, 4 }
 0x35a   :  { %v3043_v34 = vsel %vm3008_vm4, %v3036_v48, %v3042_v10  ;;  %v3055_v1 = vsel %vm3008_vm4, %v3048_v29, %v3054_v35  ;;  %v3086_v48 = vrot.slane %v14639_v63, 4 }
 0x35b   :  { %5970 = vmatpush1.bf16.msra.mxu1 %v8705_v26  ;;  %v3051_v26 = vsel %vm3008_vm4, %v3044_v54, %v3050_v3  ;;  %v3073_v31 = vsel %vm3008_vm4, %v3066_v13, %v14647_v45 }
 0x35c   :  { %5971 = vmatprep.subr.bf16.mxu1 %v8710_v18  ;;  %v3049_v18 = vsel %vm3008_vm4, %v3042_v10, %v3048_v29  ;;  %v3087_v2 = vsel %vm3008_vm4, %v3080_v5, %v3086_v48  ;;  %v3092_v10 = vrot.slane %v14640_v49, 4  ;;  %v3098_v29 = vrot.slane %v14641_v39, 4 }
 0x35e   :  { %5823 = vmatmul.mubr.bf16.gmra.mrb[72].mxu1 %v3025_v14  ;;  %v3069_v14 = vsel %vm3008_vm4, %v3062_v8, %v3068_v28  ;;  %v3093_v63 = vsel %vm3008_vm4, %v3086_v48, %v3092_v10  ;;  %v3099_v49 = vsel %vm3008_vm4, %v3092_v10, %v3098_v29  ;;  %v3154_v39 = vsel %vm3008_vm4, %v3098_v29, %v3012_v16 }
 0x35f   :  { %5832 = vmatprep.mubr.bf16.mxu1 %v3033_v32  ;;  %5972 = vmatpush1.bf16.msra.mxu1 %v8708_v40  ;;  %v3063_v40 = vsel %vm3008_vm4, %v3056_v55, %v3062_v8 }
 0x360   :  { %5973 = vmatprep.subr.bf16.mxu1 %v8713_v27  ;;  %v3061_v27 = vsel %vm3008_vm4, %v3054_v35, %v3060_v61 }
 0x363   :  { %5974 = vmatpush1.bf16.msra.mxu1 %v8711_v53  ;;  %v3067_v53 = vsel %vm3008_vm4, %v3060_v61, %v3066_v13 }
 0x364   :  { %5975 = vmatprep.subr.bf16.mxu1 %v8716_v59 }
 0x366   :  { %5833 = vmatmul.mubr.bf16.gmra.mrb[76].mxu1 %v3031_v33  ;;  %v3081_v33 = vsel %vm3008_vm4, %v3074_v46, %v3080_v5 }
 0x367   :  { %5842 = vmatprep.mubr.bf16.mxu1 %v3039_v7  ;;  %5976 = vmatpush1.bf16.msra.mxu1 %v8714_v42 }
 0x368   :  { %5977 = vmatprep.subr.bf16.mxu1 %v8719_v22 }
 0x36b   :  { %5978 = vmatpush1.bf16.msra.mxu1 %v8717_v11 }
 0x36e   :  { %5843 = vmatmul.mubr.bf16.gmra.mrb[80].mxu1 %v3037_v12 }
 0x36f   :  { %5852 = vmatprep.mubr.bf16.mxu1 %v3045_v23 }
 0x376   :  { %5853 = vmatmul.mubr.bf16.gmra.mrb[84].mxu1 %v3043_v34 }
 0x377   :  { %5862 = vmatprep.mubr.bf16.mxu1 %v3051_v26 }
 0x37e   :  { %5863 = vmatmul.mubr.bf16.gmra.mrb[88].mxu1 %v3049_v18 }
 0x37f   :  { %5872 = vmatprep.mubr.bf16.mxu1 %v3057_v47 }
 0x386   :  { %5873 = vmatmul.mubr.bf16.gmra.mrb[92].mxu1 %v3055_v1 }
 0x387   :  { %5882 = vmatprep.mubr.bf16.mxu1 %v3063_v40 }
 0x38e   :  { %5883 = vmatmul.mubr.bf16.gmra.mrb[96].mxu1 %v3061_v27 }
 0x38f   :  { %5892 = vmatprep.mubr.bf16.mxu1 %v3069_v14  ;;  %v14648_v14 = vrot.slane %v11855_v56, 4 }
 0x391   :  { %v3017_v13 = vsel %vm3008_vm4, %v14118_v4, %v14648_v14 }
 0x394   :  { %v12740_v32 = vpop.f32.mrb[128].mxu0 }
 0x395   :  { %v12743_v59 = vpop.f32.mrb[129].mxu0 }
 0x396   :  { %5893 = vmatmul.mubr.bf16.gmra.mrb[100].mxu1 %v3067_v53  ;;  %v12746_v60 = vpop.f32.mrb[130].mxu0 }
 0x397   :  { %5902 = vmatprep.mubr.bf16.mxu1 %v3075_v19  ;;  %v12748_v6 = vpop.f32.mrb[131].mxu0 }
 0x39c   :  { %v12751_v42 = vpop.f32.mrb[132].mxu0 }
 0x39d   :  { %v12756_v22 = vpop.f32.mrb[133].mxu0 }
 0x39e   :  { %5903 = vmatmul.mubr.bf16.gmra.mrb[104].mxu1 %v3073_v31  ;;  %v12759_v7 = vpop.f32.mrb[134].mxu0 }
 0x39f   :  { %5912 = vmatprep.mubr.bf16.mxu1 %v3081_v33  ;;  %v12761_v11 = vpop.f32.mrb[135].mxu0 }
 0x3a4   :  { %v12764_v54 = vpop.f32.mrb[136].mxu0 }
 0x3a5   :  { %v12766_v43 = vpop.f32.mrb[137].mxu0 }
 0x3a6   :  { %5913 = vmatmul.mubr.bf16.gmra.mrb[108].mxu1 %v12171_v24  ;;  %v12770_v12 = vpop.f32.mrb[138].mxu0 }
 0x3a7   :  { %5922 = vmatprep.mubr.bf16.mxu1 %v3087_v2  ;;  %v12772_v23 = vpop.f32.mrb[139].mxu0 }
 0x3ac   :  { %v12775_v3 = vpop.f32.mrb[140].mxu0 }
 0x3ad   :  { %v12777_v34 = vpop.f32.mrb[141].mxu0 }
 0x3ae   :  { %5923 = vmatmul.mubr.bf16.gmra.mrb[112].mxu1 %v12174_v15  ;;  %v12781_v26 = vpop.f32.mrb[142].mxu0 }
 0x3af   :  { %5932 = vmatprep.mubr.bf16.mxu1 %v3093_v63  ;;  %v12783_v24 = vpop.f32.mrb[143].mxu0 }
 0x3b4   :  { %v12786_v55 = vpop.f32.mrb[144].mxu0 }
 0x3b5   :  { %v12788_v18 = vpop.f32.mrb[145].mxu0 }
 0x3b6   :  { %5933 = vmatmul.mubr.bf16.gmra.mrb[116].mxu1 %v12177_v0  ;;  %v12792_v47 = vpop.f32.mrb[146].mxu0 }
 0x3b7   :  { %5942 = vmatprep.mubr.bf16.mxu1 %v3099_v49  ;;  %v12794_v15 = vpop.f32.mrb[147].mxu0 }
 0x3bc   :  { %v12796_v35 = vpop.f32.mrb[148].mxu0 }
 0x3bd   :  { %v12798_v8 = vpop.f32.mrb[149].mxu0 }
 0x3be   :  { %5943 = vmatmul.mubr.bf16.gmra.mrb[120].mxu1 %v12182_v51  ;;  %v12804_v1 = vpop.f32.mrb[150].mxu0  ;;  %v8727_v51 = vmov 0  }
 0x3bf   :  { %5952 = vmatprep.mubr.bf16.mxu1 %v3154_v39  ;;  %v12806_v0 = vpop.f32.mrb[151].mxu0  ;;  %v14652_v39 = vrot.slane %v11893_v44, 4 }
 0x3c4   :  { %v12808_v40 = vpop.f32.mrb[152].mxu0 }
 0x3c5   :  { %v12810_v61 = vpop.f32.mrb[153].mxu0 }
 0x3c6   :  { %5953 = vmatmul.mubr.bf16.gmra.mrb[124].mxu1 %v12187_v62  ;;  %v12813_v28 = vpop.f32.mrb[154].mxu0 }
 0x3c7   :  { %v12815_v27 = vpop.f32.mrb[155].mxu0  ;;  %5995 = vmatprep.mubr.bf16.mxu1 %v8727_v51 }
 0x3cc   :  { %v12819_v16 = vpop.f32.mrb[156].mxu0 }
 0x3cd   :  { %v12826_v46 = vpop.f32.mrb[157].mxu0 }
 0x3ce   :  { %5996 = vmatmul.mubr.bf16.vlgmr.msra.gmra.mrb[64].mxu1 %v3017_v13  ;;  %v12828_v62 = vpop.f32.mrb[158].mxu0 }
 0x3cf   :  { %v12830_v53 = vpop.f32.mrb[159].mxu0  ;;  %6005 = vmatprep.mubr.bf16.mxu1 %v8727_v51 }
 0x3d4   :  { %v12833_v19 = vpop.f32.mrb[160].mxu0 }
 0x3d5   :  { %v12835_v5 = vpop.f32.mrb[161].mxu0 }
 0x3d6   :  { %6006 = vmatmul.mubr.bf16.gmra.mrb[68].mxu1 %v12224_v41  ;;  %v12838_v56 = vpop.f32.mrb[162].mxu0 }
 0x3d7   :  { %v12840_v45 = vpop.f32.mrb[163].mxu0  ;;  %6015 = vmatprep.mubr.bf16.mxu1 %v8727_v51 }
 0x3dc   :  { %v12843_v31 = vpop.f32.mrb[164].mxu0 }
 0x3dd   :  { %v12845_v33 = vpop.f32.mrb[165].mxu0 }
 0x3de   :  { %6016 = vmatmul.mubr.bf16.gmra.mrb[72].mxu1 %v12259_v57  ;;  %v12848_v48 = vpop.f32.mrb[166].mxu0  ;;  %v3040_v57 = vrot.slane %v11902_v30, 4 }
 0x3df   :  { %v12850_v2 = vpop.f32.mrb[167].mxu0  ;;  %6025 = vmatprep.mubr.bf16.mxu1 %v8727_v51 }
 0x3e0   :  { %v3041_v14 = vsel %vm3008_vm4, %v14652_v39, %v3040_v57 }
 0x3e4   :  { %v12853_v10 = vpop.f32.mrb[168].mxu0 }
 0x3e5   :  { %v12855_v41 = vpop.f32.mrb[169].mxu0 }
 0x3e6   :  { %6026 = vmatmul.mubr.bf16.gmra.mrb[76].mxu1 %v12298_v25  ;;  %v12858_v63 = vpop.f32.mrb[170].mxu0 }
 0x3e7   :  { %14649 = vst [vmem:[#allocation73_spill] sm:$0xff] %v12858_v63  ;;  %v12860_v29 = vpop.f32.mrb[171].mxu0  ;;  %6035 = vmatprep.mubr.bf16.mxu1 %v8727_v51 }
 0x3e8   :  { %14650 = vst [vmem:[#allocation63_spill] sm:$0xff] %v12860_v29  ;;  %v3046_v29 = vrot.slane %v11915_v38, 4 }
 0x3ea   :  { %v3047_v30 = vsel %vm3008_vm4, %v3040_v57, %v3046_v29 }
 0x3ec   :  { %v12864_v49 = vpop.f32.mrb[172].mxu0 }
 0x3ed   :  { %14651 = vst [vmem:[#allocation66_spill] sm:$0xff] %v12864_v49  ;;  %v12869_v13 = vpop.f32.mrb[173].mxu0 }
 0x3ee   :  { %6036 = vmatmul.mubr.bf16.gmra.mrb[80].mxu1 %v3041_v14  ;;  %v12871_v4 = vpop.f32.mrb[174].mxu0  ;;  %v3052_v14 = vrot.slane %v11930_v37, 4 }
 0x3ef   :  { %14653 = vst [vmem:[#allocation67_spill] sm:$0xff] %v12871_v4  ;;  %v12873_v25 = vpop.f32.mrb[175].mxu0  ;;  %6045 = vmatprep.mubr.bf16.mxu1 %v8727_v51 }
 0x3f0   :  { %14654 = vst [vmem:[#allocation70_spill] sm:$0xff] %v12873_v25  ;;  %v3053_v4 = vsel %vm3008_vm4, %v3046_v29, %v3052_v14 }
 0x3f4   :  { %v12877_v63 = vpop.f32.mrb[176].mxu0 }
 0x3f5   :  { %14655 = vst [vmem:[#allocation77_spill] sm:$0xff] %v12877_v63  ;;  %v12880_v49 = vpop.f32.mrb[177].mxu0 }
 0x3f6   :  { %6046 = vmatmul.mubr.bf16.gmra.mrb[84].mxu1 %v3047_v30  ;;  %v12882_v44 = vpop.f32.mrb[178].mxu0  ;;  %v3058_v30 = vrot.slane %v11939_v58, 4 }
 0x3f7   :  { %14656 = vst [vmem:[#allocation81_spill] sm:$0xff] %v12882_v44  ;;  %v12884_v39 = vpop.f32.mrb[179].mxu0  ;;  %6055 = vmatprep.mubr.bf16.mxu1 %v8727_v51 }
 0x3f8   :  { %14657 = vst [vmem:[#allocation71_spill] sm:$0xff] %v12884_v39  ;;  %v3059_v44 = vsel %vm3008_vm4, %v3052_v14, %v3058_v30 }
 0x3fc   :  { %v12888_v25 = vpop.f32.mrb[180].mxu0 }
 0x3fd   :  { %14658 = vst [vmem:[#allocation74_spill] sm:$0xff] %v12888_v25  ;;  %v12891_v38 = vpop.f32.mrb[181].mxu0 }
 0x3fe   :  { %14659 = vst [vmem:[#allocation75_spill] sm:$0xff] %v12891_v38  ;;  %6056 = vmatmul.mubr.bf16.gmra.mrb[88].mxu1 %v3053_v4  ;;  %v12893_v63 = vpop.f32.mrb[182].mxu0  ;;  %v3064_v4 = vrot.slane %v11947_v52, 4  ;;  %v3076_v52 = vrot.slane %v11968_v20, 4  ;;  %v3094_v20 = vrot.slane %v12030_v17, 4 }
 0x3ff   :  { %14660 = vst [vmem:[#allocation78_spill] sm:$0xff] %v12893_v63  ;;  %v12895_v57 = vpop.f32.mrb[183].mxu0  ;;  %6065 = vmatprep.mubr.bf16.mxu1 %v8727_v51  ;;  %v3400_v17 = vld [vmem:[%s13902_s4] sm:$0x3] }
 0x400   :  { %14661 = vst [vmem:[#allocation80_spill] sm:$0xff] %v12895_v57  ;;  %v3065_v63 = vsel %vm3008_vm4, %v3058_v30, %v3064_v4 }
 0x404   :  { %v12899_v39 = vpop.f32.mrb[184].mxu0 }
 0x405   :  { %14662 = vst [vmem:[#allocation85_spill] sm:$0xff] %v12899_v39  ;;  %v12902_v37 = vpop.f32.mrb[185].mxu0 }
 0x406   :  { %14663 = vst [vmem:[#allocation84_spill] sm:$0xff] %v12902_v37  ;;  %6066 = vmatmul.mubr.bf16.gmra.mrb[92].mxu1 %v3059_v44  ;;  %v12904_v25 = vpop.f32.mrb[186].mxu0  ;;  %v3070_v44 = vrot.slane %v11957_v21, 4  ;;  %v3088_v21 = vrot.slane %v12011_v50, 4  ;;  %v14671_v50 = vrot.slane %v11843_v9, 4 }
 0x407   :  { %14664 = vst [vmem:[#allocation89_spill] sm:$0xff] %v12904_v25  ;;  %v12906_v29 = vpop.f32.mrb[187].mxu0  ;;  %6075 = vmatprep.mubr.bf16.mxu1 %v8727_v51 }
 0x408   :  { %14665 = vst [vmem:[#allocation88_spill] sm:$0xff] %v12906_v29  ;;  %v3071_v29 = vsel %vm3008_vm4, %v3064_v4, %v3070_v44  ;;  %v3077_v30 = vsel %vm3008_vm4, %v3070_v44, %v3076_v52  ;;  %v3095_v4 = vsel %vm3008_vm4, %v3088_v21, %v3094_v20  ;;  %v3100_v44 = vrot.slane %v14621_v36, 4 }
 0x40c   :  { %v12910_v57 = vpop.f32.mrb[188].mxu0 }
 0x40d   :  { %14666 = vst [vmem:[#allocation79_spill] sm:$0xff] %v12910_v57  ;;  %v12913_v58 = vpop.f32.mrb[189].mxu0 }
 0x40e   :  { %14667 = vst [vmem:[#allocation82_spill] sm:$0xff] %v12913_v58  ;;  %6076 = vmatmul.mubr.bf16.gmra.mrb[96].mxu1 %v3065_v63  ;;  %v12915_v39 = vpop.f32.mrb[190].mxu0  ;;  %v14670_v63 = vld [vmem:[#allocation69_spill] sm:$0xff] }
 0x40f   :  { %14668 = vst [vmem:[#allocation83_spill] sm:$0xff] %v12915_v39  ;;  %v12917_v14 = vpop.f32.mrb[191].mxu0  ;;  %6085 = vmatprep.mubr.bf16.mxu1 %v8727_v51  ;;  %v3082_v39 = vrot.slane %v14670_v63, 4 }
 0x410   :  { %14669 = vst [vmem:[#allocation86_spill] sm:$0xff] %v12917_v14 }
 0x411   :  { %v3083_v14 = vsel %vm3008_vm4, %v3076_v52, %v3082_v39  ;;  %v14672_v52 = vld [vmem:[#allocation2_spill] sm:$0xff] }
 0x412   :  { %v14674_v36 = vsub.s32 1, %v14672_v52 }
 0x416   :  { %6086 = vmatmul.mubr.bf16.gmra.mrb[100].mxu1 %v3071_v29  ;;  %v3089_v29 = vsel %vm3008_vm4, %v3082_v39, %v3088_v21  ;;  %v3158_v39 = vsel %vm3008_vm4, %v3100_v44, %v14671_v50  ;;  %v12950_v21 = vrot.slane %v3400_v17, %v14674_v36 }
 0x417   :  { %6095 = vmatprep.mubr.bf16.mxu1 %v8727_v51 }
 0x418   :  { %v7720_v9 = vadd.f32 %v12743_v59, %v12950_v21  ;;  %v7732_v59 = vadd.f32 %v12761_v11, %v12950_v21  ;;  %v12982_v11 = vadd.f32 %v12772_v23, %v12950_v21 }
 0x41e   :  { %6096 = vmatmul.mubr.bf16.gmra.mrb[104].mxu1 %v3077_v30  ;;  %v14673_v30 = vsub.s32 0, %v14672_v52 }
 0x41f   :  { %6105 = vmatprep.mubr.bf16.mxu1 %v8727_v51 }
 0x420   :  { %v12946_v63 = vrot.slane %v3400_v17, %v14673_v30 }
 0x422   :  { %v13050_v57 = vadd.f32 %v12813_v28, %v12946_v63 }
 0x426   :  { %6106 = vmatmul.mubr.bf16.gmra.mrb[108].mxu1 %v3083_v14  ;;  %v3101_v14 = vsel %vm3008_vm4, %v3094_v20, %v3100_v44  ;;  %v7726_v44 = vadd.f32 %v12751_v42, %v12946_v63  ;;  %v12974_v42 = vadd.f32 %v12766_v43, %v12950_v21  ;;  %v12990_v43 = vadd.f32 %v12777_v34, %v12950_v21 }
 0x427   :  { %6115 = vmatprep.mubr.bf16.mxu1 %v8727_v51  ;;  %v13010_v34 = vadd.f32 %v12792_v47, %v12946_v63  ;;  %v13028_v47 = vadd.f32 %v12804_v1, %v12946_v63  ;;  %v13044_v1 = vadd.f32 %v12810_v61, %v12950_v21  ;;  %v13058_v61 = vadd.f32 %v12819_v16, %v12946_v63 }
 0x42e   :  { %6116 = vmatmul.mubr.bf16.gmra.mrb[112].mxu1 %v3089_v29  ;;  %v7722_v29 = vadd.f32 %v12746_v60, %v12946_v63  ;;  %v12970_v60 = vadd.f32 %v12764_v54, %v12946_v63  ;;  %v12986_v54 = vadd.f32 %v12775_v3, %v12946_v63  ;;  %v13006_v3 = vadd.f32 %v12788_v18, %v12950_v21 }
 0x42f   :  { %6125 = vmatprep.mubr.bf16.mxu1 %v8727_v51  ;;  %v13024_v18 = vadd.f32 %v12798_v8, %v12950_v21 }
 0x436   :  { %6126 = vmatmul.mubr.bf16.gmra.mrb[116].mxu1 %v3095_v4  ;;  %v7724_v4 = vadd.f32 %v12748_v6, %v12950_v21 }
 0x437   :  { %6135 = vmatprep.mubr.bf16.mxu1 %v8727_v51 }
 0x43e   :  { %6136 = vmatmul.mubr.bf16.gmra.mrb[120].mxu1 %v3101_v14  ;;  %v7728_v14 = vadd.f32 %v12756_v22, %v12950_v21  ;;  %v12978_v22 = vadd.f32 %v12770_v12, %v12946_v63  ;;  %v12994_v12 = vadd.f32 %v12781_v26, %v12946_v63  ;;  %v13014_v26 = vadd.f32 %v12794_v15, %v12950_v21 }
 0x43f   :  { %6145 = vmatprep.mubr.bf16.mxu1 %v8727_v51  ;;  %v7718_v51 = vadd.f32 %v12740_v32, %v12946_v63  ;;  %v7730_v32 = vadd.f32 %v12759_v7, %v12946_v63 }
 0x446   :  { %6146 = vmatmul.mubr.bf16.gmra.mrb[124].mxu1 %v3158_v39 }
 0x4a1   :  { %v5997_v20 = vpop.f32.mrb[64].mxu1 }
 0x4a2   :  { %v7719_v50 = vadd.f32 %v7718_v51, %v5997_v20  ;;  %v5999_v39 = vpop.f32.mrb[65].mxu1 }
 0x4a3   :  { %v7721_v17 = vadd.f32 %v7720_v9, %v5999_v39  ;;  %v6001_v6 = vpop.f32.mrb[66].mxu1  ;;  %v12998_v9 = vadd.f32 %v12783_v24, %v12950_v21  ;;  %v13018_v24 = vadd.f32 %v12796_v35, %v12946_v63  ;;  %v13038_v35 = vadd.f32 %v12808_v40, %v12946_v63 }
 0x4a4   :  { %v6156_v52 = vmax.f32 %v7719_v50, 0.0  ;;  %v7723_v30 = vadd.f32 %v7722_v29, %v6001_v6  ;;  %v6003_v7 = vpop.f32.mrb[67].mxu1  ;;  %v13002_v29 = vadd.f32 %v12786_v55, %v12946_v63 }
 0x4a5   :  { %v6157_v36 = vmax.f32 %v7721_v17, 0.0  ;;  %v7725_v51 = vadd.f32 %v7724_v4, %v6003_v7  ;;  %v13034_v17 = vadd.f32 %v12806_v0, %v12950_v21 }
 0x4a6   :  { %v6158_v23 = vmax.f32 %v7723_v30, 0.0  ;;  %v13020_v4 = vrot.slane %v6156_v52, 2 }
 0x4a7   :  { %v6159_v20 = vmax.f32 %v7725_v51, 0.0  ;;  %v13030_v50 = vrot.slane %v6157_v36, 2 }
 0x4a8   :  { %14675 = vst [vmem:[#allocation93_spill] sm:$0xff] %v13020_v4  ;;  %v6285_v55 = vrot.slane %v6158_v23, 2 }
 0x4a9   :  { %14676 = vst [vmem:[#allocation92_spill] sm:$0xff] %v13030_v50  ;;  %v6288_v39 = vrot.slane %v6159_v20, 2  ;;  %v6007_v15 = vpop.f32.mrb[68].mxu1 }
 0x4aa   :  { %v6286_v8 = vsel %vm605_vm1, %v13020_v4, %v6285_v55  ;;  %v7727_v6 = vadd.f32 %v7726_v44, %v6007_v15  ;;  %v6009_v30 = vpop.f32.mrb[69].mxu1  ;;  %v13054_v44 = vadd.f32 %v12815_v27, %v12950_v21  ;;  %v13072_v27 = vadd.f32 %v12830_v53, %v12950_v21 }
 0x4ab   :  { %v6478_v7 = vmax.f32 %v6156_v52, %v6286_v8  ;;  %v6289_v51 = vsel %vm605_vm1, %v13030_v50, %v6288_v39  ;;  %v7729_v58 = vadd.f32 %v7728_v14, %v6009_v30  ;;  %v6011_v0 = vpop.f32.mrb[70].mxu1  ;;  %v13062_v14 = vadd.f32 %v12826_v46, %v12950_v21 }
 0x4ac   :  { %v6479_v40 = vmax.f32 %v6157_v36, %v6289_v51  ;;  %v6160_v25 = vmax.f32 %v7727_v6, 0.0  ;;  %v7731_v37 = vadd.f32 %v7730_v32, %v6011_v0  ;;  %v6013_v4 = vpop.f32.mrb[71].mxu1  ;;  %v13068_v32 = vadd.f32 %v12828_v62, %v12946_v63 }
 0x4ad   :  { %v6161_v52 = vmax.f32 %v7729_v58, 0.0  ;;  %v7733_v15 = vadd.f32 %v7732_v59, %v6013_v4  ;;  %v13076_v58 = vadd.f32 %v12833_v19, %v12946_v63  ;;  %v13080_v46 = vadd.f32 %v12835_v5, %v12950_v21 }
 0x4ae   :  { %v13064_v28 = vmax.f32 %v6478_v7, %v6479_v40  ;;  %v6290_v36 = vrot.slane %v6160_v25, 2  ;;  %v6162_v8 = vmax.f32 %v7731_v37, 0.0  ;;  %v13085_v62 = vadd.f32 %v12838_v56, %v12946_v63 }
 0x4af   :  { %v6292_v16 = vrot.slane %v6161_v52, 2  ;;  %v6163_v6 = vmax.f32 %v7733_v15, 0.0  ;;  %v13090_v19 = vadd.f32 %v12840_v45, %v12950_v21  ;;  %v13096_v40 = vadd.f32 %v12843_v31, %v12946_v63 }
 0x4b0   :  { %14677 = vst [vmem:[#allocation87_spill] sm:$0xff] %v13064_v28  ;;  %v6291_v37 = vsel %vm605_vm1, %v6285_v55, %v6290_v36  ;;  %v6294_v59 = vrot.slane %v6162_v8, 2  ;;  %v13108_v31 = vadd.f32 %v12845_v33, %v12950_v21 }
 0x4b1   :  { %v6480_v4 = vmax.f32 %v6158_v23, %v6291_v37  ;;  %v6293_v53 = vsel %vm605_vm1, %v6288_v39, %v6292_v16  ;;  %v6296_v30 = vrot.slane %v6163_v6, 2  ;;  %v6017_v7 = vpop.f32.mrb[72].mxu1 }
 0x4b2   :  { %v6481_v51 = vmax.f32 %v6159_v20, %v6293_v53  ;;  %v6295_v5 = vsel %vm605_vm1, %v6290_v36, %v6294_v59  ;;  %v7735_v0 = vadd.f32 %v12970_v60, %v6017_v7  ;;  %v6019_v55 = vpop.f32.mrb[73].mxu1  ;;  %v6704_v60 = vld [vmem:[%s13903_s7 + $0x8] sm:$0xff]  ;;  %v13117_v7 = vadd.f32 %v12848_v48, %v12946_v63 }
 0x4b3   :  { %v6482_v56 = vmax.f32 %v6160_v25, %v6295_v5  ;;  %v6297_v23 = vsel %vm605_vm1, %v6292_v16, %v6296_v30  ;;  %v7737_v39 = vadd.f32 %v12974_v42, %v6019_v55  ;;  %v6021_v15 = vpop.f32.mrb[74].mxu1  ;;  %v14121_v42 = vrot.slane %v13064_v28, 4  ;;  %6769 = vmatprep.mubr.f32.mxu0 %v6704_v60 }
 0x4b4   :  { %v13100_v37 = vmax.f32 %v6480_v4, %v6481_v51  ;;  %v6483_v45 = vmax.f32 %v6161_v52, %v6297_v23  ;;  %v6164_v50 = vmax.f32 %v7735_v0, 0.0  ;;  %v7739_v20 = vadd.f32 %v12978_v22, %v6021_v15  ;;  %v6023_v36 = vpop.f32.mrb[75].mxu1 }
 0x4b5   :  { %v6165_v25 = vmax.f32 %v7737_v39, 0.0  ;;  %v7741_v16 = vadd.f32 %v12982_v11, %v6023_v36 }
 0x4b6   :  { %v13112_v4 = vmax.f32 %v6482_v56, %v6483_v45  ;;  %v6298_v52 = vrot.slane %v6164_v50, 2  ;;  %v6166_v53 = vmax.f32 %v7739_v20, 0.0  ;;  %v6607_v22 = vrot.slane %v13100_v37, 4 }
 0x4b7   :  { %v6300_v51 = vrot.slane %v6165_v25, 2  ;;  %v6167_v5 = vmax.f32 %v7741_v16, 0.0  ;;  %v7528_v33 = vpack.c.bf16 %v13100_v37, %v13064_v28 }
 0x4b8   :  { %v6299_v11 = vsel %vm605_vm1, %v6294_v59, %v6298_v52  ;;  %v6302_v0 = vrot.slane %v6166_v53, 2  ;;  %v13125_v55 = vsel %vm3008_vm4, %v14121_v42, %v6607_v22  ;;  %v6609_v56 = vrot.slane %v13112_v4, 4 }
 0x4b9   :  { %14678 = vst [vmem:[#allocation90_spill] sm:$0xff] %v13125_v55  ;;  %v6484_v23 = vmax.f32 %v6162_v8, %v6299_v11  ;;  %v6301_v39 = vsel %vm605_vm1, %v6296_v30, %v6300_v51  ;;  %v6304_v48 = vrot.slane %v6167_v5, 2  ;;  %v6027_v15 = vpop.f32.mrb[76].mxu1 }
 0x4ba   :  { %v6485_v20 = vmax.f32 %v6163_v6, %v6301_v39  ;;  %v6303_v36 = vsel %vm605_vm1, %v6298_v52, %v6302_v0  ;;  %v7743_v59 = vadd.f32 %v12986_v54, %v6027_v15  ;;  %v6029_v60 = vpop.f32.mrb[77].mxu1  ;;  %v13134_v16 = vsel %vm3008_vm4, %v6607_v22, %v6609_v56 }
 0x4bb   :  { %v6486_v42 = vmax.f32 %v6164_v50, %v6303_v36  ;;  %v6305_v28 = vsel %vm605_vm1, %v6300_v51, %v6304_v48  ;;  %v7745_v8 = vadd.f32 %v12990_v43, %v6029_v60  ;;  %v6031_v30 = vpop.f32.mrb[78].mxu1  ;;  %v7526_v11 = vpack.c.bf16 %v13134_v16, %v13125_v55 }
 0x4bc   :  { %v13140_v38 = vmax.f32 %v6484_v23, %v6485_v20  ;;  %v6487_v6 = vmax.f32 %v6165_v25, %v6305_v28  ;;  %v6168_v39 = vmax.f32 %v7743_v59, 0.0  ;;  %v7747_v52 = vadd.f32 %v12994_v12, %v6031_v30  ;;  %v6033_v54 = vpop.f32.mrb[79].mxu1 }
 0x4bd   :  { %v13145_v22 = vadd.f32 %v12850_v2, %v12950_v21  ;;  %v13149_v50 = vadd.f32 %v12853_v10, %v12946_v63  ;;  %v6169_v43 = vmax.f32 %v7745_v8, 0.0  ;;  %v7749_v51 = vadd.f32 %v12998_v9, %v6033_v54  ;;  %7527 = vmatprep.subr.bf16.mxu0 %v7526_v11 }
 0x4be   :  { %14679 = vst [vmem:[#allocation91_spill] sm:$0xff] %v13140_v38  ;;  %v13152_v15 = vmax.f32 %v6486_v42, %v6487_v6  ;;  %v6306_v23 = vrot.slane %v6168_v39, 2  ;;  %v6170_v28 = vmax.f32 %v7747_v52, 0.0  ;;  %7529 = vmatpush1.bf16.msra.mxu0 %v7528_v33  ;;  %v6611_v12 = vrot.slane %v13140_v38, 4 }
 0x4bf   :  { %v13157_v25 = vadd.f32 %v12855_v41, %v12950_v21  ;;  %v6308_v2 = vrot.slane %v6169_v43, 2  ;;  %v6171_v20 = vmax.f32 %v7749_v51, 0.0  ;;  %v7532_v10 = vpack.c.bf16 %v13140_v38, %v13112_v4 }
 0x4c0   :  { %v6307_v36 = vsel %vm605_vm1, %v6302_v0, %v6306_v23  ;;  %v6310_v9 = vrot.slane %v6170_v28, 2  ;;  %v13163_v42 = vsel %vm3008_vm4, %v6609_v56, %v6611_v12  ;;  %v6613_v59 = vrot.slane %v13152_v15, 4 }
 0x4c1   :  { %v6488_v33 = vmax.f32 %v6166_v53, %v6307_v36  ;;  %v6309_v60 = vsel %vm605_vm1, %v6304_v48, %v6308_v2  ;;  %v6312_v8 = vrot.slane %v6171_v20, 2  ;;  %v6037_v30 = vpop.f32.mrb[80].mxu1 }
 0x4c2   :  { %v6489_v11 = vmax.f32 %v6167_v5, %v6309_v60  ;;  %v6311_v6 = vsel %vm605_vm1, %v6306_v23, %v6310_v9  ;;  %v7751_v52 = vadd.f32 %v13002_v29, %v6037_v30  ;;  %v6039_v0 = vpop.f32.mrb[81].mxu1  ;;  %v13172_v54 = vsel %vm3008_vm4, %v6611_v12, %v6613_v59  ;;  %v14681_v30 = vld [vmem:[#allocation73_spill] sm:$0xff] }
 0x4c3   :  { %v6490_v56 = vmax.f32 %v6168_v39, %v6311_v6  ;;  %v6313_v51 = vsel %vm605_vm1, %v6308_v2, %v6312_v8  ;;  %v7753_v53 = vadd.f32 %v13006_v3, %v6039_v0  ;;  %v6041_v48 = vpop.f32.mrb[82].mxu1  ;;  %v7530_v36 = vpack.c.bf16 %v13172_v54, %v13163_v42 }
 0x4c4   :  { %v13178_v45 = vmax.f32 %v6488_v33, %v6489_v11  ;;  %v6491_v5 = vmax.f32 %v6169_v43, %v6313_v51  ;;  %v6172_v60 = vmax.f32 %v7751_v52, 0.0  ;;  %v7755_v23 = vadd.f32 %v13010_v34, %v6041_v48  ;;  %v6043_v29 = vpop.f32.mrb[83].mxu1  ;;  %v14682_v34 = vld [vmem:[#allocation63_spill] sm:$0xff] }
 0x4c5   :  { %v13183_v12 = vadd.f32 %v14681_v30, %v12946_v63  ;;  %v6173_v39 = vmax.f32 %v7753_v53, 0.0  ;;  %v7757_v2 = vadd.f32 %v13014_v26, %v6043_v29  ;;  %7531 = vmatprep.subr.bf16.mxu0 %v7530_v36  ;;  %v13193_v52 = vadd.f32 %v14682_v34, %v12950_v21 }
 0x4c6   :  { %14680 = vst [vmem:[#allocation94_spill] sm:$0xff] %v13178_v45  ;;  %v13188_v6 = vmax.f32 %v6490_v56, %v6491_v5  ;;  %v6314_v33 = vrot.slane %v6172_v60, 2  ;;  %v6174_v11 = vmax.f32 %v7755_v23, 0.0  ;;  %7533 = vmatpush1.bf16.msra.mxu0 %v7532_v10  ;;  %v6615_v43 = vrot.slane %v13178_v45, 4 }
 0x4c7   :  { %v6316_v0 = vrot.slane %v6173_v39, 2  ;;  %v6175_v51 = vmax.f32 %v7757_v2, 0.0  ;;  %v7536_v26 = vpack.c.bf16 %v13178_v45, %v13152_v15 }
 0x4c8   :  { %v6315_v53 = vsel %vm605_vm1, %v6310_v9, %v6314_v33  ;;  %v6318_v48 = vrot.slane %v6174_v11, 2  ;;  %v13199_v56 = vsel %vm3008_vm4, %v6613_v59, %v6615_v43  ;;  %v6617_v36 = vrot.slane %v13188_v6, 4 }
 0x4c9   :  { %v6492_v10 = vmax.f32 %v6170_v28, %v6315_v53  ;;  %v6317_v5 = vsel %vm605_vm1, %v6312_v8, %v6316_v0  ;;  %v6320_v23 = vrot.slane %v6175_v51, 2  ;;  %v6047_v29 = vpop.f32.mrb[84].mxu1 }
 0x4ca   :  { %v6493_v2 = vmax.f32 %v6171_v20, %v6317_v5  ;;  %v6319_v34 = vsel %vm605_vm1, %v6314_v33, %v6318_v48  ;;  %v7759_v3 = vadd.f32 %v13018_v24, %v6047_v29  ;;  %v6049_v9 = vpop.f32.mrb[85].mxu1  ;;  %v13208_v41 = vsel %vm3008_vm4, %v6615_v43, %v6617_v36  ;;  %v14684_v29 = vld [vmem:[#allocation66_spill] sm:$0xff] }
 0x4cb   :  { %v6494_v59 = vmax.f32 %v6172_v60, %v6319_v34  ;;  %v6321_v55 = vsel %vm605_vm1, %v6316_v0, %v6320_v23  ;;  %v7761_v28 = vadd.f32 %v13024_v18, %v6049_v9  ;;  %v6051_v8 = vpop.f32.mrb[86].mxu1  ;;  %v7534_v53 = vpack.c.bf16 %v13208_v41, %v13199_v56 }
 0x4cc   :  { %v13214_v38 = vmax.f32 %v6492_v10, %v6493_v2  ;;  %v6495_v20 = vmax.f32 %v6173_v39, %v6321_v55  ;;  %v6176_v5 = vmax.f32 %v7759_v3, 0.0  ;;  %v7763_v33 = vadd.f32 %v13028_v47, %v6051_v8  ;;  %v6053_v24 = vpop.f32.mrb[87].mxu1 }
 0x4cd   :  { %v13219_v43 = vadd.f32 %v14684_v29, %v12946_v63  ;;  %v6177_v60 = vmax.f32 %v7761_v28, 0.0  ;;  %v7765_v0 = vadd.f32 %v13034_v17, %v6053_v24  ;;  %7535 = vmatprep.subr.bf16.mxu0 %v7534_v53  ;;  %v13229_v47 = vadd.f32 %v12869_v13, %v12950_v21 }
 0x4ce   :  { %14683 = vst [vmem:[#allocation98_spill] sm:$0xff] %v13214_v38  ;;  %v13224_v34 = vmax.f32 %v6494_v59, %v6495_v20  ;;  %v6322_v10 = vrot.slane %v6176_v5, 2  ;;  %v6178_v2 = vmax.f32 %v7763_v33, 0.0  ;;  %7537 = vmatpush1.bf16.msra.mxu0 %v7536_v26  ;;  %v6619_v55 = vrot.slane %v13214_v38, 4 }
 0x4cf   :  { %v6324_v39 = vrot.slane %v6177_v60, 2  ;;  %v6179_v3 = vmax.f32 %v7765_v0, 0.0  ;;  %v7540_v17 = vpack.c.bf16 %v13214_v38, %v13188_v6 }
 0x4d0   :  { %14685 = vst [vmem:[#allocation102_spill] sm:$0xff] %v13224_v34  ;;  %v6323_v9 = vsel %vm605_vm1, %v6318_v48, %v6322_v10  ;;  %v6326_v28 = vrot.slane %v6178_v2, 2  ;;  %v13235_v59 = vsel %vm3008_vm4, %v6617_v36, %v6619_v55  ;;  %v6621_v8 = vrot.slane %v13224_v34, 4 }
 0x4d1   :  { %v6496_v26 = vmax.f32 %v6174_v11, %v6323_v9  ;;  %v6325_v53 = vsel %vm605_vm1, %v6320_v23, %v6324_v39  ;;  %v6328_v20 = vrot.slane %v6179_v3, 2  ;;  %v6057_v33 = vpop.f32.mrb[88].mxu1 }
 0x4d2   :  { %v6497_v24 = vmax.f32 %v6175_v51, %v6325_v53  ;;  %v6327_v29 = vsel %vm605_vm1, %v6322_v10, %v6326_v28  ;;  %v7767_v0 = vadd.f32 %v13038_v35, %v6057_v33  ;;  %v6059_v48 = vpop.f32.mrb[89].mxu1  ;;  %v13244_v18 = vsel %vm3008_vm4, %v6619_v55, %v6621_v8  ;;  %v14687_v33 = vld [vmem:[#allocation67_spill] sm:$0xff] }
 0x4d3   :  { %v6498_v36 = vmax.f32 %v6176_v5, %v6327_v29  ;;  %v6329_v30 = vsel %vm605_vm1, %v6324_v39, %v6328_v20  ;;  %v7769_v11 = vadd.f32 %v13044_v1, %v6059_v48  ;;  %v6061_v23 = vpop.f32.mrb[90].mxu1  ;;  %v7538_v9 = vpack.c.bf16 %v13244_v18, %v13235_v59 }
 0x4d4   :  { %v13250_v45 = vmax.f32 %v6496_v26, %v6497_v24  ;;  %v6499_v51 = vmax.f32 %v6177_v60, %v6329_v30  ;;  %v6180_v53 = vmax.f32 %v7767_v0, 0.0  ;;  %v7771_v10 = vadd.f32 %v13050_v57, %v6061_v23  ;;  %v6063_v35 = vpop.f32.mrb[91].mxu1  ;;  %v14688_v57 = vld [vmem:[#allocation70_spill] sm:$0xff] }
 0x4d5   :  { %v13255_v55 = vadd.f32 %v14687_v33, %v12946_v63  ;;  %v6181_v5 = vmax.f32 %v7769_v11, 0.0  ;;  %v7773_v39 = vadd.f32 %v13054_v44, %v6063_v35  ;;  %7539 = vmatprep.subr.bf16.mxu0 %v7538_v9  ;;  %v13265_v60 = vadd.f32 %v14688_v57, %v12950_v21 }
 0x4d6   :  { %14686 = vst [vmem:[#allocation95_spill] sm:$0xff] %v13250_v45  ;;  %v13260_v29 = vmax.f32 %v6498_v36, %v6499_v51  ;;  %v6330_v26 = vrot.slane %v6180_v53, 2  ;;  %v6182_v24 = vmax.f32 %v7771_v10, 0.0  ;;  %7541 = vmatpush1.bf16.msra.mxu0 %v7540_v17  ;;  %v6623_v30 = vrot.slane %v13250_v45, 4 }
 0x4d7   :  { %v6332_v0 = vrot.slane %v6181_v5, 2  ;;  %v6183_v48 = vmax.f32 %v7773_v39, 0.0  ;;  %v7544_v44 = vpack.c.bf16 %v13250_v45, %v13224_v34 }
 0x4d8   :  { %v6331_v11 = vsel %vm605_vm1, %v6326_v28, %v6330_v26  ;;  %v6334_v23 = vrot.slane %v6182_v24, 2  ;;  %v13271_v36 = vsel %vm3008_vm4, %v6621_v8, %v6623_v30  ;;  %v6625_v9 = vrot.slane %v13260_v29, 4 }
 0x4d9   :  { %v6500_v17 = vmax.f32 %v6178_v2, %v6331_v11  ;;  %v6333_v51 = vsel %vm605_vm1, %v6328_v20, %v6332_v0  ;;  %v6336_v10 = vrot.slane %v6183_v48, 2  ;;  %v6067_v35 = vpop.f32.mrb[92].mxu1 }
 0x4da   :  { %v6501_v39 = vmax.f32 %v6179_v3, %v6333_v51  ;;  %v6335_v57 = vsel %vm605_vm1, %v6330_v26, %v6334_v23  ;;  %v7775_v1 = vadd.f32 %v13058_v61, %v6067_v35  ;;  %v6069_v28 = vpop.f32.mrb[93].mxu1  ;;  %v13280_v13 = vsel %vm3008_vm4, %v6623_v30, %v6625_v9  ;;  %v14690_v35 = vld [vmem:[#allocation77_spill] sm:$0xff] }
 0x4db   :  { %v6502_v8 = vmax.f32 %v6180_v53, %v6335_v57  ;;  %v6337_v38 = vsel %vm605_vm1, %v6332_v0, %v6336_v10  ;;  %v7777_v2 = vadd.f32 %v13062_v14, %v6069_v28  ;;  %v6071_v20 = vpop.f32.mrb[94].mxu1  ;;  %v7542_v11 = vpack.c.bf16 %v13280_v13, %v13271_v36 }
 0x4dc   :  { %v13286_v34 = vmax.f32 %v6500_v17, %v6501_v39  ;;  %v6503_v3 = vmax.f32 %v6181_v5, %v6337_v38  ;;  %v6184_v51 = vmax.f32 %v7775_v1, 0.0  ;;  %v7779_v26 = vadd.f32 %v13068_v32, %v6071_v20  ;;  %v6073_v61 = vpop.f32.mrb[95].mxu1 }
 0x4dd   :  { %v13291_v30 = vadd.f32 %v14690_v35, %v12946_v63  ;;  %v6185_v53 = vmax.f32 %v7777_v2, 0.0  ;;  %v7781_v0 = vadd.f32 %v13072_v27, %v6073_v61  ;;  %7543 = vmatprep.subr.bf16.mxu0 %v7542_v11  ;;  %v13301_v32 = vadd.f32 %v12880_v49, %v12950_v21 }
 0x4de   :  { %14689 = vst [vmem:[#allocation96_spill] sm:$0xff] %v13286_v34  ;;  %v13296_v57 = vmax.f32 %v6502_v8, %v6503_v3  ;;  %v6338_v17 = vrot.slane %v6184_v51, 2  ;;  %v6186_v39 = vmax.f32 %v7779_v26, 0.0  ;;  %7545 = vmatpush1.bf16.msra.mxu0 %v7544_v44  ;;  %v6627_v38 = vrot.slane %v13286_v34, 4 }
 0x4df   :  { %v6340_v5 = vrot.slane %v6185_v53, 2  ;;  %v6187_v1 = vmax.f32 %v7781_v0, 0.0  ;;  %v7548_v27 = vpack.c.bf16 %v13286_v34, %v13260_v29 }
 0x4e0   :  { %14691 = vst [vmem:[#allocation97_spill] sm:$0xff] %v13296_v57  ;;  %v6339_v28 = vsel %vm605_vm1, %v6334_v23, %v6338_v17  ;;  %v6342_v2 = vrot.slane %v6186_v39, 2  ;;  %v13307_v8 = vsel %vm3008_vm4, %v6625_v9, %v6627_v38  ;;  %v6629_v20 = vrot.slane %v13296_v57, 4 }
 0x4e1   :  { %v6504_v44 = vmax.f32 %v6182_v24, %v6339_v28  ;;  %v6341_v11 = vsel %vm605_vm1, %v6336_v10, %v6340_v5  ;;  %v6344_v3 = vrot.slane %v6187_v1, 2  ;;  %v6077_v26 = vpop.f32.mrb[96].mxu1 }
 0x4e2   :  { %v6505_v61 = vmax.f32 %v6183_v48, %v6341_v11  ;;  %v6343_v35 = vsel %vm605_vm1, %v6338_v17, %v6342_v2  ;;  %v7783_v0 = vadd.f32 %v13076_v58, %v6077_v26  ;;  %v6079_v23 = vpop.f32.mrb[97].mxu1  ;;  %v13316_v14 = vsel %vm3008_vm4, %v6627_v38, %v6629_v20  ;;  %v14693_v26 = vld [vmem:[#allocation81_spill] sm:$0xff] }
 0x4e3   :  { %v6506_v9 = vmax.f32 %v6184_v51, %v6343_v35  ;;  %v6345_v33 = vsel %vm605_vm1, %v6340_v5, %v6344_v3  ;;  %v7785_v24 = vadd.f32 %v13080_v46, %v6079_v23  ;;  %v6081_v10 = vpop.f32.mrb[98].mxu1  ;;  %v7546_v28 = vpack.c.bf16 %v13316_v14, %v13307_v8 }
 0x4e4   :  { %v13322_v45 = vmax.f32 %v6504_v44, %v6505_v61  ;;  %v6507_v48 = vmax.f32 %v6185_v53, %v6345_v33  ;;  %v6188_v11 = vmax.f32 %v7783_v0, 0.0  ;;  %v7787_v17 = vadd.f32 %v13085_v62, %v6081_v10  ;;  %v6083_v58 = vpop.f32.mrb[99].mxu1  ;;  %v14695_v62 = vld [vmem:[#allocation71_spill] sm:$0xff] }
 0x4e5   :  { %v13327_v38 = vadd.f32 %v14693_v26, %v12946_v63  ;;  %v6189_v51 = vmax.f32 %v7785_v24, 0.0  ;;  %v7789_v5 = vadd.f32 %v13090_v19, %v6083_v58  ;;  %7547 = vmatprep.subr.bf16.mxu0 %v7546_v28  ;;  %v13337_v53 = vadd.f32 %v14695_v62, %v12950_v21 }
 0x4e6   :  { %14692 = vst [vmem:[#allocation99_spill] sm:$0xff] %v13322_v45  ;;  %v13332_v35 = vmax.f32 %v6506_v9, %v6507_v48  ;;  %v6346_v44 = vrot.slane %v6188_v11, 2  ;;  %v6190_v61 = vmax.f32 %v7787_v17, 0.0  ;;  %7549 = vmatpush1.bf16.msra.mxu0 %v7548_v27  ;;  %v6631_v33 = vrot.slane %v13322_v45, 4 }
 0x4e7   :  { %v6348_v0 = vrot.slane %v6189_v51, 2  ;;  %v6191_v23 = vmax.f32 %v7789_v5, 0.0  ;;  %v7552_v19 = vpack.c.bf16 %v13322_v45, %v13296_v57 }
 0x4e8   :  { %14694 = vst [vmem:[#allocation101_spill] sm:$0xff] %v13332_v35  ;;  %v6347_v24 = vsel %vm605_vm1, %v6342_v2, %v6346_v44  ;;  %v6350_v10 = vrot.slane %v6190_v61, 2  ;;  %v13343_v9 = vsel %vm3008_vm4, %v6629_v20, %v6631_v33  ;;  %v6633_v28 = vrot.slane %v13332_v35, 4 }
 0x4e9   :  { %v6508_v27 = vmax.f32 %v6186_v39, %v6347_v24  ;;  %v6349_v48 = vsel %vm605_vm1, %v6344_v3, %v6348_v0  ;;  %v6352_v17 = vrot.slane %v6191_v23, 2  ;;  %v6087_v58 = vpop.f32.mrb[100].mxu1 }
 0x4ea   :  { %v6509_v5 = vmax.f32 %v6187_v1, %v6349_v48  ;;  %v6351_v62 = vsel %vm605_vm1, %v6346_v44, %v6350_v10  ;;  %v7791_v46 = vadd.f32 %v13096_v40, %v6087_v58  ;;  %v6089_v2 = vpop.f32.mrb[101].mxu1  ;;  %v13352_v49 = vsel %vm3008_vm4, %v6631_v33, %v6633_v28  ;;  %v14697_v58 = vld [vmem:[#allocation74_spill] sm:$0xff] }
 0x4eb   :  { %v6510_v20 = vmax.f32 %v6188_v11, %v6351_v62  ;;  %v6353_v34 = vsel %vm605_vm1, %v6348_v0, %v6352_v17  ;;  %v7793_v39 = vadd.f32 %v13108_v31, %v6089_v2  ;;  %v6091_v3 = vpop.f32.mrb[102].mxu1  ;;  %v7550_v24 = vpack.c.bf16 %v13352_v49, %v13343_v9 }
 0x4ec   :  { %v13358_v57 = vmax.f32 %v6508_v27, %v6509_v5  ;;  %v6511_v1 = vmax.f32 %v6189_v51, %v6353_v34  ;;  %v6192_v48 = vmax.f32 %v7791_v46, 0.0  ;;  %v7795_v44 = vadd.f32 %v13117_v7, %v6091_v3  ;;  %v6093_v40 = vpop.f32.mrb[103].mxu1  ;;  %v14699_v7 = vld [vmem:[#allocation75_spill] sm:$0xff] }
 0x4ed   :  { %v13363_v33 = vadd.f32 %v14697_v58, %v12946_v63  ;;  %v6193_v11 = vmax.f32 %v7793_v39, 0.0  ;;  %v7797_v0 = vadd.f32 %v13145_v22, %v6093_v40  ;;  %7551 = vmatprep.subr.bf16.mxu0 %v7550_v24  ;;  %v13373_v51 = vadd.f32 %v14699_v7, %v12950_v21 }
 0x4ee   :  { %14696 = vst [vmem:[#allocation100_spill] sm:$0xff] %v13358_v57  ;;  %v13368_v62 = vmax.f32 %v6510_v20, %v6511_v1  ;;  %v6354_v27 = vrot.slane %v6192_v48, 2  ;;  %v6194_v5 = vmax.f32 %v7795_v44, 0.0  ;;  %7553 = vmatpush1.bf16.msra.mxu0 %v7552_v19  ;;  %v6635_v34 = vrot.slane %v13358_v57, 4 }
 0x4ef   :  { %v6356_v46 = vrot.slane %v6193_v11, 2  ;;  %v6195_v2 = vmax.f32 %v7797_v0, 0.0  ;;  %v7556_v22 = vpack.c.bf16 %v13358_v57, %v13332_v35 }
 0x4f0   :  { %14698 = vst [vmem:[#allocation103_spill] sm:$0xff] %v13368_v62  ;;  %v6355_v39 = vsel %vm605_vm1, %v6350_v10, %v6354_v27  ;;  %v6358_v3 = vrot.slane %v6194_v5, 2  ;;  %v13379_v20 = vsel %vm3008_vm4, %v6633_v28, %v6635_v34  ;;  %v6637_v24 = vrot.slane %v13368_v62, 4 }
 0x4f1   :  { %v6512_v19 = vmax.f32 %v6190_v61, %v6355_v39  ;;  %v6357_v1 = vsel %vm605_vm1, %v6352_v17, %v6356_v46  ;;  %v6360_v44 = vrot.slane %v6195_v2, 2  ;;  %v6097_v40 = vpop.f32.mrb[104].mxu1 }
 0x4f2   :  { %v6513_v0 = vmax.f32 %v6191_v23, %v6357_v1  ;;  %v6359_v7 = vsel %vm605_vm1, %v6354_v27, %v6358_v3  ;;  %v7799_v31 = vadd.f32 %v13149_v50, %v6097_v40  ;;  %v6099_v10 = vpop.f32.mrb[105].mxu1  ;;  %v13388_v26 = vsel %vm3008_vm4, %v6635_v34, %v6637_v24  ;;  %v14701_v40 = vld [vmem:[#allocation78_spill] sm:$0xff] }
 0x4f3   :  { %v6514_v28 = vmax.f32 %v6192_v48, %v6359_v7  ;;  %v6361_v45 = vsel %vm605_vm1, %v6356_v46, %v6360_v44  ;;  %v7801_v61 = vadd.f32 %v13157_v25, %v6099_v10  ;;  %v6101_v17 = vpop.f32.mrb[106].mxu1  ;;  %v7554_v39 = vpack.c.bf16 %v13388_v26, %v13379_v20 }
 0x4f4   :  { %v13394_v35 = vmax.f32 %v6512_v19, %v6513_v0  ;;  %v6515_v23 = vmax.f32 %v6193_v11, %v6361_v45  ;;  %v6196_v1 = vmax.f32 %v7799_v31, 0.0  ;;  %v7803_v27 = vadd.f32 %v13183_v12, %v6101_v17  ;;  %v6103_v50 = vpop.f32.mrb[107].mxu1  ;;  %v14703_v12 = vld [vmem:[#allocation80_spill] sm:$0xff] }
 0x4f5   :  { %v13399_v34 = vadd.f32 %v14701_v40, %v12946_v63  ;;  %v6197_v48 = vmax.f32 %v7801_v61, 0.0  ;;  %v7805_v46 = vadd.f32 %v13193_v52, %v6103_v50  ;;  %7555 = vmatprep.subr.bf16.mxu0 %v7554_v39  ;;  %v13409_v11 = vadd.f32 %v14703_v12, %v12950_v21 }
 0x4f6   :  { %14700 = vst [vmem:[#allocation104_spill] sm:$0xff] %v13394_v35  ;;  %v13404_v7 = vmax.f32 %v6514_v28, %v6515_v23  ;;  %v6362_v19 = vrot.slane %v6196_v1, 2  ;;  %v6198_v0 = vmax.f32 %v7803_v27, 0.0  ;;  %7557 = vmatpush1.bf16.msra.mxu0 %v7556_v22  ;;  %v6639_v45 = vrot.slane %v13394_v35, 4 }
 0x4f7   :  { %v6364_v31 = vrot.slane %v6197_v48, 2  ;;  %v6199_v10 = vmax.f32 %v7805_v46, 0.0  ;;  %v7560_v52 = vpack.c.bf16 %v13394_v35, %v13368_v62 }
 0x4f8   :  { %14702 = vst [vmem:[#allocation105_spill] sm:$0xff] %v13404_v7  ;;  %v6363_v61 = vsel %vm605_vm1, %v6358_v3, %v6362_v19  ;;  %v6366_v17 = vrot.slane %v6198_v0, 2  ;;  %v13415_v28 = vsel %vm3008_vm4, %v6637_v24, %v6639_v45  ;;  %v6641_v39 = vrot.slane %v13404_v7, 4 }
 0x4f9   :  { %v6516_v22 = vmax.f32 %v6194_v5, %v6363_v61  ;;  %v6365_v23 = vsel %vm605_vm1, %v6360_v44, %v6364_v31  ;;  %v6368_v27 = vrot.slane %v6199_v10, 2  ;;  %v6107_v50 = vpop.f32.mrb[108].mxu1 }
 0x4fa   :  { %v6517_v46 = vmax.f32 %v6195_v2, %v6365_v23  ;;  %v6367_v12 = vsel %vm605_vm1, %v6362_v19, %v6366_v17  ;;  %v7807_v25 = vadd.f32 %v13219_v43, %v6107_v50  ;;  %v6109_v3 = vpop.f32.mrb[109].mxu1  ;;  %v13424_v58 = vsel %vm3008_vm4, %v6639_v45, %v6641_v39  ;;  %v14705_v50 = vld [vmem:[#allocation85_spill] sm:$0xff] }
 0x4fb   :  { %v6518_v24 = vmax.f32 %v6196_v1, %v6367_v12  ;;  %v6369_v57 = vsel %vm605_vm1, %v6364_v31, %v6368_v27  ;;  %v7809_v5 = vadd.f32 %v13229_v47, %v6109_v3  ;;  %v6111_v44 = vpop.f32.mrb[110].mxu1  ;;  %v7558_v61 = vpack.c.bf16 %v13424_v58, %v13415_v28 }
 0x4fc   :  { %v13430_v62 = vmax.f32 %v6516_v22, %v6517_v46  ;;  %v6519_v2 = vmax.f32 %v6197_v48, %v6369_v57  ;;  %v6200_v23 = vmax.f32 %v7807_v25, 0.0  ;;  %v7811_v19 = vadd.f32 %v13255_v55, %v6111_v44  ;;  %v6113_v43 = vpop.f32.mrb[111].mxu1  ;;  %v14707_v55 = vld [vmem:[#allocation84_spill] sm:$0xff] }
 0x4fd   :  { %v13435_v45 = vadd.f32 %v14705_v50, %v12946_v63  ;;  %v6201_v1 = vmax.f32 %v7809_v5, 0.0  ;;  %v7813_v31 = vadd.f32 %v13265_v60, %v6113_v43  ;;  %7559 = vmatprep.subr.bf16.mxu0 %v7558_v61  ;;  %v13445_v48 = vadd.f32 %v14707_v55, %v12950_v21 }
 0x4fe   :  { %14704 = vst [vmem:[#allocation109_spill] sm:$0xff] %v13430_v62  ;;  %v13440_v12 = vmax.f32 %v6518_v24, %v6519_v2  ;;  %v6370_v22 = vrot.slane %v6200_v23, 2  ;;  %v6202_v46 = vmax.f32 %v7811_v19, 0.0  ;;  %7561 = vmatpush1.bf16.msra.mxu0 %v7560_v52  ;;  %v6643_v57 = vrot.slane %v13430_v62, 4 }
 0x4ff   :  { %v6372_v25 = vrot.slane %v6201_v1, 2  ;;  %v6203_v3 = vmax.f32 %v7813_v31, 0.0  ;;  %v7564_v60 = vpack.c.bf16 %v13430_v62, %v13404_v7 }
 0x500   :  { %14706 = vst [vmem:[#allocation113_spill] sm:$0xff] %v13440_v12  ;;  %v6371_v5 = vsel %vm605_vm1, %v6366_v17, %v6370_v22  ;;  %v6374_v44 = vrot.slane %v6202_v46, 2  ;;  %v13451_v24 = vsel %vm3008_vm4, %v6641_v39, %v6643_v57  ;;  %v6645_v61 = vrot.slane %v13440_v12, 4 }
 0x501   :  { %v6520_v52 = vmax.f32 %v6198_v0, %v6371_v5  ;;  %v6373_v2 = vsel %vm605_vm1, %v6368_v27, %v6372_v25  ;;  %v6376_v19 = vrot.slane %v6203_v3, 2  ;;  %v6117_v43 = vpop.f32.mrb[112].mxu1 }
 0x502   :  { %v6521_v31 = vmax.f32 %v6199_v10, %v6373_v2  ;;  %v6375_v55 = vsel %vm605_vm1, %v6370_v22, %v6374_v44  ;;  %v7815_v47 = vadd.f32 %v13291_v30, %v6117_v43  ;;  %v6119_v17 = vpop.f32.mrb[113].mxu1  ;;  %v13460_v40 = vsel %vm3008_vm4, %v6643_v57, %v6645_v61  ;;  %v14709_v43 = vld [vmem:[#allocation89_spill] sm:$0xff] }
 0x503   :  { %v6522_v39 = vmax.f32 %v6200_v23, %v6375_v55  ;;  %v6377_v35 = vsel %vm605_vm1, %v6372_v25, %v6376_v19  ;;  %v7817_v0 = vadd.f32 %v13301_v32, %v6119_v17  ;;  %v6121_v27 = vpop.f32.mrb[114].mxu1  ;;  %v7562_v5 = vpack.c.bf16 %v13460_v40, %v13451_v24 }
 0x504   :  { %v13466_v7 = vmax.f32 %v6520_v52, %v6521_v31  ;;  %v6523_v10 = vmax.f32 %v6201_v1, %v6377_v35  ;;  %v6204_v2 = vmax.f32 %v7815_v47, 0.0  ;;  %v7819_v22 = vadd.f32 %v13327_v38, %v6121_v27  ;;  %v6123_v30 = vpop.f32.mrb[115].mxu1  ;;  %v14711_v38 = vld [vmem:[#allocation88_spill] sm:$0xff] }
 0x505   :  { %v13471_v57 = vadd.f32 %v14709_v43, %v12946_v63  ;;  %v6205_v23 = vmax.f32 %v7817_v0, 0.0  ;;  %v7821_v25 = vadd.f32 %v13337_v53, %v6123_v30  ;;  %7563 = vmatprep.subr.bf16.mxu0 %v7562_v5  ;;  %v13481_v1 = vadd.f32 %v14711_v38, %v12950_v21 }
 0x506   :  { %14708 = vst [vmem:[#allocation106_spill] sm:$0xff] %v13466_v7  ;;  %v13476_v55 = vmax.f32 %v6522_v39, %v6523_v10  ;;  %v6378_v52 = vrot.slane %v6204_v2, 2  ;;  %v6206_v31 = vmax.f32 %v7819_v22, 0.0  ;;  %7565 = vmatpush1.bf16.msra.mxu0 %v7564_v60  ;;  %v6647_v35 = vrot.slane %v13466_v7, 4 }
 0x507   :  { %v6380_v47 = vrot.slane %v6205_v23, 2  ;;  %v6207_v17 = vmax.f32 %v7821_v25, 0.0  ;;  %v7568_v53 = vpack.c.bf16 %v13466_v7, %v13440_v12 }
 0x508   :  { %14710 = vst [vmem:[#allocation107_spill] sm:$0xff] %v13476_v55  ;;  %v6379_v0 = vsel %vm605_vm1, %v6374_v44, %v6378_v52  ;;  %v6382_v27 = vrot.slane %v6206_v31, 2  ;;  %v13487_v39 = vsel %vm3008_vm4, %v6645_v61, %v6647_v35  ;;  %v6649_v5 = vrot.slane %v13476_v55, 4 }
 0x509   :  { %v6524_v60 = vmax.f32 %v6202_v46, %v6379_v0  ;;  %v6381_v10 = vsel %vm605_vm1, %v6376_v19, %v6380_v47  ;;  %v6384_v22 = vrot.slane %v6207_v17, 2  ;;  %v6127_v30 = vpop.f32.mrb[116].mxu1 }
 0x50a   :  { %v6525_v25 = vmax.f32 %v6203_v3, %v6381_v10  ;;  %v6383_v38 = vsel %vm605_vm1, %v6378_v52, %v6382_v27  ;;  %v7823_v32 = vadd.f32 %v13363_v33, %v6127_v30  ;;  %v6129_v44 = vpop.f32.mrb[117].mxu1  ;;  %v13496_v50 = vsel %vm3008_vm4, %v6647_v35, %v6649_v5  ;;  %v14713_v30 = vld [vmem:[#allocation79_spill] sm:$0xff] }
 0x50b   :  { %v6526_v61 = vmax.f32 %v6204_v2, %v6383_v38  ;;  %v6385_v62 = vsel %vm605_vm1, %v6380_v47, %v6384_v22  ;;  %v7825_v46 = vadd.f32 %v13373_v51, %v6129_v44  ;;  %v6131_v19 = vpop.f32.mrb[118].mxu1  ;;  %v7566_v0 = vpack.c.bf16 %v13496_v50, %v13487_v39 }
 0x50c   :  { %v13502_v12 = vmax.f32 %v6524_v60, %v6525_v25  ;;  %v6527_v3 = vmax.f32 %v6205_v23, %v6385_v62  ;;  %v6208_v10 = vmax.f32 %v7823_v32, 0.0  ;;  %v7827_v52 = vadd.f32 %v13399_v34, %v6131_v19  ;;  %v6133_v33 = vpop.f32.mrb[119].mxu1  ;;  %v14714_v34 = vld [vmem:[#allocation82_spill] sm:$0xff] }
 0x50d   :  { %v13507_v35 = vadd.f32 %v14713_v30, %v12946_v63  ;;  %v6209_v2 = vmax.f32 %v7825_v46, 0.0  ;;  %v7829_v47 = vadd.f32 %v13409_v11, %v6133_v33  ;;  %7567 = vmatprep.subr.bf16.mxu0 %v7566_v0  ;;  %v7840_v23 = vadd.f32 %v14714_v34, %v12950_v21 }
 0x50e   :  { %14712 = vst [vmem:[#allocation108_spill] sm:$0xff] %v13502_v12  ;;  %v13512_v38 = vmax.f32 %v6526_v61, %v6527_v3  ;;  %v6386_v60 = vrot.slane %v6208_v10, 2  ;;  %v6210_v25 = vmax.f32 %v7827_v52, 0.0  ;;  %7569 = vmatpush1.bf16.msra.mxu0 %v7568_v53  ;;  %v6651_v62 = vrot.slane %v13502_v12, 4 }
 0x50f   :  { %v6388_v32 = vrot.slane %v6209_v2, 2  ;;  %v6211_v44 = vmax.f32 %v7829_v47, 0.0  ;;  %v7572_v46 = vpack.c.bf16 %v13502_v12, %v13476_v55 }
 0x510   :  { %v6387_v11 = vsel %vm605_vm1, %v6382_v27, %v6386_v60  ;;  %v6390_v19 = vrot.slane %v6210_v25, 2  ;;  %v13521_v0 = vsel %vm3008_vm4, %v6649_v5, %v6651_v62  ;;  %v6653_v61 = vrot.slane %v13512_v38, 4 }
 0x511   :  { %v6528_v3 = vmax.f32 %v6206_v31, %v6387_v11  ;;  %v6389_v53 = vsel %vm605_vm1, %v6384_v22, %v6388_v32  ;;  %v6392_v52 = vrot.slane %v6211_v44, 2  ;;  %v6137_v33 = vpop.f32.mrb[120].mxu1 }
 0x512   :  { %v6529_v47 = vmax.f32 %v6207_v17, %v6389_v53  ;;  %v6391_v34 = vsel %vm605_vm1, %v6386_v60, %v6390_v19  ;;  %v7831_v51 = vadd.f32 %v13435_v45, %v6137_v33  ;;  %v6139_v27 = vpop.f32.mrb[121].mxu1  ;;  %v13530_v43 = vsel %vm3008_vm4, %v6651_v62, %v6653_v61  ;;  %v14715_v33 = vld [vmem:[#allocation83_spill] sm:$0xff] }
 0x513   :  { %v6530_v5 = vmax.f32 %v6208_v10, %v6391_v34  ;;  %v6393_v7 = vsel %vm605_vm1, %v6388_v32, %v6392_v52  ;;  %v7833_v31 = vadd.f32 %v13445_v48, %v6139_v27  ;;  %v6141_v22 = vpop.f32.mrb[122].mxu1  ;;  %v7570_v11 = vpack.c.bf16 %v13530_v43, %v13521_v0 }
 0x514   :  { %v13536_v55 = vmax.f32 %v6528_v3, %v6529_v47  ;;  %v6531_v17 = vmax.f32 %v6209_v2, %v6393_v7  ;;  %v6212_v53 = vmax.f32 %v7831_v51, 0.0  ;;  %v7835_v60 = vadd.f32 %v13471_v57, %v6141_v22  ;;  %v6143_v45 = vpop.f32.mrb[123].mxu1  ;;  %v14716_v57 = vld [vmem:[#allocation86_spill] sm:$0xff] }
 0x515   :  { %v7842_v62 = vadd.f32 %v14715_v33, %v12946_v63  ;;  %v6213_v30 = vmax.f32 %v7833_v31, 0.0  ;;  %v7837_v10 = vadd.f32 %v13481_v1, %v6143_v45  ;;  %7571 = vmatprep.subr.bf16.mxu0 %v7570_v11  ;;  %v7844_v2 = vadd.f32 %v14716_v57, %v12950_v21 }
 0x516   :  { %v13544_v32 = vmax.f32 %v6530_v5, %v6531_v17  ;;  %v6394_v34 = vrot.slane %v6212_v53, 2  ;;  %v6214_v3 = vmax.f32 %v7835_v60, 0.0  ;;  %7573 = vmatpush1.bf16.msra.mxu0 %v7572_v46  ;;  %v6655_v7 = vrot.slane %v13536_v55, 4 }
 0x517   :  { %v6396_v51 = vrot.slane %v6213_v30, 2  ;;  %v6215_v47 = vmax.f32 %v7837_v10, 0.0  ;;  %v7576_v63 = vpack.c.bf16 %v13536_v55, %v13512_v38 }
 0x518   :  { %v6395_v1 = vsel %vm605_vm1, %v6390_v19, %v6394_v34  ;;  %v6398_v27 = vrot.slane %v6214_v3, 2  ;;  %v13553_v31 = vsel %vm3008_vm4, %v6653_v61, %v6655_v7  ;;  %v6657_v5 = vrot.slane %v13544_v32, 4 }
 0x519   :  { %v6532_v22 = vmax.f32 %v6210_v25, %v6395_v1  ;;  %v6397_v46 = vsel %vm605_vm1, %v6392_v52, %v6396_v51  ;;  %v6400_v11 = vrot.slane %v6215_v47, 2  ;;  %v6147_v17 = vpop.f32.mrb[124].mxu1 }
 0x51a   :  { %v6533_v60 = vmax.f32 %v6211_v44, %v6397_v46  ;;  %v6399_v45 = vsel %vm605_vm1, %v6394_v34, %v6398_v27  ;;  %v7839_v33 = vadd.f32 %v13507_v35, %v6147_v17  ;;  %v6149_v19 = vpop.f32.mrb[125].mxu1  ;;  %v13562_v10 = vsel %vm3008_vm4, %v6655_v7, %v6657_v5 }
 0x51b   :  { %v6534_v61 = vmax.f32 %v6212_v53, %v6399_v45  ;;  %v6401_v57 = vsel %vm605_vm1, %v6396_v51, %v6400_v11  ;;  %v7841_v25 = vadd.f32 %v7840_v23, %v6149_v19  ;;  %v6151_v1 = vpop.f32.mrb[126].mxu1  ;;  %v7574_v52 = vpack.c.bf16 %v13562_v10, %v13553_v31 }
 0x51c   :  { %v13567_v48 = vmax.f32 %v6532_v22, %v6533_v60  ;;  %v6535_v21 = vmax.f32 %v6213_v30, %v6401_v57  ;;  %v6216_v44 = vmax.f32 %v7839_v33, 0.0  ;;  %v7843_v46 = vadd.f32 %v7842_v62, %v6151_v1  ;;  %v6153_v34 = vpop.f32.mrb[127].mxu1  ;;  %v14717_v1 = vld [vmem:[#allocation93_spill] sm:$0xff] }
 0x51d   :  { %v6217_v12 = vmax.f32 %v7841_v25, 0.0  ;;  %v7845_v35 = vadd.f32 %v7844_v2, %v6153_v34  ;;  %7575 = vmatprep.subr.bf16.mxu0 %v7574_v52 }
 0x51e   :  { %v13571_v53 = vmax.f32 %v6534_v61, %v6535_v21  ;;  %v6402_v51 = vrot.slane %v6216_v44, 2  ;;  %v6218_v23 = vmax.f32 %v7843_v46, 0.0  ;;  %7577 = vmatpush1.bf16.msra.mxu0 %v7576_v63  ;;  %v6659_v17 = vrot.slane %v13567_v48, 4 }
 0x51f   :  { %v6404_v45 = vrot.slane %v6217_v12, 2  ;;  %v6219_v22 = vmax.f32 %v7845_v35, 0.0  ;;  %v7580_v30 = vpack.c.bf16 %v13567_v48, %v13544_v32  ;;  %v14718_v35 = vld [vmem:[#allocation92_spill] sm:$0xff] }
 0x520   :  { %v6403_v62 = vsel %vm605_vm1, %v6398_v27, %v6402_v51  ;;  %v6406_v60 = vrot.slane %v6218_v23, 2  ;;  %v13578_v2 = vsel %vm3008_vm4, %v6657_v5, %v6659_v17  ;;  %v6661_v33 = vrot.slane %v13571_v53, 4 }
 0x521   :  { %v6536_v21 = vmax.f32 %v6214_v3, %v6403_v62  ;;  %v6405_v19 = vsel %vm605_vm1, %v6400_v11, %v6404_v45  ;;  %v6408_v61 = vrot.slane %v6219_v22, 2  ;;  %v7638_v63 = vpack.c.bf16 %v13578_v2, %v13562_v10 }
 0x522   :  { %v6537_v57 = vmax.f32 %v6215_v47, %v6405_v19  ;;  %v6407_v25 = vsel %vm605_vm1, %v6402_v51, %v6406_v60  ;;  %v6476_v52 = vsel %vm605_vm1, %v6406_v60, %v14717_v1  ;;  %v6662_v27 = vsel %vm3008_vm4, %v6659_v17, %v6661_v33 }
 0x523   :  { %v6538_v46 = vmax.f32 %v6216_v44, %v6407_v25  ;;  %v6540_v5 = vmax.f32 %v6218_v23, %v6476_v52  ;;  %v6409_v34 = vsel %vm605_vm1, %v6404_v45, %v6408_v61  ;;  %v6477_v3 = vsel %vm605_vm1, %v6408_v61, %v14718_v35  ;;  %v14724_v35 = vld [vmem:[#allocation91_spill] sm:$0xff] }
 0x524   :  { %v13591_v11 = vmax.f32 %v6536_v21, %v6537_v57  ;;  %v6539_v62 = vmax.f32 %v6217_v12, %v6409_v34  ;;  %v6541_v7 = vmax.f32 %v6219_v22, %v6477_v3  ;;  %v7578_v47 = vpack.c.bf16 %v6662_v27, %v13578_v2  ;;  %v14719_v57 = vld [vmem:[#allocation87_spill] sm:$0xff]  ;;  %v6865_v2 = vld [vmem:[%s13904_s5 + $0x90] sm:$0xff] }
 0x525   :  { %v7644_v51 = vpack.c.bf16 %v13571_v53, %v13567_v48  ;;  %v14720_v25 = vrot.slane %v14719_v57, 4  ;;  %v14723_v34 = vpack.c.bf16 %v13199_v56, %v13172_v54  ;;  %v14725_v3 = vpack.c.bf16 %v13152_v15, %v14724_v35  ;;  %v14734_v56 = vld [vmem:[#allocation95_spill] sm:$0xff]  ;;  %v6853_v35 = vld [vmem:[%s13904_s5 + $0x30] sm:$0xff] }
 0x526   :  { %v6572_v19 = vmax.f32 %v6538_v46, %v6539_v62  ;;  %v13596_v60 = vmax.f32 %v6540_v5, %v6541_v7  ;;  %7579 = vmatprep.subr.bf16.mxu0 %v7578_v47  ;;  %v6663_v44 = vrot.slane %v13591_v11, 4  ;;  %v7584_v23 = vpack.c.bf16 %v13591_v11, %v13571_v53  ;;  %v8726_v5 = vld [vmem:[%s13903_s7 + $0x8] sm:$0xff]  ;;  %v14731_v62 = vld [vmem:[#allocation98_spill] sm:$0xff]  ;;  %v14738_v47 = vld [vmem:[#allocation96_spill] sm:$0xff] }
 0x527   :  { %7581 = vmatpush1.bf16.msra.mxu0 %v7580_v30  ;;  %v14722_v46 = vpack.c.bf16 %v13112_v4, %v13100_v37  ;;  %v14727_v37 = vld [vmem:[#allocation94_spill] sm:$0xff]  ;;  %v14733_v15 = vpack.c.bf16 %v13307_v8, %v13280_v13  ;;  %v14745_v8 = vld [vmem:[#allocation103_spill] sm:$0xff] }
 0x528   :  { %v6664_v17 = vsel %vm3008_vm4, %v6661_v33, %v6663_v44  ;;  %v6665_v45 = vrot.slane %v6572_v19, 4  ;;  %v6667_v12 = vrot.slane %v13596_v60, 4  ;;  %v7588_v22 = vpack.c.bf16 %v13596_v60, %v6572_v19  ;;  %v6703_v33 = vld [vmem:[%s13903_s7] sm:$0xff] }
 0x529   :  { %v7642_v21 = vpack.c.bf16 %v6664_v17, %v6662_v27  ;;  %v7648_v48 = vpack.c.bf16 %v6572_v19, %v13591_v11  ;;  %v14721_v27 = vpack.c.bf16 %v13163_v42, %v13134_v16  ;;  %v14726_v16 = vpack.c.bf16 %v13235_v59, %v13208_v41  ;;  %v14730_v11 = vld [vmem:[#allocation102_spill] sm:$0xff]  ;;  %v14737_v59 = vld [vmem:[#allocation97_spill] sm:$0xff] }
 0x52a   :  { %v6666_v7 = vsel %vm3008_vm4, %v6663_v44, %v6665_v45  ;;  %v6668_v61 = vsel %vm3008_vm4, %v6665_v45, %v6667_v12  ;;  %v6702_v1 = vsel %vm3008_vm4, %v6667_v12, %v14720_v25  ;;  %v14728_v4 = vpack.c.bf16 %v13188_v6, %v14727_v37  ;;  %v14741_v19 = vld [vmem:[#allocation101_spill] sm:$0xff]  ;;  %v14742_v44 = vld [vmem:[#allocation99_spill] sm:$0xff]  ;;  %v14750_v45 = vld [vmem:[#allocation104_spill] sm:$0xff] }
 0x52b   :  { %v7582_v53 = vpack.c.bf16 %v6666_v7, %v6664_v17  ;;  %v7586_v30 = vpack.c.bf16 %v6702_v1, %v6668_v61  ;;  %v7646_v52 = vpack.c.bf16 %v6668_v61, %v6666_v7  ;;  %v14729_v42 = vpack.c.bf16 %v13271_v36, %v13244_v18  ;;  %v14749_v17 = vld [vmem:[#allocation105_spill] sm:$0xff]  ;;  %v14757_v7 = vld [vmem:[#allocation107_spill] sm:$0xff]  ;;  %v14758_v61 = vld [vmem:[#allocation106_spill] sm:$0xff] }
 0x52c   :  { %v14732_v54 = vpack.c.bf16 %v14730_v11, %v14731_v62  ;;  %v14735_v41 = vpack.c.bf16 %v13260_v29, %v14734_v56  ;;  %v14736_v6 = vpack.c.bf16 %v13343_v9, %v13316_v14  ;;  %v14739_v18 = vpack.c.bf16 %v14737_v59, %v14738_v47  ;;  %v14753_v12 = vld [vmem:[#allocation113_spill] sm:$0xff]  ;;  %v14761_v25 = vld [vmem:[#allocation108_spill] sm:$0xff]  ;;  %v6872_v37 = vld [vmem:[%s13904_s5 + $0xc8] sm:$0xff] }
 0x52d   :  { %7583 = vmatprep.subr.bf16.mxu0 %v7582_v53  ;;  %v14740_v36 = vpack.c.bf16 %v13379_v20, %v13352_v49  ;;  %v14743_v13 = vpack.c.bf16 %v14741_v19, %v14742_v44  ;;  %v14744_v29 = vpack.c.bf16 %v13415_v28, %v13388_v26  ;;  %v14748_v9 = vpack.c.bf16 %v13451_v24, %v13424_v58  ;;  %v6855_v11 = vld [vmem:[%s13904_s5 + $0x40] sm:$0xff]  ;;  %v6856_v62 = vld [vmem:[%s13904_s5 + $0x48] sm:$0xff]  ;;  %v6858_v59 = vld [vmem:[%s13904_s5 + $0x58] sm:$0xff] }
 0x52e   :  { %7585 = vmatpush1.bf16.msra.mxu0 %v7584_v23  ;;  %v14746_v23 = vld [vmem:[#allocation100_spill] sm:$0xff]  ;;  %v14751_v49 = vpack.c.bf16 %v14749_v17, %v14750_v45  ;;  %v14752_v20 = vpack.c.bf16 %v13487_v39, %v13460_v40  ;;  %v14756_v28 = vpack.c.bf16 %v13521_v0, %v13496_v50  ;;  %v14759_v58 = vpack.c.bf16 %v14757_v7, %v14758_v61  ;;  %v6863_v39 = vld [vmem:[%s13904_s5 + $0x80] sm:$0xff]  ;;  %v6862_v17 = vld [vmem:[%s13904_s5 + $0x78] sm:$0xff] }
 0x52f   :  { %7587 = vmatprep.subr.bf16.mxu0 %v7586_v30  ;;  %v14747_v14 = vpack.c.bf16 %v14745_v8, %v14746_v23  ;;  %v14760_v24 = vpack.c.bf16 %v13553_v31, %v13530_v43  ;;  %v14762_v40 = vpack.c.bf16 %v13512_v38, %v14761_v25  ;;  %v14763_v50 = vpack.c.bf16 %v13544_v32, %v13536_v55  ;;  %v6864_v43 = vld [vmem:[%s13904_s5 + $0x88] sm:$0xff]  ;;  %v14764_v38 = vld [vmem:[#allocation90_spill] sm:$0xff]  ;;  %v6878_v8 = vld [vmem:[%s13904_s5 + $0xf8] sm:$0xff] }
 0x530   :  { %v7650_v0 = vpack.c.bf16 %v14764_v38, %v6702_v1  ;;  %v7654_v31 = vpack.c.bf16 %v6864_v43, %v6863_v39  ;;  %v6847_v55 = vld [vmem:[%s13904_s5] sm:$0xff]  ;;  %v6848_v32 = vld [vmem:[%s13904_s5 + $0x8] sm:$0xff]  ;;  %v7652_v10 = vpack.c.bf16 %v14719_v57, %v13596_v60  ;;  %v6850_v60 = vld [vmem:[%s13904_s5 + $0x18] sm:$0xff]  ;;  %v7672_v56 = vpack.c.bf16 %v6856_v62, %v6855_v11 }
 0x531   :  { %v6867_v57 = vld [vmem:[%s13904_s5 + $0xa0] sm:$0xff]  ;;  %v6868_v1 = vld [vmem:[%s13904_s5 + $0xa8] sm:$0xff]  ;;  %v6898_v7 = vld [vmem:[%s13904_s5 + $0x198] sm:$0xff] }
 0x532   :  { %7589 = vmatpush1.bf16.msra.mxu0 %v7588_v22  ;;  %v14754_v22 = vld [vmem:[#allocation109_spill] sm:$0xff]  ;;  %v7662_v30 = vpack.c.bf16 %v6868_v1, %v6867_v57  ;;  %v6875_v47 = vld [vmem:[%s13904_s5 + $0xe0] sm:$0xff]  ;;  %v6900_v43 = vld [vmem:[%s13904_s5 + $0x1a8] sm:$0xff] }
 0x533   :  { %7591 = vmatprep.subr.bf16.mxu0 %v14721_v27  ;;  %v14755_v26 = vpack.c.bf16 %v14753_v12, %v14754_v22  ;;  %v6852_v27 = vld [vmem:[%s13904_s5 + $0x28] sm:$0xff]  ;;  %v6859_v44 = vld [vmem:[%s13904_s5 + $0x60] sm:$0xff]  ;;  %v6909_v11 = vld [vmem:[%s13904_s5 + $0x1f0] sm:$0xff] }
 0x534   :  { %v6895_v45 = vld [vmem:[%s13904_s5 + $0x180] sm:$0xff]  ;;  %v6910_v62 = vld [vmem:[%s13904_s5 + $0x1f8] sm:$0xff] }
 0x535   :  { %6770 = vmatmul.mubr.f32.vlgmr.msra.gmra.mrb[192].mxu0 %v6703_v33  ;;  %v6879_v22 = vld [vmem:[%s13904_s5 + $0x100] sm:$0xff] }
 0x536   :  { %7593 = vmatpush1.bf16.msra.mxu0 %v14722_v46  ;;  %6840 = vmatprep.mubr.f32.mxu0 %v8726_v5  ;;  %v6869_v46 = vld [vmem:[%s13904_s5 + $0xb0] sm:$0xff]  ;;  %v6899_v39 = vld [vmem:[%s13904_s5 + $0x1a0] sm:$0xff] }
 0x537   :  { %7595 = vmatprep.subr.bf16.mxu0 %v14723_v34 }
 0x53a   :  { %7597 = vmatpush1.bf16.msra.mxu0 %v14725_v3  ;;  %v6854_v3 = vld [vmem:[%s13904_s5 + $0x38] sm:$0xff] }
 0x53b   :  { %7599 = vmatprep.subr.bf16.mxu0 %v14726_v16  ;;  %v6871_v16 = vld [vmem:[%s13904_s5 + $0xc0] sm:$0xff] }
 0x53e   :  { %7601 = vmatpush1.bf16.msra.mxu0 %v14728_v4  ;;  %v7668_v4 = vpack.c.bf16 %v6854_v3, %v6853_v35  ;;  %v6907_v35 = vld [vmem:[%s13904_s5 + $0x1e0] sm:$0xff]  ;;  %v6908_v3 = vld [vmem:[%s13904_s5 + $0x1e8] sm:$0xff] }
 0x53f   :  { %7603 = vmatprep.subr.bf16.mxu0 %v14729_v42  ;;  %v7670_v42 = vpack.c.bf16 %v6872_v37, %v6871_v16  ;;  %v7710_v37 = vpack.c.bf16 %v6908_v3, %v6907_v35 }
 0x542   :  { %7605 = vmatpush1.bf16.msra.mxu0 %v14732_v54  ;;  %v6873_v54 = vld [vmem:[%s13904_s5 + $0xd0] sm:$0xff] }
 0x543   :  { %7607 = vmatprep.subr.bf16.mxu0 %v14733_v15  ;;  %v6874_v15 = vld [vmem:[%s13904_s5 + $0xd8] sm:$0xff] }
 0x546   :  { %7609 = vmatpush1.bf16.msra.mxu0 %v14735_v41  ;;  %v7674_v41 = vpack.c.bf16 %v6874_v15, %v6873_v54  ;;  %v7714_v15 = vpack.c.bf16 %v6910_v62, %v6909_v11 }
 0x547   :  { %7611 = vmatprep.subr.bf16.mxu0 %v14736_v6  ;;  %v6857_v6 = vld [vmem:[%s13904_s5 + $0x50] sm:$0xff] }
 0x54a   :  { %7613 = vmatpush1.bf16.msra.mxu0 %v14739_v18  ;;  %v6876_v18 = vld [vmem:[%s13904_s5 + $0xe8] sm:$0xff] }
 0x54b   :  { %7615 = vmatprep.subr.bf16.mxu0 %v14740_v36  ;;  %v7676_v36 = vpack.c.bf16 %v6858_v59, %v6857_v6  ;;  %v7678_v19 = vpack.c.bf16 %v6876_v18, %v6875_v47 }
 0x54e   :  { %7617 = vmatpush1.bf16.msra.mxu0 %v14743_v13  ;;  %v6860_v13 = vld [vmem:[%s13904_s5 + $0x68] sm:$0xff] }
 0x54f   :  { %7619 = vmatprep.subr.bf16.mxu0 %v14744_v29  ;;  %v6877_v29 = vld [vmem:[%s13904_s5 + $0xf0] sm:$0xff]  ;;  %v7680_v23 = vpack.c.bf16 %v6860_v13, %v6859_v44  ;;  %v7455_v44 = vld [vmem:[%s13905_s6] ss:$0 sm:$0xff] }
 0x552   :  { %7621 = vmatpush1.bf16.msra.mxu0 %v14747_v14  ;;  %v7682_v14 = vpack.c.bf16 %v6878_v8, %v6877_v29 }
 0x553   :  { %7623 = vmatprep.subr.bf16.mxu0 %v14748_v9  ;;  %v6861_v9 = vld [vmem:[%s13904_s5 + $0x70] sm:$0xff] }
 0x556   :  { %7625 = vmatpush1.bf16.msra.mxu0 %v14751_v49  ;;  %v6896_v49 = vld [vmem:[%s13904_s5 + $0x188] sm:$0xff] }
 0x557   :  { %7627 = vmatprep.subr.bf16.mxu0 %v14752_v20  ;;  %v7684_v20 = vpack.c.bf16 %v6862_v17, %v6861_v9  ;;  %v7686_v12 = vpack.c.bf16 %v6896_v49, %v6895_v45 }
 0x55a   :  { %7629 = vmatpush1.bf16.msra.mxu0 %v14755_v26  ;;  %v6880_v26 = vld [vmem:[%s13904_s5 + $0x108] sm:$0xff] }
 0x55b   :  { %7631 = vmatprep.subr.bf16.mxu0 %v14756_v28  ;;  %v6897_v28 = vld [vmem:[%s13904_s5 + $0x190] sm:$0xff] }
 0x55c   :  { %v7690_v25 = vpack.c.bf16 %v6898_v7, %v6897_v28 }
 0x55e   :  { %7633 = vmatpush1.bf16.msra.mxu0 %v14759_v58  ;;  %v7688_v58 = vpack.c.bf16 %v6880_v26, %v6879_v22 }
 0x55f   :  { %7635 = vmatprep.subr.bf16.mxu0 %v14760_v24 }
 0x562   :  { %7637 = vmatpush1.bf16.msra.mxu0 %v14762_v40  ;;  %v6881_v40 = vld [vmem:[%s13904_s5 + $0x110] sm:$0xff] }
 0x563   :  { %7639 = vmatprep.subr.bf16.mxu0 %v7638_v63  ;;  %v6866_v63 = vld [vmem:[%s13904_s5 + $0x98] sm:$0xff] }
 0x566   :  { %7641 = vmatpush1.bf16.msra.mxu0 %v14763_v50  ;;  %v6882_v50 = vld [vmem:[%s13904_s5 + $0x118] sm:$0xff] }
 0x567   :  { %7643 = vmatprep.subr.bf16.mxu0 %v7642_v21  ;;  %v7658_v21 = vpack.c.bf16 %v6866_v63, %v6865_v2  ;;  %v7692_v38 = vpack.c.bf16 %v6882_v50, %v6881_v40 }
 0x56a   :  { %7645 = vmatpush1.bf16.msra.mxu0 %v7644_v51  ;;  %v7656_v51 = vpack.c.bf16 %v6848_v32, %v6847_v55  ;;  %v6884_v55 = vld [vmem:[%s13904_s5 + $0x128] sm:$0xff]  ;;  %v6901_v32 = vld [vmem:[%s13904_s5 + $0x1b0] sm:$0xff] }
 0x56b   :  { %7647 = vmatprep.subr.bf16.mxu0 %v7646_v52  ;;  %v6851_v52 = vld [vmem:[%s13904_s5 + $0x20] sm:$0xff] }
 0x56c   :  { %v7664_v5 = vpack.c.bf16 %v6852_v27, %v6851_v52  ;;  %v6905_v52 = vld [vmem:[%s13904_s5 + $0x1d0] sm:$0xff]  ;;  %v6906_v27 = vld [vmem:[%s13904_s5 + $0x1d8] sm:$0xff] }
 0x56e   :  { %7649 = vmatpush1.bf16.msra.mxu0 %v7648_v48  ;;  %v6849_v48 = vld [vmem:[%s13904_s5 + $0x10] sm:$0xff] }
 0x56f   :  { %7651 = vmatprep.subr.bf16.mxu0 %v7650_v0  ;;  %v7660_v53 = vpack.c.bf16 %v6850_v60, %v6849_v48  ;;  %v7694_v0 = vpack.c.bf16 %v6900_v43, %v6899_v39  ;;  %v6903_v48 = vld [vmem:[%s13904_s5 + $0x1c0] sm:$0xff]  ;;  %v6904_v60 = vld [vmem:[%s13904_s5 + $0x1c8] sm:$0xff] }
 0x570   :  { %v7702_v1 = vpack.c.bf16 %v6904_v60, %v6903_v48 }
 0x572   :  { %7653 = vmatpush1.bf16.msra.mxu0 %v7652_v10  ;;  %v6902_v10 = vld [vmem:[%s13904_s5 + $0x1b8] sm:$0xff] }
 0x573   :  { %7655 = vmatprep.subr.bf16.mxu0 %v7654_v31  ;;  %v6883_v31 = vld [vmem:[%s13904_s5 + $0x120] sm:$0xff]  ;;  %v7698_v63 = vpack.c.bf16 %v6902_v10, %v6901_v32 }
 0x574   :  { %v7696_v2 = vpack.c.bf16 %v6884_v55, %v6883_v31 }
 0x575   :  { %6841 = vmatmul.mubr.f32.vlgmr.msra.gmra.mrb[194].mxu0 %v6703_v33  ;;  %v6870_v33 = vld [vmem:[%s13904_s5 + $0xb8] sm:$0xff] }
 0x576   :  { %7657 = vmatpush3.bf16.msra.mxu0 %v7656_v51  ;;  %v7666_v34 = vpack.c.bf16 %v6870_v33, %v6869_v46  ;;  %v6885_v51 = vld [vmem:[%s13904_s5 + $0x130] sm:$0xff]  ;;  %v7706_v33 = vpack.c.bf16 %v6906_v27, %v6905_v52 }
 0x577   :  { %7659 = vmatprep.subr.bf16.mxu0 %v7658_v21  ;;  %v6886_v21 = vld [vmem:[%s13904_s5 + $0x138] sm:$0xff] }
 0x578   :  { %v7700_v57 = vpack.c.bf16 %v6886_v21, %v6885_v51 }
 0x57a   :  { %7661 = vmatpush3.bf16.msra.mxu0 %v7660_v53  ;;  %v6887_v53 = vld [vmem:[%s13904_s5 + $0x140] sm:$0xff] }
 0x57b   :  { %7663 = vmatprep.subr.bf16.mxu0 %v7662_v30  ;;  %v6888_v30 = vld [vmem:[%s13904_s5 + $0x148] sm:$0xff] }
 0x57c   :  { %v7704_v46 = vpack.c.bf16 %v6888_v30, %v6887_v53 }
 0x57e   :  { %7665 = vmatpush3.bf16.msra.mxu0 %v7664_v5  ;;  %v6889_v5 = vld [vmem:[%s13904_s5 + $0x150] sm:$0xff] }
 0x57f   :  { %7667 = vmatprep.subr.bf16.mxu0 %v7666_v34  ;;  %v6890_v34 = vld [vmem:[%s13904_s5 + $0x158] sm:$0xff] }
 0x580   :  { %v7708_v16 = vpack.c.bf16 %v6890_v34, %v6889_v5 }
 0x582   :  { %7669 = vmatpush3.bf16.msra.mxu0 %v7668_v4  ;;  %v6891_v4 = vld [vmem:[%s13904_s5 + $0x160] sm:$0xff] }
 0x583   :  { %7671 = vmatprep.subr.bf16.mxu0 %v7670_v42  ;;  %v6892_v42 = vld [vmem:[%s13904_s5 + $0x168] sm:$0xff] }
 0x584   :  { %v7712_v54 = vpack.c.bf16 %v6892_v42, %v6891_v4 }
 0x586   :  { %7673 = vmatpush3.bf16.msra.mxu0 %v7672_v56  ;;  %v6893_v56 = vld [vmem:[%s13904_s5 + $0x170] sm:$0xff] }
 0x587   :  { %7675 = vmatprep.subr.bf16.mxu0 %v7674_v41  ;;  %v6894_v41 = vld [vmem:[%s13904_s5 + $0x178] sm:$0xff] }
 0x588   :  { %v7716_v6 = vpack.c.bf16 %v6894_v41, %v6893_v56 }
 0x58a   :  { %7677 = vmatpush3.bf16.msra.mxu0 %v7676_v36 }
 0x58b   :  { %7679 = vmatprep.subr.bf16.mxu0 %v7678_v19 }
 0x58e   :  { %7681 = vmatpush3.bf16.msra.mxu0 %v7680_v23 }
 0x58f   :  { %7683 = vmatprep.subr.bf16.mxu0 %v7682_v14 }
 0x592   :  { %7685 = vmatpush3.bf16.msra.mxu0 %v7684_v20 }
 0x593   :  { %7687 = vmatprep.subr.bf16.mxu0 %v7686_v12 }
 0x608   :  { %v6771_v61 = vpop.f32.mrb[192].mxu0 }
 0x609   :  { %v6773_v24 = vpop.f32.mrb[193].mxu0 }
 0x60a   :  { %6982 = vmatprep.mubr.f32.mxu0 %v6773_v24 }
 0x60b   :  { %6983 = vmatmul.mubr.f32.vlgmr.msra.gmra.mrb[196].mxu0 %v6771_v61 }
 0x60c   :  { %7689 = vmatpush3.bf16.msra.mxu0 %v7688_v58 }
 0x60d   :  { %7691 = vmatprep.subr.bf16.mxu0 %v7690_v25 }
 0x610   :  { %7693 = vmatpush3.bf16.msra.mxu0 %v7692_v38 }
 0x611   :  { %7695 = vmatprep.subr.bf16.mxu0 %v7694_v0 }
 0x614   :  { %7697 = vmatpush3.bf16.msra.mxu0 %v7696_v2 }
 0x615   :  { %7699 = vmatprep.subr.bf16.mxu0 %v7698_v63 }
 0x618   :  { %7701 = vmatpush3.bf16.msra.mxu0 %v7700_v57 }
 0x619   :  { %7703 = vmatprep.subr.bf16.mxu0 %v7702_v1 }
 0x61c   :  { %7705 = vmatpush3.bf16.msra.mxu0 %v7704_v46 }
 0x61d   :  { %7707 = vmatprep.subr.bf16.mxu0 %v7706_v33 }
 0x620   :  { %7709 = vmatpush3.bf16.msra.mxu0 %v7708_v16 }
 0x621   :  { %7711 = vmatprep.subr.bf16.mxu0 %v7710_v37 }
 0x624   :  { %7713 = vmatpush3.bf16.msra.mxu0 %v7712_v54 }
 0x625   :  { %7715 = vmatprep.subr.bf16.mxu0 %v7714_v15 }
 0x628   :  { %7717 = vmatpush3.bf16.msra.mxu0 %v7716_v6 }
 0x648   :  { %v6842_v59 = vpop.f32.mrb[194].mxu0 }
 0x649   :  { %v6844_v47 = vpop.f32.mrb[195].mxu0 }
 0x64a   :  { %7052 = vmatprep.mubr.f32.mxu0 %v6844_v47 }
 0x64b   :  { %7053 = vmatmul.mubr.f32.vlgmr.msra.gmra.mrb[198].mxu0 %v6842_v59 }
 0x6de   :  { %v7488_v18 = vpop.f32.mrb[196].mxu0 }
 0x6df   :  { %v7489_v36 = vpop.f32.mrb[197].mxu0 }
 0x6e0   :  { %v7490_v19 = vadd.f32 %v7489_v36, %v7488_v18 }
 0x6e2   :  { %v6985_v8 = vadd.f32 %v7490_v19, %v7455_v44 }
 0x71e   :  { %v7523_v13 = vpop.f32.mrb[198].mxu0 }
 0x71f   :  { %v7524_v29 = vpop.f32.mrb[199].mxu0 }
 0x720   :  { %v7525_v23 = vadd.f32 %v7524_v29, %v7523_v13 }
 0x722   :  { %v7055_v14 = vadd.f32 %v7525_v23, %v6985_v8 }
 0x724   :  { %v7058_v9 = vmax.f32 %v7055_v14, 0.0 }
 0x726   :  { %v7060_v17 = vsel %vm7059_vm5, %v7058_v9, -inf }
 0x727   :  { %7061 = vmax.xlane.f32.xlu0 %v7060_v17 }
 0x7b4   :  { %v7062_v45 = vpop.xlane.xlu0 %7061 }
 0x7b5   :  { %v7063_v49 = vsub.f32 %v7058_v9, %v7062_v45 }
 0x7b7   :  { %v7064_v20 = vmul.f32 1.442695, %v7063_v49 }
 0x7b9   :  { %8720 = vpow2.f32 %v7064_v20 }
 0x7c3   :  { %v8721_v12 = vpop.eup %8720 }
 0x7c4   :  { %v7066_v22 = vsel %vm7059_vm5, %v8721_v12, 0.0 }
 0x7c5   :  { %7067 = vadd.xlane.f32.xlu0 %v7066_v22 }
 0x852   :  { %v7068_v26 = vpop.xlane.xlu0 %7067 }
 0x853   :  { %8722 = vlog2.f32 %v7068_v26 }
 0x85d   :  { %v8723_v28 = vpop.eup %8722 }
 0x85e   :  { %v7070_v7 = vmul.f32 0.6931472, %v8723_v28 }
 0x860   :  { %v7071_v61 = vadd.f32 %v7070_v7, %v7062_v45 }
 0x862   :  { %v7072_v58 = vsub.f32 %v7058_v9, %v7071_v61 }
 0x864   :  { %7073 = vst.msk [vmem:[%s13906_s8] sm:$0xff] %vm7059_vm5, %v7072_v58 }

</bundles_post_ra>
